<compile_context>
chip_gen: v5e
topology: v5e:2x2
jax: 0.10.0
libtpu: 0.0.40
codegen_flags: <defaults>
</compile_context>

<pallas_src>
import functools

import jax
import jax.numpy as jnp
from jax import lax
from jax.experimental import pallas as pl
from jax.experimental.pallas import tpu as pltpu

C1 = 64                  # conv1 output channels
C2 = 128                 # conv2 output channels
H, W = 8, 16             # input spatial size -> 128 * (H//4) * (W//4) = 1024 for linear1
H2, W2 = H // 2, W // 2  # after pool1: (4, 8)
H4, W4 = H // 4, W // 4  # after pool2: (2, 4)
P1 = H2 * W2             # 32 pooled positions after pool1
K2 = 9 * C1              # 576: conv2 im2col contraction dim
F1 = H4 * W4 * C2        # 1024: fc1 input width
ACTIONS = 5
OUT_LANES = 128          # lane-dense padded output width


def tetris_kernel(a1_ref, w1_ref, b1_ref, w2_ref, w3_ref, b3_ref,
                  w4_ref, b4_ref, w5_ref, b5_ref, out_ref,
                  pbuf_ref, im_ref, c2_ref, pool_ref):
    f32, bf16 = jnp.float32, jnp.bfloat16
    B = out_ref.shape[0]

    b1 = b1_ref[...]
    b3 = b3_ref[...]
    b4 = b4_ref[...]
    b5 = b5_ref[...]

    # Re-zero ONLY the 1-wide border of the padded pool1 buffer (interior is fully
    # overwritten below).  Unconditional every grid step so the kernel stays correct
    # when the "parallel" batch axis is split across TensorCores (v7x megacore).
    pbuf_ref[0:1, :, :, :] = jnp.zeros((1, W2 + 2, B, C1), bf16)
    pbuf_ref[H2 + 1:H2 + 2, :, :, :] = jnp.zeros((1, W2 + 2, B, C1), bf16)
    pbuf_ref[1:H2 + 1, 0:1, :, :] = jnp.zeros((H2, 1, B, C1), bf16)
    pbuf_ref[1:H2 + 1, W2 + 1:W2 + 2, :, :] = jnp.zeros((H2, 1, B, C1), bf16)

    # ---------------- conv1 (1 -> 64, 3x3, pad=1) + maxpool(2): one MXU matmul -------
    # a1 rows are (pool1 position p, image n); w1 is block-diagonal over the 4 pooling
    # parities, so pool1 is an elementwise max over the 4 column groups.
    y = jnp.dot(a1_ref[...], w1_ref[...], preferred_element_type=f32)    # (32B, 256)
    p1 = jnp.maximum(jnp.maximum(y[:, 0:C1], y[:, C1:2 * C1]),
                     jnp.maximum(y[:, 2 * C1:3 * C1], y[:, 3 * C1:4 * C1]))
    p1 = (p1 + b1).astype(bf16)                                          # (32B, 64)
    pbuf_ref[1:H2 + 1, 1:W2 + 1, :, :] = p1.reshape(H2, W2, B, C1)

    # ---------------- conv2 (64 -> 128, 3x3, pad=1): one lane-dense K=576 GEMM -------
    for ky in range(3):
        for kx in range(3):
            t = 3 * ky + kx
            im_ref[:, t * C1:(t + 1) * C1] = (
                pbuf_ref[ky:ky + H2, kx:kx + W2, :, :].reshape(P1 * B, C1))
    c2_ref[...] = jnp.dot(im_ref[...], w2_ref[...], preferred_element_type=f32)

    # ---------------- maxpool(2) + flatten into a lane-dense (B, 1024) scratch -------
    # c2 rows are (i, j, n); PyTorch flatten order (c*8 + I*4 + J) is folded into w3,
    # and the conv2 bias b2 is folded into b3 on the host.
    for I in range(H4):
        for J in range(W4):
            r00 = (2 * I * W2 + 2 * J) * B
            r01 = (2 * I * W2 + 2 * J + 1) * B
            r10 = ((2 * I + 1) * W2 + 2 * J) * B
            r11 = ((2 * I + 1) * W2 + 2 * J + 1) * B
            pooled = jnp.maximum(
                jnp.maximum(c2_ref[r00:r00 + B, :], c2_ref[r01:r01 + B, :]),
                jnp.maximum(c2_ref[r10:r10 + B, :], c2_ref[r11:r11 + B, :]))
            col = (I * W4 + J) * C2
            pool_ref[:, col:col + C2] = pooled.astype(bf16)

    # ---------------- fc1 -> relu -> fc2 -> dropout(eval) -> relu -> fc3 -------------
    y1 = jnp.dot(pool_ref[...], w3_ref[...], preferred_element_type=f32) + b3
    y1 = jnp.maximum(y1, 0.0)
    # TODO(synk): nn.Dropout(0.25) is the identity in eval/inference mode; the
    # training-mode random mask + 1/(1-p) scaling is not implemented here.
    y2 = jnp.dot(y1.astype(bf16), w4_ref[...], preferred_element_type=f32) + b4
    y2 = jnp.maximum(y2, 0.0)
    out_ref[...] = jnp.dot(y2.astype(bf16), w5_ref[...], preferred_element_type=f32) + b5


@functools.partial(jax.jit, static_argnames=('block_batch',))
def tetris_forward(x, params, block_batch=128):
    """x: (N, 1, 8, 16) float32 (NCHW, like the PyTorch module)."""
    N = x.shape[0]
    assert x.shape == (N, 1, H, W)
    assert block_batch % 16 == 0

    # Batch block size (multiple of 16).  B=128 fits comfortably in VMEM on all chips;
    # raise block_batch to 256 on v6e/v7x for more MXU occupancy (keep >=2 grid steps
    # on v7x so both TensorCores get work).
    B = min(block_batch, ((N + 15) // 16) * 16)
    n_blocks = (N + B - 1) // B
    N_pad = n_blocks * B

    # ---- glue (plain JAX): conv1 im2col, pre-grouped per batch block ----------------
    # rows within a block are ((i,j) pool1 position, local image n); the 36 columns are
    # (pooling parity q, 3x3 tap t).
    x0 = jnp.pad(x[:, 0].astype(jnp.float32), ((0, N_pad - N), (0, 0), (0, 0)))
    xp = jnp.pad(x0, ((0, 0), (1, 1), (1, 1)))                     # (N_pad, 10, 18)
    cols = []
    for dy in range(2):
        for dx in range(2):
            for ky in range(3):
                for kx in range(3):
                    sl = xp[:, dy + ky:dy + ky + 2 * H2:2, dx + kx:dx + kx + 2 * W2:2]
                    cols.append(sl.reshape(N_pad, P1))             # (N_pad, 32)
    a1 = jnp.stack(cols, axis=-1)                                  # (N_pad, 32, 36)
    a1 = a1.reshape(n_blocks, B, P1, 36).transpose(0, 2, 1, 3)
    a1 = a1.reshape(n_blocks, P1 * B, 36).astype(jnp.bfloat16)     # (n_blocks, 32B, 36)

    # ---- glue: weight re-layout (plain JAX) -----------------------------------------
    w1t = params['w1'][:, 0].reshape(C1, 9).T                      # (9, 64): [tap, c]
    w1blk = jnp.zeros((36, 4 * C1), jnp.float32)
    for q in range(4):
        w1blk = w1blk.at[q * 9:(q + 1) * 9, q * C1:(q + 1) * C1].set(w1t)
    w1blk = w1blk.astype(jnp.bfloat16)                             # (36, 256) block-diag
    b1k = params['b1'].reshape(1, C1).astype(jnp.float32)

    # conv2 weight as one (576, 128) matrix, rows ordered (ky, kx, c).
    w2k = jnp.transpose(params['w2'], (2, 3, 1, 0)).reshape(K2, C2).astype(jnp.bfloat16)

    # fc1: PyTorch flatten f = c*8 + I*4 + J  ->  kernel column order (I, J, c).
    w3k = jnp.transpose(params['W3'].T.reshape(C2, H4, W4, 128), (1, 2, 0, 3))
    w3k = w3k.reshape(F1, 128).astype(jnp.bfloat16)                # (1024, 128)
    # Fold b2 into b3: b3' = b3 + W3 @ repeat(b2, 8)   (max commutes with +b2[c]).
    b2rep = jnp.repeat(params['b2'], H4 * W4)                      # (1024,), index c*8+pos
    b3k = (params['b3'] + params['W3'] @ b2rep).reshape(1, 128).astype(jnp.float32)

    # fc2 / fc3 padded to 128 lanes (exact: padded activations are relu(0)=0, weights 0).
    w4k = jnp.zeros((128, OUT_LANES), jnp.float32).at[:, :32].set(params['W4'].T)
    w4k = w4k.astype(jnp.bfloat16)                                 # (128, 128)
    b4k = jnp.zeros((1, OUT_LANES), jnp.float32).at[0, :32].set(params['b4'])
    w5k = jnp.zeros((OUT_LANES, OUT_LANES), jnp.float32).at[:32, :ACTIONS].set(params['W5'].T)
    w5k = w5k.astype(jnp.bfloat16)                                 # (128, 128)
    b5k = jnp.zeros((1, OUT_LANES), jnp.float32).at[0, :ACTIONS].set(params['b5'])

    out = pl.pallas_call(
        tetris_kernel,
        out_shape=jax.ShapeDtypeStruct((N_pad, OUT_LANES), jnp.float32),
        grid_spec=pltpu.PrefetchScalarGridSpec(
            num_scalar_prefetch=0,
            grid=(n_blocks,),
            in_specs=[
                pl.BlockSpec((None, P1 * B, 36), lambda n: (n, 0, 0)),
                pl.BlockSpec((36, 4 * C1), lambda n: (0, 0)),
                pl.BlockSpec((1, C1), lambda n: (0, 0)),
                pl.BlockSpec((K2, C2), lambda n: (0, 0)),
                pl.BlockSpec((F1, 128), lambda n: (0, 0)),
                pl.BlockSpec((1, 128), lambda n: (0, 0)),
                pl.BlockSpec((128, OUT_LANES), lambda n: (0, 0)),
                pl.BlockSpec((1, OUT_LANES), lambda n: (0, 0)),
                pl.BlockSpec((OUT_LANES, OUT_LANES), lambda n: (0, 0)),
                pl.BlockSpec((1, OUT_LANES), lambda n: (0, 0)),
            ],
            out_specs=pl.BlockSpec((B, OUT_LANES), lambda n: (n, 0)),
            scratch_shapes=[
                pltpu.VMEM((H2 + 2, W2 + 2, B, C1), jnp.bfloat16),  # padded pool1 map
                pltpu.VMEM((P1 * B, K2), jnp.bfloat16),             # conv2 im2col (lane-dense)
                pltpu.VMEM((P1 * B, C2), jnp.float32),              # conv2 output
                pltpu.VMEM((B, F1), jnp.bfloat16),                  # fc1 input (lane-dense)
            ],
        ),
        compiler_params=pltpu.CompilerParams(
            dimension_semantics=("parallel",),
            vmem_limit_bytes=64 * 1024 * 1024),
    )(a1, w1blk, b1k, w2k, w3k, b3k, w4k, b4k, w5k, b5k)
    return out[:N, :ACTIONS]


def init_params(key):
    ks = jax.random.split(key, 10)
    return {
        'w1': jax.random.normal(ks[0], (C1, 1, 3, 3), jnp.float32) * 0.2,
        'b1': jax.random.normal(ks[1], (C1,), jnp.float32) * 0.1,
        'w2': jax.random.normal(ks[2], (C2, C1, 3, 3), jnp.float32) * 0.05,
        'b2': jax.random.normal(ks[3], (C2,), jnp.float32) * 0.1,
        'W3': jax.random.normal(ks[4], (128, 1024), jnp.float32) * 0.03,
        'b3': jax.random.normal(ks[5], (128,), jnp.float32) * 0.1,
        'W4': jax.random.normal(ks[6], (32, 128), jnp.float32) * 0.08,
        'b4': jax.random.normal(ks[7], (32,), jnp.float32) * 0.1,
        'W5': jax.random.normal(ks[8], (ACTIONS, 32), jnp.float32) * 0.15,
        'b5': jax.random.normal(ks[9], (ACTIONS,), jnp.float32) * 0.1,
    }


def ref_forward(x, p):
    """Pure-JAX reference mirroring the PyTorch forward (eval mode), f32."""
    dn = ('NCHW', 'OIHW', 'NCHW')
    y = lax.conv_general_dilated(x, p['w1'], (1, 1), 'SAME', dimension_numbers=dn)
    y = y + p['b1'][None, :, None, None]
    y = lax.reduce_window(y, -jnp.inf, lax.max, (1, 1, 2, 2), (1, 1, 2, 2), 'VALID')
    y = lax.conv_general_dilated(y, p['w2'], (1, 1), 'SAME', dimension_numbers=dn)
    y = y + p['b2'][None, :, None, None]
    y = lax.reduce_window(y, -jnp.inf, lax.max, (1, 1, 2, 2), (1, 1, 2, 2), 'VALID')
    y = y.reshape(y.shape[0], -1)                     # (N, 1024), PyTorch flatten order
    y = jnp.maximum(y @ p['W3'].T + p['b3'], 0.0)
    y = jnp.maximum(y @ p['W4'].T + p['b4'], 0.0)     # dropout == identity in eval
    y = y @ p['W5'].T + p['b5']
    return y


if __name__ == "__main__":
    key = jax.random.PRNGKey(0)
    k_x, k_p = jax.random.split(key)
    params = init_params(k_p)
    x = jax.random.normal(k_x, (2, 1, H, W), jnp.float32)   # batch=2, NCHW

    out = jax.block_until_ready(tetris_forward(x, params))
    ref = ref_forward(x, params)
    assert out.shape == (2, ACTIONS)
    # Tolerance relaxed vs pure-f32 because MXU operands are bf16 (f32 accumulate).
    if not jnp.allclose(out, ref, rtol=5e-2, atol=5e-2):
        diff = jnp.max(jnp.abs(out - ref))
        raise AssertionError(f"mismatch vs reference (max abs diff {diff}):\n{out}\n{ref}")
    print("KERNEL_OK")
</pallas_src>

<mosaic_0001>
module attributes {stable_mosaic.version = 11 : i64} {
  func.func @tetris_kernel(%arg0: i32, %arg1: memref<1x512x36xbf16, #tpu.memory_space<vmem>>, %arg2: memref<36x256xbf16, #tpu.memory_space<vmem>>, %arg3: memref<1x64xf32, #tpu.memory_space<vmem>>, %arg4: memref<576x128xbf16, #tpu.memory_space<vmem>>, %arg5: memref<1024x128xbf16, #tpu.memory_space<vmem>>, %arg6: memref<1x128xf32, #tpu.memory_space<vmem>>, %arg7: memref<128x128xbf16, #tpu.memory_space<vmem>>, %arg8: memref<1x128xf32, #tpu.memory_space<vmem>>, %arg9: memref<128x128xbf16, #tpu.memory_space<vmem>>, %arg10: memref<1x128xf32, #tpu.memory_space<vmem>>, %arg11: memref<16x128xf32, #tpu.memory_space<vmem>>, %arg12: memref<6x10x16x64xbf16, #tpu.memory_space<vmem>>, %arg13: memref<512x576xbf16, #tpu.memory_space<vmem>>, %arg14: memref<512x128xf32, #tpu.memory_space<vmem>>, %arg15: memref<16x1024xbf16, #tpu.memory_space<vmem>>) attributes {dimension_semantics = [#tpu.dimension_semantics<parallel>], iteration_bounds = array<i64: 1>, scalar_prefetch = 0 : i64, scratch_operands = 4 : i64, tpu.core_type = #tpu.core_type<tc>, window_params = [{transform_indices = @transform_0, window_bounds = array<i64: 1, 512, 36>}, {pipeline_mode = #tpu.pipeline_mode<synchronous>, transform_indices = @transform_1, window_bounds = array<i64: 36, 256>}, {pipeline_mode = #tpu.pipeline_mode<synchronous>, transform_indices = @transform_2, window_bounds = array<i64: 1, 64>}, {pipeline_mode = #tpu.pipeline_mode<synchronous>, transform_indices = @transform_3, window_bounds = array<i64: 576, 128>}, {pipeline_mode = #tpu.pipeline_mode<synchronous>, transform_indices = @transform_4, window_bounds = array<i64: 1024, 128>}, {pipeline_mode = #tpu.pipeline_mode<synchronous>, transform_indices = @transform_5, window_bounds = array<i64: 1, 128>}, {pipeline_mode = #tpu.pipeline_mode<synchronous>, transform_indices = @transform_6, window_bounds = array<i64: 128, 128>}, {pipeline_mode = #tpu.pipeline_mode<synchronous>, transform_indices = @transform_7, window_bounds = array<i64: 1, 128>}, {pipeline_mode = #tpu.pipeline_mode<synchronous>, transform_indices = @transform_8, window_bounds = array<i64: 128, 128>}, {pipeline_mode = #tpu.pipeline_mode<synchronous>, transform_indices = @transform_9, window_bounds = array<i64: 1, 128>}, {transform_indices = @transform_10, window_bounds = array<i64: 16, 128>}]} {
    %c0 = arith.constant 0 : index
    %c0_0 = arith.constant 0 : index
    %0 = vector.load %arg3[%c0, %c0_0] : memref<1x64xf32, #tpu.memory_space<vmem>>, vector<1x64xf32>
    %c0_1 = arith.constant 0 : index
    %c0_2 = arith.constant 0 : index
    %1 = vector.load %arg6[%c0_1, %c0_2] : memref<1x128xf32, #tpu.memory_space<vmem>>, vector<1x128xf32>
    %c0_3 = arith.constant 0 : index
    %c0_4 = arith.constant 0 : index
    %2 = vector.load %arg8[%c0_3, %c0_4] : memref<1x128xf32, #tpu.memory_space<vmem>>, vector<1x128xf32>
    %c0_5 = arith.constant 0 : index
    %c0_6 = arith.constant 0 : index
    %3 = vector.load %arg10[%c0_5, %c0_6] : memref<1x128xf32, #tpu.memory_space<vmem>>, vector<1x128xf32>
    %cst = arith.constant 0.000000e+00 : bf16
    %4 = vector.broadcast %cst : bf16 to vector<1x10x16x64xbf16>
    %c0_7 = arith.constant 0 : index
    %c0_8 = arith.constant 0 : index
    %c0_9 = arith.constant 0 : index
    %c0_10 = arith.constant 0 : index
    %5 = vector.load %arg12[%c0_7, %c0_8, %c0_9, %c0_10] : memref<6x10x16x64xbf16, #tpu.memory_space<vmem>>, vector<1x10x16x64xbf16>
    tpu.vector_store %arg12[%c0_7, %c0_8, %c0_9, %c0_10], %4 {strides = array<i32>} : memref<6x10x16x64xbf16, #tpu.memory_space<vmem>>, vector<1x10x16x64xbf16>,
    %cst_11 = arith.constant 0.000000e+00 : bf16
    %6 = vector.broadcast %cst_11 : bf16 to vector<1x10x16x64xbf16>
    %c5 = arith.constant 5 : index
    %c0_12 = arith.constant 0 : index
    %c0_13 = arith.constant 0 : index
    %c0_14 = arith.constant 0 : index
    %7 = vector.load %arg12[%c5, %c0_12, %c0_13, %c0_14] : memref<6x10x16x64xbf16, #tpu.memory_space<vmem>>, vector<1x10x16x64xbf16>
    tpu.vector_store %arg12[%c5, %c0_12, %c0_13, %c0_14], %6 {strides = array<i32>} : memref<6x10x16x64xbf16, #tpu.memory_space<vmem>>, vector<1x10x16x64xbf16>,
    %cst_15 = arith.constant 0.000000e+00 : bf16
    %8 = vector.broadcast %cst_15 : bf16 to vector<4x1x16x64xbf16>
    %c1 = arith.constant 1 : index
    %c0_16 = arith.constant 0 : index
    %c0_17 = arith.constant 0 : index
    %c0_18 = arith.constant 0 : index
    %9 = vector.load %arg12[%c1, %c0_16, %c0_17, %c0_18] : memref<6x10x16x64xbf16, #tpu.memory_space<vmem>>, vector<4x1x16x64xbf16>
    tpu.vector_store %arg12[%c1, %c0_16, %c0_17, %c0_18], %8 {strides = array<i32>} : memref<6x10x16x64xbf16, #tpu.memory_space<vmem>>, vector<4x1x16x64xbf16>,
    %cst_19 = arith.constant 0.000000e+00 : bf16
    %10 = vector.broadcast %cst_19 : bf16 to vector<4x1x16x64xbf16>
    %c1_20 = arith.constant 1 : index
    %c9 = arith.constant 9 : index
    %c0_21 = arith.constant 0 : index
    %c0_22 = arith.constant 0 : index
    %11 = vector.load %arg12[%c1_20, %c9, %c0_21, %c0_22] : memref<6x10x16x64xbf16, #tpu.memory_space<vmem>>, vector<4x1x16x64xbf16>
    tpu.vector_store %arg12[%c1_20, %c9, %c0_21, %c0_22], %10 {strides = array<i32>} : memref<6x10x16x64xbf16, #tpu.memory_space<vmem>>, vector<4x1x16x64xbf16>,
    %c0_23 = arith.constant 0 : index
    %c0_24 = arith.constant 0 : index
    %c0_25 = arith.constant 0 : index
    %12 = vector.load %arg1[%c0_23, %c0_24, %c0_25] : memref<1x512x36xbf16, #tpu.memory_space<vmem>>, vector<1x512x36xbf16>
    %13 = vector.shape_cast %12 : vector<1x512x36xbf16> to vector<512x36xbf16>
    %c0_26 = arith.constant 0 : index
    %c0_27 = arith.constant 0 : index
    %14 = vector.load %arg2[%c0_26, %c0_27] : memref<36x256xbf16, #tpu.memory_space<vmem>>, vector<36x256xbf16>
    %cst_28 = arith.constant dense<0.000000e+00> : vector<512x256xf32>
    %15 = tpu.matmul %13, %14, %cst_28 {dimension_numbers = #tpu.dot_dimension_numbers<[1], [0], [0], [1], [0, 0, 1, 1], [], []>} : vector<512x36xbf16>, vector<36x256xbf16>, vector<512x256xf32> -> vector<512x256xf32>
    %16 = vector.extract_strided_slice %15 {offsets = [0, 0], sizes = [512, 64], strides = [1, 1]} : vector<512x256xf32> to vector<512x64xf32>
    %17 = vector.extract_strided_slice %15 {offsets = [0, 64], sizes = [512, 64], strides = [1, 1]} : vector<512x256xf32> to vector<512x64xf32>
    %18 = arith.maximumf %16, %17 : vector<512x64xf32>
    %19 = vector.extract_strided_slice %15 {offsets = [0, 128], sizes = [512, 64], strides = [1, 1]} : vector<512x256xf32> to vector<512x64xf32>
    %20 = vector.extract_strided_slice %15 {offsets = [0, 192], sizes = [512, 64], strides = [1, 1]} : vector<512x256xf32> to vector<512x64xf32>
    %21 = arith.maximumf %19, %20 : vector<512x64xf32>
    %22 = arith.maximumf %18, %21 : vector<512x64xf32>
    %23 = vector.broadcast %0 : vector<1x64xf32> to vector<512x64xf32>
    %24 = arith.addf %22, %23 : vector<512x64xf32>
    %25 = arith.truncf %24 : vector<512x64xf32> to vector<512x64xbf16>
    %26 = vector.shape_cast %25 : vector<512x64xbf16> to vector<4x8x16x64xbf16>
    %c1_29 = arith.constant 1 : index
    %c1_30 = arith.constant 1 : index
    %c0_31 = arith.constant 0 : index
    %c0_32 = arith.constant 0 : index
    %27 = vector.load %arg12[%c1_29, %c1_30, %c0_31, %c0_32] : memref<6x10x16x64xbf16, #tpu.memory_space<vmem>>, vector<4x8x16x64xbf16>
    tpu.vector_store %arg12[%c1_29, %c1_30, %c0_31, %c0_32], %26 {strides = array<i32>} : memref<6x10x16x64xbf16, #tpu.memory_space<vmem>>, vector<4x8x16x64xbf16>,
    %c0_33 = arith.constant 0 : index
    %c0_34 = arith.constant 0 : index
    %c0_35 = arith.constant 0 : index
    %c0_36 = arith.constant 0 : index
    %28 = vector.load %arg12[%c0_33, %c0_34, %c0_35, %c0_36] : memref<6x10x16x64xbf16, #tpu.memory_space<vmem>>, vector<4x8x16x64xbf16>
    %29 = vector.shape_cast %28 : vector<4x8x16x64xbf16> to vector<512x64xbf16>
    %c0_37 = arith.constant 0 : index
    %c0_38 = arith.constant 0 : index
    %30 = vector.load %arg13[%c0_37, %c0_38] : memref<512x576xbf16, #tpu.memory_space<vmem>>, vector<512x64xbf16>
    tpu.vector_store %arg13[%c0_37, %c0_38], %29 {strides = array<i32>} : memref<512x576xbf16, #tpu.memory_space<vmem>>, vector<512x64xbf16>,
    %c0_39 = arith.constant 0 : index
    %c1_40 = arith.constant 1 : index
    %c0_41 = arith.constant 0 : index
    %c0_42 = arith.constant 0 : index
    %31 = vector.load %arg12[%c0_39, %c1_40, %c0_41, %c0_42] : memref<6x10x16x64xbf16, #tpu.memory_space<vmem>>, vector<4x8x16x64xbf16>
    %32 = vector.shape_cast %31 : vector<4x8x16x64xbf16> to vector<512x64xbf16>
    %c0_43 = arith.constant 0 : index
    %c64 = arith.constant 64 : index
    %33 = vector.load %arg13[%c0_43, %c64] : memref<512x576xbf16, #tpu.memory_space<vmem>>, vector<512x64xbf16>
    tpu.vector_store %arg13[%c0_43, %c64], %32 {strides = array<i32>} : memref<512x576xbf16, #tpu.memory_space<vmem>>, vector<512x64xbf16>,
    %c0_44 = arith.constant 0 : index
    %c2 = arith.constant 2 : index
    %c0_45 = arith.constant 0 : index
    %c0_46 = arith.constant 0 : index
    %34 = vector.load %arg12[%c0_44, %c2, %c0_45, %c0_46] : memref<6x10x16x64xbf16, #tpu.memory_space<vmem>>, vector<4x8x16x64xbf16>
    %35 = vector.shape_cast %34 : vector<4x8x16x64xbf16> to vector<512x64xbf16>
    %c0_47 = arith.constant 0 : index
    %c128 = arith.constant 128 : index
    %36 = vector.load %arg13[%c0_47, %c128] : memref<512x576xbf16, #tpu.memory_space<vmem>>, vector<512x64xbf16>
    tpu.vector_store %arg13[%c0_47, %c128], %35 {strides = array<i32>} : memref<512x576xbf16, #tpu.memory_space<vmem>>, vector<512x64xbf16>,
    %c1_48 = arith.constant 1 : index
    %c0_49 = arith.constant 0 : index
    %c0_50 = arith.constant 0 : index
    %c0_51 = arith.constant 0 : index
    %37 = vector.load %arg12[%c1_48, %c0_49, %c0_50, %c0_51] : memref<6x10x16x64xbf16, #tpu.memory_space<vmem>>, vector<4x8x16x64xbf16>
    %38 = vector.shape_cast %37 : vector<4x8x16x64xbf16> to vector<512x64xbf16>
    %c0_52 = arith.constant 0 : index
    %c192 = arith.constant 192 : index
    %39 = vector.load %arg13[%c0_52, %c192] : memref<512x576xbf16, #tpu.memory_space<vmem>>, vector<512x64xbf16>
    tpu.vector_store %arg13[%c0_52, %c192], %38 {strides = array<i32>} : memref<512x576xbf16, #tpu.memory_space<vmem>>, vector<512x64xbf16>,
    %c1_53 = arith.constant 1 : index
    %c1_54 = arith.constant 1 : index
    %c0_55 = arith.constant 0 : index
    %c0_56 = arith.constant 0 : index
    %40 = vector.load %arg12[%c1_53, %c1_54, %c0_55, %c0_56] : memref<6x10x16x64xbf16, #tpu.memory_space<vmem>>, vector<4x8x16x64xbf16>
    %41 = vector.shape_cast %40 : vector<4x8x16x64xbf16> to vector<512x64xbf16>
    %c0_57 = arith.constant 0 : index
    %c256 = arith.constant 256 : index
    %42 = vector.load %arg13[%c0_57, %c256] : memref<512x576xbf16, #tpu.memory_space<vmem>>, vector<512x64xbf16>
    tpu.vector_store %arg13[%c0_57, %c256], %41 {strides = array<i32>} : memref<512x576xbf16, #tpu.memory_space<vmem>>, vector<512x64xbf16>,
    %c1_58 = arith.constant 1 : index
    %c2_59 = arith.constant 2 : index
    %c0_60 = arith.constant 0 : index
    %c0_61 = arith.constant 0 : index
    %43 = vector.load %arg12[%c1_58, %c2_59, %c0_60, %c0_61] : memref<6x10x16x64xbf16, #tpu.memory_space<vmem>>, vector<4x8x16x64xbf16>
    %44 = vector.shape_cast %43 : vector<4x8x16x64xbf16> to vector<512x64xbf16>
    %c0_62 = arith.constant 0 : index
    %c320 = arith.constant 320 : index
    %45 = vector.load %arg13[%c0_62, %c320] : memref<512x576xbf16, #tpu.memory_space<vmem>>, vector<512x64xbf16>
    tpu.vector_store %arg13[%c0_62, %c320], %44 {strides = array<i32>} : memref<512x576xbf16, #tpu.memory_space<vmem>>, vector<512x64xbf16>,
    %c2_63 = arith.constant 2 : index
    %c0_64 = arith.constant 0 : index
    %c0_65 = arith.constant 0 : index
    %c0_66 = arith.constant 0 : index
    %46 = vector.load %arg12[%c2_63, %c0_64, %c0_65, %c0_66] : memref<6x10x16x64xbf16, #tpu.memory_space<vmem>>, vector<4x8x16x64xbf16>
    %47 = vector.shape_cast %46 : vector<4x8x16x64xbf16> to vector<512x64xbf16>
    %c0_67 = arith.constant 0 : index
    %c384 = arith.constant 384 : index
    %48 = vector.load %arg13[%c0_67, %c384] : memref<512x576xbf16, #tpu.memory_space<vmem>>, vector<512x64xbf16>
    tpu.vector_store %arg13[%c0_67, %c384], %47 {strides = array<i32>} : memref<512x576xbf16, #tpu.memory_space<vmem>>, vector<512x64xbf16>,
    %c2_68 = arith.constant 2 : index
    %c1_69 = arith.constant 1 : index
    %c0_70 = arith.constant 0 : index
    %c0_71 = arith.constant 0 : index
    %49 = vector.load %arg12[%c2_68, %c1_69, %c0_70, %c0_71] : memref<6x10x16x64xbf16, #tpu.memory_space<vmem>>, vector<4x8x16x64xbf16>
    %50 = vector.shape_cast %49 : vector<4x8x16x64xbf16> to vector<512x64xbf16>
    %c0_72 = arith.constant 0 : index
    %c448 = arith.constant 448 : index
    %51 = vector.load %arg13[%c0_72, %c448] : memref<512x576xbf16, #tpu.memory_space<vmem>>, vector<512x64xbf16>
    tpu.vector_store %arg13[%c0_72, %c448], %50 {strides = array<i32>} : memref<512x576xbf16, #tpu.memory_space<vmem>>, vector<512x64xbf16>,
    %c2_73 = arith.constant 2 : index
    %c2_74 = arith.constant 2 : index
    %c0_75 = arith.constant 0 : index
    %c0_76 = arith.constant 0 : index
    %52 = vector.load %arg12[%c2_73, %c2_74, %c0_75, %c0_76] : memref<6x10x16x64xbf16, #tpu.memory_space<vmem>>, vector<4x8x16x64xbf16>
    %53 = vector.shape_cast %52 : vector<4x8x16x64xbf16> to vector<512x64xbf16>
    %c0_77 = arith.constant 0 : index
    %c512 = arith.constant 512 : index
    %54 = vector.load %arg13[%c0_77, %c512] : memref<512x576xbf16, #tpu.memory_space<vmem>>, vector<512x64xbf16>
    tpu.vector_store %arg13[%c0_77, %c512], %53 {strides = array<i32>} : memref<512x576xbf16, #tpu.memory_space<vmem>>, vector<512x64xbf16>,
    %c0_78 = arith.constant 0 : index
    %c0_79 = arith.constant 0 : index
    %55 = vector.load %arg13[%c0_78, %c0_79] : memref<512x576xbf16, #tpu.memory_space<vmem>>, vector<512x576xbf16>
    %c0_80 = arith.constant 0 : index
    %c0_81 = arith.constant 0 : index
    %56 = vector.load %arg4[%c0_80, %c0_81] : memref<576x128xbf16, #tpu.memory_space<vmem>>, vector<576x128xbf16>
    %cst_82 = arith.constant dense<0.000000e+00> : vector<512x128xf32>
    %57 = tpu.matmul %55, %56, %cst_82 {dimension_numbers = #tpu.dot_dimension_numbers<[1], [0], [0], [1], [0, 0, 1, 1], [], []>} : vector<512x576xbf16>, vector<576x128xbf16>, vector<512x128xf32> -> vector<512x128xf32>
    %c0_83 = arith.constant 0 : index
    %c0_84 = arith.constant 0 : index
    %58 = vector.load %arg14[%c0_83, %c0_84] : memref<512x128xf32, #tpu.memory_space<vmem>>, vector<512x128xf32>
    tpu.vector_store %arg14[%c0_83, %c0_84], %57 {strides = array<i32>} : memref<512x128xf32, #tpu.memory_space<vmem>>, vector<512x128xf32>,
    %c0_85 = arith.constant 0 : index
    %c0_86 = arith.constant 0 : index
    %59 = vector.load %arg14[%c0_85, %c0_86] : memref<512x128xf32, #tpu.memory_space<vmem>>, vector<16x128xf32>
    %c16 = arith.constant 16 : index
    %c0_87 = arith.constant 0 : index
    %60 = vector.load %arg14[%c16, %c0_87] : memref<512x128xf32, #tpu.memory_space<vmem>>, vector<16x128xf32>
    %61 = arith.maximumf %59, %60 : vector<16x128xf32>
    %c128_88 = arith.constant 128 : index
    %c0_89 = arith.constant 0 : index
    %62 = vector.load %arg14[%c128_88, %c0_89] : memref<512x128xf32, #tpu.memory_space<vmem>>, vector<16x128xf32>
    %c144 = arith.constant 144 : index
    %c0_90 = arith.constant 0 : index
    %63 = vector.load %arg14[%c144, %c0_90] : memref<512x128xf32, #tpu.memory_space<vmem>>, vector<16x128xf32>
    %64 = arith.maximumf %62, %63 : vector<16x128xf32>
    %65 = arith.maximumf %61, %64 : vector<16x128xf32>
    %66 = arith.truncf %65 : vector<16x128xf32> to vector<16x128xbf16>
    %c0_91 = arith.constant 0 : index
    %c0_92 = arith.constant 0 : index
    %67 = vector.load %arg15[%c0_91, %c0_92] : memref<16x1024xbf16, #tpu.memory_space<vmem>>, vector<16x128xbf16>
    tpu.vector_store %arg15[%c0_91, %c0_92], %66 {strides = array<i32>} : memref<16x1024xbf16, #tpu.memory_space<vmem>>, vector<16x128xbf16>,
    %c32 = arith.constant 32 : index
    %c0_93 = arith.constant 0 : index
    %68 = vector.load %arg14[%c32, %c0_93] : memref<512x128xf32, #tpu.memory_space<vmem>>, vector<16x128xf32>
    %c48 = arith.constant 48 : index
    %c0_94 = arith.constant 0 : index
    %69 = vector.load %arg14[%c48, %c0_94] : memref<512x128xf32, #tpu.memory_space<vmem>>, vector<16x128xf32>
    %70 = arith.maximumf %68, %69 : vector<16x128xf32>
    %c160 = arith.constant 160 : index
    %c0_95 = arith.constant 0 : index
    %71 = vector.load %arg14[%c160, %c0_95] : memref<512x128xf32, #tpu.memory_space<vmem>>, vector<16x128xf32>
    %c176 = arith.constant 176 : index
    %c0_96 = arith.constant 0 : index
    %72 = vector.load %arg14[%c176, %c0_96] : memref<512x128xf32, #tpu.memory_space<vmem>>, vector<16x128xf32>
    %73 = arith.maximumf %71, %72 : vector<16x128xf32>
    %74 = arith.maximumf %70, %73 : vector<16x128xf32>
    %75 = arith.truncf %74 : vector<16x128xf32> to vector<16x128xbf16>
    %c0_97 = arith.constant 0 : index
    %c128_98 = arith.constant 128 : index
    %76 = vector.load %arg15[%c0_97, %c128_98] : memref<16x1024xbf16, #tpu.memory_space<vmem>>, vector<16x128xbf16>
    tpu.vector_store %arg15[%c0_97, %c128_98], %75 {strides = array<i32>} : memref<16x1024xbf16, #tpu.memory_space<vmem>>, vector<16x128xbf16>,
    %c64_99 = arith.constant 64 : index
    %c0_100 = arith.constant 0 : index
    %77 = vector.load %arg14[%c64_99, %c0_100] : memref<512x128xf32, #tpu.memory_space<vmem>>, vector<16x128xf32>
    %c80 = arith.constant 80 : index
    %c0_101 = arith.constant 0 : index
    %78 = vector.load %arg14[%c80, %c0_101] : memref<512x128xf32, #tpu.memory_space<vmem>>, vector<16x128xf32>
    %79 = arith.maximumf %77, %78 : vector<16x128xf32>
    %c192_102 = arith.constant 192 : index
    %c0_103 = arith.constant 0 : index
    %80 = vector.load %arg14[%c192_102, %c0_103] : memref<512x128xf32, #tpu.memory_space<vmem>>, vector<16x128xf32>
    %c208 = arith.constant 208 : index
    %c0_104 = arith.constant 0 : index
    %81 = vector.load %arg14[%c208, %c0_104] : memref<512x128xf32, #tpu.memory_space<vmem>>, vector<16x128xf32>
    %82 = arith.maximumf %80, %81 : vector<16x128xf32>
    %83 = arith.maximumf %79, %82 : vector<16x128xf32>
    %84 = arith.truncf %83 : vector<16x128xf32> to vector<16x128xbf16>
    %c0_105 = arith.constant 0 : index
    %c256_106 = arith.constant 256 : index
    %85 = vector.load %arg15[%c0_105, %c256_106] : memref<16x1024xbf16, #tpu.memory_space<vmem>>, vector<16x128xbf16>
    tpu.vector_store %arg15[%c0_105, %c256_106], %84 {strides = array<i32>} : memref<16x1024xbf16, #tpu.memory_space<vmem>>, vector<16x128xbf16>,
    %c96 = arith.constant 96 : index
    %c0_107 = arith.constant 0 : index
    %86 = vector.load %arg14[%c96, %c0_107] : memref<512x128xf32, #tpu.memory_space<vmem>>, vector<16x128xf32>
    %c112 = arith.constant 112 : index
    %c0_108 = arith.constant 0 : index
    %87 = vector.load %arg14[%c112, %c0_108] : memref<512x128xf32, #tpu.memory_space<vmem>>, vector<16x128xf32>
    %88 = arith.maximumf %86, %87 : vector<16x128xf32>
    %c224 = arith.constant 224 : index
    %c0_109 = arith.constant 0 : index
    %89 = vector.load %arg14[%c224, %c0_109] : memref<512x128xf32, #tpu.memory_space<vmem>>, vector<16x128xf32>
    %c240 = arith.constant 240 : index
    %c0_110 = arith.constant 0 : index
    %90 = vector.load %arg14[%c240, %c0_110] : memref<512x128xf32, #tpu.memory_space<vmem>>, vector<16x128xf32>
    %91 = arith.maximumf %89, %90 : vector<16x128xf32>
    %92 = arith.maximumf %88, %91 : vector<16x128xf32>
    %93 = arith.truncf %92 : vector<16x128xf32> to vector<16x128xbf16>
    %c0_111 = arith.constant 0 : index
    %c384_112 = arith.constant 384 : index
    %94 = vector.load %arg15[%c0_111, %c384_112] : memref<16x1024xbf16, #tpu.memory_space<vmem>>, vector<16x128xbf16>
    tpu.vector_store %arg15[%c0_111, %c384_112], %93 {strides = array<i32>} : memref<16x1024xbf16, #tpu.memory_space<vmem>>, vector<16x128xbf16>,
    %c256_113 = arith.constant 256 : index
    %c0_114 = arith.constant 0 : index
    %95 = vector.load %arg14[%c256_113, %c0_114] : memref<512x128xf32, #tpu.memory_space<vmem>>, vector<16x128xf32>
    %c272 = arith.constant 272 : index
    %c0_115 = arith.constant 0 : index
    %96 = vector.load %arg14[%c272, %c0_115] : memref<512x128xf32, #tpu.memory_space<vmem>>, vector<16x128xf32>
    %97 = arith.maximumf %95, %96 : vector<16x128xf32>
    %c384_116 = arith.constant 384 : index
    %c0_117 = arith.constant 0 : index
    %98 = vector.load %arg14[%c384_116, %c0_117] : memref<512x128xf32, #tpu.memory_space<vmem>>, vector<16x128xf32>
    %c400 = arith.constant 400 : index
    %c0_118 = arith.constant 0 : index
    %99 = vector.load %arg14[%c400, %c0_118] : memref<512x128xf32, #tpu.memory_space<vmem>>, vector<16x128xf32>
    %100 = arith.maximumf %98, %99 : vector<16x128xf32>
    %101 = arith.maximumf %97, %100 : vector<16x128xf32>
    %102 = arith.truncf %101 : vector<16x128xf32> to vector<16x128xbf16>
    %c0_119 = arith.constant 0 : index
    %c512_120 = arith.constant 512 : index
    %103 = vector.load %arg15[%c0_119, %c512_120] : memref<16x1024xbf16, #tpu.memory_space<vmem>>, vector<16x128xbf16>
    tpu.vector_store %arg15[%c0_119, %c512_120], %102 {strides = array<i32>} : memref<16x1024xbf16, #tpu.memory_space<vmem>>, vector<16x128xbf16>,
    %c288 = arith.constant 288 : index
    %c0_121 = arith.constant 0 : index
    %104 = vector.load %arg14[%c288, %c0_121] : memref<512x128xf32, #tpu.memory_space<vmem>>, vector<16x128xf32>
    %c304 = arith.constant 304 : index
    %c0_122 = arith.constant 0 : index
    %105 = vector.load %arg14[%c304, %c0_122] : memref<512x128xf32, #tpu.memory_space<vmem>>, vector<16x128xf32>
    %106 = arith.maximumf %104, %105 : vector<16x128xf32>
    %c416 = arith.constant 416 : index
    %c0_123 = arith.constant 0 : index
    %107 = vector.load %arg14[%c416, %c0_123] : memref<512x128xf32, #tpu.memory_space<vmem>>, vector<16x128xf32>
    %c432 = arith.constant 432 : index
    %c0_124 = arith.constant 0 : index
    %108 = vector.load %arg14[%c432, %c0_124] : memref<512x128xf32, #tpu.memory_space<vmem>>, vector<16x128xf32>
    %109 = arith.maximumf %107, %108 : vector<16x128xf32>
    %110 = arith.maximumf %106, %109 : vector<16x128xf32>
    %111 = arith.truncf %110 : vector<16x128xf32> to vector<16x128xbf16>
    %c0_125 = arith.constant 0 : index
    %c640 = arith.constant 640 : index
    %112 = vector.load %arg15[%c0_125, %c640] : memref<16x1024xbf16, #tpu.memory_space<vmem>>, vector<16x128xbf16>
    tpu.vector_store %arg15[%c0_125, %c640], %111 {strides = array<i32>} : memref<16x1024xbf16, #tpu.memory_space<vmem>>, vector<16x128xbf16>,
    %c320_126 = arith.constant 320 : index
    %c0_127 = arith.constant 0 : index
    %113 = vector.load %arg14[%c320_126, %c0_127] : memref<512x128xf32, #tpu.memory_space<vmem>>, vector<16x128xf32>
    %c336 = arith.constant 336 : index
    %c0_128 = arith.constant 0 : index
    %114 = vector.load %arg14[%c336, %c0_128] : memref<512x128xf32, #tpu.memory_space<vmem>>, vector<16x128xf32>
    %115 = arith.maximumf %113, %114 : vector<16x128xf32>
    %c448_129 = arith.constant 448 : index
    %c0_130 = arith.constant 0 : index
    %116 = vector.load %arg14[%c448_129, %c0_130] : memref<512x128xf32, #tpu.memory_space<vmem>>, vector<16x128xf32>
    %c464 = arith.constant 464 : index
    %c0_131 = arith.constant 0 : index
    %117 = vector.load %arg14[%c464, %c0_131] : memref<512x128xf32, #tpu.memory_space<vmem>>, vector<16x128xf32>
    %118 = arith.maximumf %116, %117 : vector<16x128xf32>
    %119 = arith.maximumf %115, %118 : vector<16x128xf32>
    %120 = arith.truncf %119 : vector<16x128xf32> to vector<16x128xbf16>
    %c0_132 = arith.constant 0 : index
    %c768 = arith.constant 768 : index
    %121 = vector.load %arg15[%c0_132, %c768] : memref<16x1024xbf16, #tpu.memory_space<vmem>>, vector<16x128xbf16>
    tpu.vector_store %arg15[%c0_132, %c768], %120 {strides = array<i32>} : memref<16x1024xbf16, #tpu.memory_space<vmem>>, vector<16x128xbf16>,
    %c352 = arith.constant 352 : index
    %c0_133 = arith.constant 0 : index
    %122 = vector.load %arg14[%c352, %c0_133] : memref<512x128xf32, #tpu.memory_space<vmem>>, vector<16x128xf32>
    %c368 = arith.constant 368 : index
    %c0_134 = arith.constant 0 : index
    %123 = vector.load %arg14[%c368, %c0_134] : memref<512x128xf32, #tpu.memory_space<vmem>>, vector<16x128xf32>
    %124 = arith.maximumf %122, %123 : vector<16x128xf32>
    %c480 = arith.constant 480 : index
    %c0_135 = arith.constant 0 : index
    %125 = vector.load %arg14[%c480, %c0_135] : memref<512x128xf32, #tpu.memory_space<vmem>>, vector<16x128xf32>
    %c496 = arith.constant 496 : index
    %c0_136 = arith.constant 0 : index
    %126 = vector.load %arg14[%c496, %c0_136] : memref<512x128xf32, #tpu.memory_space<vmem>>, vector<16x128xf32>
    %127 = arith.maximumf %125, %126 : vector<16x128xf32>
    %128 = arith.maximumf %124, %127 : vector<16x128xf32>
    %129 = arith.truncf %128 : vector<16x128xf32> to vector<16x128xbf16>
    %c0_137 = arith.constant 0 : index
    %c896 = arith.constant 896 : index
    %130 = vector.load %arg15[%c0_137, %c896] : memref<16x1024xbf16, #tpu.memory_space<vmem>>, vector<16x128xbf16>
    tpu.vector_store %arg15[%c0_137, %c896], %129 {strides = array<i32>} : memref<16x1024xbf16, #tpu.memory_space<vmem>>, vector<16x128xbf16>,
    %c0_138 = arith.constant 0 : index
    %c0_139 = arith.constant 0 : index
    %131 = vector.load %arg15[%c0_138, %c0_139] : memref<16x1024xbf16, #tpu.memory_space<vmem>>, vector<16x1024xbf16>
    %c0_140 = arith.constant 0 : index
    %c0_141 = arith.constant 0 : index
    %132 = vector.load %arg5[%c0_140, %c0_141] : memref<1024x128xbf16, #tpu.memory_space<vmem>>, vector<1024x128xbf16>
    %cst_142 = arith.constant dense<0.000000e+00> : vector<16x128xf32>
    %133 = tpu.matmul %131, %132, %cst_142 {dimension_numbers = #tpu.dot_dimension_numbers<[1], [0], [0], [1], [0, 0, 1, 1], [], []>} : vector<16x1024xbf16>, vector<1024x128xbf16>, vector<16x128xf32> -> vector<16x128xf32>
    %134 = vector.broadcast %1 : vector<1x128xf32> to vector<16x128xf32>
    %135 = arith.addf %133, %134 : vector<16x128xf32>
    %cst_143 = arith.constant 0.000000e+00 : f32
    %136 = vector.broadcast %cst_143 : f32 to vector<16x128xf32>
    %137 = arith.maximumf %135, %136 : vector<16x128xf32>
    %138 = arith.truncf %137 : vector<16x128xf32> to vector<16x128xbf16>
    %c0_144 = arith.constant 0 : index
    %c0_145 = arith.constant 0 : index
    %139 = vector.load %arg7[%c0_144, %c0_145] : memref<128x128xbf16, #tpu.memory_space<vmem>>, vector<128x128xbf16>
    %cst_146 = arith.constant dense<0.000000e+00> : vector<16x128xf32>
    %140 = tpu.matmul %138, %139, %cst_146 {dimension_numbers = #tpu.dot_dimension_numbers<[1], [0], [0], [1], [0, 0, 1, 1], [], []>} : vector<16x128xbf16>, vector<128x128xbf16>, vector<16x128xf32> -> vector<16x128xf32>
    %141 = vector.broadcast %2 : vector<1x128xf32> to vector<16x128xf32>
    %142 = arith.addf %140, %141 : vector<16x128xf32>
    %cst_147 = arith.constant 0.000000e+00 : f32
    %143 = vector.broadcast %cst_147 : f32 to vector<16x128xf32>
    %144 = arith.maximumf %142, %143 : vector<16x128xf32>
    %145 = arith.truncf %144 : vector<16x128xf32> to vector<16x128xbf16>
    %c0_148 = arith.constant 0 : index
    %c0_149 = arith.constant 0 : index
    %146 = vector.load %arg9[%c0_148, %c0_149] : memref<128x128xbf16, #tpu.memory_space<vmem>>, vector<128x128xbf16>
    %cst_150 = arith.constant dense<0.000000e+00> : vector<16x128xf32>
    %147 = tpu.matmul %145, %146, %cst_150 {dimension_numbers = #tpu.dot_dimension_numbers<[1], [0], [0], [1], [0, 0, 1, 1], [], []>} : vector<16x128xbf16>, vector<128x128xbf16>, vector<16x128xf32> -> vector<16x128xf32>
    %148 = vector.broadcast %3 : vector<1x128xf32> to vector<16x128xf32>
    %149 = arith.addf %147, %148 : vector<16x128xf32>
    %c0_151 = arith.constant 0 : index
    %c0_152 = arith.constant 0 : index
    %150 = vector.load %arg11[%c0_151, %c0_152] : memref<16x128xf32, #tpu.memory_space<vmem>>, vector<16x128xf32>
    tpu.vector_store %arg11[%c0_151, %c0_152], %149 {strides = array<i32>} : memref<16x128xf32, #tpu.memory_space<vmem>>, vector<16x128xf32>,
    return
  }
  func.func @transform_0(%arg0: i32) -> (i32, i32, i32) {
    %c0_i32 = arith.constant 0 : i32
    %c0_i32_0 = arith.constant 0 : i32
    %c0_i32_1 = arith.constant 0 : i32
    return %arg0, %c0_i32, %c0_i32_0 : i32, i32, i32
  }
  func.func @transform_1(%arg0: i32) -> (i32, i32) {
    %c0_i32 = arith.constant 0 : i32
    %c0_i32_0 = arith.constant 0 : i32
    %c0_i32_1 = arith.constant 0 : i32
    return %c0_i32, %c0_i32_0 : i32, i32
  }
  func.func @transform_2(%arg0: i32) -> (i32, i32) {
    %c0_i32 = arith.constant 0 : i32
    %c0_i32_0 = arith.constant 0 : i32
    %c0_i32_1 = arith.constant 0 : i32
    return %c0_i32, %c0_i32_0 : i32, i32
  }
  func.func @transform_3(%arg0: i32) -> (i32, i32) {
    %c0_i32 = arith.constant 0 : i32
    %c0_i32_0 = arith.constant 0 : i32
    %c0_i32_1 = arith.constant 0 : i32
    return %c0_i32, %c0_i32_0 : i32, i32
  }
  func.func @transform_4(%arg0: i32) -> (i32, i32) {
    %c0_i32 = arith.constant 0 : i32
    %c0_i32_0 = arith.constant 0 : i32
    %c0_i32_1 = arith.constant 0 : i32
    return %c0_i32, %c0_i32_0 : i32, i32
  }
  func.func @transform_5(%arg0: i32) -> (i32, i32) {
    %c0_i32 = arith.constant 0 : i32
    %c0_i32_0 = arith.constant 0 : i32
    %c0_i32_1 = arith.constant 0 : i32
    return %c0_i32, %c0_i32_0 : i32, i32
  }
  func.func @transform_6(%arg0: i32) -> (i32, i32) {
    %c0_i32 = arith.constant 0 : i32
    %c0_i32_0 = arith.constant 0 : i32
    %c0_i32_1 = arith.constant 0 : i32
    return %c0_i32, %c0_i32_0 : i32, i32
  }
  func.func @transform_7(%arg0: i32) -> (i32, i32) {
    %c0_i32 = arith.constant 0 : i32
    %c0_i32_0 = arith.constant 0 : i32
    %c0_i32_1 = arith.constant 0 : i32
    return %c0_i32, %c0_i32_0 : i32, i32
  }
  func.func @transform_8(%arg0: i32) -> (i32, i32) {
    %c0_i32 = arith.constant 0 : i32
    %c0_i32_0 = arith.constant 0 : i32
    %c0_i32_1 = arith.constant 0 : i32
    return %c0_i32, %c0_i32_0 : i32, i32
  }
  func.func @transform_9(%arg0: i32) -> (i32, i32) {
    %c0_i32 = arith.constant 0 : i32
    %c0_i32_0 = arith.constant 0 : i32
    %c0_i32_1 = arith.constant 0 : i32
    return %c0_i32, %c0_i32_0 : i32, i32
  }
  func.func @transform_10(%arg0: i32) -> (i32, i32) {
    %c0_i32 = arith.constant 0 : i32
    %c0_i32_0 = arith.constant 0 : i32
    return %arg0, %c0_i32 : i32, i32
  }
}

</mosaic_0001>

<bundles_post_ra>
// kernel: squeeze.3
= control target key start
LH: loop header
LB: loop body
LE: loop exit
PB: predicated region body
PF: predicated region fallthrough
CT: control target
= control target key end

     0   :  { %vm48_vm0 = vcmask 523264   ;;  %s101_s0 = inlined_call_operand.vmem [shape: bf16[64,3,3], index: 0, kind: input, shape index: {}]   ;;  %s102_s1 = inlined_call_operand.vmem [shape: bf16[64,9], index: 1, kind: output, shape index: {}]  }
   0x1   :  { %v74_v0 = vld [vmem:[%s101_s0 + $0x2] sm:$0xf]   ;;  %v43_v1 = vld [vmem:[%s101_s0] sm:$0x3] }
   0x2   :  { %v15_v2 = vunpack.c.l.bf16 %v74_v0  ;;  %v44_v3 = vunpack.c.l.bf16 %v43_v1 }
   0x4   :  { %18 = vst [vmem:[#allocation1 - $0x4] sm:$0xf0] %v15_v2 }
   0x5   :  { %33 = vst [vmem:[#allocation1 + $0x10] sm:$0xf] %v15_v2 }
   0x6   :  { %46 = vst [vmem:[#allocation1 + $0x8] sm:$0xf] %v44_v3 }
   0xb   :  { %v56_v4 = vld [vmem:[#allocation1] sm:$0x7]  }
   0xc   :  { %v51_v5 = vld [vmem:[#allocation1 + $0x10] sm:$0x7]   ;;  %59 = vst.msk [vmem:[#allocation0 + $0x6] sm:$0x7] %vm48_vm0, %v56_v4  }
   0xd   :  { %v47_v6 = vld [vmem:[#allocation1 + $0x8] sm:$0x7]   ;;  %54 = vst.msk [vmem:[#allocation0 + $0x3] sm:$0x7] %vm48_vm0, %v51_v5  }
   0xe   :  { %49 = vst.msk [vmem:[#allocation0] sm:$0x7] %vm48_vm0, %v47_v6  }
  0x13   :  { %v68_v7 = vld [vmem:[#allocation0 + $0x8] sm:$0xff] }
  0x15   :  { %v62_v8 = vld [vmem:[#allocation0] sm:$0xff] }
  0x16   :  { %v80_v9 = vpack.c.bf16 %v68_v7, %v62_v8 }
  0x18   :  { %81 = vst [vmem:[%s102_s1] sm:$0xff] %v80_v9  }

// kernel: tetris_forward.1
= control target key start
LH: loop header
LB: loop body
LE: loop exit
PB: predicated region body
PF: predicated region fallthrough
CT: control target
= control target key end

     0   :  { %vm40_vm0 = vcmask 519168   ;;  %v8886_v1 = vmov 0   ;;  %vm451_vm1 = vcmask 1041408   ;;  %s8887_s11 = smov 64   ;;  %vm354_vm2 = vcmask 293888   ;;  %s12014_s1 = inlined_call_operand.vmem [shape: bf16[36,256], index: 1, kind: input, shape index: {}]   ;;  %s12015_s0 = inlined_call_operand.vmem [shape: bf16[1,512,36], index: 0, kind: input, shape index: {}]   ;;  %s12016_s3 = inlined_call_operand.vmem [shape: bf16[576,128], index: 3, kind: input, shape index: {}]   ;;  %s12017_s2 = inlined_call_operand.vmem [shape: f32[1,64], index: 2, kind: input, shape index: {}]   ;;  %s12018_s4 = inlined_call_operand.vmem [shape: bf16[1024,128], index: 4, kind: input, shape index: {}]   ;;  %s12019_s5 = inlined_call_operand.vmem [shape: f32[1,128], index: 5, kind: input, shape index: {}]   ;;  %s12020_s7 = inlined_call_operand.vmem [shape: f32[1,128], index: 7, kind: input, shape index: {}]   ;;  %s12021_s6 = inlined_call_operand.vmem [shape: bf16[128,128], index: 6, kind: input, shape index: {}]   ;;  %s12022_s8 = inlined_call_operand.vmem [shape: bf16[128,128], index: 8, kind: input, shape index: {}]   ;;  %s12023_s9 = inlined_call_operand.vmem [shape: f32[1,128], index: 9, kind: input, shape index: {}]   ;;  %s12024_s10 = inlined_call_operand.vmem [shape: f32[16,128], index: 10, kind: output, shape index: {}]  }
   0x1   :  { %v168_v0 = vld [vmem:[%s12014_s1 + $0x20] sm:$0x33]  ;;  %43 = vst.msk [vmem:[#allocation2 + $0x8] sm:$0xf] %vm40_vm0, %v8886_v1  ;;  %v7296_v4 = vld [vmem:[%s12014_s1 + $0x10] sm:$0xf] }
   0x2   :  { %v342_v2 = vunpack.c.l.b16 %v168_v0  ;;  %v343_v3 = vunpack.c.h.b16 %v168_v0  ;;  %41 = vst.msk [vmem:[#allocation2] sm:$0xf] %vm40_vm0, %v8886_v1  ;;  %v8569_v5 = vld [vmem:[%s12014_s1 + $0x14] sm:$0xf0]  ;;  %v8568_v8 = vld [vmem:[%s12014_s1 + $0x14] sm:$0xf] }
   0x3   :  { %42 = vst.msk [vmem:[#allocation2 + $0x4] sm:$0xf] %vm40_vm0, %v8886_v1  ;;  %v7298_v9 = vld [vmem:[%s12014_s1 + $0x18] sm:$0xf0]  ;;  %v7288_v12 = vld [vmem:[%s12014_s1] sm:$0xf]  ;;  %v7297_v13 = vor.u32 %v8569_v5, %v7296_v4 }
   0x4   :  { %v348_v6 = vpack.c.b16 %v342_v2, %v342_v2  ;;  %v349_v7 = vpack.c.b16 %v343_v3, %v343_v3  ;;  %44 = vst.msk [vmem:[#allocation2 + $0xc] sm:$0xf] %vm40_vm0, %v8886_v1  ;;  %v7301_v14 = vor.u32 %v8568_v8, %v7298_v9  ;;  %v8567_v15 = vld [vmem:[%s12014_s1 + $0x4] sm:$0xf0]  ;;  %v8566_v16 = vld [vmem:[%s12014_s1 + $0x4] sm:$0xf] }
   0x5   :  { %45 = vst.msk [vmem:[#allocation2 + $0x10] sm:$0xf] %vm40_vm0, %v8886_v1  ;;  %v7290_v18 = vld [vmem:[%s12014_s1 + $0x8] sm:$0xf0]  ;;  %v7289_v19 = vor.u32 %v8567_v15, %v7288_v12  ;;  %v8534_v23 = vld [vmem:[%s12015_s0] sm:$0xff]  ;;  %v8536_v31 = vld [vmem:[%s12015_s0 + $0x10] sm:$0xff] }
   0x6   :  { %v453_v10 = vsel %vm451_vm1, %v348_v6, 0  ;;  %v456_v11 = vsel %vm451_vm1, %v349_v7, 0  ;;  %46 = vst.msk [vmem:[#allocation2 + $0x14] sm:$0xf] %vm40_vm0, %v8886_v1  ;;  %v7293_v20 = vor.u32 %v8566_v16, %v7290_v18  ;;  %v8535_v28 = vld [vmem:[%s12015_s0 + $0x8] sm:$0xff]  ;;  %v8537_v33 = vld [vmem:[%s12015_s0 + $0x18] sm:$0xff] }
   0x7   :  { %463 = vmatpush.bf16.msra.mxu0 %v453_v10  ;;  %632 = vmatpush.bf16.msra.mxu1 %v456_v11  ;;  %47 = vst.msk [vmem:[#allocation2 + $0x18] sm:$0xf] %vm40_vm0, %v8886_v1  ;;  %v8737_v35 = vld [vmem:[%s12016_s3 + $0x38] sm:$0xff]  ;;  %v8538_v37 = vld [vmem:[%s12015_s0 + $0x20] sm:$0xff]  ;;  %v8736_v38 = vld [vmem:[%s12016_s3 + $0x30] sm:$0xff]  ;;  %vm2145_vm3 = vcmask 1043968  }
   0x8   :  { %v1825_v17 = vld [vmem:[#allocation2 + $0x8] sm:$0xf]  ;;  %48 = vst.msk [vmem:[#allocation2 + $0x1c] sm:$0xf] %vm40_vm0, %v8886_v1  ;;  %8854 = vmatpush.bf16.msra.mxu3 %v453_v10  ;;  %5256 = vmatpush.bf16.msra.mxu2 %v8737_v35  ;;  %v8734_v41 = vld [vmem:[%s12016_s3 + $0x20] sm:$0xff]  ;;  %v8733_v43 = vld [vmem:[%s12016_s3 + $0x18] sm:$0xff] }
   0x9   :  { %1953 = vrot.lane.b32.xlu0 %v1825_v17, %s8887_s11  ;;  %49 = vst.msk [vmem:[#allocation2 + $0x20] sm:$0xf] %vm40_vm0, %v8886_v1  ;;  %v8735_v40 = vld [vmem:[%s12016_s3 + $0x28] sm:$0xff]  ;;  %v1696_v42 = vld [vmem:[#allocation2] sm:$0xf]  ;;  %v8732_v47 = vld [vmem:[%s12016_s3 + $0x10] sm:$0xff] }
   0xa   :  { %50 = vst.msk [vmem:[#allocation2 + $0x24] sm:$0xf] %vm40_vm0, %v8886_v1  ;;  %v8539_v46 = vld [vmem:[%s12015_s0 + $0x28] sm:$0xff]  ;;  %v1697_v48 = vld [vmem:[#allocation2 + $0x4] sm:$0xf]  ;;  %v8540_v54 = vld [vmem:[%s12015_s0 + $0x30] sm:$0xff] }
   0xb   :  { %51 = vst.msk [vmem:[#allocation2 + $0x28] sm:$0xf] %vm40_vm0, %v8886_v1  ;;  %464 = vmatpush.bf16.msra.mxu0 %v7297_v13  ;;  %633 = vmatpush.bf16.msra.mxu1 %v7301_v14  ;;  %v1826_v22 = vld [vmem:[#allocation2 + $0xc] sm:$0xf]  ;;  %v1698_v52 = vld [vmem:[#allocation2 + $0x8] sm:$0xf] }
   0xc   :  { %52 = vst.msk [vmem:[#allocation2 + $0x2c] sm:$0xf] %vm40_vm0, %v8886_v1  ;;  %v1827_v21 = vld [vmem:[#allocation2 + $0x10] sm:$0xf]  ;;  %8855 = vmatpush.bf16.msra.mxu3 %v7297_v13  ;;  %5257 = vmatpush.bf16.msra.mxu2 %v8736_v38  ;;  %v8731_v49 = vld [vmem:[%s12016_s3 + $0x8] sm:$0xff]  ;;  %v8730_v53 = vld [vmem:[%s12016_s3] sm:$0xff] }
   0xd   :  { %53 = vst.msk [vmem:[#allocation2 + $0x30] sm:$0xf] %vm40_vm0, %v8886_v1  ;;  %1957 = vrot.lane.b32.xlu1 %v1827_v21, %s8887_s11  ;;  %v1828_v24 = vld [vmem:[#allocation2 + $0x14] sm:$0xf]  ;;  %v1699_v56 = vld [vmem:[#allocation2 + $0xc] sm:$0xf] }
   0xe   :  { %54 = vst.msk [vmem:[#allocation2 + $0x34] sm:$0xf] %vm40_vm0, %v8886_v1  ;;  %v1829_v25 = vld [vmem:[#allocation2 + $0x18] sm:$0xf]  ;;  %v1700_v58 = vld [vmem:[#allocation2 + $0x10] sm:$0xf] }
   0xf   :  { %55 = vst.msk [vmem:[#allocation2 + $0x38] sm:$0xf] %vm40_vm0, %v8886_v1  ;;  %465 = vmatpush.bf16.msra.mxu0 %v7289_v19  ;;  %634 = vmatpush.bf16.msra.mxu1 %v7293_v20  ;;  %v1830_v29 = vld [vmem:[#allocation2 + $0x1c] sm:$0xf]  ;;  %v1701_v63 = vld [vmem:[#allocation2 + $0x14] sm:$0xf] }
  0x10   :  { %56 = vst.msk [vmem:[#allocation2 + $0x3c] sm:$0xf] %vm40_vm0, %v8886_v1  ;;  %8856 = vmatpush.bf16.msra.mxu3 %v7289_v19  ;;  %1961 = vrot.lane.b32.xlu2 %v1829_v25, %s8887_s11  ;;  %v1831_v26 = vld [vmem:[#allocation2 + $0x20] sm:$0xf]  ;;  %v8541_v60 = vld [vmem:[%s12015_s0 + $0x38] sm:$0xff]  ;;  %v8543_v17 = vld [vmem:[%s12015_s0 + $0x48] sm:$0xff] }
  0x11   :  { %57 = vst.msk [vmem:[#allocation2 + $0x40] sm:$0xf] %vm40_vm0, %v8886_v1  ;;  %1955 = vrot.lane.b32.xlu0 %v1826_v22, %s8887_s11  ;;  %v1832_v27 = vld [vmem:[#allocation2 + $0x24] sm:$0xf]  ;;  %5258 = vmatpush.bf16.msra.mxu2 %v8735_v40  ;;  %v1703_v8 = vld [vmem:[#allocation2 + $0x1c] sm:$0xf] }
  0x12   :  { %58 = vst.msk [vmem:[#allocation2 + $0x44] sm:$0xf] %vm40_vm0, %v8886_v1  ;;  %7302 = vmatmul.msk.bf16.vlgmr.msra.gmra.mxu0 %vm354_vm2, %v8534_v23  ;;  %7334 = vmatmul.msk.bf16.vlgmr.msra.gmra.mxu1 %vm354_vm2, %v8534_v23  ;;  %v1833_v34 = vld [vmem:[#allocation2 + $0x28] sm:$0xf]  ;;  %v8542_v5 = vld [vmem:[%s12015_s0 + $0x40] sm:$0xff]  ;;  %vm5159_vm4 = vcmask 523264  }
  0x13   :  { %59 = vst.msk [vmem:[#allocation2 + $0x48] sm:$0xf] %vm40_vm0, %v8886_v1  ;;  %v1834_v30 = vld [vmem:[#allocation2 + $0x2c] sm:$0xf]  ;;  %v1702_v10 = vld [vmem:[#allocation2 + $0x18] sm:$0xf] }
  0x14   :  { %8857 = vmatpush.bf16.msrb.mxu3 %v456_v11  ;;  %60 = vst.msk [vmem:[#allocation2 + $0x4c] sm:$0xf] %vm40_vm0, %v8886_v1  ;;  %v1835_v39 = vld [vmem:[#allocation2 + $0x30] sm:$0xf]  ;;  %v1705_v22 = vld [vmem:[#allocation2 + $0x24] sm:$0xf] }
  0x15   :  { %62 = vst.msk [vmem:[#allocation2 + $0x190] sm:$0xf] %vm40_vm0, %v8886_v1  ;;  %1959 = vrot.lane.b32.xlu1 %v1828_v24, %s8887_s11  ;;  %v1836_v32 = vld [vmem:[#allocation2 + $0x34] sm:$0xf]  ;;  %5259 = vmatpush.bf16.msra.mxu2 %v8734_v41  ;;  %v1708_v40 = vld [vmem:[#allocation2 + $0x30] sm:$0xf] }
  0x16   :  { %63 = vst.msk [vmem:[#allocation2 + $0x194] sm:$0xf] %vm40_vm0, %v8886_v1  ;;  %v1837_v44 = vld [vmem:[#allocation2 + $0x38] sm:$0xf] }
  0x17   :  { %64 = vst.msk [vmem:[#allocation2 + $0x198] sm:$0xf] %vm40_vm0, %v8886_v1  ;;  %v1838_v36 = vld [vmem:[#allocation2 + $0x3c] sm:$0xf] }
  0x18   :  { %8858 = vmatpush.bf16.msrb.mxu3 %v7301_v14  ;;  %65 = vst.msk [vmem:[#allocation2 + $0x19c] sm:$0xf] %vm40_vm0, %v8886_v1  ;;  %1963 = vrot.lane.b32.xlu2 %v1830_v29, %s8887_s11  ;;  %v1839_v50 = vld [vmem:[#allocation2 + $0x40] sm:$0xf]  ;;  %v8544_v29 = vld [vmem:[%s12015_s0 + $0x50] sm:$0xff] }
  0x19   :  { %66 = vst.msk [vmem:[#allocation2 + $0x1a0] sm:$0xf] %vm40_vm0, %v8886_v1  ;;  %1965 = vrot.lane.b32.xlu0 %v1831_v26, %s8887_s11  ;;  %v1840_v45 = vld [vmem:[#allocation2 + $0x44] sm:$0xf]  ;;  %5260 = vmatpush.bf16.msra.mxu2 %v8733_v43  ;;  %v8545_v43 = vld [vmem:[%s12015_s0 + $0x58] sm:$0xff] }
  0x1a   :  { %67 = vst.msk [vmem:[#allocation2 + $0x1a4] sm:$0xf] %vm40_vm0, %v8886_v1 }
  0x1b   :  { %68 = vst.msk [vmem:[#allocation2 + $0x1a8] sm:$0xf] %vm40_vm0, %v8886_v1 }
  0x1c   :  { %8859 = vmatpush.bf16.msrb.mxu3 %v7293_v20  ;;  %69 = vst.msk [vmem:[#allocation2 + $0x1ac] sm:$0xf] %vm40_vm0, %v8886_v1  ;;  %v1704_v20 = vld [vmem:[#allocation2 + $0x20] sm:$0xf] }
  0x1d   :  { %70 = vst.msk [vmem:[#allocation2 + $0x1b0] sm:$0xf] %vm40_vm0, %v8886_v1  ;;  %1967 = vrot.lane.b32.xlu1 %v1832_v27, %s8887_s11  ;;  %5261 = vmatpush.bf16.msra.mxu2 %v8732_v47 }
  0x1e   :  { %71 = vst.msk [vmem:[#allocation2 + $0x1b4] sm:$0xf] %vm40_vm0, %v8886_v1 }
  0x1f   :  { %72 = vst.msk [vmem:[#allocation2 + $0x1b8] sm:$0xf] %vm40_vm0, %v8886_v1 }
  0x20   :  { %73 = vst.msk [vmem:[#allocation2 + $0x1bc] sm:$0xf] %vm40_vm0, %v8886_v1  ;;  %1969 = vrot.lane.b32.xlu2 %v1833_v34, %s8887_s11  ;;  %v1707_v34 = vld [vmem:[#allocation2 + $0x2c] sm:$0xf] }
  0x21   :  { %74 = vst.msk [vmem:[#allocation2 + $0x1c0] sm:$0xf] %vm40_vm0, %v8886_v1  ;;  %1971 = vrot.lane.b32.xlu0 %v1834_v30, %s8887_s11  ;;  %5262 = vmatpush.bf16.msra.mxu2 %v8731_v49 }
  0x22   :  { %75 = vst.msk [vmem:[#allocation2 + $0x1c4] sm:$0xf] %vm40_vm0, %v8886_v1  ;;  %7303 = vmatmul.msk.bf16.gmra.mxu0 %vm354_vm2, %v8535_v28  ;;  %7335 = vmatmul.msk.bf16.gmra.mxu1 %vm354_vm2, %v8535_v28 }
  0x23   :  { %76 = vst.msk [vmem:[#allocation2 + $0x1c8] sm:$0xf] %vm40_vm0, %v8886_v1 }
  0x24   :  { %77 = vst.msk [vmem:[#allocation2 + $0x1cc] sm:$0xf] %vm40_vm0, %v8886_v1 }
  0x25   :  { %78 = vst.msk [vmem:[#allocation2 + $0x1d0] sm:$0xf] %vm40_vm0, %v8886_v1  ;;  %5263 = vmatpush.bf16.msra.mxu2 %v8730_v53 }
  0x26   :  { %79 = vst.msk [vmem:[#allocation2 + $0x1d4] sm:$0xf] %vm40_vm0, %v8886_v1 }
  0x27   :  { %80 = vst.msk [vmem:[#allocation2 + $0x1d8] sm:$0xf] %vm40_vm0, %v8886_v1 }
  0x28   :  { %81 = vst.msk [vmem:[#allocation2 + $0x1dc] sm:$0xf] %vm40_vm0, %v8886_v1  ;;  %1973 = vrot.lane.b32.xlu2 %v1835_v39, %s8887_s11 }
  0x29   :  { %83 = vst.msk [vmem:[#allocation2 + $0x50] sm:$0xf] %vm40_vm0, %v8886_v1  ;;  %1975 = vrot.lane.b32.xlu0 %v1836_v32, %s8887_s11  ;;  %v1706_v32 = vld [vmem:[#allocation2 + $0x28] sm:$0xf] }
  0x2a   :  { %84 = vst.msk [vmem:[#allocation2 + $0x54] sm:$0xf] %vm40_vm0, %v8886_v1 }
  0x2b   :  { %85 = vst.msk [vmem:[#allocation2 + $0xa0] sm:$0xf] %vm40_vm0, %v8886_v1 }
  0x2c   :  { %86 = vst.msk [vmem:[#allocation2 + $0xa4] sm:$0xf] %vm40_vm0, %v8886_v1 }
  0x2d   :  { %87 = vst.msk [vmem:[#allocation2 + $0xf0] sm:$0xf] %vm40_vm0, %v8886_v1 }
  0x2e   :  { %88 = vst.msk [vmem:[#allocation2 + $0xf4] sm:$0xf] %vm40_vm0, %v8886_v1 }
  0x2f   :  { %89 = vst.msk [vmem:[#allocation2 + $0x140] sm:$0xf] %vm40_vm0, %v8886_v1 }
  0x30   :  { %90 = vst.msk [vmem:[#allocation2 + $0x144] sm:$0xf] %vm40_vm0, %v8886_v1  ;;  %1977 = vrot.lane.b32.xlu2 %v1837_v44, %s8887_s11  ;;  %v2339_v51 = vld [vmem:[#allocation2 + $0x50] sm:$0xf] }
  0x31   :  { %92 = vst.msk [vmem:[#allocation2 + $0x98] sm:$0xf] %vm40_vm0, %v8886_v1  ;;  %1979 = vrot.lane.b32.xlu0 %v1838_v36, %s8887_s11  ;;  %2467 = vrot.lane.b32.xlu1 %v2339_v51, %s8887_s11  ;;  %v2340_v55 = vld [vmem:[#allocation2 + $0x54] sm:$0xf] }
  0x32   :  { %93 = vst.msk [vmem:[#allocation2 + $0x9c] sm:$0xf] %vm40_vm0, %v8886_v1  ;;  %7304 = vmatmul.msk.bf16.gmra.mxu0 %vm354_vm2, %v8536_v31  ;;  %7336 = vmatmul.msk.bf16.gmra.mxu1 %vm354_vm2, %v8536_v31 }
  0x33   :  { %94 = vst.msk [vmem:[#allocation2 + $0xe8] sm:$0xf] %vm40_vm0, %v8886_v1 }
  0x34   :  { %95 = vst.msk [vmem:[#allocation2 + $0xec] sm:$0xf] %vm40_vm0, %v8886_v1 }
  0x35   :  { %96 = vst.msk [vmem:[#allocation2 + $0x138] sm:$0xf] %vm40_vm0, %v8886_v1 }
  0x36   :  { %97 = vst.msk [vmem:[#allocation2 + $0x13c] sm:$0xf] %vm40_vm0, %v8886_v1 }
  0x37   :  { %98 = vst.msk [vmem:[#allocation2 + $0x188] sm:$0xf] %vm40_vm0, %v8886_v1 }
  0x38   :  { %99 = vst.msk [vmem:[#allocation2 + $0x18c] sm:$0xf] %vm40_vm0, %v8886_v1  ;;  %1981 = vrot.lane.b32.xlu2 %v1839_v50, %s8887_s11 }
  0x39   :  { %1760 = vst.msk [vmem:[#allocation3] sm:$0xf] %vm40_vm0, %v1696_v42  ;;  %1983 = vrot.lane.b32.xlu0 %v1840_v45, %s8887_s11 }
  0x3a   :  { %1761 = vst.msk [vmem:[#allocation3 + $0x14] sm:$0xf] %vm40_vm0, %v1697_v48  ;;  %v1709_v48 = vld [vmem:[#allocation2 + $0x34] sm:$0xf] }
  0x3b   :  { %1762 = vst.msk [vmem:[#allocation3 + $0x28] sm:$0xf] %vm40_vm0, %v1698_v52 }
  0x3c   :  { %1763 = vst.msk [vmem:[#allocation3 + $0x3c] sm:$0xf] %vm40_vm0, %v1699_v56 }
  0x3d   :  { %1764 = vst.msk [vmem:[#allocation3 + $0x50] sm:$0xf] %vm40_vm0, %v1700_v58 }
  0x3e   :  { %1765 = vst.msk [vmem:[#allocation3 + $0x64] sm:$0xf] %vm40_vm0, %v1701_v63 }
  0x3f   :  { %1767 = vst.msk [vmem:[#allocation3 + $0x8c] sm:$0xf] %vm40_vm0, %v1703_v8 }
  0x40   :  { %2469 = vrot.lane.b32.xlu2 %v2340_v55, %s8887_s11  ;;  %1766 = vst.msk [vmem:[#allocation3 + $0x78] sm:$0xf] %vm40_vm0, %v1702_v10 }
  0x41   :  { %1768 = vst.msk [vmem:[#allocation3 + $0xa0] sm:$0xf] %vm40_vm0, %v1704_v20 }
  0x42   :  { %7305 = vmatmul.msk.bf16.gmra.mxu0 %vm354_vm2, %v8537_v33  ;;  %7337 = vmatmul.msk.bf16.gmra.mxu1 %vm354_vm2, %v8537_v33  ;;  %1769 = vst.msk [vmem:[#allocation3 + $0xb4] sm:$0xf] %vm40_vm0, %v1705_v22 }
  0x43   :  { %1770 = vst.msk [vmem:[#allocation3 + $0xc8] sm:$0xf] %vm40_vm0, %v1706_v32 }
  0x44   :  { %1771 = vst.msk [vmem:[#allocation3 + $0xdc] sm:$0xf] %vm40_vm0, %v1707_v34 }
  0x45   :  { %1772 = vst.msk [vmem:[#allocation3 + $0xf0] sm:$0xf] %vm40_vm0, %v1708_v40 }
  0x46   :  { %1773 = vst.msk [vmem:[#allocation3 + $0x104] sm:$0xf] %vm40_vm0, %v1709_v48 }
  0x52   :  { %7306 = vmatmul.msk.bf16.gmra.mxu0 %vm354_vm2, %v8538_v37  ;;  %7338 = vmatmul.msk.bf16.gmra.mxu1 %vm354_vm2, %v8538_v37 }
  0x62   :  { %7307 = vmatmul.msk.bf16.gmra.mxu0 %vm354_vm2, %v8539_v46  ;;  %7339 = vmatmul.msk.bf16.gmra.mxu1 %vm354_vm2, %v8539_v46  ;;  %v1710_v46 = vld [vmem:[#allocation2 + $0x38] sm:$0xf] }
  0x63   :  { %1774 = vst.msk [vmem:[#allocation3 + $0x118] sm:$0xf] %vm40_vm0, %v1710_v46 }
  0x6a   :  { %v1962_v57 = vpop.permute.xlu2 %1961 }
  0x6b   :  { %2150 = vst.msk [vmem:[#allocation3 + $0x50] sm:$0xf] %vm2145_vm3, %v1962_v57  ;;  %v8546_v57 = vld [vmem:[%s12015_s0 + $0x60] sm:$0xff] }
  0x72   :  { %7308 = vmatmul.msk.bf16.gmra.mxu0 %vm354_vm2, %v8540_v54  ;;  %7340 = vmatmul.msk.bf16.gmra.mxu1 %vm354_vm2, %v8540_v54  ;;  %v1964_v62 = vpop.permute.xlu2 %1963  ;;  %v7408_v26 = vld [vmem:[#allocation3 + $0x50] sm:$0xf]  ;;  %v2212_v54 = vld [vmem:[#allocation2 + $0x14] sm:$0xf] }
  0x73   :  { %2151 = vst.msk [vmem:[#allocation3 + $0x64] sm:$0xf] %vm2145_vm3, %v1964_v62 }
  0x74   :  { %2276 = vst.msk [vmem:[#allocation3 + $0x18] sm:$0xf] %vm40_vm0, %v2212_v54 }
  0x7a   :  { %v1970_v21 = vpop.permute.xlu2 %1969  ;;  %v8582_v27 = vld [vmem:[#allocation3 + $0x60] sm:$0xf0] }
  0x7b   :  { %v1954_v59 = vpop.permute.xlu0 %1953  ;;  %2154 = vst.msk [vmem:[#allocation3 + $0xa0] sm:$0xf] %vm2145_vm3, %v1970_v21  ;;  %v7409_v28 = vor.u32 %v8582_v27, %v7408_v26 }
  0x7c   :  { %2146 = vst.msk [vmem:[#allocation3] sm:$0xf] %vm2145_vm3, %v1954_v59 }
  0x7f   :  { %v1958_v61 = vpop.permute.xlu1 %1957 }
  0x80   :  { %2148 = vst.msk [vmem:[#allocation3 + $0x28] sm:$0xf] %vm2145_vm3, %v1958_v61 }
  0x82   :  { %7309 = vmatmul.msk.bf16.gmra.mxu0 %vm354_vm2, %v8541_v60  ;;  %7341 = vmatmul.msk.bf16.gmra.mxu1 %vm354_vm2, %v8541_v60  ;;  %v1974_v33 = vpop.permute.xlu2 %1973  ;;  %v7448_v52 = vld [vmem:[#allocation3 + $0xa0] sm:$0xf]  ;;  %v1711_v60 = vld [vmem:[#allocation2 + $0x3c] sm:$0xf] }
  0x83   :  { %v1956_v0 = vpop.permute.xlu0 %1955  ;;  %v7368_v2 = vld [vmem:[#allocation3] sm:$0xf]  ;;  %2156 = vst.msk [vmem:[#allocation3 + $0xc8] sm:$0xf] %vm2145_vm3, %v1974_v33 }
  0x84   :  { %2147 = vst.msk [vmem:[#allocation3 + $0x14] sm:$0xf] %vm2145_vm3, %v1956_v0 }
  0x85   :  { %1775 = vst.msk [vmem:[#allocation3 + $0x12c] sm:$0xf] %vm40_vm0, %v1711_v60 }
  0x87   :  { %v1960_v1 = vpop.permute.xlu1 %1959  ;;  %v7388_v14 = vld [vmem:[#allocation3 + $0x28] sm:$0xf] }
  0x88   :  { %2149 = vst.msk [vmem:[#allocation3 + $0x3c] sm:$0xf] %vm2145_vm3, %v1960_v1 }
  0x8a   :  { %v1978_v41 = vpop.permute.xlu2 %1977  ;;  %v7468_v0 = vld [vmem:[#allocation3 + $0xc8] sm:$0xf] }
  0x8b   :  { %v8572_v3 = vld [vmem:[#allocation3 + $0x10] sm:$0xf0]  ;;  %v1966_v11 = vpop.permute.xlu0 %1965  ;;  %2158 = vst.msk [vmem:[#allocation3 + $0xf0] sm:$0xf] %vm2145_vm3, %v1978_v41 }
  0x8c   :  { %v7369_v4 = vor.u32 %v8572_v3, %v7368_v2  ;;  %2152 = vst.msk [vmem:[#allocation3 + $0x78] sm:$0xf] %vm2145_vm3, %v1966_v11  ;;  %v2211_v2 = vld [vmem:[#allocation2 + $0x10] sm:$0xf] }
  0x8d   :  { %2275 = vst.msk [vmem:[#allocation3 + $0x4] sm:$0xf] %vm40_vm0, %v2211_v2 }
  0x8e   :  { %5264 = vmatmul.bf16.vlgmr.msra.gmra.mxu2 %v7369_v4 }
  0x8f   :  { %v9179_v6 = vpop.f32.mrf.mxu0  ;;  %v9181_v7 = vpop.f32.mrf.mxu1  ;;  %v8577_v15 = vld [vmem:[#allocation3 + $0x38] sm:$0xf0] }
  0x90   :  { %1180 = vrot.lane.b32.xlu0 %v9181_v7, %s8887_s11  ;;  %860 = vrot.lane.b32.xlu1 %v9179_v6, %s8887_s11  ;;  %v1968_v9 = vpop.permute.xlu1 %1967  ;;  %v7389_v16 = vor.u32 %v8577_v15, %v7388_v14 }
  0x91   :  { %2153 = vst.msk [vmem:[#allocation3 + $0x8c] sm:$0xf] %vm2145_vm3, %v1968_v9 }
  0x92   :  { %7310 = vmatmul.msk.bf16.gmra.mxu0 %vm354_vm2, %v8542_v5  ;;  %7342 = vmatmul.msk.bf16.gmra.mxu1 %vm354_vm2, %v8542_v5  ;;  %v1982_v47 = vpop.permute.xlu2 %1981  ;;  %v8547_v5 = vld [vmem:[%s12015_s0 + $0x68] sm:$0xff]  ;;  %v7488_v14 = vld [vmem:[#allocation3 + $0xf0] sm:$0xf] }
  0x93   :  { %v1972_v23 = vpop.permute.xlu0 %1971  ;;  %v7428_v38 = vld [vmem:[#allocation3 + $0x78] sm:$0xf]  ;;  %2160 = vst.msk [vmem:[#allocation3 + $0x118] sm:$0xf] %vm2145_vm3, %v1982_v47 }
  0x94   :  { %2155 = vst.msk [vmem:[#allocation3 + $0xb4] sm:$0xf] %vm2145_vm3, %v1972_v23 }
  0x97   :  { %v9193_v12 = vpop.f32.mrf.mxu0  ;;  %v9195_v13 = vpop.f32.mrf.mxu1 }
  0x98   :  { %1182 = vrot.lane.b32.xlu1 %v9195_v13, %s8887_s11  ;;  %862 = vrot.lane.b32.xlu2 %v9193_v12, %s8887_s11  ;;  %v8587_v39 = vld [vmem:[#allocation3 + $0x88] sm:$0xf0] }
  0x99   :  { %v7429_v42 = vor.u32 %v8587_v39, %v7428_v38  ;;  %v9364_v39 = vld [vmem:[%s12017_s2] ss:$0 sm:$0xff] }
  0x9a   :  { %v2470_v56 = vpop.permute.xlu2 %2469  ;;  %v7508_v26 = vld [vmem:[#allocation3 + $0x118] sm:$0xf] }
  0x9b   :  { %v1976_v35 = vpop.permute.xlu0 %1975  ;;  %v8592_v53 = vld [vmem:[#allocation3 + $0xb0] sm:$0xf0]  ;;  %2660 = vst.msk [vmem:[#allocation3 + $0x18] sm:$0xf] %vm2145_vm3, %v2470_v56 }
  0x9c   :  { %2157 = vst.msk [vmem:[#allocation3 + $0xdc] sm:$0xf] %vm2145_vm3, %v1976_v35  ;;  %v7449_v55 = vor.u32 %v8592_v53, %v7448_v52  ;;  %v8550_v53 = vld [vmem:[%s12015_s0 + $0x80] sm:$0xff] }
  0x9e   :  { %5269 = vmatmul.bf16.gmra.mxu2 %v7389_v16 }
  0x9f   :  { %v9204_v18 = vpop.f32.mrf.mxu0  ;;  %v9206_v19 = vpop.f32.mrf.mxu1 }
  0xa0   :  { %1184 = vrot.lane.b32.xlu0 %v9206_v19, %s8887_s11  ;;  %864 = vrot.lane.b32.xlu1 %v9204_v18, %s8887_s11 }
  0xa2   :  { %7311 = vmatmul.msk.bf16.gmra.mxu0 %vm354_vm2, %v8543_v17  ;;  %7343 = vmatmul.msk.bf16.gmra.mxu1 %vm354_vm2, %v8543_v17  ;;  %v8548_v17 = vld [vmem:[%s12015_s0 + $0x70] sm:$0xff] }
  0xa3   :  { %v1980_v49 = vpop.permute.xlu0 %1979  ;;  %v8597_v1 = vld [vmem:[#allocation3 + $0xd8] sm:$0xf0]  ;;  %v2468_v3 = vpop.permute.xlu1 %2467 }
  0xa4   :  { %2159 = vst.msk [vmem:[#allocation3 + $0x104] sm:$0xf] %vm2145_vm3, %v1980_v49  ;;  %v7469_v4 = vor.u32 %v8597_v1, %v7468_v0 }
  0xa5   :  { %2659 = vst.msk [vmem:[#allocation3 + $0x4] sm:$0xf] %vm2145_vm3, %v2468_v3 }
  0xa7   :  { %v9218_v24 = vpop.f32.mrf.mxu0  ;;  %v9220_v25 = vpop.f32.mrf.mxu1 }
  0xa8   :  { %1186 = vrot.lane.b32.xlu1 %v9220_v25, %s8887_s11  ;;  %866 = vrot.lane.b32.xlu2 %v9218_v24, %s8887_s11 }
  0xab   :  { %v1984_v61 = vpop.permute.xlu0 %1983  ;;  %v8602_v15 = vld [vmem:[#allocation3 + $0x100] sm:$0xf0] }
  0xac   :  { %2161 = vst.msk [vmem:[#allocation3 + $0x12c] sm:$0xf] %vm2145_vm3, %v1984_v61  ;;  %v7489_v16 = vor.u32 %v8602_v15, %v7488_v14 }
  0xae   :  { %5274 = vmatmul.bf16.gmra.mxu2 %v7409_v28 }
  0xaf   :  { %v9229_v30 = vpop.f32.mrf.mxu0  ;;  %v9231_v31 = vpop.f32.mrf.mxu1 }
  0xb0   :  { %1188 = vrot.lane.b32.xlu0 %v9231_v31, %s8887_s11  ;;  %868 = vrot.lane.b32.xlu1 %v9229_v30, %s8887_s11 }
  0xb2   :  { %7312 = vmatmul.msk.bf16.gmra.mxu0 %vm354_vm2, %v8544_v29  ;;  %7344 = vmatmul.msk.bf16.gmra.mxu1 %vm354_vm2, %v8544_v29  ;;  %v8549_v29 = vld [vmem:[%s12015_s0 + $0x78] sm:$0xff] }
  0xb3   :  { %v8607_v27 = vld [vmem:[#allocation3 + $0x128] sm:$0xf0] }
  0xb4   :  { %v7509_v28 = vor.u32 %v8607_v27, %v7508_v26 }
  0xb7   :  { %v9243_v36 = vpop.f32.mrf.mxu0  ;;  %v9245_v37 = vpop.f32.mrf.mxu1 }
  0xb8   :  { %1190 = vrot.lane.b32.xlu1 %v9245_v37, %s8887_s11  ;;  %870 = vrot.lane.b32.xlu2 %v9243_v36, %s8887_s11 }
  0xbe   :  { %5279 = vmatmul.bf16.gmra.mxu2 %v7429_v42 }
  0xbf   :  { %v9256_v44 = vpop.f32.mrf.mxu0  ;;  %v9258_v45 = vpop.f32.mrf.mxu1 }
  0xc0   :  { %1192 = vrot.lane.b32.xlu0 %v9258_v45, %s8887_s11  ;;  %872 = vrot.lane.b32.xlu1 %v9256_v44, %s8887_s11 }
  0xc2   :  { %7313 = vmatmul.msk.bf16.gmra.mxu0 %vm354_vm2, %v8545_v43  ;;  %7345 = vmatmul.msk.bf16.gmra.mxu1 %vm354_vm2, %v8545_v43 }
  0xc7   :  { %v9270_v50 = vpop.f32.mrf.mxu0  ;;  %v9272_v51 = vpop.f32.mrf.mxu1 }
  0xc8   :  { %1194 = vrot.lane.b32.xlu1 %v9272_v51, %s8887_s11  ;;  %874 = vrot.lane.b32.xlu2 %v9270_v50, %s8887_s11 }
  0xce   :  { %5284 = vmatmul.bf16.gmra.mxu2 %v7449_v55 }
  0xcf   :  { %v9283_v58 = vpop.f32.mrf.mxu0  ;;  %v9285_v59 = vpop.f32.mrf.mxu1 }
  0xd0   :  { %1196 = vrot.lane.b32.xlu0 %v9285_v59, %s8887_s11  ;;  %876 = vrot.lane.b32.xlu1 %v9283_v58, %s8887_s11 }
  0xd2   :  { %7314 = vmatmul.msk.bf16.gmra.mxu0 %vm354_vm2, %v8546_v57  ;;  %7346 = vmatmul.msk.bf16.gmra.mxu1 %vm354_vm2, %v8546_v57 }
  0xd7   :  { %v9295_v62 = vpop.f32.mrf.mxu0  ;;  %v9297_v63 = vpop.f32.mrf.mxu1 }
  0xd8   :  { %1198 = vrot.lane.b32.xlu1 %v9297_v63, %s8887_s11  ;;  %878 = vrot.lane.b32.xlu2 %v9295_v62, %s8887_s11 }
  0xde   :  { %5289 = vmatmul.bf16.gmra.mxu2 %v7469_v4 }
  0xdf   :  { %v9308_v8 = vpop.f32.mrf.mxu0  ;;  %v9310_v9 = vpop.f32.mrf.mxu1 }
  0xe0   :  { %1200 = vrot.lane.b32.xlu0 %v9310_v9, %s8887_s11  ;;  %880 = vrot.lane.b32.xlu1 %v9308_v8, %s8887_s11 }
  0xe2   :  { %7315 = vmatmul.msk.bf16.gmra.mxu0 %vm354_vm2, %v8547_v5  ;;  %7347 = vmatmul.msk.bf16.gmra.mxu1 %vm354_vm2, %v8547_v5 }
  0xe7   :  { %v9318_v10 = vpop.f32.mrf.mxu0  ;;  %v9320_v11 = vpop.f32.mrf.mxu1 }
  0xe8   :  { %1202 = vrot.lane.b32.xlu1 %v9320_v11, %s8887_s11  ;;  %882 = vrot.lane.b32.xlu2 %v9318_v10, %s8887_s11 }
  0xee   :  { %5294 = vmatmul.bf16.gmra.mxu2 %v7489_v16 }
  0xef   :  { %v9329_v20 = vpop.f32.mrf.mxu0  ;;  %v9331_v21 = vpop.f32.mrf.mxu1 }
  0xf0   :  { %1204 = vrot.lane.b32.xlu0 %v9331_v21, %s8887_s11  ;;  %884 = vrot.lane.b32.xlu1 %v9329_v20, %s8887_s11 }
  0xf2   :  { %7316 = vmatmul.msk.bf16.gmra.mxu0 %vm354_vm2, %v8548_v17  ;;  %7348 = vmatmul.msk.bf16.gmra.mxu1 %vm354_vm2, %v8548_v17  ;;  %v863_v47 = vpop.permute.xlu2 %862 }
  0xf3   :  { %v1053_v49 = vmax.f32 %v9193_v12, %v863_v47 }
  0xf7   :  { %v9339_v22 = vpop.f32.mrf.mxu0  ;;  %v9341_v23 = vpop.f32.mrf.mxu1 }
  0xf8   :  { %1206 = vrot.lane.b32.xlu1 %v9341_v23, %s8887_s11  ;;  %886 = vrot.lane.b32.xlu2 %v9339_v22, %s8887_s11 }
  0xfe   :  { %5299 = vmatmul.bf16.gmra.mxu2 %v7509_v28 }
  0xff   :  { %v9350_v32 = vpop.f32.mrf.mxu0  ;;  %v9352_v33 = vpop.f32.mrf.mxu1 }
 0x100   :  { %1208 = vrot.lane.b32.xlu0 %v9352_v33, %s8887_s11  ;;  %888 = vrot.lane.b32.xlu1 %v9350_v32, %s8887_s11 }
 0x102   :  { %v1181_v34 = vpop.permute.xlu0 %1180  ;;  %v861_v35 = vpop.permute.xlu1 %860  ;;  %7317 = vmatmul.msk.bf16.gmra.mxu0 %vm354_vm2, %v8549_v29  ;;  %7349 = vmatmul.msk.bf16.gmra.mxu1 %vm354_vm2, %v8549_v29 }
 0x103   :  { %v1372_v38 = vmax.f32 %v9181_v7, %v1181_v34  ;;  %v1052_v40 = vmax.f32 %v9179_v6, %v861_v35  ;;  %v867_v16 = vpop.permute.xlu2 %866  ;;  %v8551_v35 = vld [vmem:[%s12015_s0 + $0x88] sm:$0xff] }
 0x104   :  { %v1055_v27 = vmax.f32 %v9218_v24, %v867_v16 }
 0x105   :  { %v1436_v41 = vmax.f32 %v1052_v40, %v1372_v38 }
 0x107   :  { %v1503_v42 = vadd.f32 %v9364_v39, %v1436_v41  ;;  %v9368_v43 = vpop.f32.mrf.mxu0  ;;  %v9370_v46 = vpop.f32.mrf.mxu1 }
 0x108   :  { %1210 = vrot.lane.b32.xlu1 %v9370_v46, %s8887_s11  ;;  %890 = vrot.lane.b32.xlu2 %v9368_v43, %s8887_s11 }
 0x109   :  { %v1567_v7 = vpack.c.bf16 %v1503_v42, %v1503_v42 }
 0x10a   :  { %v1183_v48 = vpop.permute.xlu1 %1182 }
 0x10b   :  { %1632 = vst.msk [vmem:[#allocation2 + $0x58] sm:$0xf] %vm40_vm0, %v1567_v7  ;;  %v1373_v6 = vmax.f32 %v9195_v13, %v1183_v48 }
 0x10d   :  { %v1437_v52 = vmax.f32 %v1053_v49, %v1373_v6 }
 0x10f   :  { %v1504_v54 = vadd.f32 %v9364_v39, %v1437_v52  ;;  %v9383_v55 = vpop.f32.mrf.mxu0  ;;  %v9385_v56 = vpop.f32.mrf.mxu1 }
 0x110   :  { %1212 = vrot.lane.b32.xlu0 %v9385_v56, %s8887_s11  ;;  %892 = vrot.lane.b32.xlu1 %v9383_v55, %s8887_s11 }
 0x111   :  { %v1568_v12 = vpack.c.bf16 %v1504_v54, %v1504_v54 }
 0x112   :  { %v1185_v57 = vpop.permute.xlu0 %1184  ;;  %v865_v13 = vpop.permute.xlu1 %864  ;;  %7318 = vmatmul.msk.bf16.gmra.mxu0 %vm354_vm2, %v8550_v53  ;;  %v1841_v60 = vld [vmem:[#allocation2 + $0x58] sm:$0xf]  ;;  %7350 = vmatmul.msk.bf16.gmra.mxu1 %vm354_vm2, %v8550_v53 }
 0x113   :  { %v1714_v61 = vld [vmem:[#allocation2 + $0x58] sm:$0xf]  ;;  %1633 = vst.msk [vmem:[#allocation2 + $0x5c] sm:$0xf] %vm40_vm0, %v1568_v12  ;;  %v1374_v0 = vmax.f32 %v9206_v19, %v1185_v57  ;;  %v1054_v1 = vmax.f32 %v9204_v18, %v865_v13  ;;  %1985 = vrot.lane.b32.xlu2 %v1841_v60, %s8887_s11  ;;  %v871_v12 = vpop.permute.xlu2 %870 }
 0x114   :  { %v2723_v2 = vld [vmem:[#allocation2 + $0x58] sm:$0xf]  ;;  %1778 = vst.msk [vmem:[#allocation3 + $0x168] sm:$0xf] %vm40_vm0, %v1714_v61 }
 0x115   :  { %v1438_v3 = vmax.f32 %v1054_v1, %v1374_v0  ;;  %2787 = vst.msk [vmem:[#allocation3 + $0x8] sm:$0xf] %vm40_vm0, %v2723_v2  ;;  %v2341_v15 = vld [vmem:[#allocation2 + $0x58] sm:$0xf]  ;;  %v1057_v0 = vmax.f32 %v9243_v36, %v871_v12  ;;  %v8552_v36 = vld [vmem:[%s12015_s0 + $0x90] sm:$0xff] }
 0x117   :  { %v1505_v4 = vadd.f32 %v9364_v39, %v1438_v3  ;;  %v9400_v5 = vpop.f32.mrf.mxu0  ;;  %v9402_v14 = vpop.f32.mrf.mxu1 }
 0x118   :  { %2471 = vrot.lane.b32.xlu1 %v2341_v15, %s8887_s11 }
 0x119   :  { %v1569_v19 = vpack.c.bf16 %v1505_v4, %v1505_v4 }
 0x11a   :  { %v1187_v18 = vpop.permute.xlu1 %1186  ;;  %v1842_v17 = vld [vmem:[#allocation2 + $0x5c] sm:$0xf] }
 0x11b   :  { %v1715_v26 = vld [vmem:[#allocation2 + $0x5c] sm:$0xf]  ;;  %1634 = vst.msk [vmem:[#allocation2 + $0x60] sm:$0xf] %vm40_vm0, %v1569_v19  ;;  %v1375_v28 = vmax.f32 %v9220_v25, %v1187_v18  ;;  %1987 = vrot.lane.b32.xlu0 %v1842_v17, %s8887_s11  ;;  %894 = vrot.lane.b32.xlu2 %v9400_v5, %s8887_s11 }
 0x11c   :  { %v2724_v29 = vld [vmem:[#allocation2 + $0x5c] sm:$0xf]  ;;  %1779 = vst.msk [vmem:[#allocation3 + $0x17c] sm:$0xf] %vm40_vm0, %v1715_v26 }
 0x11d   :  { %v1439_v34 = vmax.f32 %v1055_v27, %v1375_v28  ;;  %2788 = vst.msk [vmem:[#allocation3 + $0x1c] sm:$0xf] %vm40_vm0, %v2724_v29  ;;  %v2342_v47 = vld [vmem:[#allocation2 + $0x5c] sm:$0xf] }
 0x11f   :  { %v1506_v24 = vadd.f32 %v9364_v39, %v1439_v34  ;;  %v9417_v38 = vpop.f32.mrf.mxu0  ;;  %v9419_v25 = vpop.f32.mrf.mxu1 }
 0x120   :  { %1214 = vrot.lane.b32.xlu1 %v9402_v14, %s8887_s11 }
 0x121   :  { %v1570_v40 = vpack.c.bf16 %v1506_v24, %v1506_v24 }
 0x122   :  { %v1189_v41 = vpop.permute.xlu0 %1188  ;;  %v869_v42 = vpop.permute.xlu1 %868  ;;  %7319 = vmatmul.msk.bf16.gmra.mxu0 %vm354_vm2, %v8551_v35  ;;  %7351 = vmatmul.msk.bf16.gmra.mxu1 %vm354_vm2, %v8551_v35  ;;  %v1716_v49 = vld [vmem:[#allocation2 + $0x60] sm:$0xf] }
 0x123   :  { %1635 = vst.msk [vmem:[#allocation2 + $0x64] sm:$0xf] %vm40_vm0, %v1570_v40  ;;  %v1376_v7 = vmax.f32 %v9231_v31, %v1189_v41  ;;  %v1056_v48 = vmax.f32 %v9229_v30, %v869_v42  ;;  %1216 = vrot.lane.b32.xlu0 %v9419_v25, %s8887_s11  ;;  %2473 = vrot.lane.b32.xlu2 %v2342_v47, %s8887_s11  ;;  %v2725_v6 = vld [vmem:[#allocation2 + $0x60] sm:$0xf] }
 0x124   :  { %1780 = vst.msk [vmem:[#allocation3 + $0x190] sm:$0xf] %vm40_vm0, %v1716_v49  ;;  %v2227_v52 = vld [vmem:[#allocation2 + $0x60] sm:$0xf] }
 0x125   :  { %v1440_v53 = vmax.f32 %v1056_v48, %v1376_v7  ;;  %2789 = vst.msk [vmem:[#allocation3 + $0x30] sm:$0xf] %vm40_vm0, %v2725_v6  ;;  %v2852_v60 = vld [vmem:[#allocation2 + $0x60] sm:$0xf] }
 0x126   :  { %2291 = vst.msk [vmem:[#allocation3 + $0x144] sm:$0xf] %vm40_vm0, %v2227_v52  ;;  %v1843_v61 = vld [vmem:[#allocation2 + $0x60] sm:$0xf] }
 0x127   :  { %v1507_v54 = vadd.f32 %v9364_v39, %v1440_v53  ;;  %v9435_v31 = vpop.f32.mrf.mxu0  ;;  %v9437_v30 = vpop.f32.mrf.mxu1  ;;  %v2343_v19 = vld [vmem:[#allocation2 + $0x60] sm:$0xf] }
 0x128   :  { %896 = vrot.lane.b32.xlu1 %v9417_v38, %s8887_s11 }
 0x129   :  { %v1571_v57 = vpack.c.bf16 %v1507_v54, %v1507_v54 }
 0x12a   :  { %v1191_v13 = vpop.permute.xlu1 %1190  ;;  %v1717_v2 = vld [vmem:[#allocation2 + $0x64] sm:$0xf] }
 0x12b   :  { %1636 = vst.msk [vmem:[#allocation2 + $0x68] sm:$0xf] %vm40_vm0, %v1571_v57  ;;  %v1377_v1 = vmax.f32 %v9245_v37, %v1191_v13  ;;  %2980 = vrot.lane.b32.xlu0 %v2852_v60, %s8887_s11  ;;  %1989 = vrot.lane.b32.xlu2 %v1843_v61, %s8887_s11  ;;  %v2726_v3 = vld [vmem:[#allocation2 + $0x64] sm:$0xf] }
 0x12c   :  { %1781 = vst.msk [vmem:[#allocation3 + $0x1a4] sm:$0xf] %vm40_vm0, %v1717_v2  ;;  %v2228_v4 = vld [vmem:[#allocation2 + $0x64] sm:$0xf] }
 0x12d   :  { %v1441_v15 = vmax.f32 %v1057_v0, %v1377_v1  ;;  %2790 = vst.msk [vmem:[#allocation3 + $0x44] sm:$0xf] %vm40_vm0, %v2726_v3  ;;  %v1844_v28 = vld [vmem:[#allocation2 + $0x64] sm:$0xf] }
 0x12e   :  { %2292 = vst.msk [vmem:[#allocation3 + $0x158] sm:$0xf] %vm40_vm0, %v2228_v4  ;;  %v2344_v49 = vld [vmem:[#allocation2 + $0x64] sm:$0xf] }
 0x12f   :  { %v1508_v37 = vadd.f32 %v9364_v39, %v1441_v15  ;;  %v9453_v16 = vpop.f32.mrf.mxu0  ;;  %v9455_v18 = vpop.f32.mrf.mxu1  ;;  %v2853_v60 = vld [vmem:[#allocation2 + $0x64] sm:$0xf] }
 0x130   :  { %2475 = vrot.lane.b32.xlu1 %v2343_v19, %s8887_s11 }
 0x131   :  { %v1572_v17 = vpack.c.bf16 %v1508_v37, %v1508_v37 }
 0x132   :  { %v1193_v26 = vpop.permute.xlu0 %1192  ;;  %v873_v27 = vpop.permute.xlu1 %872  ;;  %7320 = vmatmul.msk.bf16.gmra.mxu0 %vm354_vm2, %v8552_v36  ;;  %7352 = vmatmul.msk.bf16.gmra.mxu1 %vm354_vm2, %v8552_v36  ;;  %v1718_v29 = vld [vmem:[#allocation2 + $0x68] sm:$0xf] }
 0x133   :  { %1637 = vst.msk [vmem:[#allocation2 + $0x6c] sm:$0xf] %vm40_vm0, %v1572_v17  ;;  %v1378_v34 = vmax.f32 %v9258_v45, %v1193_v26  ;;  %v1058_v35 = vmax.f32 %v9256_v44, %v873_v27  ;;  %1991 = vrot.lane.b32.xlu0 %v1844_v28, %s8887_s11  ;;  %898 = vrot.lane.b32.xlu2 %v9435_v31, %s8887_s11  ;;  %v2727_v24 = vld [vmem:[#allocation2 + $0x68] sm:$0xf]  ;;  %v875_v44 = vpop.permute.xlu2 %874 }
 0x134   :  { %1782 = vst.msk [vmem:[#allocation3 + $0x1b8] sm:$0xf] %vm40_vm0, %v1718_v29  ;;  %v2229_v40 = vld [vmem:[#allocation2 + $0x68] sm:$0xf]  ;;  %v1059_v52 = vmax.f32 %v9270_v50, %v875_v44  ;;  %v8553_v50 = vld [vmem:[%s12015_s0 + $0x98] sm:$0xff] }
 0x135   :  { %v1442_v41 = vmax.f32 %v1058_v35, %v1378_v34  ;;  %2791 = vst.msk [vmem:[#allocation3 + $0x58] sm:$0xf] %vm40_vm0, %v2727_v24  ;;  %v2854_v3 = vld [vmem:[#allocation2 + $0x68] sm:$0xf] }
 0x136   :  { %2293 = vst.msk [vmem:[#allocation3 + $0x16c] sm:$0xf] %vm40_vm0, %v2229_v40  ;;  %v1845_v4 = vld [vmem:[#allocation2 + $0x68] sm:$0xf] }
 0x137   :  { %v1509_v42 = vadd.f32 %v9364_v39, %v1442_v41  ;;  %v9470_v47 = vpop.f32.mrf.mxu0  ;;  %v9472_v45 = vpop.f32.mrf.mxu1 }
 0x138   :  { %1218 = vrot.lane.b32.xlu1 %v9437_v30, %s8887_s11 }
 0x139   :  { %v1573_v7 = vpack.c.bf16 %v1509_v42, %v1509_v42 }
 0x13a   :  { %v1195_v48 = vpop.permute.xlu1 %1194  ;;  %v1719_v6 = vld [vmem:[#allocation2 + $0x6c] sm:$0xf] }
 0x13b   :  { %1638 = vst.msk [vmem:[#allocation2 + $0x70] sm:$0xf] %vm40_vm0, %v1573_v7  ;;  %v1379_v53 = vmax.f32 %v9272_v51, %v1195_v48  ;;  %1220 = vrot.lane.b32.xlu0 %v9455_v18, %s8887_s11  ;;  %2477 = vrot.lane.b32.xlu2 %v2344_v49, %s8887_s11  ;;  %v2728_v54 = vld [vmem:[#allocation2 + $0x6c] sm:$0xf]  ;;  %v1712_v48 = vld [vmem:[#allocation2 + $0x50] sm:$0xf] }
 0x13c   :  { %1783 = vst.msk [vmem:[#allocation3 + $0x1cc] sm:$0xf] %vm40_vm0, %v1719_v6  ;;  %v2230_v12 = vld [vmem:[#allocation2 + $0x6c] sm:$0xf] }
 0x13d   :  { %v1443_v57 = vmax.f32 %v1059_v52, %v1379_v53  ;;  %2792 = vst.msk [vmem:[#allocation3 + $0x6c] sm:$0xf] %vm40_vm0, %v2728_v54  ;;  %v1846_v35 = vld [vmem:[#allocation2 + $0x6c] sm:$0xf] }
 0x13e   :  { %2294 = vst.msk [vmem:[#allocation3 + $0x180] sm:$0xf] %vm40_vm0, %v2230_v12 }
 0x13f   :  { %v1510_v51 = vadd.f32 %v9364_v39, %v1443_v57  ;;  %v9489_v13 = vpop.f32.mrf.mxu0  ;;  %v9491_v61 = vpop.f32.mrf.mxu1  ;;  %1776 = vst.msk [vmem:[#allocation3 + $0x140] sm:$0xf] %vm40_vm0, %v1712_v48 }
 0x140   :  { %2982 = vrot.lane.b32.xlu1 %v2853_v60, %s8887_s11 }
 0x141   :  { %v1574_v0 = vpack.c.bf16 %v1510_v51, %v1510_v51 }
 0x142   :  { %v1197_v1 = vpop.permute.xlu0 %1196  ;;  %v877_v2 = vpop.permute.xlu1 %876  ;;  %7321 = vmatmul.msk.bf16.gmra.mxu0 %vm354_vm2, %v8553_v50  ;;  %7353 = vmatmul.msk.bf16.gmra.mxu1 %vm354_vm2, %v8553_v50  ;;  %v1720_v15 = vld [vmem:[#allocation2 + $0x70] sm:$0xf] }
 0x143   :  { %1639 = vst.msk [vmem:[#allocation2 + $0x74] sm:$0xf] %vm40_vm0, %v1574_v0  ;;  %v1380_v36 = vmax.f32 %v9285_v59, %v1197_v1  ;;  %v1060_v37 = vmax.f32 %v9283_v58, %v877_v2  ;;  %2984 = vrot.lane.b32.xlu0 %v2854_v3, %s8887_s11  ;;  %1993 = vrot.lane.b32.xlu2 %v1845_v4, %s8887_s11  ;;  %v2729_v19 = vld [vmem:[#allocation2 + $0x70] sm:$0xf]  ;;  %v879_v58 = vpop.permute.xlu2 %878 }
 0x144   :  { %1784 = vst.msk [vmem:[#allocation3 + $0x1e0] sm:$0xf] %vm40_vm0, %v1720_v15  ;;  %v2231_v17 = vld [vmem:[#allocation2 + $0x70] sm:$0xf]  ;;  %v1061_v40 = vmax.f32 %v9295_v62, %v879_v58  ;;  %v8554_v62 = vld [vmem:[%s12015_s0 + $0xa0] sm:$0xff] }
 0x145   :  { %v1444_v26 = vmax.f32 %v1060_v37, %v1380_v36  ;;  %2793 = vst.msk [vmem:[#allocation3 + $0x80] sm:$0xf] %vm40_vm0, %v2729_v19  ;;  %v1847_v12 = vld [vmem:[#allocation2 + $0x70] sm:$0xf] }
 0x146   :  { %2295 = vst.msk [vmem:[#allocation3 + $0x194] sm:$0xf] %vm40_vm0, %v2231_v17  ;;  %v2856_v37 = vld [vmem:[#allocation2 + $0x70] sm:$0xf] }
 0x147   :  { %v1511_v27 = vadd.f32 %v9364_v39, %v1444_v26  ;;  %v9505_v28 = vpop.f32.mrf.mxu0  ;;  %v9507_v59 = vpop.f32.mrf.mxu1 }
 0x148   :  { %900 = vrot.lane.b32.xlu1 %v9453_v16, %s8887_s11 }
 0x149   :  { %v1575_v29 = vpack.c.bf16 %v1511_v27, %v1511_v27 }
 0x14a   :  { %v1199_v34 = vpop.permute.xlu1 %1198  ;;  %v1721_v24 = vld [vmem:[#allocation2 + $0x74] sm:$0xf] }
 0x14b   :  { %1640 = vst.msk [vmem:[#allocation2 + $0x78] sm:$0xf] %vm40_vm0, %v1575_v29  ;;  %v1381_v41 = vmax.f32 %v9297_v63, %v1199_v34  ;;  %1995 = vrot.lane.b32.xlu0 %v1846_v35, %s8887_s11  ;;  %902 = vrot.lane.b32.xlu2 %v9470_v47, %s8887_s11  ;;  %v2730_v42 = vld [vmem:[#allocation2 + $0x74] sm:$0xf]  ;;  %v883_v1 = vpop.permute.xlu2 %882  ;;  %v2214_v35 = vld [vmem:[#allocation2 + $0x1c] sm:$0xf] }
 0x14c   :  { %1785 = vst.msk [vmem:[#allocation3 + $0x1f4] sm:$0xf] %vm40_vm0, %v1721_v24  ;;  %v2232_v44 = vld [vmem:[#allocation2 + $0x74] sm:$0xf]  ;;  %v1063_v17 = vmax.f32 %v9318_v10, %v883_v1  ;;  %v8555_v10 = vld [vmem:[%s12015_s0 + $0xa8] sm:$0xff] }
 0x14d   :  { %v1445_v7 = vmax.f32 %v1061_v40, %v1381_v41  ;;  %2794 = vst.msk [vmem:[#allocation3 + $0x94] sm:$0xf] %vm40_vm0, %v2730_v42 }
 0x14e   :  { %2296 = vst.msk [vmem:[#allocation3 + $0x1a8] sm:$0xf] %vm40_vm0, %v2232_v44 }
 0x14f   :  { %v1512_v63 = vadd.f32 %v9364_v39, %v1445_v7  ;;  %v9524_v49 = vpop.f32.mrf.mxu0  ;;  %v9526_v6 = vpop.f32.mrf.mxu1  ;;  %2278 = vst.msk [vmem:[#allocation3 + $0x40] sm:$0xf] %vm40_vm0, %v2214_v35  ;;  %v1848_v7 = vld [vmem:[#allocation2 + $0x74] sm:$0xf] }
 0x150   :  { %1222 = vrot.lane.b32.xlu1 %v9472_v45, %s8887_s11 }
 0x151   :  { %v1576_v52 = vpack.c.bf16 %v1512_v63, %v1512_v63 }
 0x152   :  { %v1201_v53 = vpop.permute.xlu0 %1200  ;;  %v881_v54 = vpop.permute.xlu1 %880  ;;  %7322 = vmatmul.msk.bf16.gmra.mxu0 %vm354_vm2, %v8554_v62  ;;  %7354 = vmatmul.msk.bf16.gmra.mxu1 %vm354_vm2, %v8554_v62  ;;  %v1722_v57 = vld [vmem:[#allocation2 + $0x78] sm:$0xf] }
 0x153   :  { %1641 = vst.msk [vmem:[#allocation2 + $0x7c] sm:$0xf] %vm40_vm0, %v1576_v52  ;;  %v1382_v50 = vmax.f32 %v9310_v9, %v1201_v53  ;;  %v1062_v51 = vmax.f32 %v9308_v8, %v881_v54  ;;  %1224 = vrot.lane.b32.xlu0 %v9491_v61, %s8887_s11  ;;  %1997 = vrot.lane.b32.xlu2 %v1847_v12, %s8887_s11  ;;  %v2731_v60 = vld [vmem:[#allocation2 + $0x78] sm:$0xf]  ;;  %v2855_v8 = vld [vmem:[#allocation2 + $0x6c] sm:$0xf]  ;;  %v887_v29 = vpop.permute.xlu2 %886 }
 0x154   :  { %1786 = vst.msk [vmem:[#allocation3 + $0x208] sm:$0xf] %vm40_vm0, %v1722_v57  ;;  %v2233_v0 = vld [vmem:[#allocation2 + $0x78] sm:$0xf]  ;;  %v1065_v1 = vmax.f32 %v9339_v22, %v887_v29  ;;  %v8556_v22 = vld [vmem:[%s12015_s0 + $0xb0] sm:$0xff] }
 0x155   :  { %v1446_v2 = vmax.f32 %v1062_v51, %v1382_v50  ;;  %2795 = vst.msk [vmem:[#allocation3 + $0xa8] sm:$0xf] %vm40_vm0, %v2731_v60  ;;  %v1849_v48 = vld [vmem:[#allocation2 + $0x78] sm:$0xf] }
 0x156   :  { %2297 = vst.msk [vmem:[#allocation3 + $0x1bc] sm:$0xf] %vm40_vm0, %v2233_v0  ;;  %v2213_v0 = vld [vmem:[#allocation2 + $0x18] sm:$0xf] }
 0x157   :  { %v1513_v3 = vadd.f32 %v9364_v39, %v1446_v2  ;;  %v9543_v9 = vpop.f32.mrf.mxu0  ;;  %v9545_v4 = vpop.f32.mrf.mxu1  ;;  %2277 = vst.msk [vmem:[#allocation3 + $0x2c] sm:$0xf] %vm40_vm0, %v2213_v0 }
 0x158   :  { %2986 = vrot.lane.b32.xlu1 %v2855_v8, %s8887_s11 }
 0x159   :  { %v1577_v15 = vpack.c.bf16 %v1513_v3, %v1513_v3  ;;  %v1713_v3 = vld [vmem:[#allocation2 + $0x54] sm:$0xf] }
 0x15a   :  { %v1203_v36 = vpop.permute.xlu1 %1202  ;;  %v1723_v19 = vld [vmem:[#allocation2 + $0x7c] sm:$0xf]  ;;  %1777 = vst.msk [vmem:[#allocation3 + $0x154] sm:$0xf] %vm40_vm0, %v1713_v3 }
 0x15b   :  { %1642 = vst.msk [vmem:[#allocation2 + $0x80] sm:$0xf] %vm40_vm0, %v1577_v15  ;;  %v1383_v26 = vmax.f32 %v9320_v11, %v1203_v36  ;;  %2988 = vrot.lane.b32.xlu0 %v2856_v37, %s8887_s11  ;;  %906 = vrot.lane.b32.xlu2 %v9505_v28, %s8887_s11  ;;  %v2732_v27 = vld [vmem:[#allocation2 + $0x7c] sm:$0xf] }
 0x15c   :  { %1787 = vst.msk [vmem:[#allocation3 + $0x21c] sm:$0xf] %vm40_vm0, %v1723_v19  ;;  %v2234_v58 = vld [vmem:[#allocation2 + $0x7c] sm:$0xf] }
 0x15d   :  { %v1447_v34 = vmax.f32 %v1063_v17, %v1383_v26  ;;  %2796 = vst.msk [vmem:[#allocation3 + $0xbc] sm:$0xf] %vm40_vm0, %v2732_v27 }
 0x15e   :  { %2298 = vst.msk [vmem:[#allocation3 + $0x1d0] sm:$0xf] %vm40_vm0, %v2234_v58 }
 0x15f   :  { %v1514_v11 = vadd.f32 %v9364_v39, %v1447_v34  ;;  %v9561_v24 = vpop.f32.mrf.mxu0  ;;  %v9563_v40 = vpop.f32.mrf.mxu1  ;;  %v1850_v34 = vld [vmem:[#allocation2 + $0x7c] sm:$0xf] }
 0x160   :  { %904 = vrot.lane.b32.xlu1 %v9489_v13, %s8887_s11 }
 0x161   :  { %v1578_v41 = vpack.c.bf16 %v1514_v11, %v1514_v11 }
 0x162   :  { %v1205_v42 = vpop.permute.xlu0 %1204  ;;  %v885_v44 = vpop.permute.xlu1 %884  ;;  %7323 = vmatmul.msk.bf16.gmra.mxu0 %vm354_vm2, %v8555_v10  ;;  %7355 = vmatmul.msk.bf16.gmra.mxu1 %vm354_vm2, %v8555_v10  ;;  %v1724_v62 = vld [vmem:[#allocation2 + $0x80] sm:$0xf] }
 0x163   :  { %1643 = vst.msk [vmem:[#allocation2 + $0x84] sm:$0xf] %vm40_vm0, %v1578_v41  ;;  %v1384_v63 = vmax.f32 %v9331_v21, %v1205_v42  ;;  %v1064_v52 = vmax.f32 %v9329_v20, %v885_v44  ;;  %1999 = vrot.lane.b32.xlu0 %v1848_v7, %s8887_s11  ;;  %2001 = vrot.lane.b32.xlu2 %v1849_v48, %s8887_s11  ;;  %v2733_v53 = vld [vmem:[#allocation2 + $0x80] sm:$0xf]  ;;  %v9576_v57 = vpop.permute.xlu2 %890 }
 0x164   :  { %1788 = vst.msk [vmem:[#allocation3 + $0x230] sm:$0xf] %vm40_vm0, %v1724_v62  ;;  %v2235_v54 = vld [vmem:[#allocation2 + $0x80] sm:$0xf]  ;;  %v2216_v62 = vld [vmem:[#allocation2 + $0x24] sm:$0xf] }
 0x165   :  { %v1448_v12 = vmax.f32 %v1064_v52, %v1384_v63  ;;  %2797 = vst.msk [vmem:[#allocation3 + $0xd0] sm:$0xf] %vm40_vm0, %v2733_v53  ;;  %v1851_v35 = vld [vmem:[#allocation2 + $0x80] sm:$0xf] }
 0x166   :  { %2299 = vst.msk [vmem:[#allocation3 + $0x1e4] sm:$0xf] %vm40_vm0, %v2235_v54 }
 0x167   :  { %v1515_v50 = vadd.f32 %v9364_v39, %v1448_v12  ;;  %v9581_v21 = vpop.f32.mrf.mxu0  ;;  %v9583_v20 = vpop.f32.mrf.mxu1  ;;  %2280 = vst.msk [vmem:[#allocation3 + $0x68] sm:$0xf] %vm40_vm0, %v2216_v62  ;;  %v1067_v12 = vmax.f32 %v9368_v43, %v9576_v57  ;;  %v8557_v43 = vld [vmem:[%s12015_s0 + $0xb8] sm:$0xff]  ;;  %v8558_v62 = vld [vmem:[%s12015_s0 + $0xc0] sm:$0xff] }
 0x168   :  { %1226 = vrot.lane.b32.xlu1 %v9507_v59, %s8887_s11 }
 0x169   :  { %v1579_v51 = vpack.c.bf16 %v1515_v50, %v1515_v50 }
 0x16a   :  { %v1207_v60 = vpop.permute.xlu1 %1206  ;;  %v1725_v8 = vld [vmem:[#allocation2 + $0x84] sm:$0xf] }
 0x16b   :  { %1644 = vst.msk [vmem:[#allocation2 + $0x88] sm:$0xf] %vm40_vm0, %v1579_v51  ;;  %v1385_v2 = vmax.f32 %v9341_v23, %v1207_v60  ;;  %1228 = vrot.lane.b32.xlu0 %v9526_v6, %s8887_s11  ;;  %910 = vrot.lane.b32.xlu2 %v9543_v9, %s8887_s11  ;;  %v2734_v37 = vld [vmem:[#allocation2 + $0x84] sm:$0xf] }
 0x16c   :  { %v2236_v23 = vld [vmem:[#allocation2 + $0x84] sm:$0xf]  ;;  %1789 = vst.msk [vmem:[#allocation3 + $0x244] sm:$0xf] %vm40_vm0, %v1725_v8 }
 0x16d   :  { %v1449_v15 = vmax.f32 %v1065_v1, %v1385_v2  ;;  %v1986_v36 = vpop.permute.xlu2 %1985  ;;  %2798 = vst.msk [vmem:[#allocation3 + $0xe4] sm:$0xf] %vm40_vm0, %v2734_v37 }
 0x16e   :  { %2162 = vst.msk [vmem:[#allocation3 + $0x140] sm:$0xf] %vm2145_vm3, %v1986_v36  ;;  %v1852_v36 = vld [vmem:[#allocation2 + $0x84] sm:$0xf] }
 0x16f   :  { %v1516_v19 = vadd.f32 %v9364_v39, %v1449_v15  ;;  %v9601_v17 = vpop.f32.mrf.mxu0  ;;  %v9603_v26 = vpop.f32.mrf.mxu1  ;;  %2300 = vst.msk [vmem:[#allocation3 + $0x1f8] sm:$0xf] %vm40_vm0, %v2236_v23 }
 0x170   :  { %908 = vrot.lane.b32.xlu1 %v9524_v49, %s8887_s11 }
 0x171   :  { %v1580_v27 = vpack.c.bf16 %v1516_v19, %v1516_v19  ;;  %v2215_v19 = vld [vmem:[#allocation2 + $0x20] sm:$0xf] }
 0x172   :  { %v1209_v58 = vpop.permute.xlu0 %1208  ;;  %v889_v29 = vpop.permute.xlu1 %888  ;;  %7324 = vmatmul.msk.bf16.gmra.mxu0 %vm354_vm2, %v8556_v22  ;;  %7356 = vmatmul.msk.bf16.gmra.mxu1 %vm354_vm2, %v8556_v22  ;;  %v1726_v10 = vld [vmem:[#allocation2 + $0x88] sm:$0xf]  ;;  %2279 = vst.msk [vmem:[#allocation3 + $0x54] sm:$0xf] %vm40_vm0, %v2215_v19 }
 0x173   :  { %1645 = vst.msk [vmem:[#allocation2 + $0x8c] sm:$0xf] %vm40_vm0, %v1580_v27  ;;  %v1386_v11 = vmax.f32 %v9352_v33, %v1209_v58  ;;  %v1066_v41 = vmax.f32 %v9350_v32, %v889_v29  ;;  %2003 = vrot.lane.b32.xlu0 %v1850_v34, %s8887_s11  ;;  %2005 = vrot.lane.b32.xlu2 %v1851_v35, %s8887_s11  ;;  %v2735_v42 = vld [vmem:[#allocation2 + $0x88] sm:$0xf] }
 0x174   :  { %1790 = vst.msk [vmem:[#allocation3 + $0x258] sm:$0xf] %vm40_vm0, %v1726_v10  ;;  %v2237_v44 = vld [vmem:[#allocation2 + $0x88] sm:$0xf] }
 0x175   :  { %v1450_v7 = vmax.f32 %v1066_v41, %v1386_v11  ;;  %v9618_v48 = vpop.permute.xlu2 %894  ;;  %2799 = vst.msk [vmem:[#allocation3 + $0xf8] sm:$0xf] %vm40_vm0, %v2735_v42  ;;  %v1853_v37 = vld [vmem:[#allocation2 + $0x88] sm:$0xf] }
 0x176   :  { %2301 = vst.msk [vmem:[#allocation3 + $0x20c] sm:$0xf] %vm40_vm0, %v2237_v44 }
 0x177   :  { %v1517_v33 = vadd.f32 %v9364_v39, %v1450_v7  ;;  %v9623_v63 = vpop.f32.mrf.mxu0  ;;  %v9625_v32 = vpop.f32.mrf.mxu1 }
 0x178   :  { %1230 = vrot.lane.b32.xlu1 %v9545_v4, %s8887_s11 }
 0x179   :  { %v1581_v52 = vpack.c.bf16 %v1517_v33, %v1517_v33 }
 0x17a   :  { %v1211_v53 = vpop.permute.xlu1 %1210  ;;  %v1727_v54 = vld [vmem:[#allocation2 + $0x8c] sm:$0xf] }
 0x17b   :  { %1646 = vst.msk [vmem:[#allocation2 + $0x90] sm:$0xf] %vm40_vm0, %v1581_v52  ;;  %v1387_v50 = vmax.f32 %v9370_v46, %v1211_v53  ;;  %1232 = vrot.lane.b32.xlu0 %v9563_v40, %s8887_s11  ;;  %914 = vrot.lane.b32.xlu2 %v9581_v21, %s8887_s11  ;;  %v2736_v51 = vld [vmem:[#allocation2 + $0x8c] sm:$0xf]  ;;  %v9688_v53 = vpop.f32.mrf.mxu2 }
 0x17c   :  { %1791 = vst.msk [vmem:[#allocation3 + $0x26c] sm:$0xf] %vm40_vm0, %v1727_v54  ;;  %v2238_v60 = vld [vmem:[#allocation2 + $0x8c] sm:$0xf] }
 0x17d   :  { %v1451_v0 = vmax.f32 %v1067_v12, %v1387_v50  ;;  %v2474_v1 = vpop.permute.xlu2 %2473  ;;  %2800 = vst.msk [vmem:[#allocation3 + $0x10c] sm:$0xf] %vm40_vm0, %v2736_v51  ;;  %v1854_v12 = vld [vmem:[#allocation2 + $0x8c] sm:$0xf]  ;;  %v1069_v51 = vmax.f32 %v9400_v5, %v9618_v48 }
 0x17e   :  { %2662 = vst.msk [vmem:[#allocation3 + $0x40] sm:$0xf] %vm2145_vm3, %v2474_v1 }
 0x17f   :  { %v1518_v46 = vadd.f32 %v9364_v39, %v1451_v0  ;;  %v9645_v57 = vpop.f32.mrf.mxu0  ;;  %v9647_v2 = vpop.f32.mrf.mxu1  ;;  %2302 = vst.msk [vmem:[#allocation3 + $0x220] sm:$0xf] %vm40_vm0, %v2238_v60 }
 0x180   :  { %912 = vrot.lane.b32.xlu1 %v9561_v24, %s8887_s11 }
 0x181   :  { %v1582_v3 = vpack.c.bf16 %v1518_v46, %v1518_v46 }
 0x182   :  { %v1213_v8 = vpop.permute.xlu0 %1212  ;;  %v893_v15 = vpop.permute.xlu1 %892  ;;  %7325 = vmatmul.msk.bf16.gmra.mxu0 %vm354_vm2, %v8557_v43  ;;  %7357 = vmatmul.msk.bf16.gmra.mxu1 %vm354_vm2, %v8557_v43  ;;  %v2737_v27 = vld [vmem:[#allocation2 + $0x90] sm:$0xf] }
 0x183   :  { %1647 = vst.msk [vmem:[#allocation2 + $0x94] sm:$0xf] %vm40_vm0, %v1582_v3  ;;  %v1388_v22 = vmax.f32 %v9385_v56, %v1213_v8  ;;  %v1068_v23 = vmax.f32 %v9383_v55, %v893_v15  ;;  %2007 = vrot.lane.b32.xlu0 %v1852_v36, %s8887_s11  ;;  %2009 = vrot.lane.b32.xlu2 %v1853_v37, %s8887_s11  ;;  %v2239_v58 = vld [vmem:[#allocation2 + $0x90] sm:$0xf]  ;;  %v7528_v15 = vld [vmem:[#allocation3 + $0x140] sm:$0xf] }
 0x184   :  { %2801 = vst.msk [vmem:[#allocation3 + $0x120] sm:$0xf] %vm40_vm0, %v2737_v27  ;;  %v1855_v50 = vld [vmem:[#allocation2 + $0x90] sm:$0xf] }
 0x185   :  { %v1452_v29 = vmax.f32 %v1068_v23, %v1388_v22  ;;  %v1990_v34 = vpop.permute.xlu2 %1989  ;;  %2303 = vst.msk [vmem:[#allocation3 + $0x234] sm:$0xf] %vm40_vm0, %v2239_v58  ;;  %v9710_v23 = vpop.f32.mrf.mxu2 }
 0x186   :  { %2164 = vst.msk [vmem:[#allocation3 + $0x168] sm:$0xf] %vm2145_vm3, %v1990_v34 }
 0x187   :  { %v1519_v35 = vadd.f32 %v9364_v39, %v1452_v29  ;;  %v9663_v56 = vpop.f32.mrf.mxu0  ;;  %v9665_v55 = vpop.f32.mrf.mxu1 }
 0x188   :  { %1234 = vrot.lane.b32.xlu1 %v9583_v20, %s8887_s11 }
 0x189   :  { %v1583_v10 = vpack.c.bf16 %v1519_v35, %v1519_v35 }
 0x18a   :  { %v2472_v11 = vpop.permute.xlu1 %2471  ;;  %v2738_v41 = vld [vmem:[#allocation2 + $0x94] sm:$0xf] }
 0x18b   :  { %1648 = vst.msk [vmem:[#allocation2 + $0xa8] sm:$0xf] %vm40_vm0, %v1583_v10  ;;  %1236 = vrot.lane.b32.xlu0 %v9603_v26, %s8887_s11  ;;  %918 = vrot.lane.b32.xlu2 %v9623_v63, %s8887_s11  ;;  %v2240_v42 = vld [vmem:[#allocation2 + $0x94] sm:$0xf]  ;;  %v8559_v10 = vld [vmem:[%s12015_s0 + $0xc8] sm:$0xff] }
 0x18c   :  { %2661 = vst.msk [vmem:[#allocation3 + $0x2c] sm:$0xf] %vm2145_vm3, %v2472_v11 }
 0x18d   :  { %v1988_v44 = vpop.permute.xlu0 %1987  ;;  %v9676_v7 = vpop.permute.xlu2 %898  ;;  %2802 = vst.msk [vmem:[#allocation3 + $0x134] sm:$0xf] %vm40_vm0, %v2738_v41 }
 0x18e   :  { %2163 = vst.msk [vmem:[#allocation3 + $0x154] sm:$0xf] %vm2145_vm3, %v1988_v44  ;;  %v1856_v44 = vld [vmem:[#allocation2 + $0x94] sm:$0xf] }
 0x18f   :  { %v9683_v33 = vpop.f32.mrf.mxu0  ;;  %v9685_v52 = vpop.f32.mrf.mxu1  ;;  %2304 = vst.msk [vmem:[#allocation3 + $0x248] sm:$0xf] %vm40_vm0, %v2240_v42 }
 0x190   :  { %916 = vrot.lane.b32.xlu1 %v9601_v17, %s8887_s11 }
 0x192   :  { %v1215_v54 = vpop.permute.xlu1 %1214  ;;  %7326 = vmatmul.msk.bf16.gmra.mxu0 %vm354_vm2, %v8558_v62  ;;  %7358 = vmatmul.msk.bf16.gmra.mxu1 %vm354_vm2, %v8558_v62  ;;  %v1730_v0 = vld [vmem:[#allocation2 + $0xa8] sm:$0xf] }
 0x193   :  { %v1389_v60 = vmax.f32 %v9402_v14, %v1215_v54  ;;  %2011 = vrot.lane.b32.xlu0 %v1854_v12, %s8887_s11  ;;  %2013 = vrot.lane.b32.xlu2 %v1855_v50, %s8887_s11  ;;  %v3239_v1 = vld [vmem:[#allocation2 + $0xa8] sm:$0xf]  ;;  %1794 = vst.msk [vmem:[#allocation3 + $0x2a8] sm:$0xf] %vm40_vm0, %v1730_v0  ;;  %v9736_v12 = vpop.f32.mrf.mxu2 }
 0x194   :  { %v2739_v43 = vld [vmem:[#allocation2 + $0xa8] sm:$0xf]  ;;  %3303 = vst.msk [vmem:[#allocation3 + $0x34] sm:$0xf] %vm40_vm0, %v3239_v1 }
 0x195   :  { %v1453_v46 = vmax.f32 %v1069_v51, %v1389_v60  ;;  %v1217_v3 = vpop.permute.xlu0 %1216  ;;  %v2478_v8 = vpop.permute.xlu2 %2477  ;;  %v8612_v36 = vld [vmem:[#allocation3 + $0x150] sm:$0xf0]  ;;  %2803 = vst.msk [vmem:[#allocation3 + $0x148] sm:$0xf] %vm40_vm0, %v2739_v43  ;;  %v1857_v62 = vld [vmem:[#allocation2 + $0xa8] sm:$0xf] }
 0x196   :  { %2664 = vst.msk [vmem:[#allocation3 + $0x68] sm:$0xf] %vm2145_vm3, %v2478_v8  ;;  %v7529_v5 = vor.u32 %v8612_v36, %v7528_v15  ;;  %v1390_v27 = vmax.f32 %v9419_v25, %v1217_v3  ;;  %v3366_v8 = vld [vmem:[#allocation2 + $0xa8] sm:$0xf]  ;;  %v1071_v15 = vmax.f32 %v9435_v31, %v9676_v7  ;;  %v8560_v31 = vld [vmem:[%s12015_s0 + $0xd0] sm:$0xff] }
 0x197   :  { %v1520_v14 = vadd.f32 %v9364_v39, %v1453_v46  ;;  %v9703_v48 = vpop.f32.mrf.mxu0  ;;  %v9705_v37 = vpop.f32.mrf.mxu1 }
 0x198   :  { %5304 = vmatmul.bf16.gmra.mxu2 %v7529_v5  ;;  %1238 = vrot.lane.b32.xlu1 %v9625_v32, %s8887_s11 }
 0x199   :  { %v1584_v22 = vpack.c.bf16 %v1520_v14, %v1520_v14 }
 0x19a   :  { %v897_v19 = vpop.permute.xlu1 %896 }
 0x19b   :  { %1649 = vst.msk [vmem:[#allocation2 + $0xac] sm:$0xf] %vm40_vm0, %v1584_v22  ;;  %v1070_v58 = vmax.f32 %v9417_v38, %v897_v19  ;;  %1240 = vrot.lane.b32.xlu0 %v9647_v2, %s8887_s11  ;;  %922 = vrot.lane.b32.xlu2 %v9663_v56, %s8887_s11  ;;  %v7548_v22 = vld [vmem:[#allocation3 + $0x168] sm:$0xf] }
 0x19d   :  { %v1454_v29 = vmax.f32 %v1070_v58, %v1390_v27  ;;  %v2981_v34 = vpop.permute.xlu0 %2980  ;;  %v1994_v35 = vpop.permute.xlu2 %1993 }
 0x19e   :  { %3172 = vst.msk [vmem:[#allocation3 + $0x8] sm:$0xf] %vm2145_vm3, %v2981_v34 }
 0x19f   :  { %v1521_v11 = vadd.f32 %v9364_v39, %v1454_v29  ;;  %2166 = vst.msk [vmem:[#allocation3 + $0x190] sm:$0xf] %vm2145_vm3, %v1994_v35  ;;  %v9725_v38 = vpop.f32.mrf.mxu0  ;;  %v9727_v25 = vpop.f32.mrf.mxu1 }
 0x1a0   :  { %920 = vrot.lane.b32.xlu1 %v9645_v57, %s8887_s11 }
 0x1a1   :  { %v1585_v41 = vpack.c.bf16 %v1521_v11, %v1521_v11 }
 0x1a2   :  { %v2476_v42 = vpop.permute.xlu1 %2475  ;;  %7327 = vmatmul.msk.bf16.gmra.mxu0 %vm354_vm2, %v8559_v10  ;;  %7359 = vmatmul.msk.bf16.gmra.mxu1 %vm354_vm2, %v8559_v10  ;;  %v1731_v54 = vld [vmem:[#allocation2 + $0xac] sm:$0xf] }
 0x1a3   :  { %1650 = vst.msk [vmem:[#allocation2 + $0xb0] sm:$0xf] %vm40_vm0, %v1585_v41  ;;  %2015 = vrot.lane.b32.xlu0 %v1856_v44, %s8887_s11  ;;  %2017 = vrot.lane.b32.xlu2 %v1857_v62, %s8887_s11  ;;  %v3240_v50 = vld [vmem:[#allocation2 + $0xac] sm:$0xf] }
 0x1a4   :  { %2663 = vst.msk [vmem:[#allocation3 + $0x54] sm:$0xf] %vm2145_vm3, %v2476_v42  ;;  %v2740_v0 = vld [vmem:[#allocation2 + $0xac] sm:$0xf] }
 0x1a5   :  { %v1992_v51 = vpop.permute.xlu0 %1991  ;;  %v9739_v60 = vpop.permute.xlu2 %902  ;;  %1795 = vst.msk [vmem:[#allocation3 + $0x2bc] sm:$0xf] %vm40_vm0, %v1731_v54  ;;  %v1858_v62 = vld [vmem:[#allocation2 + $0xac] sm:$0xf] }
 0x1a6   :  { %2165 = vst.msk [vmem:[#allocation3 + $0x17c] sm:$0xf] %vm2145_vm3, %v1992_v51 }
 0x1a7   :  { %v9743_v1 = vpop.f32.mrf.mxu0  ;;  %v9745_v43 = vpop.f32.mrf.mxu1  ;;  %3304 = vst.msk [vmem:[#allocation3 + $0x48] sm:$0xf] %vm40_vm0, %v3240_v50 }
 0x1a8   :  { %1242 = vrot.lane.b32.xlu1 %v9665_v55, %s8887_s11  ;;  %2804 = vst.msk [vmem:[#allocation3 + $0x15c] sm:$0xf] %vm40_vm0, %v2740_v0 }
 0x1aa   :  { %v3751_v46 = vld [vmem:[#allocation2 + $0xb0] sm:$0xf]  ;;  %v1219_v3 = vpop.permute.xlu1 %1218 }
 0x1ab   :  { %3815 = vst.msk [vmem:[#allocation3 + $0x10] sm:$0xf] %vm40_vm0, %v3751_v46  ;;  %v1391_v36 = vmax.f32 %v9437_v30, %v1219_v3  ;;  %1244 = vrot.lane.b32.xlu0 %v9685_v52, %s8887_s11  ;;  %3494 = vrot.lane.b32.xlu2 %v3366_v8, %s8887_s11  ;;  %v1732_v5 = vld [vmem:[#allocation2 + $0xb0] sm:$0xf]  ;;  %v9763_v30 = vpop.f32.mrf.mxu2 }
 0x1ac   :  { %v3241_v14 = vld [vmem:[#allocation2 + $0xb0] sm:$0xf]  ;;  %1796 = vst.msk [vmem:[#allocation3 + $0x2d0] sm:$0xf] %vm40_vm0, %v1732_v5 }
 0x1ad   :  { %v1455_v19 = vmax.f32 %v1071_v15, %v1391_v36  ;;  %v1221_v27 = vpop.permute.xlu0 %1220  ;;  %v1998_v58 = vpop.permute.xlu2 %1997  ;;  %v8617_v29 = vld [vmem:[#allocation3 + $0x178] sm:$0xf0]  ;;  %3305 = vst.msk [vmem:[#allocation3 + $0x5c] sm:$0xf] %vm40_vm0, %v3241_v14  ;;  %v2741_v34 = vld [vmem:[#allocation2 + $0xb0] sm:$0xf] }
 0x1ae   :  { %2168 = vst.msk [vmem:[#allocation3 + $0x1b8] sm:$0xf] %vm2145_vm3, %v1998_v58  ;;  %v7549_v7 = vor.u32 %v8617_v29, %v7548_v22  ;;  %v2243_v35 = vld [vmem:[#allocation2 + $0xb0] sm:$0xf]  ;;  %v3367_v36 = vld [vmem:[#allocation2 + $0xac] sm:$0xf]  ;;  %v1392_v14 = vmax.f32 %v9455_v18, %v1221_v27 }
 0x1af   :  { %v1522_v10 = vadd.f32 %v9364_v39, %v1455_v19  ;;  %v9767_v11 = vpop.f32.mrf.mxu0  ;;  %v9769_v41 = vpop.f32.mrf.mxu1  ;;  %2805 = vst.msk [vmem:[#allocation3 + $0x170] sm:$0xf] %vm40_vm0, %v2741_v34  ;;  %v8753_v39 = vld [vmem:[%s12016_s3 + $0xb8] sm:$0xff]  ;;  %v8752_v46 = vld [vmem:[%s12016_s3 + $0xb0] sm:$0xff]  ;;  %v8751_v19 = vld [vmem:[%s12016_s3 + $0xa8] sm:$0xff] }
 0x1b0   :  { %5309 = vmatmul.bf16.gmra.mxu2 %v7549_v7  ;;  %924 = vrot.lane.b32.xlu1 %v9683_v33, %s8887_s11  ;;  %2307 = vst.msk [vmem:[#allocation3 + $0x284] sm:$0xf] %vm40_vm0, %v2243_v35  ;;  %v1859_v5 = vld [vmem:[#allocation2 + $0xb0] sm:$0xf]  ;;  %v9815_v27 = vld [vmem:[%s12017_s2] ss:$0 sm:$0xff] }
 0x1b1   :  { %v1586_v42 = vpack.c.bf16 %v1522_v10, %v1522_v10  ;;  %5594 = vmatpush.bf16.msrb.mxu0 %v8753_v39 }
 0x1b2   :  { %v2983_v44 = vpop.permute.xlu1 %2982  ;;  %7328 = vmatmul.msk.bf16.gmra.mxu0 %vm354_vm2, %v8560_v31  ;;  %7360 = vmatmul.msk.bf16.gmra.mxu1 %vm354_vm2, %v8560_v31 }
 0x1b3   :  { %1651 = vst.msk [vmem:[#allocation2 + $0xb4] sm:$0xf] %vm40_vm0, %v1586_v42  ;;  %2019 = vrot.lane.b32.xlu0 %v1858_v62, %s8887_s11  ;;  %926 = vrot.lane.b32.xlu2 %v9703_v48, %s8887_s11  ;;  %v9795_v3 = vpop.f32.mrf.mxu2  ;;  %v8750_v42 = vld [vmem:[%s12016_s3 + $0xa0] sm:$0xff] }
 0x1b4   :  { %3173 = vst.msk [vmem:[#allocation3 + $0x1c] sm:$0xf] %vm2145_vm3, %v2983_v44 }
 0x1b5   :  { %v2985_v54 = vpop.permute.xlu0 %2984  ;;  %v9785_v50 = vpop.permute.xlu2 %906  ;;  %5595 = vmatpush.bf16.msrb.mxu0 %v8752_v46 }
 0x1b6   :  { %3174 = vst.msk [vmem:[#allocation3 + $0x30] sm:$0xf] %vm2145_vm3, %v2985_v54 }
 0x1b7   :  { %v9788_v51 = vpop.f32.mrf.mxu0  ;;  %v9790_v0 = vpop.f32.mrf.mxu1 }
 0x1b8   :  { %1246 = vrot.lane.b32.xlu1 %v9705_v37, %s8887_s11 }
 0x1b9   :  { %5596 = vmatpush.bf16.msrb.mxu0 %v8751_v19 }
 0x1ba   :  { %v3752_v8 = vld [vmem:[#allocation2 + $0xb4] sm:$0xf]  ;;  %v901_v15 = vpop.permute.xlu1 %900 }
 0x1bb   :  { %3816 = vst.msk [vmem:[#allocation3 + $0x24] sm:$0xf] %vm40_vm0, %v3752_v8  ;;  %v1072_v22 = vmax.f32 %v9453_v16, %v901_v15  ;;  %3496 = vrot.lane.b32.xlu0 %v3367_v36, %s8887_s11  ;;  %2021 = vrot.lane.b32.xlu2 %v1859_v5, %s8887_s11  ;;  %v1733_v58 = vld [vmem:[#allocation2 + $0xb4] sm:$0xf]  ;;  %v8561_v16 = vld [vmem:[%s12015_s0 + $0xd8] sm:$0xff]  ;;  %v9830_v54 = vpop.f32.mrf.mxu2  ;;  %v1073_v15 = vmax.f32 %v9470_v47, %v9739_v60 }
 0x1bc   :  { %1797 = vst.msk [vmem:[#allocation3 + $0x2e4] sm:$0xf] %vm40_vm0, %v1733_v58  ;;  %v3242_v34 = vld [vmem:[#allocation2 + $0xb4] sm:$0xf]  ;;  %v3368_v8 = vld [vmem:[#allocation2 + $0xb0] sm:$0xf] }
 0x1bd   :  { %v1456_v29 = vmax.f32 %v1072_v22, %v1392_v14  ;;  %v1996_v31 = vpop.permute.xlu0 %1995  ;;  %v2002_v7 = vpop.permute.xlu2 %2001  ;;  %v2742_v18 = vld [vmem:[#allocation2 + $0xb4] sm:$0xf]  ;;  %3306 = vst.msk [vmem:[#allocation3 + $0x70] sm:$0xf] %vm40_vm0, %v3242_v34  ;;  %5597 = vmatpush.bf16.msrb.mxu0 %v8750_v42  ;;  %v8749_v5 = vld [vmem:[%s12016_s3 + $0x98] sm:$0xff]  ;;  %v8747_v42 = vld [vmem:[%s12016_s3 + $0x88] sm:$0xff] }
 0x1be   :  { %2167 = vst.msk [vmem:[#allocation3 + $0x1a4] sm:$0xf] %vm2145_vm3, %v1996_v31  ;;  %v2244_v44 = vld [vmem:[#allocation2 + $0xb4] sm:$0xf]  ;;  %v7568_v58 = vld [vmem:[#allocation3 + $0x190] sm:$0xf] }
 0x1bf   :  { %v1523_v35 = vadd.f32 %v9815_v27, %v1456_v29  ;;  %2170 = vst.msk [vmem:[#allocation3 + $0x1e0] sm:$0xf] %vm2145_vm3, %v2002_v7  ;;  %v9819_v10 = vpop.f32.mrf.mxu0  ;;  %v9826_v62 = vpop.f32.mrf.mxu1  ;;  %v8748_v31 = vld [vmem:[%s12016_s3 + $0x90] sm:$0xff] }
 0x1c0   :  { %928 = vrot.lane.b32.xlu1 %v9725_v38, %s8887_s11  ;;  %2806 = vst.msk [vmem:[#allocation3 + $0x184] sm:$0xf] %vm40_vm0, %v2742_v18  ;;  %v1860_v18 = vld [vmem:[#allocation2 + $0xb4] sm:$0xf] }
 0x1c1   :  { %v1587_v39 = vpack.c.bf16 %v1523_v35, %v1523_v35  ;;  %2308 = vst.msk [vmem:[#allocation3 + $0x298] sm:$0xf] %vm40_vm0, %v2244_v44  ;;  %5598 = vmatpush.bf16.msrb.mxu0 %v8749_v5 }
 0x1c2   :  { %v1223_v46 = vpop.permute.xlu1 %1222  ;;  %7329 = vmatmul.msk.bf16.gmra.mxu0 %vm354_vm2, %v8561_v16  ;;  %7361 = vmatmul.msk.bf16.gmra.mxu1 %vm354_vm2, %v8561_v16 }
 0x1c3   :  { %1652 = vst.msk [vmem:[#allocation2 + $0xb8] sm:$0xf] %vm40_vm0, %v1587_v39  ;;  %v1393_v36 = vmax.f32 %v9472_v45, %v1223_v46  ;;  %1248 = vrot.lane.b32.xlu0 %v9727_v25, %s8887_s11  ;;  %3498 = vrot.lane.b32.xlu2 %v3368_v8, %s8887_s11  ;;  %v9864_v44 = vpop.f32.mrf.mxu2 }
 0x1c5   :  { %v1457_v14 = vmax.f32 %v1073_v15, %v1393_v36  ;;  %v1225_v22 = vpop.permute.xlu0 %1224  ;;  %v9845_v19 = vpop.permute.xlu2 %910  ;;  %v8622_v29 = vld [vmem:[#allocation3 + $0x1a0] sm:$0xf0]  ;;  %5599 = vmatpush.bf16.msrb.mxu0 %v8748_v31 }
 0x1c6   :  { %v7569_v47 = vor.u32 %v8622_v29, %v7568_v58  ;;  %v8562_v15 = vld [vmem:[%s12015_s0 + $0xe0] sm:$0xff]  ;;  %v1394_v31 = vmax.f32 %v9491_v61, %v1225_v22 }
 0x1c7   :  { %v1524_v60 = vadd.f32 %v9815_v27, %v1457_v14  ;;  %v9848_v45 = vpop.f32.mrf.mxu0  ;;  %v9855_v35 = vpop.f32.mrf.mxu1  ;;  %v8746_v14 = vld [vmem:[%s12016_s3 + $0x80] sm:$0xff] }
 0x1c8   :  { %5314 = vmatmul.bf16.gmra.mxu2 %v7569_v47  ;;  %1250 = vrot.lane.b32.xlu1 %v9745_v43, %s8887_s11  ;;  %v3369_v47 = vld [vmem:[#allocation2 + $0xb4] sm:$0xf] }
 0x1c9   :  { %v1588_v7 = vpack.c.bf16 %v1524_v60, %v1524_v60  ;;  %5600 = vmatpush.bf16.msrb.mxu0 %v8747_v42 }
 0x1ca   :  { %v3753_v34 = vld [vmem:[#allocation2 + $0xb8] sm:$0xf]  ;;  %v2987_v16 = vpop.permute.xlu1 %2986 }
 0x1cb   :  { %3817 = vst.msk [vmem:[#allocation3 + $0x38] sm:$0xf] %vm40_vm0, %v3753_v34  ;;  %2023 = vrot.lane.b32.xlu0 %v1860_v18, %s8887_s11  ;;  %930 = vrot.lane.b32.xlu2 %v9743_v1, %s8887_s11  ;;  %v1734_v8 = vld [vmem:[#allocation2 + $0xb8] sm:$0xf]  ;;  %v9896_v61 = vpop.f32.mrf.mxu2 }
 0x1cc   :  { %1653 = vst.msk [vmem:[#allocation2 + $0xbc] sm:$0xf] %vm40_vm0, %v1588_v7  ;;  %v3243_v36 = vld [vmem:[#allocation2 + $0xb8] sm:$0xf] }
 0x1cd   :  { %3175 = vst.msk [vmem:[#allocation3 + $0x44] sm:$0xf] %vm2145_vm3, %v2987_v16  ;;  %v2989_v39 = vpop.permute.xlu0 %2988  ;;  %v2006_v46 = vpop.permute.xlu2 %2005  ;;  %v2743_v58 = vld [vmem:[#allocation2 + $0xb8] sm:$0xf]  ;;  %5601 = vmatpush.bf16.msrb.mxu0 %v8746_v14 }
 0x1ce   :  { %3176 = vst.msk [vmem:[#allocation3 + $0x58] sm:$0xf] %vm2145_vm3, %v2989_v39 }
 0x1cf   :  { %2172 = vst.msk [vmem:[#allocation3 + $0x208] sm:$0xf] %vm2145_vm3, %v2006_v46  ;;  %v9873_v5 = vpop.f32.mrf.mxu0  ;;  %v9891_v34 = vpop.f32.mrf.mxu1 }
 0x1d0   :  { %1252 = vrot.lane.b32.xlu1 %v9769_v41, %s8887_s11  ;;  %1798 = vst.msk [vmem:[#allocation3 + $0x2f8] sm:$0xf] %vm40_vm0, %v1734_v8 }
 0x1d1   :  { %3307 = vst.msk [vmem:[#allocation3 + $0x84] sm:$0xf] %vm40_vm0, %v3243_v36 }
 0x1d2   :  { %v905_v29 = vpop.permute.xlu1 %904  ;;  %7330 = vmatmul.msk.bf16.gmra.mxu0 %vm354_vm2, %v8562_v15  ;;  %7362 = vmatmul.msk.bf16.gmra.mxu1 %vm354_vm2, %v8562_v15  ;;  %2807 = vst.msk [vmem:[#allocation3 + $0x198] sm:$0xf] %vm40_vm0, %v2743_v58 }
 0x1d3   :  { %v3754_v60 = vld [vmem:[#allocation2 + $0xbc] sm:$0xf]  ;;  %v1074_v7 = vmax.f32 %v9489_v13, %v905_v29  ;;  %3500 = vrot.lane.b32.xlu0 %v3369_v47, %s8887_s11  ;;  %932 = vrot.lane.b32.xlu2 %v9767_v11, %s8887_s11  ;;  %v2245_v13 = vld [vmem:[#allocation2 + $0xb8] sm:$0xf]  ;;  %v1075_v47 = vmax.f32 %v9505_v28, %v9785_v50  ;;  %v8563_v28 = vld [vmem:[%s12015_s0 + $0xe8] sm:$0xff] }
 0x1d4   :  { %3818 = vst.msk [vmem:[#allocation3 + $0x4c] sm:$0xf] %vm40_vm0, %v3754_v60  ;;  %v1735_v16 = vld [vmem:[#allocation2 + $0xbc] sm:$0xf]  ;;  %v1861_v29 = vld [vmem:[#allocation2 + $0xb8] sm:$0xf] }
 0x1d5   :  { %v1458_v18 = vmax.f32 %v1074_v7, %v1394_v31  ;;  %v2000_v42 = vpop.permute.xlu0 %1999  ;;  %v9893_v39 = vpop.permute.xlu2 %914  ;;  %1799 = vst.msk [vmem:[#allocation3 + $0x30c] sm:$0xf] %vm40_vm0, %v1735_v16  ;;  %v3244_v46 = vld [vmem:[#allocation2 + $0xbc] sm:$0xf] }
 0x1d6   :  { %2169 = vst.msk [vmem:[#allocation3 + $0x1cc] sm:$0xf] %vm2145_vm3, %v2000_v42  ;;  %v2744_v15 = vld [vmem:[#allocation2 + $0xbc] sm:$0xf] }
 0x1d7   :  { %v1525_v22 = vadd.f32 %v9815_v27, %v1458_v18  ;;  %v9900_v8 = vpop.f32.mrf.mxu0  ;;  %3308 = vst.msk [vmem:[#allocation3 + $0x98] sm:$0xf] %vm40_vm0, %v3244_v46  ;;  %v2246_v36 = vld [vmem:[#allocation2 + $0xbc] sm:$0xf]  ;;  %v7588_v18 = vld [vmem:[#allocation3 + $0x1b8] sm:$0xf]  ;;  %v9919_v50 = vpop.f32.mrf.mxu1 }
 0x1d8   :  { %938 = vrot.lane.b32.xlu1 %v9848_v45, %s8887_s11  ;;  %2808 = vst.msk [vmem:[#allocation3 + $0x1ac] sm:$0xf] %vm40_vm0, %v2744_v15  ;;  %v9925_v15 = vpop.f32.mrf.mxu2 }
 0x1d9   :  { %v1589_v14 = vpack.c.bf16 %v1525_v22, %v1525_v22  ;;  %2309 = vst.msk [vmem:[#allocation3 + $0x2ac] sm:$0xf] %vm40_vm0, %v2245_v13 }
 0x1da   :  { %v1227_v58 = vpop.permute.xlu1 %1226  ;;  %2310 = vst.msk [vmem:[#allocation3 + $0x2c0] sm:$0xf] %vm40_vm0, %v2246_v36 }
 0x1db   :  { %1654 = vst.msk [vmem:[#allocation2 + $0xc0] sm:$0xf] %vm40_vm0, %v1589_v14  ;;  %v1395_v60 = vmax.f32 %v9507_v59, %v1227_v58  ;;  %2025 = vrot.lane.b32.xlu2 %v1861_v29, %s8887_s11  ;;  %934 = vrot.lane.b32.xlu0 %v9788_v51, %s8887_s11  ;;  %v1728_v59 = vld [vmem:[#allocation2 + $0xa0] sm:$0xf]  ;;  %v1862_v29 = vld [vmem:[#allocation2 + $0xbc] sm:$0xf] }
 0x1dc   :  { %1792 = vst.msk [vmem:[#allocation3 + $0x280] sm:$0xf] %vm40_vm0, %v1728_v59 }
 0x1dd   :  { %v1459_v31 = vmax.f32 %v1075_v47, %v1395_v60  ;;  %v1229_v7 = vpop.permute.xlu0 %1228  ;;  %v2010_v16 = vpop.permute.xlu2 %2009  ;;  %v8627_v42 = vld [vmem:[#allocation3 + $0x1c8] sm:$0xf0]  ;;  %12035 = vst [vmem:[#allocation6_spill] sm:$0xff] %v9925_v15 }
 0x1de   :  { %2174 = vst.msk [vmem:[#allocation3 + $0x230] sm:$0xf] %vm2145_vm3, %v2010_v16  ;;  %v7589_v46 = vor.u32 %v8627_v42, %v7588_v18  ;;  %v1396_v60 = vmax.f32 %v9526_v6, %v1229_v7 }
 0x1df   :  { %v1526_v13 = vadd.f32 %v9815_v27, %v1459_v31  ;;  %v9922_v22 = vpop.f32.mrf.mxu0  ;;  %v9948_v59 = vpop.f32.mrf.mxu1 }
 0x1e0   :  { %5319 = vmatmul.bf16.gmra.mxu2 %v7589_v46  ;;  %940 = vrot.lane.b32.xlu1 %v9873_v5, %s8887_s11 }
 0x1e1   :  { %v1590_v36 = vpack.c.bf16 %v1526_v13, %v1526_v13  ;;  %v3237_v13 = vld [vmem:[#allocation2 + $0xa0] sm:$0xf] }
 0x1e2   :  { %v3755_v14 = vld [vmem:[#allocation2 + $0xc0] sm:$0xf]  ;;  %v909_v58 = vpop.permute.xlu1 %908  ;;  %7331 = vmatmul.msk.bf16.gmra.mxu0 %vm354_vm2, %v8563_v28  ;;  %7363 = vmatmul.msk.bf16.gmra.mxu1 %vm354_vm2, %v8563_v28  ;;  %3301 = vst.msk [vmem:[#allocation3 + $0xc] sm:$0xf] %vm40_vm0, %v3237_v13 }
 0x1e3   :  { %v1736_v47 = vld [vmem:[#allocation2 + $0xc0] sm:$0xf]  ;;  %3819 = vst.msk [vmem:[#allocation3 + $0x60] sm:$0xf] %vm40_vm0, %v3755_v14  ;;  %v1076_v31 = vmax.f32 %v9524_v49, %v909_v58  ;;  %1254 = vrot.lane.b32.xlu2 %v9790_v0, %s8887_s11  ;;  %2027 = vrot.lane.b32.xlu0 %v1862_v29, %s8887_s11  ;;  %v9952_v14 = vpop.f32.mrf.mxu2  ;;  %v1077_v29 = vmax.f32 %v9543_v9, %v9845_v19 }
 0x1e4   :  { %1655 = vst.msk [vmem:[#allocation2 + $0xc4] sm:$0xf] %vm40_vm0, %v1590_v36  ;;  %v3245_v16 = vld [vmem:[#allocation2 + $0xc0] sm:$0xf] }
 0x1e5   :  { %v1460_v18 = vmax.f32 %v1076_v31, %v1396_v60  ;;  %v2004_v42 = vpop.permute.xlu0 %2003  ;;  %v9938_v46 = vpop.permute.xlu2 %918  ;;  %1800 = vst.msk [vmem:[#allocation3 + $0x320] sm:$0xf] %vm40_vm0, %v1736_v47  ;;  %v2745_v28 = vld [vmem:[#allocation2 + $0xc0] sm:$0xf]  ;;  %v8573_v31 = vld [vmem:[#allocation3 + $0x18] sm:$0xf0] }
 0x1e6   :  { %2171 = vst.msk [vmem:[#allocation3 + $0x1f4] sm:$0xf] %vm2145_vm3, %v2004_v42  ;;  %v2247_v7 = vld [vmem:[#allocation2 + $0xc0] sm:$0xf] }
 0x1e7   :  { %v1527_v6 = vadd.f32 %v9815_v27, %v1460_v18  ;;  %v9943_v49 = vpop.f32.mrf.mxu0  ;;  %3309 = vst.msk [vmem:[#allocation3 + $0xac] sm:$0xf] %vm40_vm0, %v3245_v16  ;;  %v8761_v16 = vld [vmem:[%s12016_s3 + $0xf8] sm:$0xff] }
 0x1e8   :  { %1262 = vrot.lane.b32.xlu1 %v9919_v50, %s8887_s11  ;;  %2809 = vst.msk [vmem:[#allocation3 + $0x1c0] sm:$0xf] %vm40_vm0, %v2745_v28  ;;  %v7608_v28 = vld [vmem:[#allocation3 + $0x1e0] sm:$0xf]  ;;  %5763 = vmatpush.bf16.msrb.mxu1 %v8761_v16 }
 0x1e9   :  { %v1591_v36 = vpack.c.bf16 %v1527_v6, %v1527_v6  ;;  %12036 = vst [vmem:[#allocation7_spill] sm:$0xff] %v9952_v14  ;;  %v1863_v16 = vld [vmem:[#allocation2 + $0xc0] sm:$0xf] }
 0x1ea   :  { %v1231_v58 = vpop.permute.xlu1 %1230  ;;  %2311 = vst.msk [vmem:[#allocation3 + $0x2d4] sm:$0xf] %vm40_vm0, %v2247_v7 }
 0x1eb   :  { %v3756_v47 = vld [vmem:[#allocation2 + $0xc4] sm:$0xf]  ;;  %1656 = vst.msk [vmem:[#allocation2 + $0xc8] sm:$0xf] %vm40_vm0, %v1591_v36  ;;  %v1397_v60 = vmax.f32 %v9545_v4, %v1231_v58  ;;  %1256 = vrot.lane.b32.xlu2 %v9826_v62, %s8887_s11  ;;  %936 = vrot.lane.b32.xlu0 %v9819_v10, %s8887_s11  ;;  %v7376_v36 = vld [vmem:[#allocation3 + $0x8] sm:$0xf] }
 0x1ec   :  { %3820 = vst.msk [vmem:[#allocation3 + $0x74] sm:$0xf] %vm40_vm0, %v3756_v47  ;;  %v1737_v18 = vld [vmem:[#allocation2 + $0xc4] sm:$0xf] }
 0x1ed   :  { %v1461_v9 = vmax.f32 %v1077_v29, %v1397_v60  ;;  %v1233_v19 = vpop.permute.xlu0 %1232  ;;  %v2014_v42 = vpop.permute.xlu2 %2013  ;;  %v8632_v6 = vld [vmem:[#allocation3 + $0x1f0] sm:$0xf0]  ;;  %1801 = vst.msk [vmem:[#allocation3 + $0x334] sm:$0xf] %vm40_vm0, %v1737_v18  ;;  %v3246_v58 = vld [vmem:[#allocation2 + $0xc4] sm:$0xf]  ;;  %v7377_v29 = vor.u32 %v8573_v31, %v7376_v36 }
 0x1ee   :  { %2176 = vst.msk [vmem:[#allocation3 + $0x258] sm:$0xf] %vm2145_vm3, %v2014_v42  ;;  %v7609_v4 = vor.u32 %v8632_v6, %v7608_v28  ;;  %v2746_v47 = vld [vmem:[#allocation2 + $0xc4] sm:$0xf]  ;;  %v1398_v6 = vmax.f32 %v9563_v40, %v1233_v19  ;;  %v9984_v31 = vpop.f32.mrf.mxu2 }
 0x1ef   :  { %v1528_v7 = vadd.f32 %v9815_v27, %v1461_v9  ;;  %v9970_v13 = vpop.f32.mrf.mxu0  ;;  %3310 = vst.msk [vmem:[#allocation3 + $0xc0] sm:$0xf] %vm40_vm0, %v3246_v58  ;;  %v9976_v9 = vpop.f32.mrf.mxu1 }
 0x1f0   :  { %5324 = vmatmul.bf16.gmra.mxu2 %v7609_v4  ;;  %944 = vrot.lane.b32.xlu1 %v9922_v22, %s8887_s11  ;;  %2810 = vst.msk [vmem:[#allocation3 + $0x1d4] sm:$0xf] %vm40_vm0, %v2746_v47 }
 0x1f1   :  { %v1592_v60 = vpack.c.bf16 %v1528_v7, %v1528_v7  ;;  %12037 = vst [vmem:[#allocation8_spill] sm:$0xff] %v9984_v31 }
 0x1f2   :  { %v3757_v18 = vld [vmem:[#allocation2 + $0xc8] sm:$0xf]  ;;  %v913_v42 = vpop.permute.xlu1 %912  ;;  %5602 = vmatmul.bf16.vlgmr.msrb.gmra.mxu0 %v7377_v29 }
 0x1f3   :  { %v1738_v28 = vld [vmem:[#allocation2 + $0xc8] sm:$0xf]  ;;  %3821 = vst.msk [vmem:[#allocation3 + $0x88] sm:$0xf] %vm40_vm0, %v3757_v18  ;;  %v1078_v4 = vmax.f32 %v9561_v24, %v913_v42  ;;  %2029 = vrot.lane.b32.xlu2 %v1863_v16, %s8887_s11  ;;  %1258 = vrot.lane.b32.xlu0 %v9855_v35, %s8887_s11  ;;  %v2248_v24 = vld [vmem:[#allocation2 + $0xc4] sm:$0xf] }
 0x1f4   :  { %1657 = vst.msk [vmem:[#allocation2 + $0xcc] sm:$0xf] %vm40_vm0, %v1592_v60  ;;  %v3247_v7 = vld [vmem:[#allocation2 + $0xc8] sm:$0xf] }
 0x1f5   :  { %v1462_v36 = vmax.f32 %v1078_v4, %v1398_v6  ;;  %v2008_v58 = vpop.permute.xlu0 %2007  ;;  %v9987_v47 = vpop.permute.xlu2 %922  ;;  %1802 = vst.msk [vmem:[#allocation3 + $0x348] sm:$0xf] %vm40_vm0, %v1738_v28  ;;  %v2747_v40 = vld [vmem:[#allocation2 + $0xc8] sm:$0xf]  ;;  %v1864_v28 = vld [vmem:[#allocation2 + $0xc4] sm:$0xf]  ;;  %v1079_v6 = vmax.f32 %v9581_v21, %v9893_v39 }
 0x1f6   :  { %2173 = vst.msk [vmem:[#allocation3 + $0x21c] sm:$0xf] %vm2145_vm3, %v2008_v58  ;;  %v2249_v18 = vld [vmem:[#allocation2 + $0xc8] sm:$0xf] }
 0x1f7   :  { %v1529_v19 = vadd.f32 %v9815_v27, %v1462_v36  ;;  %v9992_v29 = vpop.f32.mrf.mxu0  ;;  %3311 = vst.msk [vmem:[#allocation3 + $0xd4] sm:$0xf] %vm40_vm0, %v3247_v7  ;;  %v1865_v16 = vld [vmem:[#allocation2 + $0xc8] sm:$0xf]  ;;  %v8578_v36 = vld [vmem:[#allocation3 + $0x40] sm:$0xf0]  ;;  %v10007_v58 = vpop.f32.mrf.mxu1 }
 0x1f8   :  { %1266 = vrot.lane.b32.xlu1 %v9976_v9, %s8887_s11  ;;  %2811 = vst.msk [vmem:[#allocation3 + $0x1e8] sm:$0xf] %vm40_vm0, %v2747_v40  ;;  %v8765_v40 = vld [vmem:[%s12016_s3 + $0x118] sm:$0xff] }
 0x1f9   :  { %v1593_v60 = vpack.c.bf16 %v1529_v19, %v1529_v19  ;;  %2312 = vst.msk [vmem:[#allocation3 + $0x2e8] sm:$0xf] %vm40_vm0, %v2248_v24  ;;  %5936 = vmatpush.bf16.msrb.mxu2 %v8765_v40 }
 0x1fa   :  { %v1235_v42 = vpop.permute.xlu1 %1234  ;;  %2313 = vst.msk [vmem:[#allocation3 + $0x2fc] sm:$0xf] %vm40_vm0, %v2249_v18  ;;  %v7628_v18 = vld [vmem:[#allocation3 + $0x208] sm:$0xf] }
 0x1fb   :  { %v3758_v4 = vld [vmem:[#allocation2 + $0xcc] sm:$0xf]  ;;  %1658 = vst.msk [vmem:[#allocation2 + $0xd0] sm:$0xf] %vm40_vm0, %v1593_v60  ;;  %v1399_v7 = vmax.f32 %v9583_v20, %v1235_v42  ;;  %2033 = vrot.lane.b32.xlu2 %v1865_v16, %s8887_s11  ;;  %2031 = vrot.lane.b32.xlu0 %v1864_v28, %s8887_s11  ;;  %v10013_v20 = vpop.f32.mrf.mxu2  ;;  %v7396_v16 = vld [vmem:[#allocation3 + $0x30] sm:$0xf] }
 0x1fc   :  { %3822 = vst.msk [vmem:[#allocation3 + $0x9c] sm:$0xf] %vm40_vm0, %v3758_v4  ;;  %v1739_v24 = vld [vmem:[#allocation2 + $0xcc] sm:$0xf] }
 0x1fd   :  { %v1463_v21 = vmax.f32 %v1079_v6, %v1399_v7  ;;  %v1237_v39 = vpop.permute.xlu0 %1236  ;;  %v2018_v19 = vpop.permute.xlu2 %2017  ;;  %v8637_v60 = vld [vmem:[#allocation3 + $0x218] sm:$0xf0]  ;;  %1803 = vst.msk [vmem:[#allocation3 + $0x35c] sm:$0xf] %vm40_vm0, %v1739_v24  ;;  %v8760_v6 = vld [vmem:[%s12016_s3 + $0xf0] sm:$0xff]  ;;  %v7397_v24 = vor.u32 %v8578_v36, %v7396_v16 }
 0x1fe   :  { %12038 = vst [vmem:[#allocation9_spill] sm:$0xff] %v10013_v20  ;;  %v7629_v42 = vor.u32 %v8637_v60, %v7628_v18  ;;  %v3248_v7 = vld [vmem:[#allocation2 + $0xcc] sm:$0xf]  ;;  %5764 = vmatpush.bf16.msrb.mxu1 %v8760_v6  ;;  %v1400_v60 = vmax.f32 %v9603_v26, %v1237_v39  ;;  %v8758_v6 = vld [vmem:[%s12016_s3 + $0xe0] sm:$0xff] }
 0x1ff   :  { %2178 = vst.msk [vmem:[#allocation3 + $0x280] sm:$0xf] %vm2145_vm3, %v2018_v19  ;;  %v1530_v28 = vadd.f32 %v9815_v27, %v1463_v21  ;;  %v10017_v4 = vpop.f32.mrf.mxu0  ;;  %v2748_v31 = vld [vmem:[#allocation2 + $0xcc] sm:$0xf] }
 0x200   :  { %5329 = vmatmul.bf16.gmra.mxu2 %v7629_v42  ;;  %1268 = vrot.lane.b32.xlu1 %v10007_v58, %s8887_s11  ;;  %3312 = vst.msk [vmem:[#allocation3 + $0xe8] sm:$0xf] %vm40_vm0, %v3248_v7 }
 0x201   :  { %v1594_v19 = vpack.c.bf16 %v1530_v28, %v1530_v28  ;;  %2812 = vst.msk [vmem:[#allocation3 + $0x1fc] sm:$0xf] %vm40_vm0, %v2748_v31  ;;  %v8759_v31 = vld [vmem:[%s12016_s3 + $0xe8] sm:$0xff] }
 0x202   :  { %v3759_v40 = vld [vmem:[#allocation2 + $0xd0] sm:$0xf]  ;;  %v917_v21 = vpop.permute.xlu1 %916  ;;  %5607 = vmatmul.bf16.gmra.mxu0 %v7397_v24  ;;  %5765 = vmatpush.bf16.msrb.mxu1 %v8759_v31 }
 0x203   :  { %v1740_v18 = vld [vmem:[#allocation2 + $0xd0] sm:$0xf]  ;;  %3823 = vst.msk [vmem:[#allocation3 + $0xb0] sm:$0xf] %vm40_vm0, %v3759_v40  ;;  %v1080_v42 = vmax.f32 %v9601_v17, %v917_v21  ;;  %1260 = vrot.lane.b32.xlu0 %v9891_v34, %s8887_s11  ;;  %942 = vrot.lane.b32.xlu2 %v9900_v8, %s8887_s11  ;;  %v10046_v24 = vpop.f32.mrf.mxu2 }
 0x204   :  { %1659 = vst.msk [vmem:[#allocation2 + $0xd4] sm:$0xf] %vm40_vm0, %v1594_v19  ;;  %v3249_v26 = vld [vmem:[#allocation2 + $0xd0] sm:$0xf]  ;;  %v1729_v19 = vld [vmem:[#allocation2 + $0xa4] sm:$0xf] }
 0x205   :  { %v1464_v36 = vmax.f32 %v1080_v42, %v1400_v60  ;;  %v2012_v16 = vpop.permute.xlu0 %2011  ;;  %v3495_v28 = vpop.permute.xlu2 %3494  ;;  %1804 = vst.msk [vmem:[#allocation3 + $0x370] sm:$0xf] %vm40_vm0, %v1740_v18  ;;  %v2749_v7 = vld [vmem:[#allocation2 + $0xd0] sm:$0xf]  ;;  %v1866_v18 = vld [vmem:[#allocation2 + $0xcc] sm:$0xf]  ;;  %v1081_v42 = vmax.f32 %v9623_v63, %v9938_v46 }
 0x206   :  { %2175 = vst.msk [vmem:[#allocation3 + $0x244] sm:$0xf] %vm2145_vm3, %v2012_v16  ;;  %5766 = vmatpush.bf16.msrb.mxu1 %v8758_v6  ;;  %v1867_v60 = vld [vmem:[#allocation2 + $0xd0] sm:$0xf] }
 0x207   :  { %v1531_v17 = vadd.f32 %v9815_v27, %v1464_v36  ;;  %3686 = vst.msk [vmem:[#allocation3 + $0xc] sm:$0xf] %vm2145_vm3, %v3495_v28  ;;  %v10041_v39 = vpop.f32.mrf.mxu0  ;;  %v7648_v16 = vld [vmem:[#allocation3 + $0x230] sm:$0xf]  ;;  %v8757_v28 = vld [vmem:[%s12016_s3 + $0xd8] sm:$0xff] }
 0x208   :  { %12039 = vst [vmem:[#allocation10_spill] sm:$0xff] %v10046_v24  ;;  %954 = vrot.lane.b32.xlu1 %v10041_v39, %s8887_s11 }
 0x209   :  { %3313 = vst.msk [vmem:[#allocation3 + $0xfc] sm:$0xf] %vm40_vm0, %v3249_v26  ;;  %v1595_v40 = vpack.c.bf16 %v1531_v17, %v1531_v17 }
 0x20a   :  { %1793 = vst.msk [vmem:[#allocation3 + $0x294] sm:$0xf] %vm40_vm0, %v1729_v19  ;;  %v1239_v21 = vpop.permute.xlu1 %1238  ;;  %5767 = vmatpush.bf16.msrb.mxu1 %v8757_v28 }
 0x20b   :  { %2813 = vst.msk [vmem:[#allocation3 + $0x210] sm:$0xf] %vm40_vm0, %v2749_v7  ;;  %v3760_v31 = vld [vmem:[#allocation2 + $0xd4] sm:$0xf]  ;;  %v1401_v36 = vmax.f32 %v9625_v32, %v1239_v21  ;;  %2035 = vrot.lane.b32.xlu0 %v1866_v18, %s8887_s11  ;;  %2037 = vrot.lane.b32.xlu2 %v1867_v60, %s8887_s11  ;;  %v2250_v32 = vld [vmem:[#allocation2 + $0xcc] sm:$0xf] }
 0x20c   :  { %1660 = vst.msk [vmem:[#allocation2 + $0xd8] sm:$0xf] %vm40_vm0, %v1595_v40  ;;  %v1741_v26 = vld [vmem:[#allocation2 + $0xd4] sm:$0xf]  ;;  %v3238_v18 = vld [vmem:[#allocation2 + $0xa4] sm:$0xf] }
 0x20d   :  { %3824 = vst.msk [vmem:[#allocation3 + $0xc4] sm:$0xf] %vm40_vm0, %v3760_v31  ;;  %v1465_v17 = vmax.f32 %v1081_v42, %v1401_v36  ;;  %v1241_v6 = vpop.permute.xlu0 %1240  ;;  %v10063_v63 = vpop.permute.xlu2 %926  ;;  %v8642_v46 = vld [vmem:[#allocation3 + $0x240] sm:$0xf0]  ;;  %v3250_v19 = vld [vmem:[#allocation2 + $0xd4] sm:$0xf] }
 0x20e   :  { %1805 = vst.msk [vmem:[#allocation3 + $0x384] sm:$0xf] %vm40_vm0, %v1741_v26  ;;  %v7649_v7 = vor.u32 %v8642_v46, %v7648_v16  ;;  %v8756_v21 = vld [vmem:[%s12016_s3 + $0xd0] sm:$0xff]  ;;  %v10073_v42 = vpop.f32.mrf.mxu2  ;;  %v1402_v28 = vmax.f32 %v9647_v2, %v1241_v6 }
 0x20f   :  { %v1532_v40 = vadd.f32 %v9815_v27, %v1465_v17  ;;  %3314 = vst.msk [vmem:[#allocation3 + $0x110] sm:$0xf] %vm40_vm0, %v3250_v19  ;;  %5768 = vmatpush.bf16.msrb.mxu1 %v8756_v21  ;;  %v8755_v17 = vld [vmem:[%s12016_s3 + $0xc8] sm:$0xff]  ;;  %v2750_v6 = vld [vmem:[#allocation2 + $0xd4] sm:$0xf] }
 0x210   :  { %5334 = vmatmul.bf16.gmra.mxu2 %v7649_v7  ;;  %2314 = vst.msk [vmem:[#allocation3 + $0x310] sm:$0xf] %vm40_vm0, %v2250_v32 }
 0x211   :  { %v1596_v60 = vpack.c.bf16 %v1532_v40, %v1532_v40  ;;  %3302 = vst.msk [vmem:[#allocation3 + $0x20] sm:$0xf] %vm40_vm0, %v3238_v18 }
 0x212   :  { %12040 = vst [vmem:[#allocation11_spill] sm:$0xff] %v10073_v42  ;;  %v921_v36 = vpop.permute.xlu1 %920 }
 0x213   :  { %v3761_v31 = vld [vmem:[#allocation2 + $0xd8] sm:$0xf]  ;;  %v1082_v26 = vmax.f32 %v9645_v57, %v921_v36  ;;  %1264 = vrot.lane.b32.xlu0 %v9948_v59, %s8887_s11  ;;  %946 = vrot.lane.b32.xlu2 %v9943_v49, %s8887_s11  ;;  %1661 = vst.msk [vmem:[#allocation2 + $0xdc] sm:$0xf] %vm40_vm0, %v1596_v60  ;;  %v8754_v57 = vld [vmem:[%s12016_s3 + $0xc0] sm:$0xff] }
 0x214   :  { %v1742_v16 = vld [vmem:[#allocation2 + $0xd8] sm:$0xf]  ;;  %3825 = vst.msk [vmem:[#allocation3 + $0xd8] sm:$0xf] %vm40_vm0, %v3761_v31  ;;  %5769 = vmatpush.bf16.msrb.mxu1 %v8755_v17  ;;  %v1868_v60 = vld [vmem:[#allocation2 + $0xd4] sm:$0xf]  ;;  %v1083_v31 = vmax.f32 %v9663_v56, %v9987_v47 }
 0x215   :  { %v1466_v46 = vmax.f32 %v1082_v26, %v1402_v28  ;;  %v2016_v32 = vpop.permute.xlu0 %2015  ;;  %v2022_v7 = vpop.permute.xlu2 %2021  ;;  %1806 = vst.msk [vmem:[#allocation3 + $0x398] sm:$0xf] %vm40_vm0, %v1742_v16  ;;  %v3251_v2 = vld [vmem:[#allocation2 + $0xd8] sm:$0xf] }
 0x216   :  { %2177 = vst.msk [vmem:[#allocation3 + $0x26c] sm:$0xf] %vm2145_vm3, %v2016_v32  ;;  %v2751_v40 = vld [vmem:[#allocation2 + $0xd8] sm:$0xf]  ;;  %v10103_v28 = vpop.f32.mrf.mxu2 }
 0x217   :  { %v1533_v19 = vadd.f32 %v9815_v27, %v1466_v46  ;;  %2180 = vst.msk [vmem:[#allocation3 + $0x2a8] sm:$0xf] %vm2145_vm3, %v2022_v7  ;;  %v7668_v7 = vld [vmem:[#allocation3 + $0x258] sm:$0xf] }
 0x218   :  { %3315 = vst.msk [vmem:[#allocation3 + $0x124] sm:$0xf] %vm40_vm0, %v3251_v2  ;;  %5770 = vmatpush.bf16.msrb.mxu1 %v8754_v57  ;;  %v2251_v2 = vld [vmem:[#allocation2 + $0xd0] sm:$0xf] }
 0x219   :  { %v1597_v21 = vpack.c.bf16 %v1533_v19, %v1533_v19  ;;  %2814 = vst.msk [vmem:[#allocation3 + $0x224] sm:$0xf] %vm40_vm0, %v2750_v6 }
 0x21a   :  { %v1243_v18 = vpop.permute.xlu1 %1242  ;;  %2815 = vst.msk [vmem:[#allocation3 + $0x238] sm:$0xf] %vm40_vm0, %v2751_v40  ;;  %v3762_v36 = vld [vmem:[#allocation2 + $0xdc] sm:$0xf] }
 0x21b   :  { %1662 = vst.msk [vmem:[#allocation2 + $0xe0] sm:$0xf] %vm40_vm0, %v1597_v21  ;;  %v1403_v16 = vmax.f32 %v9665_v55, %v1243_v18  ;;  %2039 = vrot.lane.b32.xlu0 %v1868_v60, %s8887_s11  ;;  %948 = vrot.lane.b32.xlu2 %v9970_v13, %s8887_s11  ;;  %v1743_v26 = vld [vmem:[#allocation2 + $0xdc] sm:$0xf]  ;;  %v1869_v18 = vld [vmem:[#allocation2 + $0xd8] sm:$0xf] }
 0x21c   :  { %12041 = vst [vmem:[#allocation12_spill] sm:$0xff] %v10103_v28  ;;  %v3252_v47 = vld [vmem:[#allocation2 + $0xdc] sm:$0xf] }
 0x21d   :  { %3826 = vst.msk [vmem:[#allocation3 + $0xec] sm:$0xf] %vm40_vm0, %v3762_v36  ;;  %v1467_v17 = vmax.f32 %v1083_v31, %v1403_v16  ;;  %v1245_v46 = vpop.permute.xlu0 %1244  ;;  %v3499_v32 = vpop.permute.xlu2 %3498  ;;  %v8647_v56 = vld [vmem:[#allocation3 + $0x268] sm:$0xf0]  ;;  %v2752_v6 = vld [vmem:[#allocation2 + $0xdc] sm:$0xf] }
 0x21e   :  { %1807 = vst.msk [vmem:[#allocation3 + $0x3ac] sm:$0xf] %vm40_vm0, %v1743_v26  ;;  %v7669_v55 = vor.u32 %v8647_v56, %v7668_v7  ;;  %v1404_v60 = vmax.f32 %v9685_v52, %v1245_v46  ;;  %v2252_v16 = vld [vmem:[#allocation2 + $0xd4] sm:$0xf]  ;;  %v2253_v7 = vld [vmem:[#allocation2 + $0xd8] sm:$0xf]  ;;  %v10122_v56 = vpop.f32.mrf.mxu2 }
 0x21f   :  { %3688 = vst.msk [vmem:[#allocation3 + $0x34] sm:$0xf] %vm2145_vm3, %v3499_v32  ;;  %v1534_v57 = vadd.f32 %v9815_v27, %v1467_v17 }
 0x220   :  { %3316 = vst.msk [vmem:[#allocation3 + $0x138] sm:$0xf] %vm40_vm0, %v3252_v47  ;;  %5339 = vmatmul.bf16.gmra.mxu2 %v7669_v55  ;;  %v2254_v55 = vld [vmem:[#allocation2 + $0xdc] sm:$0xf] }
 0x221   :  { %2816 = vst.msk [vmem:[#allocation3 + $0x24c] sm:$0xf] %vm40_vm0, %v2752_v6  ;;  %v1598_v19 = vpack.c.bf16 %v1534_v57, %v1534_v57  ;;  %v1870_v57 = vld [vmem:[#allocation2 + $0xdc] sm:$0xf]  ;;  %v1085_v6 = vmax.f32 %v9703_v48, %v10063_v63  ;;  %v7688_v48 = vld [vmem:[#allocation3 + $0x280] sm:$0xf] }
 0x222   :  { %2315 = vst.msk [vmem:[#allocation3 + $0x324] sm:$0xf] %vm40_vm0, %v2251_v2  ;;  %v3763_v40 = vld [vmem:[#allocation2 + $0xe0] sm:$0xf]  ;;  %v925_v21 = vpop.permute.xlu1 %924 }
 0x223   :  { %3827 = vst.msk [vmem:[#allocation3 + $0x100] sm:$0xf] %vm40_vm0, %v3763_v40  ;;  %v1084_v31 = vmax.f32 %v9683_v33, %v925_v21  ;;  %2041 = vrot.lane.b32.xlu2 %v1869_v18, %s8887_s11  ;;  %950 = vrot.lane.b32.xlu0 %v9992_v29, %s8887_s11  ;;  %v2753_v36 = vld [vmem:[#allocation2 + $0xe0] sm:$0xf]  ;;  %v10125_v33 = vpop.f32.mrf.mxu1 }
 0x224   :  { %1663 = vst.msk [vmem:[#allocation2 + $0xe4] sm:$0xf] %vm40_vm0, %v1598_v19  ;;  %v2255_v52 = vld [vmem:[#allocation2 + $0xe0] sm:$0xf] }
 0x225   :  { %v1468_v26 = vmax.f32 %v1084_v31, %v1404_v60  ;;  %v2020_v17 = vpop.permute.xlu0 %2019  ;;  %v10119_v32 = vpop.permute.xlu2 %930  ;;  %2817 = vst.msk [vmem:[#allocation3 + $0x260] sm:$0xf] %vm40_vm0, %v2753_v36 }
 0x226   :  { %12042 = vst [vmem:[#allocation13_spill] sm:$0xff] %v10122_v56 }
 0x227   :  { %2179 = vst.msk [vmem:[#allocation3 + $0x294] sm:$0xf] %vm2145_vm3, %v2020_v17  ;;  %v1535_v46 = vadd.f32 %v9815_v27, %v1468_v26 }
 0x228   :  { %2316 = vst.msk [vmem:[#allocation3 + $0x338] sm:$0xf] %vm40_vm0, %v2252_v16  ;;  %v10143_v16 = vpop.f32.mrf.mxu2 }
 0x229   :  { %2317 = vst.msk [vmem:[#allocation3 + $0x34c] sm:$0xf] %vm40_vm0, %v2253_v7  ;;  %v1599_v47 = vpack.c.bf16 %v1535_v46, %v1535_v46 }
 0x22a   :  { %2319 = vst.msk [vmem:[#allocation3 + $0x374] sm:$0xf] %vm40_vm0, %v2255_v52  ;;  %v1247_v2 = vpop.permute.xlu1 %1246 }
 0x22b   :  { %2318 = vst.msk [vmem:[#allocation3 + $0x360] sm:$0xf] %vm40_vm0, %v2254_v55  ;;  %v3764_v19 = vld [vmem:[#allocation2 + $0xe4] sm:$0xf]  ;;  %v1405_v40 = vmax.f32 %v9705_v37, %v1247_v2  ;;  %1270 = vrot.lane.b32.xlu2 %v10125_v33, %s8887_s11  ;;  %2043 = vrot.lane.b32.xlu0 %v1870_v57, %s8887_s11  ;;  %v10148_v17 = vpop.f32.mrf.mxu1 }
 0x22c   :  { %1664 = vst.msk [vmem:[#allocation2 + $0xf8] sm:$0xf] %vm40_vm0, %v1599_v47  ;;  %v1872_v21 = vld [vmem:[#allocation2 + $0xe4] sm:$0xf]  ;;  %v2857_v47 = vld [vmem:[#allocation2 + $0x74] sm:$0xf] }
 0x22d   :  { %3828 = vst.msk [vmem:[#allocation3 + $0x114] sm:$0xf] %vm40_vm0, %v3764_v19  ;;  %2047 = vrot.lane.b32.xlu1 %v1872_v21, %s8887_s11  ;;  %v1469_v18 = vmax.f32 %v1085_v6, %v1405_v40  ;;  %v3497_v60 = vpop.permute.xlu0 %3496  ;;  %v10141_v31 = vpop.permute.xlu2 %932  ;;  %v2754_v36 = vld [vmem:[#allocation2 + $0xe4] sm:$0xf]  ;;  %v8571_v40 = vld [vmem:[#allocation3 + $0xc] sm:$0xf] }
 0x22e   :  { %v8652_v63 = vld [vmem:[#allocation3 + $0x290] sm:$0xf0]  ;;  %12043 = vst [vmem:[#allocation14_spill] sm:$0xff] %v10143_v16  ;;  %v2256_v7 = vld [vmem:[#allocation2 + $0xe4] sm:$0xf] }
 0x22f   :  { %3687 = vst.msk [vmem:[#allocation3 + $0x20] sm:$0xf] %vm2145_vm3, %v3497_v60  ;;  %v7689_v37 = vor.u32 %v8652_v63, %v7688_v48  ;;  %v1536_v26 = vadd.f32 %v9815_v27, %v1469_v18 }
 0x230   :  { %2818 = vst.msk [vmem:[#allocation3 + $0x274] sm:$0xf] %vm40_vm0, %v2754_v36  ;;  %v10163_v63 = vpop.f32.mrf.mxu2 }
 0x231   :  { %5344 = vmatmul.bf16.gmra.mxu2 %v7689_v37  ;;  %v1600_v52 = vpack.c.bf16 %v1536_v26, %v1536_v26  ;;  %2320 = vst.msk [vmem:[#allocation3 + $0x388] sm:$0xf] %vm40_vm0, %v2256_v7  ;;  %v3370_v7 = vld [vmem:[#allocation2 + $0xb8] sm:$0xf] }
 0x232   :  { %v929_v46 = vpop.permute.xlu1 %928  ;;  %12044 = vst [vmem:[#allocation15_spill] sm:$0xff] %v10163_v63 }
 0x233   :  { %v1746_v55 = vld [vmem:[#allocation2 + $0xf8] sm:$0xf]  ;;  %1665 = vst.msk [vmem:[#allocation2 + $0xfc] sm:$0xf] %vm40_vm0, %v1600_v52  ;;  %1272 = vrot.lane.b32.xlu2 %v10148_v17, %s8887_s11  ;;  %952 = vrot.lane.b32.xlu0 %v10017_v4, %s8887_s11  ;;  %v1086_v18 = vmax.f32 %v9725_v38, %v929_v46  ;;  %v1871_v52 = vld [vmem:[#allocation2 + $0xe0] sm:$0xf]  ;;  %v1087_v38 = vmax.f32 %v9743_v1, %v10119_v32 }
 0x234   :  { %v3255_v2 = vld [vmem:[#allocation2 + $0xf8] sm:$0xf]  ;;  %1810 = vst.msk [vmem:[#allocation3 + $0x3e8] sm:$0xf] %vm40_vm0, %v1746_v55 }
 0x235   :  { %2990 = vrot.lane.b32.xlu1 %v2857_v47, %s8887_s11  ;;  %v2755_v57 = vld [vmem:[#allocation2 + $0xf8] sm:$0xf]  ;;  %v1249_v6 = vpop.permute.xlu0 %1248  ;;  %v2026_v19 = vpop.permute.xlu2 %2025  ;;  %3319 = vst.msk [vmem:[#allocation3 + $0x174] sm:$0xf] %vm40_vm0, %v3255_v2 }
 0x236   :  { %v7378_v21 = vld [vmem:[#allocation3 + $0x1c] sm:$0xf0]  ;;  %v1406_v60 = vmax.f32 %v9727_v25, %v1249_v6  ;;  %2182 = vst.msk [vmem:[#allocation3 + $0x2d0] sm:$0xf] %vm2145_vm3, %v2026_v19  ;;  %v1873_v46 = vld [vmem:[#allocation2 + $0xf8] sm:$0xf] }
 0x237   :  { %v7381_v48 = vor.u32 %v8571_v40, %v7378_v21  ;;  %2819 = vst.msk [vmem:[#allocation3 + $0x288] sm:$0xf] %vm40_vm0, %v2755_v57  ;;  %v10180_v21 = vpop.f32.mrf.mxu1 }
 0x238   :  { %v1470_v36 = vmax.f32 %v1086_v18, %v1406_v60 }
 0x239   :  { %5771 = vmatmul.bf16.vlgmr.msrb.gmra.mxu1 %v7381_v48  ;;  %v1088_v48 = vmax.f32 %v9767_v11, %v10141_v31  ;;  %v7708_v11 = vld [vmem:[#allocation3 + $0x2a8] sm:$0xf] }
 0x23a   :  { %v1537_v37 = vadd.f32 %v9815_v27, %v1470_v36  ;;  %v1251_v26 = vpop.permute.xlu1 %1250  ;;  %v1747_v55 = vld [vmem:[#allocation2 + $0xfc] sm:$0xf] }
 0x23b   :  { %v1407_v25 = vmax.f32 %v9745_v43, %v1251_v26  ;;  %3502 = vrot.lane.b32.xlu2 %v3370_v7, %s8887_s11  ;;  %2045 = vrot.lane.b32.xlu0 %v1871_v52, %s8887_s11  ;;  %1811 = vst.msk [vmem:[#allocation3 + $0x3fc] sm:$0xf] %vm40_vm0, %v1747_v55  ;;  %v3256_v47 = vld [vmem:[#allocation2 + $0xfc] sm:$0xf]  ;;  %v10178_v43 = vpop.f32.mrf.mxu2 }
 0x23c   :  { %v1601_v2 = vpack.c.bf16 %v1537_v37, %v1537_v37  ;;  %3320 = vst.msk [vmem:[#allocation3 + $0x188] sm:$0xf] %vm40_vm0, %v3256_v47  ;;  %v2756_v57 = vld [vmem:[#allocation2 + $0xfc] sm:$0xf]  ;;  %v2345_v37 = vld [vmem:[#allocation2 + $0x68] sm:$0xf] }
 0x23d   :  { %2049 = vrot.lane.b32.xlu1 %v1873_v46, %s8887_s11  ;;  %v1471_v6 = vmax.f32 %v1087_v38, %v1407_v25  ;;  %v2024_v19 = vpop.permute.xlu0 %2023  ;;  %v1255_v40 = vpop.permute.xlu2 %1254  ;;  %2820 = vst.msk [vmem:[#allocation3 + $0x29c] sm:$0xf] %vm40_vm0, %v2756_v57  ;;  %v1874_v60 = vld [vmem:[#allocation2 + $0xfc] sm:$0xf] }
 0x23e   :  { %1666 = vst.msk [vmem:[#allocation2 + $0x100] sm:$0xf] %vm40_vm0, %v1601_v2  ;;  %v3371_v2 = vld [vmem:[#allocation2 + $0xbc] sm:$0xf] }
 0x23f   :  { %v1538_v1 = vadd.f32 %v9815_v27, %v1471_v6  ;;  %2181 = vst.msk [vmem:[#allocation3 + $0x2bc] sm:$0xf] %vm2145_vm3, %v2024_v19 }
 0x240   :  { %12045 = vst [vmem:[#allocation16_spill] sm:$0xff] %v10178_v43 }
 0x241   :  { %v1602_v32 = vpack.c.bf16 %v1538_v1, %v1538_v1 }
 0x242   :  { %v1253_v18 = vpop.permute.xlu1 %1252 }
 0x243   :  { %1667 = vst.msk [vmem:[#allocation2 + $0x104] sm:$0xf] %vm40_vm0, %v1602_v32  ;;  %v1408_v36 = vmax.f32 %v9769_v41, %v1253_v18  ;;  %2051 = vrot.lane.b32.xlu2 %v1874_v60, %s8887_s11  ;;  %1274 = vrot.lane.b32.xlu0 %v10180_v21, %s8887_s11  ;;  %v10197_v6 = vpop.f32.mrf.mxu2 }
 0x244   :  { %12046 = vst [vmem:[#allocation17_spill] sm:$0xff] %v10197_v6  ;;  %v2373_v6 = vld [vmem:[#allocation2 + $0xf8] sm:$0xf] }
 0x245   :  { %2479 = vrot.lane.b32.xlu1 %v2345_v37, %s8887_s11  ;;  %v3767_v26 = vld [vmem:[#allocation2 + $0x100] sm:$0xf]  ;;  %v1472_v7 = vmax.f32 %v1088_v48, %v1408_v36  ;;  %v3501_v52 = vpop.permute.xlu0 %3500  ;;  %v10190_v55 = vpop.permute.xlu2 %1256  ;;  %v8576_v48 = vld [vmem:[#allocation3 + $0x34] sm:$0xf]  ;;  %v1409_v37 = vmax.f32 %v9790_v0, %v1255_v40 }
 0x246   :  { %v1748_v38 = vld [vmem:[#allocation2 + $0x100] sm:$0xf]  ;;  %3831 = vst.msk [vmem:[#allocation3 + $0x150] sm:$0xf] %vm40_vm0, %v3767_v26  ;;  %v8657_v31 = vld [vmem:[#allocation3 + $0x2b8] sm:$0xf0] }
 0x247   :  { %v1539_v41 = vadd.f32 %v9815_v27, %v1472_v7  ;;  %3689 = vst.msk [vmem:[#allocation3 + $0x48] sm:$0xf] %vm2145_vm3, %v3501_v52  ;;  %v7709_v25 = vor.u32 %v8657_v31, %v7708_v11  ;;  %v3257_v46 = vld [vmem:[#allocation2 + $0x100] sm:$0xf] }
 0x248   :  { %1812 = vst.msk [vmem:[#allocation3 + $0x410] sm:$0xf] %vm40_vm0, %v1748_v38  ;;  %v1875_v1 = vld [vmem:[#allocation2 + $0x100] sm:$0xf] }
 0x249   :  { %v1603_v47 = vpack.c.bf16 %v1539_v41, %v1539_v41  ;;  %5349 = vmatmul.bf16.gmra.mxu2 %v7709_v25  ;;  %3321 = vst.msk [vmem:[#allocation3 + $0x19c] sm:$0xf] %vm40_vm0, %v3257_v46  ;;  %v2757_v36 = vld [vmem:[#allocation2 + $0x100] sm:$0xf] }
 0x24a   :  { %v3768_v57 = vld [vmem:[#allocation2 + $0x104] sm:$0xf]  ;;  %v10199_v19 = vpop.permute.xlu1 %938  ;;  %v2259_v11 = vld [vmem:[#allocation2 + $0x100] sm:$0xf]  ;;  %2821 = vst.msk [vmem:[#allocation3 + $0x2b0] sm:$0xf] %vm40_vm0, %v2757_v36 }
 0x24b   :  { %v1749_v32 = vld [vmem:[#allocation2 + $0x104] sm:$0xf]  ;;  %3832 = vst.msk [vmem:[#allocation3 + $0x164] sm:$0xf] %vm40_vm0, %v3768_v57  ;;  %2053 = vrot.lane.b32.xlu2 %v1875_v1, %s8887_s11  ;;  %3504 = vrot.lane.b32.xlu0 %v3371_v2, %s8887_s11  ;;  %v10212_v41 = vpop.f32.mrf.mxu2  ;;  %v10217_v0 = vld [vmem:[%s12017_s2] ss:$0 sm:$0xff] }
 0x24c   :  { %1668 = vst.msk [vmem:[#allocation2 + $0x108] sm:$0xf] %vm40_vm0, %v1603_v47  ;;  %v3258_v27 = vld [vmem:[#allocation2 + $0x104] sm:$0xf] }
 0x24d   :  { %v2030_v18 = vpop.permute.xlu2 %2029  ;;  %v935_v60 = vpop.permute.xlu0 %934  ;;  %1813 = vst.msk [vmem:[#allocation3 + $0x424] sm:$0xf] %vm40_vm0, %v1749_v32  ;;  %v2758_v52 = vld [vmem:[#allocation2 + $0x104] sm:$0xf] }
 0x24e   :  { %2184 = vst.msk [vmem:[#allocation3 + $0x2f8] sm:$0xf] %vm2145_vm3, %v2030_v18  ;;  %v1089_v26 = vmax.f32 %v9788_v51, %v935_v60  ;;  %v7398_v7 = vld [vmem:[#allocation3 + $0x44] sm:$0xf0]  ;;  %v1876_v25 = vld [vmem:[#allocation2 + $0x104] sm:$0xf] }
 0x24f   :  { %v7401_v38 = vor.u32 %v8576_v48, %v7398_v7  ;;  %3322 = vst.msk [vmem:[#allocation3 + $0x1b0] sm:$0xf] %vm40_vm0, %v3258_v27  ;;  %v2260_v60 = vld [vmem:[#allocation2 + $0x104] sm:$0xf] }
 0x250   :  { %v1473_v31 = vmax.f32 %v1089_v26, %v1409_v37  ;;  %2822 = vst.msk [vmem:[#allocation3 + $0x2c4] sm:$0xf] %vm40_vm0, %v2758_v52  ;;  %v1410_v26 = vmax.f32 %v9826_v62, %v10190_v55 }
 0x251   :  { %5776 = vmatmul.bf16.gmra.mxu1 %v7401_v38  ;;  %12047 = vst [vmem:[#allocation18_spill] sm:$0xff] %v10212_v41 }
 0x252   :  { %v1540_v51 = vadd.f32 %v10217_v0, %v1473_v31  ;;  %v10220_v40 = vpop.permute.xlu1 %940  ;;  %2323 = vst.msk [vmem:[#allocation3 + $0x3c4] sm:$0xf] %vm40_vm0, %v2259_v11 }
 0x253   :  { %v3769_v46 = vld [vmem:[#allocation2 + $0x108] sm:$0xf]  ;;  %2055 = vrot.lane.b32.xlu0 %v1876_v25, %s8887_s11  ;;  %v10233_v37 = vpop.f32.mrf.mxu2  ;;  %2324 = vst.msk [vmem:[#allocation3 + $0x3d8] sm:$0xf] %vm40_vm0, %v2260_v60 }
 0x254   :  { %v1750_v47 = vld [vmem:[#allocation2 + $0x108] sm:$0xf]  ;;  %3833 = vst.msk [vmem:[#allocation3 + $0x178] sm:$0xf] %vm40_vm0, %v3769_v46  ;;  %v1604_v2 = vpack.c.bf16 %v1540_v51, %v1540_v51 }
 0x255   :  { %v2034_v57 = vpop.permute.xlu2 %2033  ;;  %v2028_v1 = vpop.permute.xlu0 %2027  ;;  %1814 = vst.msk [vmem:[#allocation3 + $0x438] sm:$0xf] %vm40_vm0, %v1750_v47  ;;  %v3259_v32 = vld [vmem:[#allocation2 + $0x108] sm:$0xf]  ;;  %v7728_v47 = vld [vmem:[#allocation3 + $0x2d0] sm:$0xf] }
 0x256   :  { %1669 = vst.msk [vmem:[#allocation2 + $0x10c] sm:$0xf] %vm40_vm0, %v1604_v2  ;;  %v2759_v27 = vld [vmem:[#allocation2 + $0x108] sm:$0xf] }
 0x257   :  { %2186 = vst.msk [vmem:[#allocation3 + $0x320] sm:$0xf] %vm2145_vm3, %v2034_v57  ;;  %v2261_v18 = vld [vmem:[#allocation2 + $0x108] sm:$0xf] }
 0x258   :  { %2183 = vst.msk [vmem:[#allocation3 + $0x2e4] sm:$0xf] %vm2145_vm3, %v2028_v1  ;;  %v1877_v36 = vld [vmem:[#allocation2 + $0x108] sm:$0xf] }
 0x259   :  { %3323 = vst.msk [vmem:[#allocation3 + $0x1c4] sm:$0xf] %vm40_vm0, %v3259_v32  ;;  %v2886_v28 = vld [vmem:[#allocation2 + $0x108] sm:$0xf] }
 0x25a   :  { %v1263_v48 = vpop.permute.xlu1 %1262  ;;  %2823 = vst.msk [vmem:[#allocation3 + $0x2d8] sm:$0xf] %vm40_vm0, %v2759_v27 }
 0x25b   :  { %2057 = vrot.lane.b32.xlu0 %v1877_v36, %s8887_s11  ;;  %2325 = vst.msk [vmem:[#allocation3 + $0x3ec] sm:$0xf] %vm40_vm0, %v2261_v18  ;;  %v1413_v51 = vmax.f32 %v9919_v50, %v1263_v48 }
 0x25c   :  { %12048 = vst [vmem:[#allocation19_spill] sm:$0xff] %v10233_v37 }
 0x25d   :  { %v3770_v7 = vld [vmem:[#allocation2 + $0x10c] sm:$0xf]  ;;  %v937_v52 = vpop.permute.xlu0 %936  ;;  %v943_v38 = vpop.permute.xlu2 %942 }
 0x25e   :  { %v1878_v11 = vld [vmem:[#allocation2 + $0x10c] sm:$0xf]  ;;  %3834 = vst.msk [vmem:[#allocation3 + $0x18c] sm:$0xf] %vm40_vm0, %v3770_v7  ;;  %v1090_v25 = vmax.f32 %v9819_v10, %v937_v52  ;;  %v1093_v46 = vmax.f32 %v9900_v8, %v943_v38  ;;  %v1091_v7 = vmax.f32 %v9848_v45, %v10199_v19 }
 0x25f   :  { %v1751_v31 = vld [vmem:[#allocation2 + $0x10c] sm:$0xf]  ;;  %2059 = vrot.lane.b32.xlu1 %v1878_v11, %s8887_s11  ;;  %v8662_v2 = vld [vmem:[#allocation3 + $0x2e0] sm:$0xf0]  ;;  %v8764_v11 = vld [vmem:[%s12016_s3 + $0x110] sm:$0xff] }
 0x260   :  { %1815 = vst.msk [vmem:[#allocation3 + $0x44c] sm:$0xf] %vm40_vm0, %v1751_v31  ;;  %v3260_v62 = vld [vmem:[#allocation2 + $0x10c] sm:$0xf]  ;;  %v1474_v55 = vmax.f32 %v1090_v25, %v1410_v26  ;;  %v1477_v57 = vmax.f32 %v1093_v46, %v1413_v51  ;;  %v7729_v1 = vor.u32 %v8662_v2, %v7728_v47  ;;  %5937 = vmatpush.bf16.msrb.mxu2 %v8764_v11  ;;  %v2858_v11 = vld [vmem:[#allocation2 + $0x78] sm:$0xf] }
 0x261   :  { %3324 = vst.msk [vmem:[#allocation3 + $0x1d8] sm:$0xf] %vm40_vm0, %v3260_v62  ;;  %v2760_v32 = vld [vmem:[#allocation2 + $0x10c] sm:$0xf] }
 0x262   :  { %v1541_v27 = vadd.f32 %v10217_v0, %v1474_v55  ;;  %v1544_v50 = vadd.f32 %v10217_v0, %v1477_v57  ;;  %5354 = vmatmul.bf16.gmra.mxu2 %v7729_v1  ;;  %v10247_v10 = vpop.permute.xlu1 %944  ;;  %2824 = vst.msk [vmem:[#allocation3 + $0x2ec] sm:$0xf] %vm40_vm0, %v2760_v32  ;;  %v2262_v8 = vld [vmem:[#allocation2 + $0x10c] sm:$0xf] }
 0x263   :  { %v10250_v48 = vpop.f32.mrf.mxu2  ;;  %2326 = vst.msk [vmem:[#allocation3 + $0x400] sm:$0xf] %vm40_vm0, %v2262_v8 }
 0x264   :  { %v1605_v18 = vpack.c.bf16 %v1541_v27, %v1541_v27  ;;  %v1608_v60 = vpack.c.bf16 %v1544_v50, %v1544_v50  ;;  %12049 = vst [vmem:[#allocation20_spill] sm:$0xff] %v10250_v48  ;;  %v2885_v48 = vld [vmem:[#allocation2 + $0x104] sm:$0xf] }
 0x265   :  { %v1259_v36 = vpop.permute.xlu0 %1258  ;;  %v2038_v26 = vpop.permute.xlu2 %2037  ;;  %v8619_v63 = vld [vmem:[#allocation3 + $0x188] sm:$0xf0] }
 0x266   :  { %1670 = vst.msk [vmem:[#allocation2 + $0x110] sm:$0xf] %vm40_vm0, %v1605_v18  ;;  %v1411_v52 = vmax.f32 %v9855_v35, %v1259_v36 }
 0x267   :  { %1673 = vst.msk [vmem:[#allocation2 + $0x11c] sm:$0xf] %vm40_vm0, %v1608_v60 }
 0x268   :  { %v1475_v38 = vmax.f32 %v1091_v7, %v1411_v52  ;;  %2188 = vst.msk [vmem:[#allocation3 + $0x348] sm:$0xf] %vm2145_vm3, %v2038_v26  ;;  %v1092_v26 = vmax.f32 %v9873_v5, %v10220_v40  ;;  %v7748_v40 = vld [vmem:[#allocation3 + $0x2f8] sm:$0xf] }
 0x26a   :  { %v1542_v31 = vadd.f32 %v10217_v0, %v1475_v38  ;;  %v1267_v51 = vpop.permute.xlu1 %1266 }
 0x26b   :  { %v1415_v2 = vmax.f32 %v9976_v9, %v1267_v51  ;;  %v10265_v62 = vpop.f32.mrf.mxu2 }
 0x26c   :  { %v1606_v25 = vpack.c.bf16 %v1542_v31, %v1542_v31  ;;  %12050 = vst [vmem:[#allocation21_spill] sm:$0xff] %v10265_v62 }
 0x26d   :  { %v3771_v46 = vld [vmem:[#allocation2 + $0x110] sm:$0xf]  ;;  %v2032_v45 = vpop.permute.xlu0 %2031  ;;  %v947_v19 = vpop.permute.xlu2 %946 }
 0x26e   :  { %v1879_v47 = vld [vmem:[#allocation2 + $0x110] sm:$0xf]  ;;  %3835 = vst.msk [vmem:[#allocation3 + $0x1a0] sm:$0xf] %vm40_vm0, %v3771_v46  ;;  %v3774_v35 = vld [vmem:[#allocation2 + $0x11c] sm:$0xf]  ;;  %v1095_v55 = vmax.f32 %v9943_v49, %v947_v19 }
 0x26f   :  { %v1882_v57 = vld [vmem:[#allocation2 + $0x11c] sm:$0xf]  ;;  %2061 = vrot.lane.b32.xlu1 %v1879_v47, %s8887_s11  ;;  %3838 = vst.msk [vmem:[#allocation3 + $0x1dc] sm:$0xf] %vm40_vm0, %v3774_v35  ;;  %v1752_v1 = vld [vmem:[#allocation2 + $0x110] sm:$0xf] }
 0x270   :  { %2067 = vrot.lane.b32.xlu0 %v1882_v57, %s8887_s11  ;;  %1671 = vst.msk [vmem:[#allocation2 + $0x114] sm:$0xf] %vm40_vm0, %v1606_v25  ;;  %v1479_v32 = vmax.f32 %v1095_v55, %v1415_v2  ;;  %v1755_v27 = vld [vmem:[#allocation2 + $0x11c] sm:$0xf]  ;;  %v3261_v50 = vld [vmem:[#allocation2 + $0x110] sm:$0xf] }
 0x271   :  { %2185 = vst.msk [vmem:[#allocation3 + $0x30c] sm:$0xf] %vm2145_vm3, %v2032_v45  ;;  %v3264_v49 = vld [vmem:[#allocation2 + $0x11c] sm:$0xf] }
 0x272   :  { %v1546_v9 = vadd.f32 %v10217_v0, %v1479_v32  ;;  %1816 = vst.msk [vmem:[#allocation3 + $0x460] sm:$0xf] %vm40_vm0, %v1752_v1  ;;  %v1269_v8 = vpop.permute.xlu1 %1268 }
 0x273   :  { %1819 = vst.msk [vmem:[#allocation3 + $0x49c] sm:$0xf] %vm40_vm0, %v1755_v27  ;;  %v1416_v7 = vmax.f32 %v10007_v58, %v1269_v8  ;;  %v10286_v46 = vpop.f32.mrf.mxu2 }
 0x274   :  { %v1610_v18 = vpack.c.bf16 %v1546_v9, %v1546_v9  ;;  %3325 = vst.msk [vmem:[#allocation3 + $0x1ec] sm:$0xf] %vm40_vm0, %v3261_v50  ;;  %v3373_v50 = vld [vmem:[#allocation2 + $0xc4] sm:$0xf]  ;;  %v1745_v9 = vld [vmem:[#allocation2 + $0xf4] sm:$0xf] }
 0x275   :  { %v1261_v60 = vpop.permute.xlu0 %1260  ;;  %v949_v36 = vpop.permute.xlu2 %948  ;;  %3328 = vst.msk [vmem:[#allocation3 + $0x228] sm:$0xf] %vm40_vm0, %v3264_v49 }
 0x276   :  { %1675 = vst.msk [vmem:[#allocation2 + $0x124] sm:$0xf] %vm40_vm0, %v1610_v18  ;;  %v1412_v52 = vmax.f32 %v9891_v34, %v1261_v60  ;;  %v1096_v38 = vmax.f32 %v9970_v13, %v949_v36  ;;  %v2761_v13 = vld [vmem:[#allocation2 + $0x110] sm:$0xf] }
 0x277   :  { %v3772_v31 = vld [vmem:[#allocation2 + $0x114] sm:$0xf]  ;;  %12051 = vst [vmem:[#allocation22_spill] sm:$0xff] %v10286_v46 }
 0x278   :  { %v1880_v51 = vld [vmem:[#allocation2 + $0x114] sm:$0xf]  ;;  %2992 = vrot.lane.b32.xlu0 %v2858_v11, %s8887_s11  ;;  %3836 = vst.msk [vmem:[#allocation3 + $0x1b4] sm:$0xf] %vm40_vm0, %v3772_v31  ;;  %v1476_v45 = vmax.f32 %v1092_v26, %v1412_v52  ;;  %v1480_v5 = vmax.f32 %v1096_v38, %v1416_v7  ;;  %v8667_v58 = vld [vmem:[#allocation3 + $0x308] sm:$0xf0]  ;;  %v1094_v26 = vmax.f32 %v9922_v22, %v10247_v10 }
 0x279   :  { %v1753_v25 = vld [vmem:[#allocation2 + $0x114] sm:$0xf]  ;;  %2063 = vrot.lane.b32.xlu2 %v1880_v51, %s8887_s11  ;;  %v7749_v19 = vor.u32 %v8667_v58, %v7748_v40  ;;  %2825 = vst.msk [vmem:[#allocation3 + $0x300] sm:$0xf] %vm40_vm0, %v2761_v13  ;;  %v7768_v51 = vld [vmem:[#allocation3 + $0x320] sm:$0xf] }
 0x27a   :  { %1817 = vst.msk [vmem:[#allocation3 + $0x474] sm:$0xf] %vm40_vm0, %v1753_v25  ;;  %v3262_v34 = vld [vmem:[#allocation2 + $0x114] sm:$0xf]  ;;  %v1543_v47 = vadd.f32 %v10217_v0, %v1476_v45  ;;  %v1547_v35 = vadd.f32 %v10217_v0, %v1480_v5  ;;  %v2764_v10 = vld [vmem:[#allocation2 + $0x11c] sm:$0xf] }
 0x27b   :  { %3326 = vst.msk [vmem:[#allocation3 + $0x200] sm:$0xf] %vm40_vm0, %v3262_v34  ;;  %v2762_v2 = vld [vmem:[#allocation2 + $0x114] sm:$0xf]  ;;  %5359 = vmatmul.bf16.gmra.mxu2 %v7749_v19  ;;  %v10300_v8 = vpop.f32.mrf.mxu2 }
 0x27c   :  { %2826 = vst.msk [vmem:[#allocation3 + $0x314] sm:$0xf] %vm40_vm0, %v2762_v2  ;;  %v1607_v55 = vpack.c.bf16 %v1543_v47, %v1543_v47  ;;  %v1611_v57 = vpack.c.bf16 %v1547_v35, %v1547_v35 }
 0x27d   :  { %v3776_v1 = vld [vmem:[#allocation2 + $0x124] sm:$0xf]  ;;  %v2036_v32 = vpop.permute.xlu0 %2035  ;;  %v2042_v27 = vpop.permute.xlu2 %2041  ;;  %12052 = vst [vmem:[#allocation23_spill] sm:$0xff] %v10300_v8 }
 0x27e   :  { %3840 = vst.msk [vmem:[#allocation3 + $0x204] sm:$0xf] %vm40_vm0, %v3776_v1  ;;  %v1757_v49 = vld [vmem:[#allocation2 + $0x124] sm:$0xf]  ;;  %v1744_v1 = vld [vmem:[#allocation2 + $0xf0] sm:$0xf] }
 0x27f   :  { %1672 = vst.msk [vmem:[#allocation2 + $0x118] sm:$0xf] %vm40_vm0, %v1607_v55  ;;  %v3266_v18 = vld [vmem:[#allocation2 + $0x124] sm:$0xf]  ;;  %v8624_v42 = vld [vmem:[#allocation3 + $0x1b0] sm:$0xf0] }
 0x280   :  { %3508 = vrot.lane.b32.xlu0 %v3373_v50, %s8887_s11  ;;  %1676 = vst.msk [vmem:[#allocation2 + $0x128] sm:$0xf] %vm40_vm0, %v1611_v57  ;;  %v1884_v2 = vld [vmem:[#allocation2 + $0x124] sm:$0xf] }
 0x281   :  { %2187 = vst.msk [vmem:[#allocation3 + $0x334] sm:$0xf] %vm2145_vm3, %v2036_v32  ;;  %v2766_v55 = vld [vmem:[#allocation2 + $0x124] sm:$0xf]  ;;  %v2263_v32 = vld [vmem:[#allocation2 + $0x110] sm:$0xf] }
 0x282   :  { %2190 = vst.msk [vmem:[#allocation3 + $0x370] sm:$0xf] %vm2145_vm3, %v2042_v27  ;;  %v2346_v27 = vld [vmem:[#allocation2 + $0x6c] sm:$0xf] }
 0x283   :  { %1809 = vst.msk [vmem:[#allocation3 + $0x3d4] sm:$0xf] %vm40_vm0, %v1745_v9  ;;  %v10318_v19 = vpop.f32.mrf.mxu2 }
 0x284   :  { %1821 = vst.msk [vmem:[#allocation3 + $0x4c4] sm:$0xf] %vm40_vm0, %v1757_v49 }
 0x285   :  { %v1265_v60 = vpop.permute.xlu0 %1264  ;;  %v10305_v36 = vpop.permute.xlu2 %1270  ;;  %3330 = vst.msk [vmem:[#allocation3 + $0x250] sm:$0xf] %vm40_vm0, %v3266_v18 }
 0x286   :  { %v3773_v7 = vld [vmem:[#allocation2 + $0x118] sm:$0xf]  ;;  %v1414_v52 = vmax.f32 %v9948_v59, %v1265_v60  ;;  %12053 = vst [vmem:[#allocation24_spill] sm:$0xff] %v10318_v19 }
 0x287   :  { %v1881_v38 = vld [vmem:[#allocation2 + $0x118] sm:$0xf]  ;;  %3837 = vst.msk [vmem:[#allocation3 + $0x1c8] sm:$0xf] %vm40_vm0, %v3773_v7  ;;  %v3777_v31 = vld [vmem:[#allocation2 + $0x128] sm:$0xf]  ;;  %v1417_v7 = vmax.f32 %v10125_v33, %v10305_v36 }
 0x288   :  { %v1754_v11 = vld [vmem:[#allocation2 + $0x118] sm:$0xf]  ;;  %2065 = vrot.lane.b32.xlu2 %v1881_v38, %s8887_s11  ;;  %3841 = vst.msk [vmem:[#allocation3 + $0x218] sm:$0xf] %vm40_vm0, %v3777_v31  ;;  %v1478_v25 = vmax.f32 %v1094_v26, %v1414_v52  ;;  %v8672_v45 = vld [vmem:[#allocation3 + $0x330] sm:$0xf0]  ;;  %v10332_v26 = vpop.permute.xlu1 %954 }
 0x289   :  { %v1758_v5 = vld [vmem:[#allocation2 + $0x128] sm:$0xf]  ;;  %v7769_v40 = vor.u32 %v8672_v45, %v7768_v51  ;;  %1818 = vst.msk [vmem:[#allocation3 + $0x488] sm:$0xf] %vm40_vm0, %v1754_v11  ;;  %v3263_v59 = vld [vmem:[#allocation2 + $0x118] sm:$0xf] }
 0x28a   :  { %v1545_v22 = vadd.f32 %v10217_v0, %v1478_v25  ;;  %1822 = vst.msk [vmem:[#allocation3 + $0x4d8] sm:$0xf] %vm40_vm0, %v1758_v5  ;;  %v3267_v58 = vld [vmem:[#allocation2 + $0x128] sm:$0xf]  ;;  %v2763_v35 = vld [vmem:[#allocation2 + $0x118] sm:$0xf] }
 0x28b   :  { %5364 = vmatmul.bf16.gmra.mxu2 %v7769_v40  ;;  %3327 = vst.msk [vmem:[#allocation3 + $0x214] sm:$0xf] %vm40_vm0, %v3263_v59  ;;  %v2767_v57 = vld [vmem:[#allocation2 + $0x128] sm:$0xf]  ;;  %v10337_v52 = vpop.f32.mrf.mxu2  ;;  %v2265_v33 = vld [vmem:[#allocation2 + $0x118] sm:$0xf] }
 0x28c   :  { %v1609_v34 = vpack.c.bf16 %v1545_v22, %v1545_v22  ;;  %3331 = vst.msk [vmem:[#allocation3 + $0x264] sm:$0xf] %vm40_vm0, %v3267_v58  ;;  %v7788_v11 = vld [vmem:[#allocation3 + $0x348] sm:$0xf]  ;;  %v2859_v58 = vld [vmem:[#allocation2 + $0x7c] sm:$0xf] }
 0x28d   :  { %v2040_v13 = vpop.permute.xlu0 %2039  ;;  %v10321_v47 = vpop.permute.xlu2 %1272  ;;  %2828 = vst.msk [vmem:[#allocation3 + $0x33c] sm:$0xf] %vm40_vm0, %v2764_v10  ;;  %v2217_v40 = vld [vmem:[#allocation2 + $0x28] sm:$0xf] }
 0x28e   :  { %1674 = vst.msk [vmem:[#allocation2 + $0x120] sm:$0xf] %vm40_vm0, %v1609_v34 }
 0x28f   :  { %2189 = vst.msk [vmem:[#allocation3 + $0x35c] sm:$0xf] %vm2145_vm3, %v2040_v13  ;;  %v1885_v13 = vld [vmem:[#allocation2 + $0x128] sm:$0xf] }
 0x290   :  { %2071 = vrot.lane.b32.xlu2 %v1884_v2, %s8887_s11  ;;  %2827 = vst.msk [vmem:[#allocation3 + $0x328] sm:$0xf] %vm40_vm0, %v2763_v35  ;;  %v2269_v35 = vld [vmem:[#allocation2 + $0x128] sm:$0xf] }
 0x291   :  { %2830 = vst.msk [vmem:[#allocation3 + $0x364] sm:$0xf] %vm40_vm0, %v2766_v55  ;;  %v2264_v55 = vld [vmem:[#allocation2 + $0x114] sm:$0xf] }
 0x292   :  { %1808 = vst.msk [vmem:[#allocation3 + $0x3c0] sm:$0xf] %vm40_vm0, %v1744_v1  ;;  %v2347_v1 = vld [vmem:[#allocation2 + $0x70] sm:$0xf] }
 0x293   :  { %2831 = vst.msk [vmem:[#allocation3 + $0x378] sm:$0xf] %vm40_vm0, %v2767_v57  ;;  %v10354_v2 = vpop.f32.mrf.mxu2  ;;  %v2266_v57 = vld [vmem:[#allocation2 + $0x11c] sm:$0xf] }
 0x294   :  { %2327 = vst.msk [vmem:[#allocation3 + $0x414] sm:$0xf] %vm40_vm0, %v2263_v32 }
 0x295   :  { %v3775_v50 = vld [vmem:[#allocation2 + $0x120] sm:$0xf]  ;;  %v3503_v9 = vpop.permute.xlu2 %3502  ;;  %v951_v49 = vpop.permute.xlu0 %950  ;;  %12054 = vst [vmem:[#allocation25_spill] sm:$0xff] %v10337_v52  ;;  %v2370_v52 = vld [vmem:[#allocation2 + $0xdc] sm:$0xf] }
 0x296   :  { %v1883_v18 = vld [vmem:[#allocation2 + $0x120] sm:$0xf]  ;;  %3839 = vst.msk [vmem:[#allocation3 + $0x1f0] sm:$0xf] %vm40_vm0, %v3775_v50  ;;  %v1097_v38 = vmax.f32 %v9992_v29, %v951_v49  ;;  %v8677_v31 = vld [vmem:[#allocation3 + $0x358] sm:$0xf0] }
 0x297   :  { %v1756_v60 = vld [vmem:[#allocation2 + $0x120] sm:$0xf]  ;;  %2069 = vrot.lane.b32.xlu1 %v1883_v18, %s8887_s11  ;;  %3690 = vst.msk [vmem:[#allocation3 + $0x5c] sm:$0xf] %vm2145_vm3, %v3503_v9  ;;  %v7789_v51 = vor.u32 %v8677_v31, %v7788_v11  ;;  %v1418_v18 = vmax.f32 %v10148_v17, %v10321_v47  ;;  %v2268_v47 = vld [vmem:[#allocation2 + $0x124] sm:$0xf] }
 0x298   :  { %2481 = vrot.lane.b32.xlu2 %v2346_v27, %s8887_s11  ;;  %v3265_v25 = vld [vmem:[#allocation2 + $0x120] sm:$0xf]  ;;  %v1481_v45 = vmax.f32 %v1097_v38, %v1417_v7  ;;  %1820 = vst.msk [vmem:[#allocation3 + $0x4b0] sm:$0xf] %vm40_vm0, %v1756_v60  ;;  %v7808_v38 = vld [vmem:[#allocation3 + $0x370] sm:$0xf] }
 0x299   :  { %v2765_v5 = vld [vmem:[#allocation2 + $0x120] sm:$0xf]  ;;  %3329 = vst.msk [vmem:[#allocation3 + $0x23c] sm:$0xf] %vm40_vm0, %v3265_v25 }
 0x29a   :  { %v1548_v29 = vadd.f32 %v10217_v0, %v1481_v45  ;;  %2281 = vst.msk [vmem:[#allocation3 + $0x7c] sm:$0xf] %vm40_vm0, %v2217_v40  ;;  %v2267_v36 = vld [vmem:[#allocation2 + $0x120] sm:$0xf] }
 0x29b   :  { %5369 = vmatmul.bf16.gmra.mxu2 %v7789_v51  ;;  %2829 = vst.msk [vmem:[#allocation3 + $0x350] sm:$0xf] %vm40_vm0, %v2765_v5  ;;  %v3372_v9 = vld [vmem:[#allocation2 + $0xc0] sm:$0xf]  ;;  %v10371_v45 = vpop.f32.mrf.mxu2 }
 0x29c   :  { %v1612_v22 = vpack.c.bf16 %v1548_v29, %v1548_v29  ;;  %2329 = vst.msk [vmem:[#allocation3 + $0x43c] sm:$0xf] %vm40_vm0, %v2265_v33  ;;  %v2860_v29 = vld [vmem:[#allocation2 + $0x80] sm:$0xf] }
 0x29d   :  { %v2052_v59 = vpop.permute.xlu2 %2051  ;;  %v2044_v10 = vpop.permute.xlu0 %2043  ;;  %2331 = vst.msk [vmem:[#allocation3 + $0x464] sm:$0xf] %vm40_vm0, %v2267_v36  ;;  %v2861_v36 = vld [vmem:[#allocation2 + $0x84] sm:$0xf] }
 0x29e   :  { %1677 = vst.msk [vmem:[#allocation2 + $0x12c] sm:$0xf] %vm40_vm0, %v1612_v22 }
 0x29f   :  { %v2048_v34 = vpop.permute.xlu1 %2047  ;;  %2994 = vrot.lane.b32.xlu1 %v2859_v58, %s8887_s11  ;;  %2195 = vst.msk [vmem:[#allocation3 + $0x3d4] sm:$0xf] %vm2145_vm3, %v2052_v59  ;;  %v2348_v59 = vld [vmem:[#allocation2 + $0x74] sm:$0xf] }
 0x2a0   :  { %2073 = vrot.lane.b32.xlu2 %v1885_v13, %s8887_s11  ;;  %12055 = vst [vmem:[#allocation26_spill] sm:$0xff] %v10354_v2  ;;  %v10386_v13 = vld [vmem:[%s12015_s0 + $0xf0] sm:$0xff] }
 0x2a1   :  { %2191 = vst.msk [vmem:[#allocation3 + $0x384] sm:$0xf] %vm2145_vm3, %v2044_v10  ;;  %v7416_v10 = vld [vmem:[#allocation3 + $0x58] sm:$0xf]  ;;  %7332 = vmatmul.msk.bf16.vlgmr.msra.gmra.mxu3 %vm354_vm2, %v10386_v13 }
 0x2a2   :  { %2193 = vst.msk [vmem:[#allocation3 + $0x3ac] sm:$0xf] %vm2145_vm3, %v2048_v34 }
 0x2a3   :  { %2333 = vst.msk [vmem:[#allocation3 + $0x48c] sm:$0xf] %vm40_vm0, %v2269_v35  ;;  %v10388_v35 = vpop.f32.mrf.mxu2 }
 0x2a4   :  { %2328 = vst.msk [vmem:[#allocation3 + $0x428] sm:$0xf] %vm40_vm0, %v2264_v55 }
 0x2a5   :  { %2330 = vst.msk [vmem:[#allocation3 + $0x450] sm:$0xf] %vm40_vm0, %v2266_v57  ;;  %v3778_v32 = vld [vmem:[#allocation2 + $0x12c] sm:$0xf]  ;;  %v2054_v27 = vpop.permute.xlu2 %2053  ;;  %v953_v50 = vpop.permute.xlu0 %952 }
 0x2a6   :  { %v1886_v49 = vld [vmem:[#allocation2 + $0x12c] sm:$0xf]  ;;  %3842 = vst.msk [vmem:[#allocation3 + $0x22c] sm:$0xf] %vm40_vm0, %v3778_v32  ;;  %v1098_v60 = vmax.f32 %v10017_v4, %v953_v50 }
 0x2a7   :  { %v2991_v7 = vpop.permute.xlu1 %2990  ;;  %2075 = vrot.lane.b32.xlu0 %v1886_v49, %s8887_s11  ;;  %2483 = vrot.lane.b32.xlu1 %v2347_v1, %s8887_s11  ;;  %v1759_v11 = vld [vmem:[#allocation2 + $0x12c] sm:$0xf]  ;;  %2196 = vst.msk [vmem:[#allocation3 + $0x3e8] sm:$0xf] %vm2145_vm3, %v2054_v27  ;;  %v3374_v1 = vld [vmem:[#allocation2 + $0xc8] sm:$0xf]  ;;  %v1099_v27 = vmax.f32 %v10041_v39, %v10332_v26 }
 0x2a8   :  { %3506 = vrot.lane.b32.xlu2 %v3372_v9, %s8887_s11  ;;  %v8682_v31 = vld [vmem:[#allocation3 + $0x380] sm:$0xf0]  ;;  %v3268_v51 = vld [vmem:[#allocation2 + $0x12c] sm:$0xf]  ;;  %v1482_v25 = vmax.f32 %v1098_v60, %v1418_v18  ;;  %3177 = vst.msk [vmem:[#allocation3 + $0x6c] sm:$0xf] %vm2145_vm3, %v2991_v7 }
 0x2a9   :  { %v7809_v17 = vor.u32 %v8682_v31, %v7808_v38  ;;  %1823 = vst.msk [vmem:[#allocation3 + $0x4ec] sm:$0xf] %vm40_vm0, %v1759_v11  ;;  %v2768_v4 = vld [vmem:[#allocation2 + $0x12c] sm:$0xf]  ;;  %v8876_v60 = vld [vmem:[%s12016_s3 + $0x38] sm:$0xff] }
 0x2aa   :  { %12056 = vst [vmem:[#allocation27_spill] sm:$0xff] %v10371_v45  ;;  %v1549_v5 = vadd.f32 %v10217_v0, %v1482_v25  ;;  %v8687_v18 = vld [vmem:[#allocation3 + $0x3a8] sm:$0xf0]  ;;  %8860 = vmatpush.bf16.msra.mxu3 %v8876_v60  ;;  %v2349_v60 = vld [vmem:[#allocation2 + $0x78] sm:$0xf] }
 0x2ab   :  { %3332 = vst.msk [vmem:[#allocation3 + $0x278] sm:$0xf] %vm40_vm0, %v3268_v51  ;;  %5374 = vmatmul.bf16.gmra.mxu2 %v7809_v17  ;;  %v3375_v25 = vld [vmem:[#allocation2 + $0xcc] sm:$0xf]  ;;  %v2882_v45 = vld [vmem:[#allocation2 + $0xe8] sm:$0xf] }
 0x2ac   :  { %2832 = vst.msk [vmem:[#allocation3 + $0x38c] sm:$0xf] %vm40_vm0, %v2768_v4  ;;  %v1613_v40 = vpack.c.bf16 %v1549_v5, %v1549_v5  ;;  %v2270_v17 = vld [vmem:[#allocation2 + $0x12c] sm:$0xf]  ;;  %v10408_v4 = vpop.f32.mrf.mxu2  ;;  %v8879_v5 = vld [vmem:[%s12016_s3 + $0x20] sm:$0xff] }
 0x2ad   :  { %2332 = vst.msk [vmem:[#allocation3 + $0x478] sm:$0xf] %vm40_vm0, %v2268_v47  ;;  %v2046_v33 = vpop.permute.xlu0 %2045  ;;  %v8878_v47 = vld [vmem:[%s12016_s3 + $0x28] sm:$0xff] }
 0x2ae   :  { %1678 = vst.msk [vmem:[#allocation2 + $0x130] sm:$0xf] %vm40_vm0, %v1613_v40  ;;  %v10424_v40 = vld [vmem:[%s12015_s0 + $0xf8] sm:$0xff] }
 0x2af   :  { %v2050_v22 = vpop.permute.xlu1 %2049  ;;  %2996 = vrot.lane.b32.xlu0 %v2860_v29, %s8887_s11  ;;  %2998 = vrot.lane.b32.xlu1 %v2861_v36, %s8887_s11  ;;  %2192 = vst.msk [vmem:[#allocation3 + $0x398] sm:$0xf] %vm2145_vm3, %v2046_v33  ;;  %v8583_v58 = vld [vmem:[#allocation3 + $0x68] sm:$0xf0]  ;;  %v3376_v33 = vld [vmem:[#allocation2 + $0xd0] sm:$0xf] }
 0x2b0   :  { %2485 = vrot.lane.b32.xlu2 %v2348_v59, %s8887_s11  ;;  %2194 = vst.msk [vmem:[#allocation3 + $0x3c0] sm:$0xf] %vm2145_vm3, %v2050_v22  ;;  %v7417_v34 = vor.u32 %v8583_v58, %v7416_v10  ;;  %v2862_v29 = vld [vmem:[#allocation2 + $0x88] sm:$0xf]  ;;  %v8581_v10 = vld [vmem:[#allocation3 + $0x5c] sm:$0xf] }
 0x2b1   :  { %12057 = vst [vmem:[#allocation28_spill] sm:$0xff] %v10388_v35  ;;  %7333 = vmatmul.msk.bf16.gmra.mxu3 %vm354_vm2, %v10424_v40 }
 0x2b2   :  { %5612 = vmatmul.bf16.gmra.mxu0 %v7417_v34  ;;  %12058 = vst [vmem:[#allocation29_spill] sm:$0xff] %v10408_v4 }
 0x2b3   :  { %2334 = vst.msk [vmem:[#allocation3 + $0x4a0] sm:$0xf] %vm40_vm0, %v2270_v17  ;;  %v2863_v17 = vld [vmem:[#allocation2 + $0x8c] sm:$0xf] }
 0x2b5   :  { %v3779_v55 = vld [vmem:[#allocation2 + $0x130] sm:$0xf]  ;;  %v1275_v57 = vpop.permute.xlu0 %1274 }
 0x2b6   :  { %v1887_v32 = vld [vmem:[#allocation2 + $0x130] sm:$0xf]  ;;  %3843 = vst.msk [vmem:[#allocation3 + $0x240] sm:$0xf] %vm40_vm0, %v3779_v55  ;;  %v1419_v50 = vmax.f32 %v10180_v21, %v1275_v57  ;;  %v7828_v49 = vld [vmem:[#allocation3 + $0x398] sm:$0xf] }
 0x2b7   :  { %v2480_v9 = vpop.permute.xlu1 %2479  ;;  %2077 = vrot.lane.b32.xlu0 %v1887_v32, %s8887_s11  ;;  %v7829_v7 = vor.u32 %v8687_v18, %v7828_v49  ;;  %v8877_v21 = vld [vmem:[%s12016_s3 + $0x30] sm:$0xff]  ;;  %v7848_v58 = vld [vmem:[#allocation3 + $0x3c0] sm:$0xf]  ;;  %v8880_v57 = vld [vmem:[%s12016_s3 + $0x18] sm:$0xff]  ;;  %v10436_v32 = vpop.f32.mrf.mxu2 }
 0x2b8   :  { %2665 = vst.msk [vmem:[#allocation3 + $0x7c] sm:$0xf] %vm2145_vm3, %v2480_v9  ;;  %3510 = vrot.lane.b32.xlu2 %v3374_v1, %s8887_s11  ;;  %v1483_v39 = vmax.f32 %v1099_v27, %v1419_v50  ;;  %8861 = vmatpush.bf16.msra.mxu3 %v8877_v21  ;;  %v2769_v38 = vld [vmem:[#allocation2 + $0x130] sm:$0xf]  ;;  %v8692_v27 = vld [vmem:[#allocation3 + $0x3d0] sm:$0xf0] }
 0x2b9   :  { %v2271_v11 = vld [vmem:[#allocation2 + $0x130] sm:$0xf]  ;;  %2833 = vst.msk [vmem:[#allocation3 + $0x3a0] sm:$0xf] %vm40_vm0, %v2769_v38  ;;  %v7849_v50 = vor.u32 %v8692_v27, %v7848_v58  ;;  %v3377_v18 = vld [vmem:[#allocation2 + $0xd4] sm:$0xf] }
 0x2ba   :  { %v1550_v26 = vadd.f32 %v10217_v0, %v1483_v39  ;;  %2335 = vst.msk [vmem:[#allocation3 + $0x4b4] sm:$0xf] %vm40_vm0, %v2271_v11  ;;  %v2350_v0 = vld [vmem:[#allocation2 + $0x7c] sm:$0xf]  ;;  %v8881_v9 = vld [vmem:[%s12016_s3 + $0x10] sm:$0xff] }
 0x2bb   :  { %5379 = vmatmul.bf16.gmra.mxu2 %v7829_v7  ;;  %12059 = vst [vmem:[#allocation30_spill] sm:$0xff] %v10436_v32  ;;  %v2352_v7 = vld [vmem:[#allocation2 + $0x84] sm:$0xf]  ;;  %v2218_v39 = vld [vmem:[#allocation2 + $0x2c] sm:$0xf] }
 0x2bc   :  { %v1614_v31 = vpack.c.bf16 %v1550_v26, %v1550_v26  ;;  %8862 = vmatpush.bf16.msra.mxu3 %v8878_v47  ;;  %v8882_v26 = vld [vmem:[%s12016_s3 + $0x8] sm:$0xff]  ;;  %2282 = vst.msk [vmem:[#allocation3 + $0x90] sm:$0xf] %vm40_vm0, %v2218_v39  ;;  %v3380_v27 = vld [vmem:[#allocation2 + $0xe0] sm:$0xf] }
 0x2bd   :  { %v3505_v51 = vpop.permute.xlu0 %3504  ;;  %v2356_v39 = vld [vmem:[#allocation2 + $0xa4] sm:$0xf] }
 0x2be   :  { %1679 = vst.msk [vmem:[#allocation2 + $0x134] sm:$0xf] %vm40_vm0, %v1614_v31  ;;  %v8763_v31 = vld [vmem:[%s12016_s3 + $0x108] sm:$0xff] }
 0x2bf   :  { %3512 = vrot.lane.b32.xlu0 %v3375_v25, %s8887_s11  ;;  %3691 = vst.msk [vmem:[#allocation3 + $0x70] sm:$0xf] %vm2145_vm3, %v3505_v51  ;;  %v10451_v38 = vpop.f32.mrf.mxu2  ;;  %v8883_v51 = vld [vmem:[%s12016_s3] sm:$0xff]  ;;  %v2864_v25 = vld [vmem:[#allocation2 + $0x90] sm:$0xf]  ;;  %5938 = vmatpush.bf16.msrb.mxu2 %v8763_v31 }
 0x2c0   :  { %2489 = vrot.lane.b32.xlu2 %v2350_v0, %s8887_s11  ;;  %8863 = vmatpush.bf16.msra.mxu3 %v8879_v5  ;;  %12060 = vst [vmem:[#allocation31_spill] sm:$0xff] %v10451_v38  ;;  %v3378_v0 = vld [vmem:[#allocation2 + $0xd8] sm:$0xf]  ;;  %v7868_v5 = vld [vmem:[#allocation3 + $0x3e8] sm:$0xf] }
 0x2c1   :  { %7364 = vmatmul.msk.bf16.vlgmr.msrb.gmra.mxu3 %vm354_vm2, %v10386_v13  ;;  %v2354_v13 = vld [vmem:[#allocation2 + $0x8c] sm:$0xf]  ;;  %v2879_v38 = vld [vmem:[#allocation2 + $0xdc] sm:$0xf] }
 0x2c4   :  { %8864 = vmatpush.bf16.msra.mxu3 %v8880_v57 }
 0x2c5   :  { %v3780_v36 = vld [vmem:[#allocation2 + $0x134] sm:$0xf]  ;;  %v2056_v22 = vpop.permute.xlu0 %2055 }
 0x2c6   :  { %v1888_v59 = vld [vmem:[#allocation2 + $0x134] sm:$0xf]  ;;  %3844 = vst.msk [vmem:[#allocation3 + $0x254] sm:$0xf] %vm40_vm0, %v3780_v36  ;;  %v7418_v34 = vld [vmem:[#allocation3 + $0x6c] sm:$0xf0] }
 0x2c7   :  { %3000 = vrot.lane.b32.xlu0 %v2862_v29, %s8887_s11  ;;  %2079 = vrot.lane.b32.xlu1 %v1888_v59, %s8887_s11  ;;  %2197 = vst.msk [vmem:[#allocation3 + $0x3fc] sm:$0xf] %vm2145_vm3, %v2056_v22  ;;  %v7421_v55 = vor.u32 %v8581_v10, %v7418_v34  ;;  %v2770_v1 = vld [vmem:[#allocation2 + $0x134] sm:$0xf]  ;;  %v3379_v22 = vld [vmem:[#allocation2 + $0xdc] sm:$0xf] }
 0x2c8   :  { %3514 = vrot.lane.b32.xlu2 %v3376_v33, %s8887_s11  ;;  %2834 = vst.msk [vmem:[#allocation3 + $0x3b4] sm:$0xf] %vm40_vm0, %v2770_v1  ;;  %8865 = vmatpush.bf16.msra.mxu3 %v8881_v9  ;;  %v2272_v36 = vld [vmem:[#allocation2 + $0x134] sm:$0xf]  ;;  %v2351_v59 = vld [vmem:[#allocation2 + $0x80] sm:$0xf] }
 0x2c9   :  { %5781 = vmatmul.bf16.gmra.mxu1 %v7421_v55  ;;  %2336 = vst.msk [vmem:[#allocation3 + $0x4c8] sm:$0xf] %vm40_vm0, %v2272_v36  ;;  %v2866_v55 = vld [vmem:[#allocation2 + $0x98] sm:$0xf]  ;;  %v2865_v1 = vld [vmem:[#allocation2 + $0x94] sm:$0xf] }
 0x2ca   :  { %v2220_v9 = vld [vmem:[#allocation2 + $0x34] sm:$0xf] }
 0x2cb   :  { %5384 = vmatmul.bf16.gmra.mxu2 %v7849_v50  ;;  %2284 = vst.msk [vmem:[#allocation3 + $0xb8] sm:$0xf] %vm40_vm0, %v2220_v9 }
 0x2cc   :  { %8866 = vmatpush.bf16.msra.mxu3 %v8882_v26  ;;  %v10465_v29 = vpop.f32.mrf.mxu2  ;;  %v3381_v26 = vld [vmem:[#allocation2 + $0xe4] sm:$0xf] }
 0x2cd   :  { %v2058_v49 = vpop.permute.xlu0 %2057  ;;  %12061 = vst [vmem:[#allocation32_spill] sm:$0xff] %v10465_v29  ;;  %v3394_v29 = vld [vmem:[#allocation2 + $0x128] sm:$0xf] }
 0x2ce   :  { %2198 = vst.msk [vmem:[#allocation3 + $0x410] sm:$0xf] %vm2145_vm3, %v2058_v49  ;;  %v8697_v47 = vld [vmem:[#allocation3 + $0x3f8] sm:$0xf0] }
 0x2cf   :  { %3516 = vrot.lane.b32.xlu0 %v3377_v18, %s8887_s11  ;;  %2487 = vrot.lane.b32.xlu1 %v2349_v60, %s8887_s11  ;;  %v7869_v33 = vor.u32 %v8697_v47, %v7868_v5  ;;  %v8762_v5 = vld [vmem:[%s12016_s3 + $0x100] sm:$0xff] }
 0x2d0   :  { %2493 = vrot.lane.b32.xlu2 %v2352_v7, %s8887_s11  ;;  %8867 = vmatpush.bf16.msra.mxu3 %v8883_v51  ;;  %v2867_v51 = vld [vmem:[#allocation2 + $0x9c] sm:$0xf] }
 0x2d1   :  { %v2060_v21 = vpop.permute.xlu1 %2059  ;;  %7365 = vmatmul.msk.bf16.gmra.mxu3 %vm354_vm2, %v10424_v40  ;;  %5939 = vmatpush.bf16.msrb.mxu2 %v8762_v5  ;;  %v2360_v5 = vld [vmem:[#allocation2 + $0xb4] sm:$0xf] }
 0x2d2   :  { %2199 = vst.msk [vmem:[#allocation3 + $0x424] sm:$0xf] %vm2145_vm3, %v2060_v21  ;;  %v2353_v21 = vld [vmem:[#allocation2 + $0x88] sm:$0xf] }
 0x2d3   :  { %v2064_v11 = vpop.permute.xlu2 %2063 }
 0x2d4   :  { %2201 = vst.msk [vmem:[#allocation3 + $0x44c] sm:$0xf] %vm2145_vm3, %v2064_v11  ;;  %v10474_v57 = vpop.f32.mrf.mxu2 }
 0x2d5   :  { %12062 = vst [vmem:[#allocation33_spill] sm:$0xff] %v10474_v57  ;;  %v7888_v49 = vld [vmem:[#allocation3 + $0x410] sm:$0xf] }
 0x2d7   :  { %3004 = vrot.lane.b32.xlu0 %v2864_v25, %s8887_s11  ;;  %3002 = vrot.lane.b32.xlu1 %v2863_v17, %s8887_s11  ;;  %v2868_v25 = vld [vmem:[#allocation2 + $0xb0] sm:$0xf] }
 0x2d8   :  { %3518 = vrot.lane.b32.xlu2 %v3378_v0, %s8887_s11  ;;  %v3382_v0 = vld [vmem:[#allocation2 + $0xf8] sm:$0xf] }
 0x2d9   :  { %v8702_v50 = vld [vmem:[#allocation3 + $0x420] sm:$0xf0] }
 0x2da   :  { %v7889_v7 = vor.u32 %v8702_v50, %v7888_v49  ;;  %v2869_v50 = vld [vmem:[#allocation2 + $0xb4] sm:$0xf]  ;;  %v3384_v49 = vld [vmem:[#allocation2 + $0x100] sm:$0xf] }
 0x2db   :  { %5389 = vmatmul.bf16.gmra.mxu2 %v7869_v33  ;;  %v2222_v33 = vld [vmem:[#allocation2 + $0x3c] sm:$0xf]  ;;  %v8707_v36 = vld [vmem:[#allocation3 + $0x448] sm:$0xf0] }
 0x2dc   :  { %2286 = vst.msk [vmem:[#allocation3 + $0xe0] sm:$0xf] %vm40_vm0, %v2222_v33 }
 0x2df   :  { %3520 = vrot.lane.b32.xlu0 %v3379_v22, %s8887_s11  ;;  %2491 = vrot.lane.b32.xlu1 %v2351_v59, %s8887_s11 }
 0x2e0   :  { %2497 = vrot.lane.b32.xlu2 %v2354_v13, %s8887_s11  ;;  %v2355_v13 = vld [vmem:[#allocation2 + $0xa0] sm:$0xf] }
 0x2e1   :  { %v2062_v10 = vpop.permute.xlu1 %2061 }
 0x2e2   :  { %v2066_v58 = vpop.permute.xlu2 %2065  ;;  %v2068_v34 = vpop.permute.xlu0 %2067  ;;  %2200 = vst.msk [vmem:[#allocation3 + $0x438] sm:$0xf] %vm2145_vm3, %v2062_v10  ;;  %v2219_v10 = vld [vmem:[#allocation2 + $0x30] sm:$0xf] }
 0x2e3   :  { %2202 = vst.msk [vmem:[#allocation3 + $0x460] sm:$0xf] %vm2145_vm3, %v2066_v58  ;;  %v3383_v58 = vld [vmem:[#allocation2 + $0xfc] sm:$0xf] }
 0x2e4   :  { %2203 = vst.msk [vmem:[#allocation3 + $0x474] sm:$0xf] %vm2145_vm3, %v2068_v34 }
 0x2e5   :  { %v10484_v40 = vpop.f32.mrf.mxu2  ;;  %2283 = vst.msk [vmem:[#allocation3 + $0xa4] sm:$0xf] %vm40_vm0, %v2219_v10  ;;  %v2872_v10 = vld [vmem:[#allocation2 + $0xc0] sm:$0xf] }
 0x2e6   :  { %12063 = vst [vmem:[#allocation34_spill] sm:$0xff] %v10484_v40 }
 0x2e7   :  { %3008 = vrot.lane.b32.xlu0 %v2866_v55, %s8887_s11  ;;  %3006 = vrot.lane.b32.xlu1 %v2865_v1, %s8887_s11  ;;  %v2358_v55 = vld [vmem:[#allocation2 + $0xac] sm:$0xf] }
 0x2e8   :  { %3522 = vrot.lane.b32.xlu2 %v3380_v27, %s8887_s11  ;;  %v2870_v27 = vld [vmem:[#allocation2 + $0xb8] sm:$0xf] }
 0x2e9   :  { %v7908_v47 = vld [vmem:[#allocation3 + $0x438] sm:$0xf] }
 0x2ea   :  { %v2072_v18 = vpop.permute.xlu2 %2071  ;;  %v2993_v60 = vpop.permute.xlu0 %2992  ;;  %v7909_v59 = vor.u32 %v8707_v36, %v7908_v47 }
 0x2eb   :  { %2205 = vst.msk [vmem:[#allocation3 + $0x49c] sm:$0xf] %vm2145_vm3, %v2072_v18  ;;  %5394 = vmatmul.bf16.gmra.mxu2 %v7889_v7  ;;  %v7928_v18 = vld [vmem:[#allocation3 + $0x460] sm:$0xf]  ;;  %v2224_v7 = vld [vmem:[#allocation2 + $0x44] sm:$0xf] }
 0x2ec   :  { %3178 = vst.msk [vmem:[#allocation3 + $0x80] sm:$0xf] %vm2145_vm3, %v2993_v60  ;;  %v8712_v60 = vld [vmem:[#allocation3 + $0x470] sm:$0xf0] }
 0x2ed   :  { %v10491_v17 = vpop.f32.mrf.mxu2  ;;  %2288 = vst.msk [vmem:[#allocation3 + $0x108] sm:$0xf] %vm40_vm0, %v2224_v7 }
 0x2ee   :  { %12064 = vst [vmem:[#allocation35_spill] sm:$0xff] %v10491_v17 }
 0x2ef   :  { %3524 = vrot.lane.b32.xlu0 %v3381_v26, %s8887_s11  ;;  %2495 = vrot.lane.b32.xlu1 %v2353_v21, %s8887_s11  ;;  %v7929_v21 = vor.u32 %v8712_v60, %v7928_v18  ;;  %v2226_v60 = vld [vmem:[#allocation2 + $0x4c] sm:$0xf] }
 0x2f0   :  { %2501 = vrot.lane.b32.xlu2 %v2356_v39, %s8887_s11  ;;  %2290 = vst.msk [vmem:[#allocation3 + $0x130] sm:$0xf] %vm40_vm0, %v2226_v60 }
 0x2f2   :  { %v2482_v11 = vpop.permute.xlu2 %2481  ;;  %v3509_v31 = vpop.permute.xlu0 %3508 }
 0x2f3   :  { %2666 = vst.msk [vmem:[#allocation3 + $0x90] sm:$0xf] %vm2145_vm3, %v2482_v11  ;;  %v7436_v18 = vld [vmem:[#allocation3 + $0x80] sm:$0xf] }
 0x2f4   :  { %3693 = vst.msk [vmem:[#allocation3 + $0x98] sm:$0xf] %vm2145_vm3, %v3509_v31 }
 0x2f7   :  { %3012 = vrot.lane.b32.xlu0 %v2868_v25, %s8887_s11  ;;  %3010 = vrot.lane.b32.xlu1 %v2867_v51, %s8887_s11  ;;  %v3385_v25 = vld [vmem:[#allocation2 + $0x104] sm:$0xf] }
 0x2f8   :  { %3526 = vrot.lane.b32.xlu2 %v3382_v0, %s8887_s11  ;;  %v2357_v0 = vld [vmem:[#allocation2 + $0xa8] sm:$0xf] }
 0x2fa   :  { %v2074_v22 = vpop.permute.xlu2 %2073 }
 0x2fb   :  { %2206 = vst.msk [vmem:[#allocation3 + $0x4b0] sm:$0xf] %vm2145_vm3, %v2074_v22  ;;  %5399 = vmatmul.bf16.gmra.mxu2 %v7909_v59  ;;  %v7438_v31 = vld [vmem:[#allocation3 + $0x94] sm:$0xf0]  ;;  %v8717_v22 = vld [vmem:[#allocation3 + $0x498] sm:$0xf0] }
 0x2fe   :  { %v10502_v34 = vpop.f32.mrf.mxu2 }
 0x2ff   :  { %12065 = vst [vmem:[#allocation36_spill] sm:$0xff] %v10502_v34  ;;  %3528 = vrot.lane.b32.xlu0 %v3383_v58, %s8887_s11  ;;  %2499 = vrot.lane.b32.xlu1 %v2355_v13, %s8887_s11  ;;  %v2871_v58 = vld [vmem:[#allocation2 + $0xbc] sm:$0xf] }
 0x300   :  { %2505 = vrot.lane.b32.xlu2 %v2358_v55, %s8887_s11 }
 0x302   :  { %v3507_v1 = vpop.permute.xlu2 %3506 }
 0x303   :  { %3692 = vst.msk [vmem:[#allocation3 + $0x84] sm:$0xf] %vm2145_vm3, %v3507_v1  ;;  %v3386_v1 = vld [vmem:[#allocation2 + $0x108] sm:$0xf] }
 0x306   :  { %v10508_v9 = vpop.f32.mrf.mxu2 }
 0x307   :  { %12066 = vst [vmem:[#allocation37_spill] sm:$0xff] %v10508_v9  ;;  %3016 = vrot.lane.b32.xlu0 %v2870_v27, %s8887_s11  ;;  %3014 = vrot.lane.b32.xlu1 %v2869_v50, %s8887_s11  ;;  %v8574_v27 = vld [vmem:[#allocation3 + $0x20] sm:$0xf0]  ;;  %v8745_v50 = vld [vmem:[%s12016_s3 + $0x78] sm:$0xff]  ;;  %v2365_v9 = vld [vmem:[#allocation2 + $0xc8] sm:$0xf] }
 0x308   :  { %3530 = vrot.lane.b32.xlu2 %v3384_v49, %s8887_s11  ;;  %v7384_v49 = vld [vmem:[#allocation3 + $0x10] sm:$0xf]  ;;  %5425 = vmatpush.bf16.msrb.mxu3 %v8745_v50  ;;  %v2221_v50 = vld [vmem:[#allocation2 + $0x38] sm:$0xf] }
 0x309   :  { %v2070_v39 = vpop.permute.xlu1 %2069  ;;  %2285 = vst.msk [vmem:[#allocation3 + $0xcc] sm:$0xf] %vm40_vm0, %v2221_v50  ;;  %v3253_v50 = vld [vmem:[#allocation2 + $0xf0] sm:$0xf] }
 0x30a   :  { %v2486_v26 = vpop.permute.xlu2 %2485  ;;  %2204 = vst.msk [vmem:[#allocation3 + $0x488] sm:$0xf] %vm2145_vm3, %v2070_v39  ;;  %v8586_v11 = vld [vmem:[#allocation3 + $0x84] sm:$0xf] }
 0x30b   :  { %2668 = vst.msk [vmem:[#allocation3 + $0xb8] sm:$0xf] %vm2145_vm3, %v2486_v26  ;;  %v7441_v51 = vor.u32 %v8586_v11, %v7438_v31  ;;  %5404 = vmatmul.bf16.gmra.mxu2 %v7929_v21  ;;  %v8744_v21 = vld [vmem:[%s12016_s3 + $0x70] sm:$0xff]  ;;  %v7385_v31 = vor.u32 %v8574_v27, %v7384_v49  ;;  %v2874_v49 = vld [vmem:[#allocation2 + $0xc8] sm:$0xf] }
 0x30c   :  { %5426 = vmatpush.bf16.msrb.mxu3 %v8744_v21  ;;  %v10561_v21 = vpop.f32.mrf.mxu0  ;;  %3317 = vst.msk [vmem:[#allocation3 + $0x14c] sm:$0xf] %vm40_vm0, %v3253_v50 }
 0x30d   :  { %5786 = vmatmul.bf16.gmra.mxu1 %v7441_v51 }
 0x30e   :  { %v10516_v47 = vpop.f32.mrf.mxu2 }
 0x30f   :  { %12067 = vst [vmem:[#allocation38_spill] sm:$0xff] %v10516_v47  ;;  %3532 = vrot.lane.b32.xlu0 %v3385_v25, %s8887_s11  ;;  %2503 = vrot.lane.b32.xlu1 %v2357_v0, %s8887_s11  ;;  %v3387_v25 = vld [vmem:[#allocation2 + $0x10c] sm:$0xf]  ;;  %v2359_v0 = vld [vmem:[#allocation2 + $0xb0] sm:$0xf] }
 0x310   :  { %2509 = vrot.lane.b32.xlu2 %v2360_v5, %s8887_s11 }
 0x311   :  { %v2995_v33 = vpop.permute.xlu1 %2994  ;;  %v7948_v36 = vld [vmem:[#allocation3 + $0x488] sm:$0xf] }
 0x312   :  { %v3511_v59 = vpop.permute.xlu2 %3510  ;;  %3179 = vst.msk [vmem:[#allocation3 + $0x94] sm:$0xf] %vm2145_vm3, %v2995_v33  ;;  %v7949_v13 = vor.u32 %v8717_v22, %v7948_v36  ;;  %v2362_v33 = vld [vmem:[#allocation2 + $0xbc] sm:$0xf]  ;;  %v8743_v36 = vld [vmem:[%s12016_s3 + $0x68] sm:$0xff] }
 0x313   :  { %3694 = vst.msk [vmem:[#allocation3 + $0xac] sm:$0xf] %vm2145_vm3, %v3511_v59  ;;  %5427 = vmatpush.bf16.msrb.mxu3 %v8743_v36 }
 0x314   :  { %5409 = vmatmul.bf16.vlgmr.msra.gmra.mxu3 %v7949_v13  ;;  %v7968_v13 = vld [vmem:[#allocation3 + $0x4b0] sm:$0xf] }
 0x316   :  { %v10523_v55 = vpop.f32.mrf.mxu2 }
 0x317   :  { %12068 = vst [vmem:[#allocation39_spill] sm:$0xff] %v10523_v55  ;;  %3020 = vrot.lane.b32.xlu0 %v2872_v10, %s8887_s11  ;;  %3018 = vrot.lane.b32.xlu1 %v2871_v58, %s8887_s11  ;;  %v8742_v58 = vld [vmem:[%s12016_s3 + $0x60] sm:$0xff] }
 0x318   :  { %3534 = vrot.lane.b32.xlu2 %v3386_v1, %s8887_s11  ;;  %5428 = vmatpush.bf16.msrb.mxu3 %v8742_v58  ;;  %v2364_v58 = vld [vmem:[#allocation2 + $0xc4] sm:$0xf] }
 0x319   :  { %v2076_v7 = vpop.permute.xlu0 %2075  ;;  %v2484_v39 = vpop.permute.xlu1 %2483  ;;  %v8588_v26 = vld [vmem:[#allocation3 + $0x90] sm:$0xf0]  ;;  %v3393_v55 = vld [vmem:[#allocation2 + $0x124] sm:$0xf] }
 0x31a   :  { %v2490_v11 = vpop.permute.xlu2 %2489  ;;  %2207 = vst.msk [vmem:[#allocation3 + $0x4c4] sm:$0xf] %vm2145_vm3, %v2076_v7  ;;  %v7437_v51 = vor.u32 %v8588_v26, %v7436_v18  ;;  %v2873_v18 = vld [vmem:[#allocation2 + $0xc4] sm:$0xf]  ;;  %v3388_v7 = vld [vmem:[#allocation2 + $0x110] sm:$0xf] }
 0x31b   :  { %2670 = vst.msk [vmem:[#allocation3 + $0xe0] sm:$0xf] %vm2145_vm3, %v2490_v11  ;;  %8150 = vmatmul.msk.bf16.vlgmr.msrb.gmra.mxu2 %vm5159_vm4, %v7385_v31  ;;  %v8741_v26 = vld [vmem:[%s12016_s3 + $0x58] sm:$0xff] }
 0x31c   :  { %2667 = vst.msk [vmem:[#allocation3 + $0xa4] sm:$0xf] %vm2145_vm3, %v2484_v39  ;;  %5617 = vmatmul.bf16.gmra.mxu0 %v7437_v51  ;;  %v8579_v39 = vld [vmem:[#allocation3 + $0x48] sm:$0xf0]  ;;  %v7404_v31 = vld [vmem:[#allocation3 + $0x38] sm:$0xf]  ;;  %5429 = vmatpush.bf16.msrb.mxu3 %v8741_v26 }
 0x31d   :  { %v2223_v26 = vld [vmem:[#allocation2 + $0x40] sm:$0xf] }
 0x31e   :  { %v10539_v5 = vpop.f32.mrf.mxu2  ;;  %2287 = vst.msk [vmem:[#allocation3 + $0xf4] sm:$0xf] %vm40_vm0, %v2223_v26  ;;  %v2363_v26 = vld [vmem:[#allocation2 + $0xc0] sm:$0xf] }
 0x31f   :  { %12069 = vst [vmem:[#allocation40_spill] sm:$0xff] %v10539_v5  ;;  %3536 = vrot.lane.b32.xlu0 %v3387_v25, %s8887_s11  ;;  %2507 = vrot.lane.b32.xlu1 %v2359_v0, %s8887_s11  ;;  %v8740_v25 = vld [vmem:[%s12016_s3 + $0x50] sm:$0xff] }
 0x320   :  { %2513 = vrot.lane.b32.xlu2 %v2362_v33, %s8887_s11  ;;  %v7405_v33 = vor.u32 %v8579_v39, %v7404_v31  ;;  %5430 = vmatpush.bf16.msrb.mxu3 %v8740_v25  ;;  %v2875_v31 = vld [vmem:[#allocation2 + $0xcc] sm:$0xf]  ;;  %v3390_v25 = vld [vmem:[#allocation2 + $0x118] sm:$0xf] }
 0x321   :  { %v2997_v22 = vpop.permute.xlu0 %2996  ;;  %v2999_v59 = vpop.permute.xlu1 %2998  ;;  %v8722_v10 = vld [vmem:[#allocation3 + $0x4c0] sm:$0xf0] }
 0x322   :  { %v3515_v1 = vpop.permute.xlu2 %3514  ;;  %3180 = vst.msk [vmem:[#allocation3 + $0xa8] sm:$0xf] %vm2145_vm3, %v2997_v22  ;;  %v7969_v27 = vor.u32 %v8722_v10, %v7968_v13  ;;  %v2361_v13 = vld [vmem:[#allocation2 + $0xb8] sm:$0xf] }
 0x323   :  { %3696 = vst.msk [vmem:[#allocation3 + $0xd4] sm:$0xf] %vm2145_vm3, %v3515_v1  ;;  %v8739_v1 = vld [vmem:[%s12016_s3 + $0x48] sm:$0xff] }
 0x324   :  { %3181 = vst.msk [vmem:[#allocation3 + $0xbc] sm:$0xf] %vm2145_vm3, %v2999_v59  ;;  %5414 = vmatmul.bf16.gmra.mxu3 %v7969_v27  ;;  %v3389_v59 = vld [vmem:[#allocation2 + $0x114] sm:$0xf]  ;;  %v10577_v27 = vpop.f32.mrf.mxu1 }
 0x325   :  { %5431 = vmatpush.bf16.msrb.mxu3 %v8739_v1 }
 0x326   :  { %v10554_v60 = vpop.f32.mrf.mxu2 }
 0x327   :  { %12070 = vst [vmem:[#allocation41_spill] sm:$0xff] %v10554_v60  ;;  %3024 = vrot.lane.b32.xlu0 %v2874_v49, %s8887_s11  ;;  %3022 = vrot.lane.b32.xlu1 %v2873_v18, %s8887_s11  ;;  %v8738_v18 = vld [vmem:[%s12016_s3 + $0x40] sm:$0xff]  ;;  %v3766_v60 = vld [vmem:[#allocation2 + $0xec] sm:$0xf] }
 0x328   :  { %3538 = vrot.lane.b32.xlu2 %v3388_v7, %s8887_s11  ;;  %v10584_v7 = vpop.f32.mrf.mxu0  ;;  %3830 = vst.msk [vmem:[#allocation3 + $0x13c] sm:$0xf] %vm40_vm0, %v3766_v60  ;;  %v2881_v60 = vld [vmem:[#allocation2 + $0xe4] sm:$0xf] }
 0x329   :  { %v2078_v11 = vpop.permute.xlu0 %2077  ;;  %v7456_v51 = vld [vmem:[#allocation3 + $0xa8] sm:$0xf]  ;;  %5432 = vmatpush.bf16.msrb.mxu3 %v8738_v18 }
 0x32a   :  { %v2494_v0 = vpop.permute.xlu2 %2493  ;;  %2208 = vst.msk [vmem:[#allocation3 + $0x4d8] sm:$0xf] %vm2145_vm3, %v2078_v11  ;;  %v2876_v11 = vld [vmem:[#allocation2 + $0xd0] sm:$0xf] }
 0x32b   :  { %2672 = vst.msk [vmem:[#allocation3 + $0x108] sm:$0xf] %vm2145_vm3, %v2494_v0  ;;  %v8593_v36 = vld [vmem:[#allocation3 + $0xb8] sm:$0xf0]  ;;  %8151 = vmatmul.msk.bf16.gmra.mxu2 %vm5159_vm4, %v7405_v33  ;;  %v8584_v0 = vld [vmem:[#allocation3 + $0x70] sm:$0xf0] }
 0x32c   :  { %v7457_v22 = vor.u32 %v8593_v36, %v7456_v51  ;;  %v7424_v36 = vld [vmem:[#allocation3 + $0x60] sm:$0xf] }
 0x32d   :  { %v7425_v50 = vor.u32 %v8584_v0, %v7424_v36 }
 0x32e   :  { %5622 = vmatmul.bf16.gmra.mxu0 %v7457_v22  ;;  %v10570_v10 = vpop.f32.mrf.mxu2 }
 0x32f   :  { %12071 = vst [vmem:[#allocation42_spill] sm:$0xff] %v10570_v10  ;;  %3540 = vrot.lane.b32.xlu0 %v3389_v59, %s8887_s11  ;;  %2511 = vrot.lane.b32.xlu1 %v2361_v13, %s8887_s11  ;;  %v8591_v59 = vld [vmem:[#allocation3 + $0xac] sm:$0xf]  ;;  %v8609_v2 = vld [vmem:[#allocation3 + $0x138] sm:$0xf0] }
 0x330   :  { %2517 = vrot.lane.b32.xlu2 %v2364_v58, %s8887_s11  ;;  %v10594_v58 = vpop.f32.mrf.mxu1  ;;  %v10598_v18 = vpop.f32.mrf.mxu0 }
 0x331   :  { %v3513_v49 = vpop.permute.xlu0 %3512  ;;  %v7988_v36 = vld [vmem:[#allocation3 + $0x4d8] sm:$0xf] }
 0x332   :  { %v3519_v39 = vpop.permute.xlu2 %3518  ;;  %3695 = vst.msk [vmem:[#allocation3 + $0xc0] sm:$0xf] %vm2145_vm3, %v3513_v49 }
 0x333   :  { %3698 = vst.msk [vmem:[#allocation3 + $0xfc] sm:$0xf] %vm2145_vm3, %v3519_v39  ;;  %v3391_v39 = vld [vmem:[#allocation2 + $0x11c] sm:$0xf] }
 0x336   :  { %v10589_v51 = vpop.f32.mrf.mxu2 }
 0x337   :  { %12072 = vst [vmem:[#allocation43_spill] sm:$0xff] %v10589_v51  ;;  %3028 = vrot.lane.b32.xlu0 %v2876_v11, %s8887_s11  ;;  %3026 = vrot.lane.b32.xlu1 %v2875_v31, %s8887_s11  ;;  %v2366_v31 = vld [vmem:[#allocation2 + $0xcc] sm:$0xf]  ;;  %v2878_v51 = vld [vmem:[#allocation2 + $0xd8] sm:$0xf] }
 0x338   :  { %3542 = vrot.lane.b32.xlu2 %v3390_v25, %s8887_s11 }
 0x339   :  { %v3001_v33 = vpop.permute.xlu0 %3000  ;;  %v2080_v22 = vpop.permute.xlu1 %2079  ;;  %v7458_v13 = vld [vmem:[#allocation3 + $0xbc] sm:$0xf0] }
 0x33a   :  { %v2498_v1 = vpop.permute.xlu2 %2497  ;;  %3182 = vst.msk [vmem:[#allocation3 + $0xd0] sm:$0xf] %vm2145_vm3, %v3001_v33  ;;  %v7461_v49 = vor.u32 %v8591_v59, %v7458_v13  ;;  %v2225_v59 = vld [vmem:[#allocation2 + $0x48] sm:$0xf]  ;;  %v10609_v13 = vpop.f32.mrf.mxu1 }
 0x33b   :  { %2674 = vst.msk [vmem:[#allocation3 + $0x130] sm:$0xf] %vm2145_vm3, %v2498_v1  ;;  %8152 = vmatmul.msk.bf16.gmra.mxu2 %vm5159_vm4, %v7425_v50  ;;  %v10613_v50 = vpop.f32.mrf.mxu0 }
 0x33c   :  { %2209 = vst.msk [vmem:[#allocation3 + $0x4ec] sm:$0xf] %vm2145_vm3, %v2080_v22  ;;  %5791 = vmatmul.bf16.gmra.mxu1 %v7461_v49  ;;  %v2877_v49 = vld [vmem:[#allocation2 + $0xd4] sm:$0xf] }
 0x33d   :  { %2289 = vst.msk [vmem:[#allocation3 + $0x11c] sm:$0xf] %vm40_vm0, %v2225_v59 }
 0x33e   :  { %v10602_v11 = vpop.f32.mrf.mxu2 }
 0x33f   :  { %12073 = vst [vmem:[#allocation44_spill] sm:$0xff] %v10602_v11  ;;  %3544 = vrot.lane.b32.xlu0 %v3391_v39, %s8887_s11  ;;  %2515 = vrot.lane.b32.xlu1 %v2363_v26, %s8887_s11  ;;  %v8589_v26 = vld [vmem:[#allocation3 + $0x98] sm:$0xf0]  ;;  %v2367_v11 = vld [vmem:[#allocation2 + $0xd0] sm:$0xf] }
 0x340   :  { %2521 = vrot.lane.b32.xlu2 %v2366_v31, %s8887_s11 }
 0x341   :  { %v3517_v25 = vpop.permute.xlu0 %3516  ;;  %v2488_v0 = vpop.permute.xlu1 %2487 }
 0x342   :  { %v3523_v33 = vpop.permute.xlu2 %3522  ;;  %3697 = vst.msk [vmem:[#allocation3 + $0xe8] sm:$0xf] %vm2145_vm3, %v3517_v25  ;;  %v7444_v25 = vld [vmem:[#allocation3 + $0x88] sm:$0xf] }
 0x343   :  { %3700 = vst.msk [vmem:[#allocation3 + $0x124] sm:$0xf] %vm2145_vm3, %v3523_v33  ;;  %v8727_v22 = vld [vmem:[#allocation3 + $0x4e8] sm:$0xf0]  ;;  %v8596_v33 = vld [vmem:[#allocation3 + $0xd4] sm:$0xf]  ;;  %v7445_v59 = vor.u32 %v8589_v26, %v7444_v25  ;;  %v10633_v26 = vpop.f32.mrf.mxu0 }
 0x344   :  { %2669 = vst.msk [vmem:[#allocation3 + $0xcc] sm:$0xf] %vm2145_vm3, %v2488_v0  ;;  %v7989_v1 = vor.u32 %v8727_v22, %v7988_v36 }
 0x346   :  { %5419 = vmatmul.bf16.gmra.mxu3 %v7989_v1  ;;  %v10615_v39 = vpop.f32.mrf.mxu2 }
 0x347   :  { %12074 = vst [vmem:[#allocation45_spill] sm:$0xff] %v10615_v39  ;;  %3030 = vrot.lane.b32.xlu1 %v2877_v49, %s8887_s11  ;;  %956 = vrot.lane.b32.xlu0 %v10561_v21, %s8887_s11  ;;  %v10626_v49 = vpop.f32.mrf.mxu1 }
 0x348   :  { %1276 = vrot.lane.b32.xlu2 %v10577_v27, %s8887_s11 }
 0x349   :  { %v3005_v31 = vpop.permute.xlu0 %3004  ;;  %v3003_v0 = vpop.permute.xlu1 %3002  ;;  %v7478_v36 = vld [vmem:[#allocation3 + $0xe4] sm:$0xf0] }
 0x34a   :  { %v2502_v22 = vpop.permute.xlu2 %2501  ;;  %3184 = vst.msk [vmem:[#allocation3 + $0xf8] sm:$0xf] %vm2145_vm3, %v3005_v31  ;;  %v7481_v1 = vor.u32 %v8596_v33, %v7478_v36  ;;  %v8570_v33 = vld [vmem:[#allocation3 + $0x4] sm:$0xf] }
 0x34b   :  { %2676 = vst.msk [vmem:[#allocation3 + $0x158] sm:$0xf] %vm2145_vm3, %v2502_v22  ;;  %8153 = vmatmul.msk.bf16.gmra.mxu2 %vm5159_vm4, %v7445_v59  ;;  %v7476_v22 = vld [vmem:[#allocation3 + $0xd0] sm:$0xf]  ;;  %v10637_v59 = vpop.f32.mrf.mxu3 }
 0x34c   :  { %3183 = vst.msk [vmem:[#allocation3 + $0xe4] sm:$0xf] %vm2145_vm3, %v3003_v0  ;;  %5796 = vmatmul.bf16.gmra.mxu1 %v7481_v1  ;;  %v7370_v0 = vld [vmem:[#allocation3 + $0x14] sm:$0xf0]  ;;  %v3254_v1 = vld [vmem:[#allocation2 + $0xf4] sm:$0xf] }
 0x34d   :  { %v7373_v57 = vor.u32 %v8570_v33, %v7370_v0  ;;  %3318 = vst.msk [vmem:[#allocation3 + $0x160] sm:$0xf] %vm40_vm0, %v3254_v1  ;;  %v7464_v33 = vld [vmem:[#allocation3 + $0xb0] sm:$0xf] }
 0x34e   :  { %v10628_v17 = vpop.f32.mrf.mxu2 }
 0x34f   :  { %12075 = vst [vmem:[#allocation46_spill] sm:$0xff] %v10628_v17  ;;  %2519 = vrot.lane.b32.xlu1 %v2365_v9, %s8887_s11  ;;  %1278 = vrot.lane.b32.xlu0 %v10594_v58, %s8887_s11 }
 0x350   :  { %3034 = vrot.lane.b32.xlu2 %v2879_v38, %s8887_s11  ;;  %v3392_v38 = vld [vmem:[#allocation2 + $0x120] sm:$0xf] }
 0x351   :  { %v3521_v31 = vpop.permute.xlu0 %3520  ;;  %v2492_v25 = vpop.permute.xlu1 %2491 }
 0x352   :  { %v3527_v36 = vpop.permute.xlu2 %3526  ;;  %3699 = vst.msk [vmem:[#allocation3 + $0x110] sm:$0xf] %vm2145_vm3, %v3521_v31  ;;  %v8594_v31 = vld [vmem:[#allocation3 + $0xc0] sm:$0xf0] }
 0x353   :  { %3702 = vst.msk [vmem:[#allocation3 + $0x14c] sm:$0xf] %vm2145_vm3, %v3527_v36  ;;  %v8598_v9 = vld [vmem:[#allocation3 + $0xe0] sm:$0xf0]  ;;  %v10647_v36 = vpop.f32.mrf.mxu1  ;;  %v7465_v1 = vor.u32 %v8594_v31, %v7464_v33  ;;  %v8575_v33 = vld [vmem:[#allocation3 + $0x2c] sm:$0xf] }
 0x354   :  { %2671 = vst.msk [vmem:[#allocation3 + $0xf4] sm:$0xf] %vm2145_vm3, %v2492_v25  ;;  %v7477_v17 = vor.u32 %v8598_v9, %v7476_v22  ;;  %v8601_v22 = vld [vmem:[#allocation3 + $0xfc] sm:$0xf] }
 0x356   :  { %5433 = vmatmul.bf16.vlgmr.msrb.gmra.mxu3 %v7373_v57  ;;  %5627 = vmatmul.bf16.gmra.mxu0 %v7477_v17  ;;  %v10642_v39 = vpop.f32.mrf.mxu2  ;;  %v10650_v17 = vpop.f32.mrf.mxu0 }
 0x357   :  { %12076 = vst [vmem:[#allocation47_spill] sm:$0xff] %v10642_v39  ;;  %3546 = vrot.lane.b32.xlu0 %v3392_v38, %s8887_s11  ;;  %958 = vrot.lane.b32.xlu1 %v10584_v7, %s8887_s11  ;;  %v2368_v39 = vld [vmem:[#allocation2 + $0xd4] sm:$0xf] }
 0x358   :  { %2523 = vrot.lane.b32.xlu2 %v2367_v11, %s8887_s11  ;;  %v10656_v11 = vpop.f32.mrf.mxu3 }
 0x359   :  { %v3009_v25 = vpop.permute.xlu0 %3008  ;;  %v3007_v0 = vpop.permute.xlu1 %3006  ;;  %v7498_v57 = vld [vmem:[#allocation3 + $0x10c] sm:$0xf0]  ;;  %12077 = vst [vmem:[#allocation48_spill] sm:$0xff] %v10656_v11 }
 0x35a   :  { %v2506_v9 = vpop.permute.xlu2 %2505  ;;  %3186 = vst.msk [vmem:[#allocation3 + $0x120] sm:$0xf] %vm2145_vm3, %v3009_v25  ;;  %v7501_v38 = vor.u32 %v8601_v22, %v7498_v57  ;;  %v7390_v57 = vld [vmem:[#allocation3 + $0x3c] sm:$0xf0] }
 0x35b   :  { %2678 = vst.msk [vmem:[#allocation3 + $0x180] sm:$0xf] %vm2145_vm3, %v2506_v9  ;;  %8154 = vmatmul.msk.bf16.gmra.mxu2 %vm5159_vm4, %v7465_v1  ;;  %v10664_v22 = vpop.f32.mrf.mxu1  ;;  %v7496_v9 = vld [vmem:[#allocation3 + $0xf8] sm:$0xf] }
 0x35c   :  { %3185 = vst.msk [vmem:[#allocation3 + $0x10c] sm:$0xf] %vm2145_vm3, %v3007_v0  ;;  %5801 = vmatmul.bf16.gmra.mxu1 %v7501_v38 }
 0x35e   :  { %v10658_v10 = vpop.f32.mrf.mxu2  ;;  %v10668_v38 = vpop.f32.mrf.mxu0 }
 0x35f   :  { %12078 = vst [vmem:[#allocation49_spill] sm:$0xff] %v10658_v10  ;;  %2525 = vrot.lane.b32.xlu0 %v2368_v39, %s8887_s11  ;;  %3032 = vrot.lane.b32.xlu1 %v2878_v51, %s8887_s11  ;;  %v7393_v51 = vor.u32 %v8575_v33, %v7390_v57  ;;  %v3765_v10 = vld [vmem:[#allocation2 + $0xe8] sm:$0xf]  ;;  %v7484_v57 = vld [vmem:[#allocation3 + $0xd8] sm:$0xf] }
 0x360   :  { %962 = vrot.lane.b32.xlu2 %v10613_v50, %s8887_s11  ;;  %v10671_v5 = vpop.f32.mrf.mxu3  ;;  %3829 = vst.msk [vmem:[#allocation3 + $0x128] sm:$0xf] %vm40_vm0, %v3765_v10 }
 0x361   :  { %v3525_v31 = vpop.permute.xlu0 %3524  ;;  %v2496_v25 = vpop.permute.xlu1 %2495  ;;  %12079 = vst [vmem:[#allocation50_spill] sm:$0xff] %v10671_v5 }
 0x362   :  { %v3531_v0 = vpop.permute.xlu2 %3530  ;;  %3701 = vst.msk [vmem:[#allocation3 + $0x138] sm:$0xf] %vm2145_vm3, %v3525_v31 }
 0x363   :  { %3704 = vst.msk [vmem:[#allocation3 + $0x174] sm:$0xf] %vm2145_vm3, %v3531_v0  ;;  %v8603_v1 = vld [vmem:[#allocation3 + $0x108] sm:$0xf0]  ;;  %v2880_v0 = vld [vmem:[#allocation2 + $0xe0] sm:$0xf]  ;;  %v10683_v47 = vpop.f32.mrf.mxu1 }
 0x364   :  { %2673 = vst.msk [vmem:[#allocation3 + $0x11c] sm:$0xf] %vm2145_vm3, %v2496_v25  ;;  %v7497_v39 = vor.u32 %v8603_v1, %v7496_v9  ;;  %v8599_v25 = vld [vmem:[#allocation3 + $0xe8] sm:$0xf0]  ;;  %v8606_v1 = vld [vmem:[#allocation3 + $0x124] sm:$0xf] }
 0x365   :  { %v7485_v10 = vor.u32 %v8599_v25, %v7484_v57  ;;  %v3395_v25 = vld [vmem:[#allocation2 + $0x12c] sm:$0xf] }
 0x366   :  { %5438 = vmatmul.bf16.gmra.mxu3 %v7393_v51  ;;  %5632 = vmatmul.bf16.gmra.mxu0 %v7497_v39  ;;  %v10674_v31 = vpop.f32.mrf.mxu2 }
 0x367   :  { %12080 = vst [vmem:[#allocation51_spill] sm:$0xff] %v10674_v31  ;;  %1280 = vrot.lane.b32.xlu0 %v10609_v13, %s8887_s11  ;;  %3548 = vrot.lane.b32.xlu1 %v3393_v55, %s8887_s11  ;;  %v10687_v55 = vpop.f32.mrf.mxu0  ;;  %v7524_v35 = vld [vmem:[#allocation3 + $0x128] sm:$0xf] }
 0x368   :  { %3036 = vrot.lane.b32.xlu2 %v2880_v0, %s8887_s11  ;;  %12081 = vst [vmem:[#allocation52_spill] sm:$0xff] %v10687_v55  ;;  %v7525_v8 = vor.u32 %v8609_v2, %v7524_v35  ;;  %v3397_v35 = vld [vmem:[#allocation2 + $0x134] sm:$0xf] }
 0x369   :  { %v3013_v33 = vpop.permute.xlu0 %3012  ;;  %v3011_v9 = vpop.permute.xlu1 %3010  ;;  %v7518_v51 = vld [vmem:[#allocation3 + $0x134] sm:$0xf0] }
 0x36a   :  { %v2510_v39 = vpop.permute.xlu2 %2509  ;;  %3188 = vst.msk [vmem:[#allocation3 + $0x148] sm:$0xf] %vm2145_vm3, %v3013_v33  ;;  %v7521_v31 = vor.u32 %v8606_v1, %v7518_v51  ;;  %v10694_v33 = vpop.f32.mrf.mxu3  ;;  %v8580_v51 = vld [vmem:[#allocation3 + $0x54] sm:$0xf] }
 0x36b   :  { %2680 = vst.msk [vmem:[#allocation3 + $0x1a8] sm:$0xf] %vm2145_vm3, %v2510_v39  ;;  %8155 = vmatmul.msk.bf16.gmra.mxu2 %vm5159_vm4, %v7485_v10  ;;  %v7516_v39 = vld [vmem:[#allocation3 + $0x120] sm:$0xf]  ;;  %v10700_v34 = vpop.f32.mrf.mxu1 }
 0x36c   :  { %3187 = vst.msk [vmem:[#allocation3 + $0x134] sm:$0xf] %vm2145_vm3, %v3011_v9  ;;  %5806 = vmatmul.bf16.gmra.mxu1 %v7521_v31  ;;  %v7410_v31 = vld [vmem:[#allocation3 + $0x64] sm:$0xf0] }
 0x36d   :  { %12083 = vst [vmem:[#allocation54_spill] sm:$0xff] %v10694_v33  ;;  %v7584_v33 = vld [vmem:[#allocation3 + $0x1a0] sm:$0xf] }
 0x36e   :  { %v10689_v0 = vpop.f32.mrf.mxu2  ;;  %12084 = vst [vmem:[#allocation55_spill] sm:$0xff] %v10700_v34  ;;  %v7585_v5 = vor.u32 %v8624_v42, %v7584_v33  ;;  %v10834_v42 = vld [vmem:[%s12017_s2] ss:$0 sm:$0xff] }
 0x36f   :  { %12082 = vst [vmem:[#allocation53_spill] sm:$0xff] %v10689_v0  ;;  %3038 = vrot.lane.b32.xlu0 %v2881_v60, %s8887_s11  ;;  %960 = vrot.lane.b32.xlu1 %v10598_v18, %s8887_s11  ;;  %v7413_v60 = vor.u32 %v8580_v51, %v7410_v31  ;;  %v7504_v51 = vld [vmem:[#allocation3 + $0x100] sm:$0xf] }
 0x370   :  { %3552 = vrot.lane.b32.xlu2 %v3395_v25, %s8887_s11  ;;  %v2369_v25 = vld [vmem:[#allocation2 + $0xd8] sm:$0xf] }
 0x371   :  { %v3529_v57 = vpop.permute.xlu0 %3528  ;;  %v2500_v1 = vpop.permute.xlu1 %2499 }
 0x372   :  { %v3535_v9 = vpop.permute.xlu2 %3534  ;;  %3703 = vst.msk [vmem:[#allocation3 + $0x160] sm:$0xf] %vm2145_vm3, %v3529_v57  ;;  %v8604_v57 = vld [vmem:[#allocation3 + $0x110] sm:$0xf0] }
 0x373   :  { %3706 = vst.msk [vmem:[#allocation3 + $0x19c] sm:$0xf] %vm2145_vm3, %v3535_v9  ;;  %v8608_v10 = vld [vmem:[#allocation3 + $0x130] sm:$0xf0]  ;;  %v10707_v9 = vpop.f32.mrf.mxu0  ;;  %v10722_v4 = vpop.f32.mrf.mxu1 }
 0x374   :  { %2675 = vst.msk [vmem:[#allocation3 + $0x144] sm:$0xf] %vm2145_vm3, %v2500_v1  ;;  %v7517_v0 = vor.u32 %v8608_v10, %v7516_v39  ;;  %v8611_v39 = vld [vmem:[#allocation3 + $0x14c] sm:$0xf] }
 0x375   :  { %12088 = vst [vmem:[#allocation59_spill] sm:$0xff] %v10722_v4 }
 0x376   :  { %5443 = vmatmul.bf16.gmra.mxu3 %v7413_v60  ;;  %5637 = vmatmul.bf16.gmra.mxu0 %v7517_v0  ;;  %v10702_v40 = vpop.f32.mrf.mxu2  ;;  %v10711_v0 = vpop.f32.mrf.mxu3 }
 0x377   :  { %12085 = vst [vmem:[#allocation56_spill] sm:$0xff] %v10702_v40  ;;  %2527 = vrot.lane.b32.xlu0 %v2369_v25, %s8887_s11  ;;  %1282 = vrot.lane.b32.xlu1 %v10626_v49, %s8887_s11  ;;  %v7505_v25 = vor.u32 %v8604_v57, %v7504_v51  ;;  %v7430_v51 = vld [vmem:[#allocation3 + $0x8c] sm:$0xf0] }
 0x378   :  { %964 = vrot.lane.b32.xlu2 %v10633_v26, %s8887_s11  ;;  %12086 = vst [vmem:[#allocation57_spill] sm:$0xff] %v10711_v0 }
 0x379   :  { %v3017_v1 = vpop.permute.xlu0 %3016  ;;  %v3015_v31 = vpop.permute.xlu1 %3014  ;;  %v7538_v10 = vld [vmem:[#allocation3 + $0x15c] sm:$0xf0] }
 0x37a   :  { %v2514_v60 = vpop.permute.xlu2 %2513  ;;  %3190 = vst.msk [vmem:[#allocation3 + $0x170] sm:$0xf] %vm2145_vm3, %v3017_v1  ;;  %v7541_v40 = vor.u32 %v8611_v39, %v7538_v10 }
 0x37b   :  { %2682 = vst.msk [vmem:[#allocation3 + $0x1d0] sm:$0xf] %vm2145_vm3, %v2514_v60  ;;  %8156 = vmatmul.msk.bf16.gmra.mxu2 %vm5159_vm4, %v7505_v25 }
 0x37c   :  { %3189 = vst.msk [vmem:[#allocation3 + $0x15c] sm:$0xf] %vm2145_vm3, %v3015_v31  ;;  %5811 = vmatmul.bf16.gmra.mxu1 %v7541_v40  ;;  %v8585_v40 = vld [vmem:[#allocation3 + $0x7c] sm:$0xf]  ;;  %v7536_v31 = vld [vmem:[#allocation3 + $0x148] sm:$0xf] }
 0x37d   :  { %v7433_v25 = vor.u32 %v8585_v40, %v7430_v51  ;;  %v8616_v51 = vld [vmem:[#allocation3 + $0x174] sm:$0xf] }
 0x37e   :  { %v10717_v32 = vpop.f32.mrf.mxu2  ;;  %v10730_v60 = vpop.f32.mrf.mxu3 }
 0x37f   :  { %12087 = vst [vmem:[#allocation58_spill] sm:$0xff] %v10717_v32  ;;  %3550 = vrot.lane.b32.xlu1 %v3394_v29, %s8887_s11  ;;  %966 = vrot.lane.b32.xlu0 %v10650_v17, %s8887_s11  ;;  %v10728_v29 = vpop.f32.mrf.mxu0 }
 0x380   :  { %1286 = vrot.lane.b32.xlu2 %v10664_v22, %s8887_s11  ;;  %12089 = vst [vmem:[#allocation60_spill] sm:$0xff] %v10728_v29 }
 0x381   :  { %v3533_v57 = vpop.permute.xlu0 %3532  ;;  %v2504_v1 = vpop.permute.xlu1 %2503 }
 0x382   :  { %v3539_v39 = vpop.permute.xlu2 %3538  ;;  %3705 = vst.msk [vmem:[#allocation3 + $0x188] sm:$0xf] %vm2145_vm3, %v3533_v57 }
 0x383   :  { %3708 = vst.msk [vmem:[#allocation3 + $0x1c4] sm:$0xf] %vm2145_vm3, %v3539_v39  ;;  %v8613_v10 = vld [vmem:[#allocation3 + $0x158] sm:$0xf0]  ;;  %v3396_v39 = vld [vmem:[#allocation2 + $0x130] sm:$0xf] }
 0x384   :  { %2677 = vst.msk [vmem:[#allocation3 + $0x16c] sm:$0xf] %vm2145_vm3, %v2504_v1  ;;  %v7537_v32 = vor.u32 %v8613_v10, %v7536_v31  ;;  %v10738_v31 = vpop.f32.mrf.mxu1 }
 0x386   :  { %5448 = vmatmul.bf16.gmra.mxu3 %v7433_v25  ;;  %5642 = vmatmul.bf16.gmra.mxu0 %v7537_v32  ;;  %v10733_v57 = vpop.f32.mrf.mxu2  ;;  %v10746_v2 = vpop.f32.mrf.mxu3 }
 0x387   :  { %12090 = vst [vmem:[#allocation61_spill] sm:$0xff] %v10733_v57  ;;  %2529 = vrot.lane.b32.xlu1 %v2370_v52, %s8887_s11  ;;  %3040 = vrot.lane.b32.xlu0 %v2882_v45, %s8887_s11  ;;  %v2372_v52 = vld [vmem:[#allocation2 + $0xf4] sm:$0xf]  ;;  %v10744_v45 = vpop.f32.mrf.mxu0 }
 0x388   :  { %3554 = vrot.lane.b32.xlu2 %v3396_v39, %s8887_s11  ;;  %12091 = vst [vmem:[#allocation62_spill] sm:$0xff] %v10746_v2  ;;  %v8590_v39 = vld [vmem:[#allocation3 + $0xa4] sm:$0xf] }
 0x389   :  { %v3021_v19 = vpop.permute.xlu0 %3020  ;;  %v3019_v1 = vpop.permute.xlu1 %3018  ;;  %v7558_v40 = vld [vmem:[#allocation3 + $0x184] sm:$0xf0] }
 0x38a   :  { %v2518_v10 = vpop.permute.xlu2 %2517  ;;  %3192 = vst.msk [vmem:[#allocation3 + $0x198] sm:$0xf] %vm2145_vm3, %v3021_v19  ;;  %v7561_v32 = vor.u32 %v8616_v51, %v7558_v40  ;;  %v7450_v51 = vld [vmem:[#allocation3 + $0xb4] sm:$0xf0]  ;;  %v7556_v40 = vld [vmem:[#allocation3 + $0x170] sm:$0xf] }
 0x38b   :  { %2684 = vst.msk [vmem:[#allocation3 + $0x1f8] sm:$0xf] %vm2145_vm3, %v2518_v10  ;;  %8157 = vmatmul.msk.bf16.gmra.mxu2 %vm5159_vm4, %v7525_v8  ;;  %v8626_v16 = vld [vmem:[#allocation3 + $0x1c4] sm:$0xf] }
 0x38c   :  { %3191 = vst.msk [vmem:[#allocation3 + $0x184] sm:$0xf] %vm2145_vm3, %v3019_v1  ;;  %5816 = vmatmul.bf16.gmra.mxu1 %v7561_v32  ;;  %v10756_v32 = vpop.f32.mrf.mxu1 }
 0x38e   :  { %v10748_v25 = vpop.f32.mrf.mxu2  ;;  %v10766_v46 = vpop.f32.mrf.mxu3 }
 0x38f   :  { %12092 = vst [vmem:[#allocation63_spill] sm:$0xff] %v10748_v25  ;;  %1284 = vrot.lane.b32.xlu1 %v10647_v36, %s8887_s11  ;;  %3556 = vrot.lane.b32.xlu0 %v3397_v35, %s8887_s11  ;;  %v7453_v25 = vor.u32 %v8590_v39, %v7450_v51  ;;  %v2883_v35 = vld [vmem:[#allocation2 + $0xec] sm:$0xf]  ;;  %v7544_v39 = vld [vmem:[#allocation3 + $0x150] sm:$0xf] }
 0x390   :  { %2533 = vrot.lane.b32.xlu2 %v2372_v52, %s8887_s11  ;;  %12094 = vst [vmem:[#allocation65_spill] sm:$0xff] %v10766_v46 }
 0x391   :  { %v3537_v19 = vpop.permute.xlu0 %3536  ;;  %v2508_v8 = vpop.permute.xlu1 %2507 }
 0x392   :  { %v3543_v1 = vpop.permute.xlu2 %3542  ;;  %3707 = vst.msk [vmem:[#allocation3 + $0x1b0] sm:$0xf] %vm2145_vm3, %v3537_v19  ;;  %v8614_v19 = vld [vmem:[#allocation3 + $0x160] sm:$0xf0] }
 0x393   :  { %3710 = vst.msk [vmem:[#allocation3 + $0x1ec] sm:$0xf] %vm2145_vm3, %v3543_v1  ;;  %v8618_v10 = vld [vmem:[#allocation3 + $0x180] sm:$0xf0]  ;;  %v10764_v1 = vpop.f32.mrf.mxu0 }
 0x394   :  { %2679 = vst.msk [vmem:[#allocation3 + $0x194] sm:$0xf] %vm2145_vm3, %v2508_v8  ;;  %v7557_v57 = vor.u32 %v8618_v10, %v7556_v40  ;;  %v7545_v10 = vor.u32 %v8614_v19, %v7544_v39  ;;  %v10774_v62 = vpop.f32.mrf.mxu1  ;;  %v8595_v39 = vld [vmem:[#allocation3 + $0xcc] sm:$0xf] }
 0x396   :  { %5453 = vmatmul.bf16.gmra.mxu3 %v7453_v25  ;;  %5647 = vmatmul.bf16.gmra.mxu0 %v7557_v57  ;;  %v10759_v52 = vpop.f32.mrf.mxu2  ;;  %v8621_v25 = vld [vmem:[#allocation3 + $0x19c] sm:$0xf] }
 0x397   :  { %12093 = vst [vmem:[#allocation64_spill] sm:$0xff] %v10759_v52  ;;  %3042 = vrot.lane.b32.xlu1 %v2883_v35, %s8887_s11  ;;  %968 = vrot.lane.b32.xlu0 %v10668_v38, %s8887_s11  ;;  %v2371_v52 = vld [vmem:[#allocation2 + $0xf0] sm:$0xf] }
 0x398   :  { %1288 = vrot.lane.b32.xlu2 %v10683_v47, %s8887_s11 }
 0x399   :  { %v3025_v8 = vpop.permute.xlu0 %3024  ;;  %v3023_v51 = vpop.permute.xlu1 %3022  ;;  %v7578_v57 = vld [vmem:[#allocation3 + $0x1ac] sm:$0xf0] }
 0x39a   :  { %v2522_v40 = vpop.permute.xlu2 %2521  ;;  %3194 = vst.msk [vmem:[#allocation3 + $0x1c0] sm:$0xf] %vm2145_vm3, %v3025_v8  ;;  %v7581_v35 = vor.u32 %v8621_v25, %v7578_v57  ;;  %v7470_v57 = vld [vmem:[#allocation3 + $0xdc] sm:$0xf0]  ;;  %v8631_v46 = vld [vmem:[#allocation3 + $0x1ec] sm:$0xf] }
 0x39b   :  { %2686 = vst.msk [vmem:[#allocation3 + $0x220] sm:$0xf] %vm2145_vm3, %v2522_v40  ;;  %8158 = vmatmul.msk.bf16.gmra.mxu2 %vm5159_vm4, %v7545_v10  ;;  %v10782_v25 = vpop.f32.mrf.mxu0  ;;  %v10787_v40 = vpop.f32.mrf.mxu3 }
 0x39c   :  { %3193 = vst.msk [vmem:[#allocation3 + $0x1ac] sm:$0xf] %vm2145_vm3, %v3023_v51  ;;  %5821 = vmatmul.bf16.gmra.mxu1 %v7581_v35  ;;  %v7473_v35 = vor.u32 %v8595_v39, %v7470_v57  ;;  %v10794_v43 = vpop.f32.mrf.mxu1 }
 0x39d   :  { %12095 = vst [vmem:[#allocation66_spill] sm:$0xff] %v10787_v40  ;;  %v7564_v40 = vld [vmem:[#allocation3 + $0x178] sm:$0xf] }
 0x39e   :  { %v10776_v37 = vpop.f32.mrf.mxu2 }
 0x39f   :  { %2531 = vrot.lane.b32.xlu1 %v2371_v52, %s8887_s11  ;;  %1290 = vrot.lane.b32.xlu0 %v10700_v34, %s8887_s11  ;;  %v7576_v52 = vld [vmem:[#allocation3 + $0x198] sm:$0xf] }
 0x3a0   :  { %3046 = vrot.lane.b32.xlu2 %v2885_v48, %s8887_s11 }
 0x3a1   :  { %v3541_v19 = vpop.permute.xlu0 %3540  ;;  %v2512_v8 = vpop.permute.xlu1 %2511 }
 0x3a2   :  { %v10784_v51 = vpop.permute.xlu2 %1276  ;;  %3709 = vst.msk [vmem:[#allocation3 + $0x1d8] sm:$0xf] %vm2145_vm3, %v3541_v19 }
 0x3a3   :  { %2681 = vst.msk [vmem:[#allocation3 + $0x1bc] sm:$0xf] %vm2145_vm3, %v2512_v8  ;;  %v8623_v10 = vld [vmem:[#allocation3 + $0x1a8] sm:$0xf0] }
 0x3a4   :  { %v7577_v41 = vor.u32 %v8623_v10, %v7576_v52  ;;  %v10799_v52 = vpop.f32.mrf.mxu0  ;;  %v2884_v10 = vld [vmem:[#allocation2 + $0x100] sm:$0xf] }
 0x3a6   :  { %5458 = vmatmul.bf16.gmra.mxu3 %v7473_v35  ;;  %5652 = vmatmul.bf16.gmra.mxu0 %v7577_v41  ;;  %v10790_v48 = vpop.f32.mrf.mxu2  ;;  %v7565_v41 = vor.u32 %v8619_v63, %v7564_v40  ;;  %v8600_v63 = vld [vmem:[#allocation3 + $0xf4] sm:$0xf] }
 0x3a7   :  { %970 = vrot.lane.b32.xlu1 %v10687_v55, %s8887_s11 }
 0x3a8   :  { %2535 = vrot.lane.b32.xlu2 %v2373_v6, %s8887_s11  ;;  %v10803_v6 = vpop.f32.mrf.mxu3 }
 0x3a9   :  { %v3029_v19 = vpop.permute.xlu0 %3028  ;;  %v3027_v8 = vpop.permute.xlu1 %3026  ;;  %v7598_v56 = vld [vmem:[#allocation3 + $0x1d4] sm:$0xf0]  ;;  %12096 = vst [vmem:[#allocation67_spill] sm:$0xff] %v10803_v6 }
 0x3aa   :  { %v3035_v39 = vpop.permute.xlu2 %3034  ;;  %3196 = vst.msk [vmem:[#allocation3 + $0x1e8] sm:$0xf] %vm2145_vm3, %v3029_v19  ;;  %v7601_v57 = vor.u32 %v8626_v16, %v7598_v56  ;;  %v7490_v19 = vld [vmem:[#allocation3 + $0x104] sm:$0xf0] }
 0x3ab   :  { %3199 = vst.msk [vmem:[#allocation3 + $0x224] sm:$0xf] %vm2145_vm3, %v3035_v39  ;;  %8159 = vmatmul.msk.bf16.gmra.mxu2 %vm5159_vm4, %v7565_v41  ;;  %v10811_v39 = vpop.f32.mrf.mxu1 }
 0x3ac   :  { %3195 = vst.msk [vmem:[#allocation3 + $0x1d4] sm:$0xf] %vm2145_vm3, %v3027_v8  ;;  %5826 = vmatmul.bf16.gmra.mxu1 %v7601_v57  ;;  %v7596_v8 = vld [vmem:[#allocation3 + $0x1c0] sm:$0xf]  ;;  %v7493_v57 = vor.u32 %v8600_v63, %v7490_v19  ;;  %v10815_v6 = vpop.f32.mrf.mxu0 }
 0x3ae   :  { %v10805_v35 = vpop.f32.mrf.mxu2 }
 0x3af   :  { %3044 = vrot.lane.b32.xlu1 %v2884_v10, %s8887_s11 }
 0x3b0   :  { %974 = vrot.lane.b32.xlu2 %v10728_v29, %s8887_s11  ;;  %v10817_v29 = vpop.f32.mrf.mxu3 }
 0x3b1   :  { %v3545_v56 = vpop.permute.xlu0 %3544  ;;  %v2516_v16 = vpop.permute.xlu1 %2515  ;;  %12097 = vst [vmem:[#allocation68_spill] sm:$0xff] %v10817_v29 }
 0x3b2   :  { %v2524_v40 = vpop.permute.xlu2 %2523  ;;  %3711 = vst.msk [vmem:[#allocation3 + $0x200] sm:$0xf] %vm2145_vm3, %v3545_v56 }
 0x3b3   :  { %2687 = vst.msk [vmem:[#allocation3 + $0x234] sm:$0xf] %vm2145_vm3, %v2524_v40  ;;  %v8628_v41 = vld [vmem:[#allocation3 + $0x1d0] sm:$0xf0] }
 0x3b4   :  { %2683 = vst.msk [vmem:[#allocation3 + $0x1e4] sm:$0xf] %vm2145_vm3, %v2516_v16  ;;  %v7597_v10 = vor.u32 %v8628_v41, %v7596_v8  ;;  %v10825_v8 = vpop.f32.mrf.mxu1  ;;  %v1420_v41 = vmax.f32 %v10577_v27, %v10784_v51  ;;  %v8605_v27 = vld [vmem:[#allocation3 + $0x11c] sm:$0xf]  ;;  %v7616_v51 = vld [vmem:[#allocation3 + $0x1e8] sm:$0xf] }
 0x3b6   :  { %5463 = vmatmul.bf16.gmra.mxu3 %v7493_v57  ;;  %5657 = vmatmul.bf16.gmra.mxu0 %v7597_v10  ;;  %v10820_v56 = vpop.f32.mrf.mxu2  ;;  %v10837_v10 = vpop.f32.mrf.mxu0 }
 0x3b8   :  { %3048 = vrot.lane.b32.xlu2 %v2886_v28, %s8887_s11 }
 0x3b9   :  { %v3031_v40 = vpop.permute.xlu1 %3030  ;;  %v7618_v24 = vld [vmem:[#allocation3 + $0x1fc] sm:$0xf0]  ;;  %v957_v16 = vpop.permute.xlu0 %956 }
 0x3ba   :  { %3197 = vst.msk [vmem:[#allocation3 + $0x1fc] sm:$0xf] %vm2145_vm3, %v3031_v40  ;;  %v10823_v63 = vpop.permute.xlu2 %962  ;;  %v7621_v19 = vor.u32 %v8631_v46, %v7618_v24  ;;  %v1100_v28 = vmax.f32 %v10561_v21, %v957_v16  ;;  %v10839_v24 = vpop.f32.mrf.mxu3 }
 0x3bb   :  { %8160 = vmatmul.msk.bf16.gmra.mxu2 %vm5159_vm4, %v7585_v5  ;;  %12098 = vst [vmem:[#allocation69_spill] sm:$0xff] %v10839_v24 }
 0x3bc   :  { %5831 = vmatmul.bf16.gmra.mxu1 %v7621_v19  ;;  %v1484_v57 = vmax.f32 %v1100_v28, %v1420_v41  ;;  %v7510_v28 = vld [vmem:[#allocation3 + $0x12c] sm:$0xf0]  ;;  %v10846_v29 = vpop.f32.mrf.mxu1 }
 0x3be   :  { %v1551_v33 = vadd.f32 %v10834_v42, %v1484_v57  ;;  %v10843_v41 = vpop.f32.mrf.mxu2  ;;  %v7513_v57 = vor.u32 %v8605_v27, %v7510_v28  ;;  %v10848_v24 = vpop.f32.mrf.mxu0 }
 0x3c0   :  { %v1615_v46 = vpack.c.bf16 %v1551_v33, %v1551_v33  ;;  %v7604_v33 = vld [vmem:[#allocation3 + $0x1c8] sm:$0xf] }
 0x3c1   :  { %v2520_v40 = vpop.permute.xlu1 %2519  ;;  %v8633_v21 = vld [vmem:[#allocation3 + $0x1f8] sm:$0xf0]  ;;  %v1279_v5 = vpop.permute.xlu0 %1278 }
 0x3c2   :  { %2685 = vst.msk [vmem:[#allocation3 + $0x20c] sm:$0xf] %vm2145_vm3, %v2520_v40  ;;  %v3037_v16 = vpop.permute.xlu2 %3036  ;;  %v7617_v19 = vor.u32 %v8633_v21, %v7616_v51  ;;  %v8629_v40 = vld [vmem:[#allocation3 + $0x1d8] sm:$0xf0]  ;;  %v1421_v14 = vmax.f32 %v10594_v58, %v1279_v5 }
 0x3c3   :  { %1680 = vst.msk [vmem:[#allocation2 + $0x148] sm:$0xf] %vm40_vm0, %v1615_v46  ;;  %v7605_v2 = vor.u32 %v8629_v40, %v7604_v33  ;;  %v8610_v40 = vld [vmem:[#allocation3 + $0x144] sm:$0xf] }
 0x3c4   :  { %3200 = vst.msk [vmem:[#allocation3 + $0x238] sm:$0xf] %vm2145_vm3, %v3037_v16 }
 0x3c6   :  { %5468 = vmatmul.bf16.gmra.mxu3 %v7513_v57  ;;  %5662 = vmatmul.bf16.gmra.mxu0 %v7617_v19  ;;  %v10858_v19 = vpop.f32.mrf.mxu1  ;;  %v10860_v28 = vpop.f32.mrf.mxu2 }
 0x3c9   :  { %v10850_v20 = vpop.f32.mrf.mxu3  ;;  %v3547_v51 = vpop.permute.xlu0 %3546 }
 0x3ca   :  { %12099 = vst [vmem:[#allocation70_spill] sm:$0xff] %v10850_v20  ;;  %v959_v21 = vpop.permute.xlu1 %958  ;;  %v3398_v46 = vld [vmem:[#allocation2 + $0x148] sm:$0xf]  ;;  %v3553_v16 = vpop.permute.xlu2 %3552 }
 0x3cb   :  { %v3271_v0 = vld [vmem:[#allocation2 + $0x148] sm:$0xf]  ;;  %3712 = vst.msk [vmem:[#allocation3 + $0x214] sm:$0xf] %vm2145_vm3, %v3547_v51  ;;  %v1101_v27 = vmax.f32 %v10584_v7, %v959_v21  ;;  %3558 = vrot.lane.b32.xlu0 %v3398_v46, %s8887_s11  ;;  %8161 = vmatmul.msk.bf16.gmra.mxu2 %vm5159_vm4, %v7605_v2  ;;  %v2374_v21 = vld [vmem:[#allocation2 + $0xfc] sm:$0xf]  ;;  %v10867_v46 = vpop.f32.mrf.mxu0 }
 0x3cc   :  { %3715 = vst.msk [vmem:[#allocation3 + $0x250] sm:$0xf] %vm2145_vm3, %v3553_v16  ;;  %v2771_v5 = vld [vmem:[#allocation2 + $0x148] sm:$0xf] }
 0x3cd   :  { %v1485_v57 = vmax.f32 %v1101_v27, %v1421_v14  ;;  %3335 = vst.msk [vmem:[#allocation3 + $0x2b4] sm:$0xf] %vm40_vm0, %v3271_v0  ;;  %v7530_v14 = vld [vmem:[#allocation3 + $0x154] sm:$0xf0] }
 0x3ce   :  { %2835 = vst.msk [vmem:[#allocation3 + $0x3c8] sm:$0xf] %vm40_vm0, %v2771_v5  ;;  %v2241_v0 = vld [vmem:[#allocation2 + $0x98] sm:$0xf]  ;;  %v7533_v27 = vor.u32 %v8610_v40, %v7530_v14  ;;  %v7624_v5 = vld [vmem:[#allocation3 + $0x1f0] sm:$0xf] }
 0x3cf   :  { %v1552_v58 = vadd.f32 %v10834_v42, %v1485_v57  ;;  %2305 = vst.msk [vmem:[#allocation3 + $0x25c] sm:$0xf] %vm40_vm0, %v2241_v0  ;;  %v10876_v57 = vpop.f32.mrf.mxu1 }
 0x3d1   :  { %v1616_v7 = vpack.c.bf16 %v1552_v58, %v1552_v58  ;;  %v10865_v33 = vpop.f32.mrf.mxu3  ;;  %v2526_v51 = vpop.permute.xlu0 %2525 }
 0x3d2   :  { %12100 = vst [vmem:[#allocation71_spill] sm:$0xff] %v10865_v33  ;;  %v3033_v2 = vpop.permute.xlu1 %3032  ;;  %v10870_v16 = vpop.permute.xlu2 %964  ;;  %v8634_v33 = vld [vmem:[#allocation3 + $0x200] sm:$0xf0] }
 0x3d3   :  { %1681 = vst.msk [vmem:[#allocation2 + $0x14c] sm:$0xf] %vm40_vm0, %v1616_v7  ;;  %2537 = vrot.lane.b32.xlu0 %v2374_v21, %s8887_s11  ;;  %v10878_v58 = vpop.f32.mrf.mxu2  ;;  %v7625_v21 = vor.u32 %v8634_v33, %v7624_v5  ;;  %v10881_v40 = vpop.f32.mrf.mxu0  ;;  %v8638_v33 = vld [vmem:[#allocation3 + $0x220] sm:$0xf0] }
 0x3d4   :  { %2688 = vst.msk [vmem:[#allocation3 + $0x248] sm:$0xf] %vm2145_vm3, %v2526_v51 }
 0x3d5   :  { %3198 = vst.msk [vmem:[#allocation3 + $0x210] sm:$0xf] %vm2145_vm3, %v3033_v2 }
 0x3d6   :  { %5473 = vmatmul.bf16.gmra.mxu3 %v7533_v27 }
 0x3d7   :  { %v10894_v5 = vpop.f32.mrf.mxu1 }
 0x3d9   :  { %v5434_v7 = vpop.f32.mrf.mxu3  ;;  %v1281_v11 = vpop.permute.xlu0 %1280 }
 0x3da   :  { %v5435_v20 = vadd.f32 %v5434_v7, %v9688_v53  ;;  %v3549_v55 = vpop.permute.xlu1 %3548  ;;  %v3399_v34 = vld [vmem:[#allocation2 + $0x14c] sm:$0xf]  ;;  %v10884_v2 = vpop.permute.xlu2 %1286 }
 0x3db   :  { %v3272_v51 = vld [vmem:[#allocation2 + $0x14c] sm:$0xf]  ;;  %3713 = vst.msk [vmem:[#allocation3 + $0x228] sm:$0xf] %vm2145_vm3, %v3549_v55  ;;  %1292 = vrot.lane.b32.xlu0 %v10722_v4, %s8887_s11  ;;  %3560 = vrot.lane.b32.xlu1 %v3399_v34, %s8887_s11  ;;  %v10899_v34 = vpop.f32.mrf.mxu2 }
 0x3dc   :  { %v2772_v14 = vld [vmem:[#allocation2 + $0x14c] sm:$0xf]  ;;  %v5604_v0 = vadd.f32 %v10782_v25, %v5435_v20  ;;  %8162 = vmatmul.msk.bf16.gmra.mxu2 %vm5159_vm4, %v7625_v21  ;;  %v7636_v53 = vld [vmem:[#allocation3 + $0x210] sm:$0xf]  ;;  %3336 = vst.msk [vmem:[#allocation3 + $0x2c8] sm:$0xf] %vm40_vm0, %v3272_v51 }
 0x3dd   :  { %v7637_v27 = vor.u32 %v8638_v33, %v7636_v53  ;;  %2836 = vst.msk [vmem:[#allocation3 + $0x3dc] sm:$0xf] %vm40_vm0, %v2772_v14  ;;  %v2887_v25 = vld [vmem:[#allocation2 + $0x10c] sm:$0xf]  ;;  %v7550_v53 = vld [vmem:[#allocation3 + $0x17c] sm:$0xf0] }
 0x3de   :  { %v5773_v55 = vadd.f32 %v10794_v43, %v5604_v0  ;;  %v8615_v21 = vld [vmem:[#allocation3 + $0x16c] sm:$0xf]  ;;  %v8636_v33 = vld [vmem:[#allocation3 + $0x214] sm:$0xf]  ;;  %v1422_v43 = vmax.f32 %v10609_v13, %v1281_v11 }
 0x3df   :  { %5667 = vmatmul.bf16.gmra.mxu0 %v7637_v27  ;;  %v7553_v13 = vor.u32 %v8615_v21, %v7550_v53  ;;  %v7644_v53 = vld [vmem:[#allocation3 + $0x218] sm:$0xf] }
 0x3e0   :  { %v10897_v7 = vadd.f32 %v10776_v37, %v5773_v55  ;;  %v2242_v55 = vld [vmem:[#allocation2 + $0x9c] sm:$0xf] }
 0x3e1   :  { %v5436_v20 = vpop.f32.mrf.mxu3  ;;  %v3039_v15 = vpop.permute.xlu0 %3038  ;;  %2306 = vst.msk [vmem:[#allocation3 + $0x270] sm:$0xf] %vm40_vm0, %v2242_v55  ;;  %v7656_v55 = vld [vmem:[#allocation3 + $0x238] sm:$0xf] }
 0x3e2   :  { %v5437_v4 = vadd.f32 %v5436_v20, %v9710_v23  ;;  %v961_v51 = vpop.permute.xlu1 %960  ;;  %v7638_v14 = vld [vmem:[#allocation3 + $0x224] sm:$0xf0]  ;;  %3201 = vst.msk [vmem:[#allocation3 + $0x24c] sm:$0xf] %vm2145_vm3, %v3039_v15  ;;  %v3555_v37 = vpop.permute.xlu2 %3554  ;;  %v8781_v23 = vld [vmem:[%s12018_s4 + $0x38] sm:$0xff] }
 0x3e3   :  { %v1102_v0 = vmax.f32 %v10598_v18, %v961_v51  ;;  %3050 = vrot.lane.b32.xlu0 %v2887_v25, %s8887_s11  ;;  %972 = vrot.lane.b32.xlu1 %v10707_v9, %s8887_s11  ;;  %v7641_v27 = vor.u32 %v8636_v33, %v7638_v14  ;;  %3716 = vst.msk [vmem:[#allocation3 + $0x264] sm:$0xf] %vm2145_vm3, %v3555_v37  ;;  %v10913_v15 = vpop.f32.mrf.mxu0  ;;  %v8639_v51 = vld [vmem:[#allocation3 + $0x228] sm:$0xf0] }
 0x3e4   :  { %v5606_v20 = vadd.f32 %v10799_v52, %v5437_v4  ;;  %6872 = vmatpush.bf16.msra.mxu3 %v8781_v23  ;;  %v10921_v4 = vpop.f32.mrf.mxu1  ;;  %v1103_v23 = vmax.f32 %v10613_v50, %v10823_v63  ;;  %v3781_v50 = vld [vmem:[#allocation2 + $0x138] sm:$0xf]  ;;  %v3782_v63 = vld [vmem:[#allocation2 + $0x13c] sm:$0xf] }
 0x3e5   :  { %v1486_v18 = vmax.f32 %v1102_v0, %v1422_v43  ;;  %5836 = vmatmul.bf16.gmra.mxu1 %v7641_v27  ;;  %v7645_v43 = vor.u32 %v8639_v51, %v7644_v53  ;;  %v2375_v27 = vld [vmem:[#allocation2 + $0x100] sm:$0xf]  ;;  %3845 = vst.msk [vmem:[#allocation3 + $0x268] sm:$0xf] %vm40_vm0, %v3781_v50  ;;  %v8644_v50 = vld [vmem:[#allocation3 + $0x250] sm:$0xf0] }
 0x3e6   :  { %v5775_v11 = vadd.f32 %v10811_v39, %v5606_v20  ;;  %5478 = vmatmul.bf16.gmra.mxu3 %v7553_v13  ;;  %v10926_v20 = vpop.f32.mrf.mxu2  ;;  %3846 = vst.msk [vmem:[#allocation3 + $0x27c] sm:$0xf] %vm40_vm0, %v3782_v63 }
 0x3e7   :  { %v1553_v25 = vadd.f32 %v10834_v42, %v1486_v18 }
 0x3e8   :  { %v10919_v33 = vadd.f32 %v10790_v48, %v5775_v11 }
 0x3e9   :  { %v1617_v52 = vpack.c.bf16 %v1553_v25, %v1553_v25  ;;  %v5439_v21 = vpop.f32.mrf.mxu3  ;;  %v2528_v0 = vpop.permute.xlu0 %2527  ;;  %v8643_v39 = vld [vmem:[#allocation3 + $0x248] sm:$0xf0] }
 0x3ea   :  { %v5440_v14 = vadd.f32 %v5439_v21, %v9736_v12  ;;  %v1283_v37 = vpop.permute.xlu1 %1282  ;;  %v2534_v13 = vpop.permute.xlu2 %2533  ;;  %v7657_v12 = vor.u32 %v8643_v39, %v7656_v55  ;;  %2689 = vst.msk [vmem:[#allocation3 + $0x25c] sm:$0xf] %vm2145_vm3, %v2528_v0  ;;  %v1425_v39 = vmax.f32 %v10664_v22, %v10884_v2 }
 0x3eb   :  { %1682 = vst.msk [vmem:[#allocation2 + $0x150] sm:$0xf] %vm40_vm0, %v1617_v52  ;;  %v1423_v48 = vmax.f32 %v10626_v49, %v1283_v37  ;;  %2539 = vrot.lane.b32.xlu0 %v2375_v27, %s8887_s11  ;;  %1294 = vrot.lane.b32.xlu1 %v10738_v31, %s8887_s11  ;;  %v10939_v25 = vpop.f32.mrf.mxu0 }
 0x3ec   :  { %v5609_v18 = vadd.f32 %v10815_v6, %v5440_v14  ;;  %8163 = vmatmul.msk.bf16.gmra.mxu2 %vm5159_vm4, %v7645_v43  ;;  %2692 = vst.msk [vmem:[#allocation3 + $0x298] sm:$0xf] %vm2145_vm3, %v2534_v13  ;;  %v10946_v52 = vpop.f32.mrf.mxu1  ;;  %v8620_v14 = vld [vmem:[#allocation3 + $0x194] sm:$0xf] }
 0x3ed   :  { %v1487_v11 = vmax.f32 %v1103_v23, %v1423_v48  ;;  %v7570_v48 = vld [vmem:[#allocation3 + $0x1a4] sm:$0xf0] }
 0x3ee   :  { %v5778_v49 = vadd.f32 %v10825_v8, %v5609_v18  ;;  %v10962_v18 = vpop.f32.mrf.mxu2 }
 0x3ef   :  { %v1554_v51 = vadd.f32 %v10834_v42, %v1487_v11  ;;  %5672 = vmatmul.bf16.gmra.mxu0 %v7657_v12  ;;  %v7573_v12 = vor.u32 %v8620_v14, %v7570_v48 }
 0x3f0   :  { %v10944_v6 = vadd.f32 %v10805_v35, %v5778_v49 }
 0x3f1   :  { %v1618_v21 = vpack.c.bf16 %v1554_v51, %v1554_v51  ;;  %v5441_v53 = vpop.f32.mrf.mxu3  ;;  %v967_v27 = vpop.permute.xlu0 %966 }
 0x3f2   :  { %v3783_v43 = vld [vmem:[#allocation2 + $0x150] sm:$0xf]  ;;  %v6169_v8 = vmax.f32 %v10897_v7, %v10944_v6  ;;  %v5442_v0 = vadd.f32 %v5441_v53, %v9763_v30  ;;  %v3551_v37 = vpop.permute.xlu1 %3550  ;;  %v10954_v35 = vpop.permute.xlu2 %1288  ;;  %v1105_v23 = vmax.f32 %v10650_v17, %v967_v27 }
 0x3f3   :  { %v3400_v55 = vld [vmem:[#allocation2 + $0x150] sm:$0xf]  ;;  %3847 = vst.msk [vmem:[#allocation3 + $0x290] sm:$0xf] %vm40_vm0, %v3783_v43  ;;  %978 = vrot.lane.b32.xlu0 %v10764_v1, %s8887_s11 }
 0x3f4   :  { %3562 = vrot.lane.b32.xlu1 %v3400_v55, %s8887_s11  ;;  %v3273_v13 = vld [vmem:[#allocation2 + $0x150] sm:$0xf]  ;;  %1683 = vst.msk [vmem:[#allocation2 + $0x154] sm:$0xf] %vm40_vm0, %v1618_v21  ;;  %v5611_v30 = vadd.f32 %v10837_v10, %v5442_v0  ;;  %v1489_v22 = vmax.f32 %v1105_v23, %v1425_v39  ;;  %v10972_v10 = vpop.f32.mrf.mxu0  ;;  %v7664_v21 = vld [vmem:[#allocation3 + $0x240] sm:$0xf]  ;;  %v10980_v23 = vpop.f32.mrf.mxu1 }
 0x3f5   :  { %3714 = vst.msk [vmem:[#allocation3 + $0x23c] sm:$0xf] %vm2145_vm3, %v3551_v37  ;;  %v2773_v63 = vld [vmem:[#allocation2 + $0x150] sm:$0xf]  ;;  %v7665_v14 = vor.u32 %v8644_v50, %v7664_v21  ;;  %v2376_v37 = vld [vmem:[#allocation2 + $0x104] sm:$0xf] }
 0x3f6   :  { %v5780_v2 = vadd.f32 %v10846_v29, %v5611_v30  ;;  %5483 = vmatmul.bf16.gmra.mxu3 %v7573_v12  ;;  %3337 = vst.msk [vmem:[#allocation3 + $0x2dc] sm:$0xf] %vm40_vm0, %v3273_v13  ;;  %v1556_v17 = vadd.f32 %v10834_v42, %v1489_v22  ;;  %v2888_v27 = vld [vmem:[#allocation2 + $0x110] sm:$0xf] }
 0x3f7   :  { %2837 = vst.msk [vmem:[#allocation3 + $0x3f0] sm:$0xf] %vm40_vm0, %v2773_v63  ;;  %v7658_v13 = vld [vmem:[#allocation3 + $0x24c] sm:$0xf0] }
 0x3f8   :  { %v10969_v11 = vadd.f32 %v10820_v56, %v5780_v2  ;;  %v1620_v49 = vpack.c.bf16 %v1556_v17, %v1556_v17  ;;  %v10989_v17 = vpop.f32.mrf.mxu2 }
 0x3f9   :  { %v5444_v51 = vpop.f32.mrf.mxu3  ;;  %v3041_v0 = vpop.permute.xlu0 %3040 }
 0x3fa   :  { %v6170_v29 = vmax.f32 %v10919_v33, %v10969_v11  ;;  %v5445_v53 = vadd.f32 %v5444_v51, %v9795_v3  ;;  %v2530_v43 = vpop.permute.xlu1 %2529  ;;  %1685 = vst.msk [vmem:[#allocation2 + $0x15c] sm:$0xf] %vm40_vm0, %v1620_v49  ;;  %v3047_v56 = vpop.permute.xlu2 %3046  ;;  %v8625_v49 = vld [vmem:[#allocation3 + $0x1bc] sm:$0xf] }
 0x3fb   :  { %v3784_v55 = vld [vmem:[#allocation2 + $0x154] sm:$0xf]  ;;  %3052 = vrot.lane.b32.xlu0 %v2888_v27, %s8887_s11  ;;  %2690 = vst.msk [vmem:[#allocation3 + $0x270] sm:$0xf] %vm2145_vm3, %v2530_v43  ;;  %v1104_v43 = vmax.f32 %v10633_v26, %v10870_v16 }
 0x3fc   :  { %2541 = vrot.lane.b32.xlu1 %v2376_v37, %s8887_s11  ;;  %v3401_v39 = vld [vmem:[#allocation2 + $0x154] sm:$0xf]  ;;  %3848 = vst.msk [vmem:[#allocation3 + $0x2a4] sm:$0xf] %vm40_vm0, %v3784_v55  ;;  %v5614_v3 = vadd.f32 %v10848_v24, %v5445_v53  ;;  %8164 = vmatmul.msk.bf16.gmra.mxu2 %vm5159_vm4, %v7665_v14  ;;  %v8641_v48 = vld [vmem:[#allocation3 + $0x23c] sm:$0xf]  ;;  %v10996_v50 = vpop.f32.mrf.mxu0 }
 0x3fd   :  { %3564 = vrot.lane.b32.xlu2 %v3401_v39, %s8887_s11  ;;  %v7661_v30 = vor.u32 %v8641_v48, %v7658_v13  ;;  %v3274_v12 = vld [vmem:[#allocation2 + $0x154] sm:$0xf]  ;;  %3205 = vst.msk [vmem:[#allocation3 + $0x29c] sm:$0xf] %vm2145_vm3, %v3047_v56  ;;  %v7590_v37 = vld [vmem:[#allocation3 + $0x1cc] sm:$0xf0]  ;;  %v11012_v56 = vpop.f32.mrf.mxu1 }
 0x3fe   :  { %v5783_v22 = vadd.f32 %v10858_v19, %v5614_v3  ;;  %v2774_v2 = vld [vmem:[#allocation2 + $0x154] sm:$0xf]  ;;  %3202 = vst.msk [vmem:[#allocation3 + $0x260] sm:$0xf] %vm2145_vm3, %v3041_v0  ;;  %v7593_v26 = vor.u32 %v8625_v49, %v7590_v37  ;;  %v8649_v55 = vld [vmem:[#allocation3 + $0x278] sm:$0xf0] }
 0x3ff   :  { %5841 = vmatmul.bf16.gmra.mxu1 %v7661_v30  ;;  %3338 = vst.msk [vmem:[#allocation3 + $0x2f0] sm:$0xf] %vm40_vm0, %v3274_v12  ;;  %v2889_v49 = vld [vmem:[#allocation2 + $0x114] sm:$0xf] }
 0x400   :  { %v10993_v24 = vadd.f32 %v10843_v41, %v5783_v22  ;;  %2838 = vst.msk [vmem:[#allocation3 + $0x404] sm:$0xf] %vm40_vm0, %v2774_v2  ;;  %v11021_v30 = vpop.f32.mrf.mxu2 }
 0x401   :  { %v5446_v63 = vpop.f32.mrf.mxu3  ;;  %v3786_v19 = vld [vmem:[#allocation2 + $0x15c] sm:$0xf]  ;;  %v3557_v53 = vpop.permute.xlu0 %3556 }
 0x402   :  { %v5447_v51 = vadd.f32 %v5446_v63, %v9830_v54  ;;  %v1285_v21 = vpop.permute.xlu1 %1284  ;;  %v3403_v14 = vld [vmem:[#allocation2 + $0x15c] sm:$0xf]  ;;  %3850 = vst.msk [vmem:[#allocation3 + $0x2cc] sm:$0xf] %vm40_vm0, %v3786_v19  ;;  %v2536_v0 = vpop.permute.xlu2 %2535  ;;  %v1426_v19 = vmax.f32 %v10683_v47, %v10954_v35  ;;  %v8646_v47 = vld [vmem:[#allocation3 + $0x264] sm:$0xf] }
 0x403   :  { %v1424_v41 = vmax.f32 %v10647_v36, %v1285_v21  ;;  %3568 = vrot.lane.b32.xlu0 %v3403_v14, %s8887_s11  ;;  %v3276_v27 = vld [vmem:[#allocation2 + $0x15c] sm:$0xf]  ;;  %2693 = vst.msk [vmem:[#allocation3 + $0x2ac] sm:$0xf] %vm2145_vm3, %v2536_v0  ;;  %v7684_v36 = vld [vmem:[#allocation3 + $0x268] sm:$0xf] }
 0x404   :  { %1296 = vrot.lane.b32.xlu1 %v10756_v32, %s8887_s11  ;;  %v5616_v54 = vadd.f32 %v10867_v46, %v5447_v51  ;;  %3717 = vst.msk [vmem:[#allocation3 + $0x278] sm:$0xf] %vm2145_vm3, %v3557_v53  ;;  %v2776_v3 = vld [vmem:[#allocation2 + $0x15c] sm:$0xf]  ;;  %v7685_v13 = vor.u32 %v8649_v55, %v7684_v36  ;;  %v11033_v21 = vpop.f32.mrf.mxu0 }
 0x405   :  { %976 = vrot.lane.b32.xlu2 %v10744_v45, %s8887_s11  ;;  %v1488_v16 = vmax.f32 %v1104_v43, %v1424_v41  ;;  %3340 = vst.msk [vmem:[#allocation3 + $0x318] sm:$0xf] %vm40_vm0, %v3276_v27  ;;  %v11042_v41 = vpop.f32.mrf.mxu1  ;;  %v2377_v27 = vld [vmem:[#allocation2 + $0x108] sm:$0xf] }
 0x406   :  { %v5785_v39 = vadd.f32 %v10876_v57, %v5616_v54  ;;  %5488 = vmatmul.bf16.gmra.mxu3 %v7593_v26  ;;  %2840 = vst.msk [vmem:[#allocation3 + $0x42c] sm:$0xf] %vm40_vm0, %v2776_v3  ;;  %v8630_v54 = vld [vmem:[#allocation3 + $0x1e4] sm:$0xf] }
 0x407   :  { %v1555_v46 = vadd.f32 %v10834_v42, %v1488_v16 }
 0x408   :  { %v11018_v48 = vadd.f32 %v10860_v28, %v5785_v39  ;;  %v7610_v39 = vld [vmem:[#allocation3 + $0x1f4] sm:$0xf0] }
 0x409   :  { %v1619_v12 = vpack.c.bf16 %v1555_v46, %v1555_v46  ;;  %v5449_v22 = vpop.f32.mrf.mxu3  ;;  %v969_v57 = vpop.permute.xlu0 %968 }
 0x40a   :  { %v5450_v2 = vadd.f32 %v5449_v22, %v9864_v44  ;;  %v3043_v63 = vpop.permute.xlu1 %3042  ;;  %v1106_v28 = vmax.f32 %v10668_v38, %v969_v57  ;;  %v11028_v51 = vpop.permute.xlu2 %974 }
 0x40b   :  { %1684 = vst.msk [vmem:[#allocation2 + $0x158] sm:$0xf] %vm40_vm0, %v1619_v12  ;;  %980 = vrot.lane.b32.xlu0 %v10637_v59, %s8887_s11  ;;  %v7678_v38 = vld [vmem:[#allocation3 + $0x274] sm:$0xf0] }
 0x40c   :  { %3054 = vrot.lane.b32.xlu1 %v2889_v49, %s8887_s11  ;;  %v5619_v44 = vadd.f32 %v10881_v40, %v5450_v2  ;;  %8165 = vmatmul.msk.bf16.gmra.mxu2 %vm5159_vm4, %v7685_v13  ;;  %3203 = vst.msk [vmem:[#allocation3 + $0x274] sm:$0xf] %vm2145_vm3, %v3043_v63  ;;  %v1490_v35 = vmax.f32 %v1106_v28, %v1426_v19  ;;  %v11054_v13 = vpop.f32.mrf.mxu2  ;;  %v11060_v63 = vpop.f32.mrf.mxu0  ;;  %v8654_v49 = vld [vmem:[#allocation3 + $0x2a0] sm:$0xf0] }
 0x40d   :  { %1298 = vrot.lane.b32.xlu2 %v10774_v62, %s8887_s11  ;;  %v7681_v53 = vor.u32 %v8646_v47, %v7678_v38  ;;  %v7704_v47 = vld [vmem:[#allocation3 + $0x290] sm:$0xf]  ;;  %v11069_v38 = vpop.f32.mrf.mxu1 }
 0x40e   :  { %v5788_v14 = vadd.f32 %v10894_v5, %v5619_v44  ;;  %v1557_v43 = vadd.f32 %v10834_v42, %v1490_v35  ;;  %v12101_v35 = vld [vmem:[#allocation6_spill] sm:$0xff] }
 0x40f   :  { %5846 = vmatmul.bf16.gmra.mxu1 %v7681_v53 }
 0x410   :  { %v11045_v40 = vadd.f32 %v10878_v58, %v5788_v14  ;;  %v1621_v0 = vpack.c.bf16 %v1557_v43, %v1557_v43  ;;  %v7676_v58 = vld [vmem:[#allocation3 + $0x260] sm:$0xf]  ;;  %v7705_v14 = vor.u32 %v8654_v49, %v7704_v47 }
 0x411   :  { %v5451_v37 = vpop.f32.mrf.mxu3  ;;  %v1291_v28 = vpop.permute.xlu0 %1290 }
 0x412   :  { %v3785_v26 = vld [vmem:[#allocation2 + $0x158] sm:$0xf]  ;;  %v6187_v16 = vmax.f32 %v10993_v24, %v11045_v40  ;;  %v5452_v36 = vadd.f32 %v5451_v37, %v9896_v61  ;;  %v2532_v55 = vpop.permute.xlu1 %2531  ;;  %v3049_v46 = vpop.permute.xlu2 %3048  ;;  %1686 = vst.msk [vmem:[#allocation2 + $0x160] sm:$0xf] %vm40_vm0, %v1621_v0  ;;  %v7613_v61 = vor.u32 %v8630_v54, %v7610_v39  ;;  %v12102_v37 = vld [vmem:[#allocation55_spill] sm:$0xff]  ;;  %v12103_v54 = vld [vmem:[#allocation52_spill] sm:$0xff] }
 0x413   :  { %v3402_v5 = vld [vmem:[#allocation2 + $0x158] sm:$0xf]  ;;  %3849 = vst.msk [vmem:[#allocation3 + $0x2b8] sm:$0xf] %vm40_vm0, %v3785_v26  ;;  %1302 = vrot.lane.b32.xlu0 %v10730_v60, %s8887_s11  ;;  %v8648_v3 = vld [vmem:[#allocation3 + $0x270] sm:$0xf0] }
 0x414   :  { %2543 = vrot.lane.b32.xlu1 %v2377_v27, %s8887_s11  ;;  %v5621_v12 = vadd.f32 %v10913_v15, %v5452_v36  ;;  %v7677_v22 = vor.u32 %v8648_v3, %v7676_v58  ;;  %v3275_v2 = vld [vmem:[#allocation2 + $0x158] sm:$0xf]  ;;  %2691 = vst.msk [vmem:[#allocation3 + $0x284] sm:$0xf] %vm2145_vm3, %v2532_v55  ;;  %v1427_v27 = vmax.f32 %v12102_v37, %v1291_v28  ;;  %v12104_v26 = vld [vmem:[#allocation48_spill] sm:$0xff]  ;;  %v11084_v58 = vpop.f32.mrf.mxu2 }
 0x415   :  { %3566 = vrot.lane.b32.xlu2 %v3402_v5, %s8887_s11  ;;  %3206 = vst.msk [vmem:[#allocation3 + $0x2b0] sm:$0xf] %vm2145_vm3, %v3049_v46  ;;  %v2775_v19 = vld [vmem:[#allocation2 + $0x158] sm:$0xf]  ;;  %v2378_v36 = vld [vmem:[#allocation2 + $0x10c] sm:$0xf] }
 0x416   :  { %v5790_v57 = vadd.f32 %v10921_v4, %v5621_v12  ;;  %5493 = vmatmul.bf16.gmra.mxu3 %v7613_v61  ;;  %5677 = vmatmul.bf16.gmra.mxu0 %v7677_v22  ;;  %3339 = vst.msk [vmem:[#allocation3 + $0x304] sm:$0xf] %vm40_vm0, %v3275_v2  ;;  %v11088_v22 = vpop.f32.mrf.mxu0  ;;  %v8780_v2 = vld [vmem:[%s12018_s4 + $0x30] sm:$0xff]  ;;  %v8635_v28 = vld [vmem:[#allocation3 + $0x20c] sm:$0xf] }
 0x417   :  { %2839 = vst.msk [vmem:[#allocation3 + $0x418] sm:$0xf] %vm40_vm0, %v2775_v19  ;;  %6873 = vmatpush.bf16.msra.mxu3 %v8780_v2 }
 0x418   :  { %v11066_v15 = vadd.f32 %v10899_v34, %v5790_v57  ;;  %v3269_v57 = vld [vmem:[#allocation2 + $0x140] sm:$0xf] }
 0x419   :  { %v5454_v44 = vpop.f32.mrf.mxu3  ;;  %v3787_v0 = vld [vmem:[#allocation2 + $0x160] sm:$0xf]  ;;  %3333 = vst.msk [vmem:[#allocation3 + $0x28c] sm:$0xf] %vm40_vm0, %v3269_v57  ;;  %v8653_v57 = vld [vmem:[#allocation3 + $0x298] sm:$0xf0] }
 0x41a   :  { %v6188_v4 = vmax.f32 %v11018_v48, %v11066_v15  ;;  %v5455_v53 = vadd.f32 %v5454_v44, %v12101_v35  ;;  %v971_v43 = vpop.permute.xlu1 %970  ;;  %v3404_v55 = vld [vmem:[#allocation2 + $0x160] sm:$0xf]  ;;  %3851 = vst.msk [vmem:[#allocation3 + $0x2e0] sm:$0xf] %vm40_vm0, %v3787_v0  ;;  %v2890_v35 = vld [vmem:[#allocation2 + $0x118] sm:$0xf] }
 0x41b   :  { %v1107_v34 = vmax.f32 %v12103_v54, %v971_v43  ;;  %v3277_v39 = vld [vmem:[#allocation2 + $0x160] sm:$0xf]  ;;  %3570 = vrot.lane.b32.xlu0 %v3404_v55, %s8887_s11  ;;  %v12106_v43 = vld [vmem:[#allocation57_spill] sm:$0xff]  ;;  %v2380_v0 = vld [vmem:[#allocation2 + $0x114] sm:$0xf] }
 0x41c   :  { %982 = vrot.lane.b32.xlu1 %v12104_v26, %s8887_s11  ;;  %v5624_v5 = vadd.f32 %v10939_v25, %v5455_v53  ;;  %8166 = vmatmul.msk.bf16.gmra.mxu2 %vm5159_vm4, %v7705_v14  ;;  %3341 = vst.msk [vmem:[#allocation3 + $0x32c] sm:$0xf] %vm40_vm0, %v3277_v39  ;;  %v2777_v61 = vld [vmem:[#allocation2 + $0x160] sm:$0xf]  ;;  %v11101_v53 = vpop.f32.mrf.mxu1  ;;  %v7724_v54 = vld [vmem:[#allocation3 + $0x2b8] sm:$0xf] }
 0x41d   :  { %2545 = vrot.lane.b32.xlu2 %v2378_v36, %s8887_s11  ;;  %v1491_v46 = vmax.f32 %v1107_v34, %v1427_v27  ;;  %2841 = vst.msk [vmem:[#allocation3 + $0x440] sm:$0xf] %vm40_vm0, %v2777_v61  ;;  %v11109_v34 = vpop.f32.mrf.mxu2 }
 0x41e   :  { %v5793_v3 = vadd.f32 %v10946_v52, %v5624_v5  ;;  %v12105_v52 = vld [vmem:[#allocation7_spill] sm:$0xff]  ;;  %v2891_v5 = vld [vmem:[#allocation2 + $0x11c] sm:$0xf]  ;;  %v11114_v39 = vpop.f32.mrf.mxu0 }
 0x41f   :  { %v1558_v12 = vadd.f32 %v10834_v42, %v1491_v46 }
 0x420   :  { %v11091_v25 = vadd.f32 %v10926_v20, %v5793_v3  ;;  %v7630_v20 = vld [vmem:[#allocation3 + $0x21c] sm:$0xf0]  ;;  %v12107_v3 = vld [vmem:[#allocation8_spill] sm:$0xff] }
 0x421   :  { %v1622_v49 = vpack.c.bf16 %v1558_v12, %v1558_v12  ;;  %v5456_v19 = vpop.f32.mrf.mxu3  ;;  %v7633_v37 = vor.u32 %v8635_v28, %v7630_v20  ;;  %v12108_v28 = vld [vmem:[#allocation62_spill] sm:$0xff]  ;;  %v7650_v20 = vld [vmem:[#allocation3 + $0x244] sm:$0xf0] }
 0x422   :  { %v5457_v44 = vadd.f32 %v5456_v19, %v12105_v52  ;;  %v3045_v47 = vpop.permute.xlu1 %3044 }
 0x423   :  { %1687 = vst.msk [vmem:[#allocation2 + $0x164] sm:$0xf] %vm40_vm0, %v1622_v49  ;;  %2549 = vrot.lane.b32.xlu0 %v2380_v0, %s8887_s11 }
 0x424   :  { %3056 = vrot.lane.b32.xlu1 %v2890_v35, %s8887_s11  ;;  %v5626_v14 = vadd.f32 %v10972_v10, %v5457_v44  ;;  %3204 = vst.msk [vmem:[#allocation3 + $0x288] sm:$0xf] %vm2145_vm3, %v3045_v47  ;;  %v8659_v10 = vld [vmem:[#allocation3 + $0x2c8] sm:$0xf0]  ;;  %v11125_v52 = vpop.f32.mrf.mxu1 }
 0x425   :  { %1300 = vrot.lane.b32.xlu2 %v12106_v43, %s8887_s11  ;;  %v7725_v61 = vor.u32 %v8659_v10, %v7724_v54  ;;  %v3270_v54 = vld [vmem:[#allocation2 + $0x144] sm:$0xf]  ;;  %v8640_v10 = vld [vmem:[#allocation3 + $0x234] sm:$0xf] }
 0x426   :  { %v5795_v27 = vadd.f32 %v10980_v23, %v5626_v14  ;;  %5498 = vmatmul.bf16.gmra.mxu3 %v7633_v37  ;;  %v11132_v14 = vpop.f32.mrf.mxu2  ;;  %v12109_v37 = vld [vmem:[#allocation9_spill] sm:$0xff]  ;;  %3334 = vst.msk [vmem:[#allocation3 + $0x2a0] sm:$0xf] %vm40_vm0, %v3270_v54 }
 0x428   :  { %v11112_v36 = vadd.f32 %v10962_v18, %v5795_v27 }
 0x429   :  { %v5459_v55 = vpop.f32.mrf.mxu3 }
 0x42a   :  { %v3788_v46 = vld [vmem:[#allocation2 + $0x164] sm:$0xf]  ;;  %v5460_v12 = vadd.f32 %v5459_v55, %v12107_v3  ;;  %v7653_v3 = vor.u32 %v8640_v10, %v7650_v20  ;;  %v2381_v20 = vld [vmem:[#allocation2 + $0x118] sm:$0xf] }
 0x42b   :  { %v3405_v2 = vld [vmem:[#allocation2 + $0x164] sm:$0xf]  ;;  %3852 = vst.msk [vmem:[#allocation3 + $0x2f4] sm:$0xf] %vm40_vm0, %v3788_v46  ;;  %v7696_v23 = vld [vmem:[#allocation3 + $0x288] sm:$0xf]  ;;  %1304 = vrot.lane.b32.xlu0 %v12108_v28, %s8887_s11 }
 0x42c   :  { %3572 = vrot.lane.b32.xlu1 %v3405_v2, %s8887_s11  ;;  %v3278_v49 = vld [vmem:[#allocation2 + $0x164] sm:$0xf]  ;;  %v5629_v18 = vadd.f32 %v10996_v50, %v5460_v12  ;;  %8167 = vmatmul.msk.bf16.gmra.mxu2 %vm5159_vm4, %v7725_v61  ;;  %v7697_v19 = vor.u32 %v8653_v57, %v7696_v23  ;;  %v11146_v2 = vpop.f32.mrf.mxu1 }
 0x42d   :  { %3058 = vrot.lane.b32.xlu2 %v2891_v5, %s8887_s11  ;;  %3342 = vst.msk [vmem:[#allocation3 + $0x340] sm:$0xf] %vm40_vm0, %v3278_v49  ;;  %v2778_v47 = vld [vmem:[#allocation2 + $0x164] sm:$0xf]  ;;  %v7744_v49 = vld [vmem:[#allocation3 + $0x2e0] sm:$0xf] }
 0x42e   :  { %v5798_v44 = vadd.f32 %v11012_v56, %v5629_v18  ;;  %5682 = vmatmul.bf16.gmra.mxu0 %v7697_v19  ;;  %2842 = vst.msk [vmem:[#allocation3 + $0x454] sm:$0xf] %vm40_vm0, %v2778_v47  ;;  %v12110_v55 = vld [vmem:[#allocation50_spill] sm:$0xff]  ;;  %v2379_v56 = vld [vmem:[#allocation2 + $0x110] sm:$0xf]  ;;  %v12112_v47 = vld [vmem:[#allocation65_spill] sm:$0xff] }
 0x42f   :  { %v2893_v46 = vld [vmem:[#allocation2 + $0x124] sm:$0xf] }
 0x430   :  { %v11129_v35 = vadd.f32 %v10989_v17, %v5798_v44  ;;  %v11140_v17 = vpop.f32.mrf.mxu0  ;;  %v12111_v18 = vld [vmem:[#allocation10_spill] sm:$0xff] }
 0x431   :  { %v5461_v50 = vpop.f32.mrf.mxu3 }
 0x432   :  { %v5462_v27 = vadd.f32 %v5461_v50, %v12109_v37  ;;  %v8664_v61 = vld [vmem:[#allocation3 + $0x2f0] sm:$0xf0]  ;;  %v11156_v50 = vpop.f32.mrf.mxu2 }
 0x433   :  { %3062 = vrot.lane.b32.xlu0 %v2893_v46, %s8887_s11  ;;  %v7745_v44 = vor.u32 %v8664_v61, %v7744_v49  ;;  %v12114_v46 = vld [vmem:[#allocation11_spill] sm:$0xff]  ;;  %v8645_v61 = vld [vmem:[#allocation3 + $0x25c] sm:$0xf] }
 0x434   :  { %984 = vrot.lane.b32.xlu1 %v12110_v55, %s8887_s11  ;;  %v5631_v5 = vadd.f32 %v11033_v21, %v5462_v27  ;;  %v2895_v49 = vld [vmem:[#allocation2 + $0x12c] sm:$0xf] }
 0x435   :  { %2547 = vrot.lane.b32.xlu2 %v2379_v56, %s8887_s11 }
 0x436   :  { %v5800_v12 = vadd.f32 %v11042_v41, %v5631_v5  ;;  %5503 = vmatmul.bf16.gmra.mxu3 %v7653_v3  ;;  %v11170_v5 = vpop.f32.mrf.mxu1 }
 0x438   :  { %v11149_v57 = vadd.f32 %v11021_v30, %v5800_v12  ;;  %v12113_v30 = vld [vmem:[#allocation54_spill] sm:$0xff]  ;;  %v11163_v27 = vpop.f32.mrf.mxu0 }
 0x439   :  { %v5464_v23 = vpop.f32.mrf.mxu3  ;;  %v2892_v12 = vld [vmem:[#allocation2 + $0x120] sm:$0xf] }
 0x43a   :  { %v5465_v19 = vadd.f32 %v5464_v23, %v12111_v18 }
 0x43b   :  { %2551 = vrot.lane.b32.xlu0 %v2381_v20, %s8887_s11  ;;  %v12115_v20 = vld [vmem:[#allocation12_spill] sm:$0xff] }
 0x43c   :  { %1306 = vrot.lane.b32.xlu1 %v12112_v47, %s8887_s11  ;;  %v5634_v41 = vadd.f32 %v11060_v63, %v5465_v19  ;;  %8168 = vmatmul.msk.bf16.gmra.mxu2 %vm5159_vm4, %v7745_v44  ;;  %v7670_v63 = vld [vmem:[#allocation3 + $0x26c] sm:$0xf0]  ;;  %v11176_v19 = vpop.f32.mrf.mxu2 }
 0x43d   :  { %986 = vrot.lane.b32.xlu2 %v12113_v30, %s8887_s11  ;;  %v3559_v37 = vpop.permute.xlu0 %3558  ;;  %v7673_v18 = vor.u32 %v8645_v61, %v7670_v63  ;;  %v2383_v63 = vld [vmem:[#allocation2 + $0x120] sm:$0xf] }
 0x43e   :  { %v5803_v54 = vadd.f32 %v11069_v38, %v5634_v41  ;;  %3718 = vst.msk [vmem:[#allocation3 + $0x28c] sm:$0xf] %vm2145_vm3, %v3559_v37 }
 0x440   :  { %v11168_v56 = vadd.f32 %v11054_v13, %v5803_v54  ;;  %v11180_v44 = vpop.f32.mrf.mxu0  ;;  %v11186_v54 = vpop.f32.mrf.mxu1 }
 0x441   :  { %v5466_v10 = vpop.f32.mrf.mxu3 }
 0x442   :  { %v5467_v3 = vadd.f32 %v5466_v10, %v12114_v46 }
 0x443   :  { %3066 = vrot.lane.b32.xlu0 %v2895_v49, %s8887_s11 }
 0x444   :  { %v5636_v23 = vadd.f32 %v11088_v22, %v5467_v3 }
 0x445   :  { %3060 = vrot.lane.b32.xlu2 %v2892_v12, %s8887_s11  ;;  %v2538_v38 = vpop.permute.xlu0 %2537  ;;  %v11192_v12 = vpop.f32.mrf.mxu2 }
 0x446   :  { %v5805_v13 = vadd.f32 %v11101_v53, %v5636_v23  ;;  %5508 = vmatmul.bf16.gmra.mxu3 %v7673_v18  ;;  %2694 = vst.msk [vmem:[#allocation3 + $0x2c0] sm:$0xf] %vm2145_vm3, %v2538_v38  ;;  %v8650_v23 = vld [vmem:[#allocation3 + $0x284] sm:$0xf]  ;;  %v12116_v18 = vld [vmem:[#allocation13_spill] sm:$0xff] }
 0x448   :  { %v11183_v41 = vadd.f32 %v11084_v58, %v5805_v13  ;;  %v11197_v49 = vpop.f32.mrf.mxu0  ;;  %v7690_v13 = vld [vmem:[#allocation3 + $0x294] sm:$0xf0]  ;;  %v11205_v21 = vpop.f32.mrf.mxu1 }
 0x449   :  { %v5469_v22 = vpop.f32.mrf.mxu3 }
 0x44a   :  { %v5470_v37 = vadd.f32 %v5469_v22, %v12115_v20  ;;  %v7693_v20 = vor.u32 %v8650_v23, %v7690_v13 }
 0x44b   :  { %2555 = vrot.lane.b32.xlu0 %v2383_v63, %s8887_s11 }
 0x44c   :  { %v5639_v10 = vadd.f32 %v11114_v39, %v5470_v37  ;;  %v12117_v37 = vld [vmem:[#allocation59_spill] sm:$0xff] }
 0x44d   :  { %v1293_v46 = vpop.permute.xlu0 %1292  ;;  %v3561_v53 = vpop.permute.xlu1 %3560 }
 0x44e   :  { %v5808_v3 = vadd.f32 %v11125_v52, %v5639_v10  ;;  %3719 = vst.msk [vmem:[#allocation3 + $0x2a0] sm:$0xf] %vm2145_vm3, %v3561_v53  ;;  %v2897_v52 = vld [vmem:[#allocation2 + $0x134] sm:$0xf]  ;;  %v1428_v10 = vmax.f32 %v12117_v37, %v1293_v46  ;;  %v8651_v53 = vld [vmem:[#allocation3 + $0x28c] sm:$0xf]  ;;  %v11214_v13 = vpop.f32.mrf.mxu2 }
 0x450   :  { %v11195_v58 = vadd.f32 %v11109_v34, %v5808_v3 }
 0x451   :  { %v5471_v61 = vpop.f32.mrf.mxu3 }
 0x452   :  { %v5472_v38 = vadd.f32 %v5471_v61, %v12116_v18 }
 0x453   :  { %3070 = vrot.lane.b32.xlu0 %v2897_v52, %s8887_s11  ;;  %v11219_v52 = vpop.f32.mrf.mxu0 }
 0x454   :  { %v5641_v22 = vadd.f32 %v11140_v17, %v5472_v38 }
 0x455   :  { %v3051_v34 = vpop.permute.xlu0 %3050  ;;  %v973_v63 = vpop.permute.xlu1 %972  ;;  %v7698_v3 = vld [vmem:[#allocation3 + $0x29c] sm:$0xf0] }
 0x456   :  { %v5810_v0 = vadd.f32 %v11146_v2, %v5641_v22  ;;  %5513 = vmatmul.bf16.gmra.mxu3 %v7693_v20  ;;  %3207 = vst.msk [vmem:[#allocation3 + $0x2c4] sm:$0xf] %vm2145_vm3, %v3051_v34  ;;  %v1108_v61 = vmax.f32 %v10707_v9, %v973_v63  ;;  %v7701_v18 = vor.u32 %v8651_v53, %v7698_v3  ;;  %v2385_v20 = vld [vmem:[#allocation2 + $0x128] sm:$0xf] }
 0x457   :  { %v3565_v17 = vpop.permute.xlu2 %3564 }
 0x458   :  { %3721 = vst.msk [vmem:[#allocation3 + $0x2c8] sm:$0xf] %vm2145_vm3, %v3565_v17  ;;  %v11212_v46 = vadd.f32 %v11132_v14, %v5810_v0  ;;  %v1492_v23 = vmax.f32 %v1108_v61, %v1428_v10  ;;  %5851 = vmatmul.bf16.gmra.mxu1 %v7701_v18  ;;  %v7716_v14 = vld [vmem:[#allocation3 + $0x2b0] sm:$0xf]  ;;  %v11229_v61 = vpop.f32.mrf.mxu1 }
 0x459   :  { %v5474_v38 = vpop.f32.mrf.mxu3  ;;  %v12118_v10 = vld [vmem:[#allocation60_spill] sm:$0xff] }
 0x45a   :  { %v1559_v22 = vadd.f32 %v10834_v42, %v1492_v23  ;;  %v1109_v63 = vmax.f32 %v12118_v10, %v11028_v51  ;;  %v7710_v23 = vld [vmem:[#allocation3 + $0x2bc] sm:$0xf0] }
 0x45b   :  { %2559 = vrot.lane.b32.xlu0 %v2385_v20, %s8887_s11  ;;  %v11237_v20 = vpop.f32.mrf.mxu2  ;;  %v11241_v2 = vpop.f32.mrf.mxu0 }
 0x45c   :  { %v1623_v9 = vpack.c.bf16 %v1559_v22, %v1559_v22  ;;  %v11234_v22 = vld [vmem:[%s12017_s2] ss:$0 sm:$0xff] }
 0x45d   :  { %v2540_v37 = vpop.permute.xlu0 %2539  ;;  %v1295_v34 = vpop.permute.xlu1 %1294  ;;  %v8658_v0 = vld [vmem:[#allocation3 + $0x2c0] sm:$0xf0] }
 0x45e   :  { %1688 = vst.msk [vmem:[#allocation2 + $0x168] sm:$0xf] %vm40_vm0, %v1623_v9  ;;  %v1429_v53 = vmax.f32 %v10738_v31, %v1295_v34  ;;  %v7717_v42 = vor.u32 %v8658_v0, %v7716_v14  ;;  %v2899_v9 = vld [vmem:[#allocation2 + $0x13c] sm:$0xf]  ;;  %v8655_v31 = vld [vmem:[#allocation3 + $0x2ac] sm:$0xf] }
 0x45f   :  { %v11226_v3 = vpop.permute.xlu2 %976  ;;  %2695 = vst.msk [vmem:[#allocation3 + $0x2d4] sm:$0xf] %vm2145_vm3, %v2540_v37  ;;  %v12119_v34 = vld [vmem:[#allocation14_spill] sm:$0xff]  ;;  %v7713_v0 = vor.u32 %v8655_v31, %v7710_v23 }
 0x460   :  { %v1493_v17 = vmax.f32 %v1109_v63, %v1429_v53  ;;  %5687 = vmatmul.bf16.gmra.mxu0 %v7717_v42  ;;  %v5475_v14 = vadd.f32 %v5474_v38, %v12119_v34  ;;  %v8779_v38 = vld [vmem:[%s12018_s4 + $0x28] sm:$0xff] }
 0x461   :  { %v5476_v18 = vpop.f32.mrf.mxu3  ;;  %6874 = vmatpush.bf16.msra.mxu3 %v8779_v38  ;;  %v2382_v38 = vld [vmem:[#allocation2 + $0x11c] sm:$0xf] }
 0x462   :  { %v1560_v51 = vadd.f32 %v11234_v22, %v1493_v17 }
 0x463   :  { %3074 = vrot.lane.b32.xlu0 %v2899_v9, %s8887_s11  ;;  %v5644_v9 = vadd.f32 %v11163_v27, %v5475_v14 }
 0x464   :  { %v1624_v37 = vpack.c.bf16 %v1560_v51, %v1560_v51 }
 0x465   :  { %v3789_v10 = vld [vmem:[#allocation2 + $0x168] sm:$0xf]  ;;  %v979_v53 = vpop.permute.xlu0 %978 }
 0x466   :  { %v3563_v63 = vpop.permute.xlu1 %3562  ;;  %v3406_v42 = vld [vmem:[#allocation2 + $0x168] sm:$0xf]  ;;  %3853 = vst.msk [vmem:[#allocation3 + $0x308] sm:$0xf] %vm40_vm0, %v3789_v10  ;;  %5518 = vmatmul.bf16.gmra.mxu3 %v7713_v0  ;;  %v1111_v39 = vmax.f32 %v10764_v1, %v979_v53  ;;  %v11254_v1 = vpop.f32.mrf.mxu1  ;;  %v12120_v0 = vld [vmem:[#allocation16_spill] sm:$0xff] }
 0x467   :  { %v1299_v17 = vpop.permute.xlu2 %1298  ;;  %3574 = vrot.lane.b32.xlu1 %v3406_v42, %s8887_s11  ;;  %1689 = vst.msk [vmem:[#allocation2 + $0x16c] sm:$0xf] %vm40_vm0, %v1624_v37  ;;  %v3279_v51 = vld [vmem:[#allocation2 + $0x168] sm:$0xf]  ;;  %v2387_v53 = vld [vmem:[#allocation2 + $0x140] sm:$0xf]  ;;  %v5813_v37 = vadd.f32 %v11170_v5, %v5644_v9  ;;  %v11269_v9 = vpop.f32.mrf.mxu0 }
 0x468   :  { %v1431_v23 = vmax.f32 %v10774_v62, %v1299_v17  ;;  %3720 = vst.msk [vmem:[#allocation3 + $0x2b4] sm:$0xf] %vm2145_vm3, %v3563_v63  ;;  %v12121_v62 = vld [vmem:[#allocation15_spill] sm:$0xff] }
 0x469   :  { %v5479_v34 = vpop.f32.mrf.mxu3  ;;  %3343 = vst.msk [vmem:[#allocation3 + $0x354] sm:$0xf] %vm40_vm0, %v3279_v51  ;;  %v5477_v17 = vadd.f32 %v5476_v18, %v12121_v62  ;;  %v7718_v18 = vld [vmem:[#allocation3 + $0x2c4] sm:$0xf0] }
 0x46a   :  { %v1495_v31 = vmax.f32 %v1111_v39, %v1431_v23  ;;  %v5480_v10 = vadd.f32 %v5479_v34, %v12120_v0  ;;  %v11262_v23 = vpop.f32.mrf.mxu2  ;;  %v5982_v0 = vadd.f32 %v11156_v50, %v5813_v37 }
 0x46b   :  { %2563 = vrot.lane.b32.xlu0 %v2387_v53, %s8887_s11 }
 0x46c   :  { %v1562_v42 = vadd.f32 %v11234_v22, %v1495_v31  ;;  %v5649_v27 = vadd.f32 %v11197_v49, %v5480_v10  ;;  %v5646_v10 = vadd.f32 %v11180_v44, %v5477_v17  ;;  %v2901_v17 = vld [vmem:[#allocation2 + $0x154] sm:$0xf] }
 0x46d   :  { %v3053_v63 = vpop.permute.xlu0 %3052 }
 0x46e   :  { %v1626_v14 = vpack.c.bf16 %v1562_v42, %v1562_v42  ;;  %v2542_v39 = vpop.permute.xlu1 %2541  ;;  %v3790_v51 = vld [vmem:[#allocation2 + $0x16c] sm:$0xf]  ;;  %v5818_v34 = vadd.f32 %v11205_v21, %v5649_v27  ;;  %3208 = vst.msk [vmem:[#allocation3 + $0x2d8] sm:$0xf] %vm2145_vm3, %v3053_v63  ;;  %v11279_v50 = vpop.f32.mrf.mxu1  ;;  %v5815_v44 = vadd.f32 %v11186_v54, %v5646_v10  ;;  %v1110_v63 = vmax.f32 %v10744_v45, %v11226_v3 }
 0x46f   :  { %2696 = vst.msk [vmem:[#allocation3 + $0x2e8] sm:$0xf] %vm2145_vm3, %v2542_v39  ;;  %v3567_v31 = vpop.permute.xlu2 %3566  ;;  %2553 = vrot.lane.b32.xlu1 %v2382_v38, %s8887_s11  ;;  %v3407_v5 = vld [vmem:[#allocation2 + $0x16c] sm:$0xf]  ;;  %v8656_v49 = vld [vmem:[#allocation3 + $0x2b4] sm:$0xf] }
 0x470   :  { %3854 = vst.msk [vmem:[#allocation3 + $0x31c] sm:$0xf] %vm40_vm0, %v3790_v51  ;;  %3576 = vrot.lane.b32.xlu2 %v3407_v5, %s8887_s11  ;;  %v5987_v21 = vadd.f32 %v11192_v12, %v5818_v34  ;;  %v7721_v53 = vor.u32 %v8656_v49, %v7718_v18  ;;  %v3280_v42 = vld [vmem:[#allocation2 + $0x16c] sm:$0xf]  ;;  %v12122_v39 = vld [vmem:[#allocation17_spill] sm:$0xff] }
 0x471   :  { %1691 = vst.msk [vmem:[#allocation2 + $0x174] sm:$0xf] %vm40_vm0, %v1626_v14  ;;  %v5481_v62 = vpop.f32.mrf.mxu3  ;;  %v2780_v51 = vld [vmem:[#allocation2 + $0x16c] sm:$0xf]  ;;  %v2779_v5 = vld [vmem:[#allocation2 + $0x168] sm:$0xf] }
 0x472   :  { %3722 = vst.msk [vmem:[#allocation3 + $0x2dc] sm:$0xf] %vm2145_vm3, %v3567_v31  ;;  %v6175_v27 = vmax.f32 %v5982_v0, %v5987_v21  ;;  %v5482_v38 = vadd.f32 %v5481_v62, %v12122_v39  ;;  %5856 = vmatmul.bf16.gmra.mxu1 %v7721_v53  ;;  %v2894_v14 = vld [vmem:[#allocation2 + $0x128] sm:$0xf]  ;;  %v8660_v49 = vld [vmem:[#allocation3 + $0x2d4] sm:$0xf]  ;;  %v11296_v21 = vpop.f32.mrf.mxu2  ;;  %v5984_v53 = vadd.f32 %v11176_v19, %v5815_v44 }
 0x473   :  { %3344 = vst.msk [vmem:[#allocation3 + $0x368] sm:$0xf] %vm40_vm0, %v3280_v42  ;;  %3078 = vrot.lane.b32.xlu0 %v2901_v17, %s8887_s11  ;;  %v7764_v0 = vld [vmem:[#allocation3 + $0x308] sm:$0xf] }
 0x474   :  { %v6177_v12 = vmax.f32 %v6169_v8, %v6175_v27  ;;  %v5651_v37 = vadd.f32 %v11219_v52, %v5482_v38  ;;  %2844 = vst.msk [vmem:[#allocation3 + $0x47c] sm:$0xf] %vm40_vm0, %v2780_v51  ;;  %v5658_v27 = vpop.f32.mrf.mxu0 }
 0x475   :  { %v3569_v31 = vpop.permute.xlu0 %3568  ;;  %2843 = vst.msk [vmem:[#allocation3 + $0x468] sm:$0xf] %vm40_vm0, %v2779_v5  ;;  %v2389_v5 = vld [vmem:[#allocation2 + $0x148] sm:$0xf] }
 0x476   :  { %v1297_v34 = vpop.permute.xlu1 %1296  ;;  %v7730_v18 = vld [vmem:[#allocation3 + $0x2e4] sm:$0xf0]  ;;  %v6179_v54 = vpack.c.bf16 %v6177_v12, %v6177_v12  ;;  %v5820_v7 = vadd.f32 %v11229_v61, %v5651_v37  ;;  %3723 = vst.msk [vmem:[#allocation3 + $0x2f0] sm:$0xf] %vm2145_vm3, %v3569_v31 }
 0x477   :  { %v1430_v6 = vmax.f32 %v10756_v32, %v1297_v34  ;;  %v2546_v8 = vpop.permute.xlu2 %2545  ;;  %v7733_v52 = vor.u32 %v8660_v49, %v7730_v18  ;;  %v8669_v10 = vld [vmem:[#allocation3 + $0x318] sm:$0xf0]  ;;  %v5827_v18 = vpop.f32.mrf.mxu1 }
 0x478   :  { %v3792_v45 = vld [vmem:[#allocation2 + $0x174] sm:$0xf]  ;;  %2698 = vst.msk [vmem:[#allocation3 + $0x310] sm:$0xf] %vm2145_vm3, %v2546_v8  ;;  %3064 = vrot.lane.b32.xlu2 %v2894_v14, %s8887_s11  ;;  %v7765_v3 = vor.u32 %v8669_v10, %v7764_v0  ;;  %v5989_v32 = vadd.f32 %v11214_v13, %v5820_v7  ;;  %v12123_v7 = vld [vmem:[#allocation18_spill] sm:$0xff] }
 0x479   :  { %3856 = vst.msk [vmem:[#allocation3 + $0x344] sm:$0xf] %vm40_vm0, %v3792_v45  ;;  %v1494_v61 = vmax.f32 %v1110_v63, %v1430_v6  ;;  %5523 = vmatmul.bf16.gmra.mxu3 %v7733_v52  ;;  %v5484_v42 = vpop.f32.mrf.mxu3  ;;  %v3282_v62 = vld [vmem:[#allocation2 + $0x174] sm:$0xf]  ;;  %v8661_v37 = vld [vmem:[#allocation3 + $0x2dc] sm:$0xf] }
 0x47a   :  { %6181 = vst [vmem:[#allocation5] sm:$0xf] %v6179_v54  ;;  %8169 = vmatmul.msk.bf16.gmra.mxu2 %vm5159_vm4, %v7765_v3  ;;  %v6176_v39 = vmax.f32 %v5984_v53, %v5989_v32  ;;  %v2782_v51 = vld [vmem:[#allocation2 + $0x174] sm:$0xf]  ;;  %v11314_v54 = vpop.f32.mrf.mxu2  ;;  %v5485_v6 = vadd.f32 %v5484_v42, %v12123_v7  ;;  %v2903_v52 = vld [vmem:[#allocation2 + $0x15c] sm:$0xf] }
 0x47b   :  { %v1561_v38 = vadd.f32 %v11234_v22, %v1494_v61  ;;  %3346 = vst.msk [vmem:[#allocation3 + $0x390] sm:$0xf] %vm40_vm0, %v3282_v62  ;;  %2567 = vrot.lane.b32.xlu0 %v2389_v5, %s8887_s11  ;;  %v3409_v31 = vld [vmem:[#allocation2 + $0x174] sm:$0xf]  ;;  %v2896_v53 = vld [vmem:[#allocation2 + $0x130] sm:$0xf] }
 0x47c   :  { %2846 = vst.msk [vmem:[#allocation3 + $0x4a4] sm:$0xf] %vm40_vm0, %v2782_v51  ;;  %v6178_v19 = vmax.f32 %v6170_v29, %v6176_v39  ;;  %v7736_v61 = vld [vmem:[#allocation3 + $0x2d8] sm:$0xf]  ;;  %v5654_v62 = vadd.f32 %v11241_v2, %v5485_v6 }
 0x47d   :  { %v1625_v13 = vpack.c.bf16 %v1561_v38, %v1561_v38  ;;  %v981_v12 = vpop.permute.xlu0 %980  ;;  %v7738_v17 = vld [vmem:[#allocation3 + $0x2ec] sm:$0xf0] }
 0x47e   :  { %v3055_v44 = vpop.permute.xlu1 %3054  ;;  %v6180_v14 = vpack.c.bf16 %v6178_v19, %v6178_v19  ;;  %v1112_v34 = vmax.f32 %v10637_v59, %v981_v12  ;;  %v7741_v49 = vor.u32 %v8661_v37, %v7738_v17  ;;  %v11318_v59 = vpop.f32.mrf.mxu0  ;;  %v12124_v19 = vld [vmem:[#allocation20_spill] sm:$0xff]  ;;  %v12125_v12 = vld [vmem:[#allocation19_spill] sm:$0xff] }
 0x47f   :  { %1690 = vst.msk [vmem:[#allocation2 + $0x170] sm:$0xf] %vm40_vm0, %v1625_v13  ;;  %v1301_v63 = vpop.permute.xlu2 %1300  ;;  %v5829_v38 = vpop.f32.mrf.mxu1 }
 0x480   :  { %3209 = vst.msk [vmem:[#allocation3 + $0x2ec] sm:$0xf] %vm2145_vm3, %v3055_v44  ;;  %v1432_v33 = vmax.f32 %v12106_v43, %v1301_v63  ;;  %3580 = vrot.lane.b32.xlu2 %v3409_v31, %s8887_s11  ;;  %v5823_v44 = vadd.f32 %v11254_v1, %v5654_v62 }
 0x481   :  { %6182 = vst [vmem:[#allocation5 + $0x20] sm:$0xf] %v6180_v14  ;;  %v5486_v29 = vpop.f32.mrf.mxu3  ;;  %v2391_v14 = vld [vmem:[#allocation2 + $0x150] sm:$0xf] }
 0x482   :  { %v1496_v11 = vmax.f32 %v1112_v34, %v1432_v33  ;;  %5861 = vmatmul.bf16.gmra.mxu1 %v7741_v49  ;;  %v5487_v37 = vadd.f32 %v5486_v29, %v12125_v12  ;;  %v11332_v2 = vpop.f32.mrf.mxu2  ;;  %v2384_v34 = vld [vmem:[#allocation2 + $0x124] sm:$0xf] }
 0x483   :  { %3082 = vrot.lane.b32.xlu0 %v2903_v52, %s8887_s11  ;;  %v8674_v49 = vld [vmem:[#allocation3 + $0x340] sm:$0xf0] }
 0x484   :  { %v1563_v8 = vadd.f32 %v11234_v22, %v1496_v11  ;;  %v5656_v52 = vadd.f32 %v11269_v9, %v5487_v37 }
 0x485   :  { %v1303_v45 = vpop.permute.xlu0 %1302 }
 0x486   :  { %v3791_v0 = vld [vmem:[#allocation2 + $0x170] sm:$0xf]  ;;  %v1627_v10 = vpack.c.bf16 %v1563_v8, %v1563_v8  ;;  %v2544_v43 = vpop.permute.xlu1 %2543  ;;  %v11335_v33 = vpop.f32.mrf.mxu0  ;;  %v1433_v7 = vmax.f32 %v10730_v60, %v1303_v45  ;;  %v12126_v45 = vld [vmem:[#allocation21_spill] sm:$0xff] }
 0x487   :  { %v3408_v3 = vld [vmem:[#allocation2 + $0x170] sm:$0xf]  ;;  %3855 = vst.msk [vmem:[#allocation3 + $0x330] sm:$0xf] %vm40_vm0, %v3791_v0  ;;  %v3059_v32 = vpop.permute.xlu2 %3058  ;;  %v8663_v42 = vld [vmem:[#allocation3 + $0x2e8] sm:$0xf0] }
 0x488   :  { %3578 = vrot.lane.b32.xlu1 %v3408_v3, %s8887_s11  ;;  %1692 = vst.msk [vmem:[#allocation2 + $0x178] sm:$0xf] %vm40_vm0, %v1627_v10  ;;  %3068 = vrot.lane.b32.xlu2 %v2896_v53, %s8887_s11  ;;  %v7737_v39 = vor.u32 %v8663_v42, %v7736_v61  ;;  %v3281_v5 = vld [vmem:[#allocation2 + $0x170] sm:$0xf]  ;;  %v11349_v61 = vpop.f32.mrf.mxu1 }
 0x489   :  { %2697 = vst.msk [vmem:[#allocation3 + $0x2fc] sm:$0xf] %vm2145_vm3, %v2544_v43  ;;  %v5489_v51 = vpop.f32.mrf.mxu3  ;;  %v7750_v43 = vld [vmem:[#allocation3 + $0x30c] sm:$0xf0] }
 0x48a   :  { %3211 = vst.msk [vmem:[#allocation3 + $0x314] sm:$0xf] %vm2145_vm3, %v3059_v32  ;;  %5692 = vmatmul.bf16.gmra.mxu0 %v7737_v39  ;;  %v5490_v13 = vadd.f32 %v5489_v51, %v12124_v19  ;;  %v2905_v51 = vld [vmem:[#allocation2 + $0x164] sm:$0xf] }
 0x48b   :  { %3345 = vst.msk [vmem:[#allocation3 + $0x37c] sm:$0xf] %vm40_vm0, %v3281_v5  ;;  %2571 = vrot.lane.b32.xlu0 %v2391_v14, %s8887_s11  ;;  %v11358_v5 = vpop.f32.mrf.mxu2  ;;  %v2781_v14 = vld [vmem:[#allocation2 + $0x170] sm:$0xf] }
 0x48c   :  { %v5659_v17 = vadd.f32 %v5658_v27, %v5490_v13  ;;  %v5992_v27 = vadd.f32 %v11237_v20, %v5823_v44  ;;  %2845 = vst.msk [vmem:[#allocation3 + $0x490] sm:$0xf] %vm40_vm0, %v2781_v14 }
 0x48d   :  { %v3571_v0 = vpop.permute.xlu0 %3570 }
 0x48e   :  { %v983_v63 = vpop.permute.xlu1 %982  ;;  %v7784_v31 = vld [vmem:[#allocation3 + $0x330] sm:$0xf]  ;;  %v5828_v1 = vadd.f32 %v5827_v18, %v5659_v17  ;;  %3724 = vst.msk [vmem:[#allocation3 + $0x304] sm:$0xf] %vm2145_vm3, %v3571_v0  ;;  %v11365_v40 = vpop.f32.mrf.mxu0 }
 0x48f   :  { %v3793_v11 = vld [vmem:[#allocation2 + $0x178] sm:$0xf]  ;;  %v1113_v29 = vmax.f32 %v12104_v26, %v983_v63  ;;  %v2548_v6 = vpop.permute.xlu2 %2547  ;;  %v7785_v8 = vor.u32 %v8674_v49, %v7784_v31  ;;  %v2386_v49 = vld [vmem:[#allocation2 + $0x12c] sm:$0xf] }
 0x490   :  { %2557 = vrot.lane.b32.xlu1 %v2384_v34, %s8887_s11  ;;  %3857 = vst.msk [vmem:[#allocation3 + $0x358] sm:$0xf] %vm40_vm0, %v3793_v11  ;;  %v8665_v10 = vld [vmem:[#allocation3 + $0x2fc] sm:$0xf]  ;;  %v5997_v3 = vadd.f32 %v11296_v21, %v5828_v1  ;;  %v3283_v9 = vld [vmem:[#allocation2 + $0x178] sm:$0xf]  ;;  %v5825_v21 = vadd.f32 %v11279_v50, %v5656_v52  ;;  %v11374_v34 = vpop.f32.mrf.mxu1 }
 0x491   :  { %v1497_v53 = vmax.f32 %v1113_v29, %v1433_v7  ;;  %2699 = vst.msk [vmem:[#allocation3 + $0x324] sm:$0xf] %vm2145_vm3, %v2548_v6  ;;  %v7753_v60 = vor.u32 %v8665_v10, %v7750_v43  ;;  %8170 = vmatmul.msk.bf16.gmra.mxu2 %vm5159_vm4, %v7785_v8  ;;  %v5491_v26 = vpop.f32.mrf.mxu3  ;;  %v3410_v13 = vld [vmem:[#allocation2 + $0x178] sm:$0xf]  ;;  %v8668_v48 = vld [vmem:[#allocation3 + $0x310] sm:$0xf0] }
 0x492   :  { %v6193_v18 = vmax.f32 %v5992_v27, %v5997_v3  ;;  %v5492_v32 = vadd.f32 %v5491_v26, %v12126_v45  ;;  %3347 = vst.msk [vmem:[#allocation3 + $0x3a4] sm:$0xf] %vm40_vm0, %v3283_v9  ;;  %v2393_v63 = vld [vmem:[#allocation2 + $0x158] sm:$0xf]  ;;  %v8778_v10 = vld [vmem:[%s12018_s4 + $0x20] sm:$0xff] }
 0x493   :  { %v1564_v20 = vadd.f32 %v11234_v22, %v1497_v53  ;;  %5528 = vmatmul.bf16.gmra.mxu3 %v7753_v60  ;;  %3086 = vrot.lane.b32.xlu0 %v2905_v51, %s8887_s11  ;;  %v6006_v6 = vpop.f32.mrf.mxu2  ;;  %v12127_v53 = vld [vmem:[#allocation22_spill] sm:$0xff]  ;;  %v2898_v26 = vld [vmem:[#allocation2 + $0x138] sm:$0xf] }
 0x494   :  { %v6195_v42 = vmax.f32 %v6187_v16, %v6193_v18  ;;  %v5661_v39 = vadd.f32 %v11318_v59, %v5492_v32  ;;  %v5994_v16 = vadd.f32 %v11262_v23, %v5825_v21  ;;  %v2783_v18 = vld [vmem:[#allocation2 + $0x178] sm:$0xf]  ;;  %6875 = vmatpush.bf16.msra.mxu3 %v8778_v10 }
 0x495   :  { %v1628_v62 = vpack.c.bf16 %v1564_v20, %v1564_v20  ;;  %v2550_v24 = vpop.permute.xlu0 %2549  ;;  %v2907_v20 = vld [vmem:[#allocation2 + $0x16c] sm:$0xf]  ;;  %2847 = vst.msk [vmem:[#allocation3 + $0x4b8] sm:$0xf] %vm40_vm0, %v2783_v18  ;;  %v12130_v10 = vld [vmem:[#allocation25_spill] sm:$0xff] }
 0x496   :  { %v3057_v19 = vpop.permute.xlu1 %3056  ;;  %v6197_v44 = vpack.c.bf16 %v6195_v42, %v6195_v42  ;;  %v5830_v12 = vadd.f32 %v5829_v38, %v5661_v39  ;;  %2700 = vst.msk [vmem:[#allocation3 + $0x338] sm:$0xf] %vm2145_vm3, %v2550_v24  ;;  %v5668_v29 = vpop.f32.mrf.mxu0  ;;  %v8666_v39 = vld [vmem:[#allocation3 + $0x304] sm:$0xf] }
 0x497   :  { %1693 = vst.msk [vmem:[#allocation2 + $0x17c] sm:$0xf] %vm40_vm0, %v1628_v62  ;;  %v11361_v37 = vpop.permute.xlu2 %986  ;;  %v7804_v9 = vld [vmem:[#allocation3 + $0x358] sm:$0xf] }
 0x498   :  { %3582 = vrot.lane.b32.xlu1 %v3410_v13, %s8887_s11  ;;  %3210 = vst.msk [vmem:[#allocation3 + $0x300] sm:$0xf] %vm2145_vm3, %v3057_v19  ;;  %v5999_v50 = vadd.f32 %v11314_v54, %v5830_v12  ;;  %v8670_v8 = vld [vmem:[#allocation3 + $0x324] sm:$0xf]  ;;  %v5837_v45 = vpop.f32.mrf.mxu1 }
 0x499   :  { %6199 = vst [vmem:[#allocation5 + $0x4] sm:$0xf] %v6197_v44  ;;  %v5494_v59 = vpop.f32.mrf.mxu3 }
 0x49a   :  { %v6194_v17 = vmax.f32 %v5994_v16, %v5999_v50  ;;  %v5495_v60 = vadd.f32 %v5494_v59, %v12127_v53  ;;  %v12128_v59 = vld [vmem:[#allocation24_spill] sm:$0xff] }
 0x49b   :  { %2575 = vrot.lane.b32.xlu0 %v2393_v63, %s8887_s11 }
 0x49c   :  { %v6196_v38 = vmax.f32 %v6188_v4, %v6194_v17  ;;  %v5664_v13 = vadd.f32 %v11335_v33, %v5495_v60 }
 0x49d   :  { %v1305_v15 = vpop.permute.xlu0 %1304  ;;  %v7770_v27 = vld [vmem:[#allocation3 + $0x334] sm:$0xf0] }
 0x49e   :  { %v3794_v31 = vld [vmem:[#allocation2 + $0x17c] sm:$0xf]  ;;  %v3573_v23 = vpop.permute.xlu1 %3572  ;;  %v6198_v11 = vpack.c.bf16 %v6196_v38, %v6196_v38  ;;  %v7773_v0 = vor.u32 %v8670_v8, %v7770_v27  ;;  %v1434_v42 = vmax.f32 %v12108_v28, %v1305_v15  ;;  %v5670_v50 = vpop.f32.mrf.mxu0  ;;  %v5833_v14 = vadd.f32 %v11349_v61, %v5664_v13  ;;  %v12129_v38 = vld [vmem:[#allocation23_spill] sm:$0xff] }
 0x49f   :  { %v3411_v54 = vld [vmem:[#allocation2 + $0x17c] sm:$0xf]  ;;  %3858 = vst.msk [vmem:[#allocation3 + $0x36c] sm:$0xf] %vm40_vm0, %v3794_v31  ;;  %v3061_v7 = vpop.permute.xlu2 %3060  ;;  %v7756_v1 = vld [vmem:[#allocation3 + $0x300] sm:$0xf]  ;;  %v6008_v28 = vpop.f32.mrf.mxu2 }
 0x4a0   :  { %2561 = vrot.lane.b32.xlu1 %v2386_v49, %s8887_s11  ;;  %3584 = vrot.lane.b32.xlu2 %v3411_v54, %s8887_s11  ;;  %3725 = vst.msk [vmem:[#allocation3 + $0x318] sm:$0xf] %vm2145_vm3, %v3573_v23  ;;  %v7757_v4 = vor.u32 %v8668_v48, %v7756_v1  ;;  %v3284_v43 = vld [vmem:[#allocation2 + $0x17c] sm:$0xf]  ;;  %v2395_v23 = vld [vmem:[#allocation2 + $0x160] sm:$0xf]  ;;  %v1115_v54 = vmax.f32 %v12113_v30, %v11361_v37  ;;  %v5839_v1 = vpop.f32.mrf.mxu1 }
 0x4a1   :  { %6200 = vst [vmem:[#allocation5 + $0x24] sm:$0xf] %v6198_v11  ;;  %v5496_v52 = vpop.f32.mrf.mxu3  ;;  %v2784_v3 = vld [vmem:[#allocation2 + $0x17c] sm:$0xf]  ;;  %v6002_v48 = vadd.f32 %v11332_v2, %v5833_v14  ;;  %v2900_v14 = vld [vmem:[#allocation2 + $0x150] sm:$0xf] }
 0x4a2   :  { %3212 = vst.msk [vmem:[#allocation3 + $0x328] sm:$0xf] %vm2145_vm3, %v3061_v7  ;;  %5697 = vmatmul.bf16.gmra.mxu0 %v7757_v4  ;;  %v5497_v63 = vadd.f32 %v5496_v52, %v12129_v38 }
 0x4a3   :  { %5533 = vmatmul.bf16.gmra.mxu3 %v7773_v0  ;;  %3348 = vst.msk [vmem:[#allocation3 + $0x3b8] sm:$0xf] %vm40_vm0, %v3284_v43  ;;  %3090 = vrot.lane.b32.xlu0 %v2907_v20, %s8887_s11 }
 0x4a4   :  { %2848 = vst.msk [vmem:[#allocation3 + $0x4cc] sm:$0xf] %vm40_vm0, %v2784_v3 }
 0x4a5   :  { %v3063_v44 = vpop.permute.xlu0 %3062 }
 0x4a6   :  { %v985_v32 = vpop.permute.xlu1 %984  ;;  %v8679_v21 = vld [vmem:[#allocation3 + $0x368] sm:$0xf0]  ;;  %3213 = vst.msk [vmem:[#allocation3 + $0x33c] sm:$0xf] %vm2145_vm3, %v3063_v44 }
 0x4a7   :  { %v1114_v62 = vmax.f32 %v12110_v55, %v985_v32  ;;  %v7758_v51 = vld [vmem:[#allocation3 + $0x314] sm:$0xf0]  ;;  %v7805_v19 = vor.u32 %v8679_v21, %v7804_v9  ;;  %v11410_v3 = vpop.f32.mrf.mxu2  ;;  %v2257_v9 = vld [vmem:[#allocation2 + $0xe8] sm:$0xf] }
 0x4a8   :  { %3072 = vrot.lane.b32.xlu2 %v2898_v26, %s8887_s11  ;;  %v7761_v12 = vor.u32 %v8666_v39, %v7758_v51  ;;  %v2909_v26 = vld [vmem:[#allocation2 + $0x174] sm:$0xf]  ;;  %v5842_v32 = vpop.f32.mrf.mxu1  ;;  %2321 = vst.msk [vmem:[#allocation3 + $0x39c] sm:$0xf] %vm40_vm0, %v2257_v9  ;;  %v12132_v39 = vmax.f32 %v11112_v36, %v11149_v57  ;;  %v3414_v57 = vld [vmem:[#allocation2 + $0x198] sm:$0xf] }
 0x4a9   :  { %v1498_v24 = vmax.f32 %v1114_v62, %v1434_v42  ;;  %8171 = vmatmul.msk.bf16.gmra.mxu2 %vm5159_vm4, %v7805_v19  ;;  %v5499_v16 = vpop.f32.mrf.mxu3  ;;  %v7776_v15 = vld [vmem:[#allocation3 + $0x328] sm:$0xf]  ;;  %v2388_v62 = vld [vmem:[#allocation2 + $0x144] sm:$0xf] }
 0x4aa   :  { %5866 = vmatmul.bf16.gmra.mxu1 %v7761_v12  ;;  %v5500_v17 = vadd.f32 %v5499_v16, %v12128_v59  ;;  %v2397_v19 = vld [vmem:[#allocation2 + $0x168] sm:$0xf]  ;;  %v2911_v59 = vld [vmem:[#allocation2 + $0x17c] sm:$0xf] }
 0x4ab   :  { %v1565_v55 = vadd.f32 %v11234_v22, %v1498_v24  ;;  %2579 = vrot.lane.b32.xlu0 %v2395_v23, %s8887_s11 }
 0x4ac   :  { %v5669_v31 = vadd.f32 %v5668_v29, %v5500_v17  ;;  %v5666_v29 = vadd.f32 %v11365_v40, %v5497_v63  ;;  %v12131_v40 = vmax.f32 %v11091_v25, %v11129_v35 }
 0x4ad   :  { %v1629_v33 = vpack.c.bf16 %v1565_v55, %v1565_v55  ;;  %v2552_v61 = vpop.permute.xlu0 %2551  ;;  %v8673_v4 = vld [vmem:[#allocation3 + $0x338] sm:$0xf0] }
 0x4ae   :  { %v1307_v49 = vpop.permute.xlu1 %1306  ;;  %v5838_v11 = vadd.f32 %v5837_v45, %v5669_v31  ;;  %2701 = vst.msk [vmem:[#allocation3 + $0x34c] sm:$0xf] %vm2145_vm3, %v2552_v61  ;;  %v7777_v52 = vor.u32 %v8673_v4, %v7776_v15  ;;  %v5835_v2 = vadd.f32 %v11374_v34, %v5666_v29  ;;  %v12135_v4 = vld [vmem:[#allocation27_spill] sm:$0xff] }
 0x4af   :  { %1694 = vst.msk [vmem:[#allocation2 + $0x180] sm:$0xf] %vm40_vm0, %v1629_v33  ;;  %v1435_v7 = vmax.f32 %v12112_v47, %v1307_v49  ;;  %v5673_v47 = vpop.f32.mrf.mxu0  ;;  %v11427_v44 = vpop.f32.mrf.mxu2 }
 0x4b0   :  { %v6007_v8 = vadd.f32 %v6006_v6, %v5838_v11  ;;  %v6004_v25 = vadd.f32 %v11358_v5, %v5835_v2 }
 0x4b1   :  { %v1499_v27 = vmax.f32 %v1115_v54, %v1435_v7  ;;  %v5501_v0 = vpop.f32.mrf.mxu3  ;;  %v12134_v7 = vld [vmem:[#allocation28_spill] sm:$0xff] }
 0x4b2   :  { %v6211_v30 = vmax.f32 %v6002_v48, %v6007_v8  ;;  %v5502_v43 = vadd.f32 %v5501_v0, %v12130_v10  ;;  %5702 = vmatmul.bf16.gmra.mxu0 %v7777_v52  ;;  %v3415_v52 = vld [vmem:[#allocation2 + $0x19c] sm:$0xf]  ;;  %v2390_v0 = vld [vmem:[#allocation2 + $0x14c] sm:$0xf] }
 0x4b3   :  { %v1566_v37 = vadd.f32 %v11234_v22, %v1499_v27  ;;  %3094 = vrot.lane.b32.xlu0 %v2909_v26, %s8887_s11  ;;  %v2399_v27 = vld [vmem:[#allocation2 + $0x170] sm:$0xf]  ;;  %v12136_v26 = vld [vmem:[#allocation29_spill] sm:$0xff] }
 0x4b4   :  { %v6213_v6 = vmax.f32 %v12131_v40, %v6211_v30  ;;  %v5671_v60 = vadd.f32 %v5670_v50, %v5502_v43  ;;  %v5844_v50 = vpop.f32.mrf.mxu1 }
 0x4b5   :  { %v1630_v53 = vpack.c.bf16 %v1566_v37, %v1566_v37  ;;  %v3067_v34 = vpop.permute.xlu0 %3066 }
 0x4b6   :  { %v3795_v18 = vld [vmem:[#allocation2 + $0x180] sm:$0xf]  ;;  %v6215_v22 = vpack.c.bf16 %v6213_v6, %v6213_v6  ;;  %v5840_v45 = vadd.f32 %v5839_v1, %v5671_v60  ;;  %3215 = vst.msk [vmem:[#allocation3 + $0x364] sm:$0xf] %vm2145_vm3, %v3067_v34 }
 0x4b7   :  { %v3412_v20 = vld [vmem:[#allocation2 + $0x180] sm:$0xf]  ;;  %3859 = vst.msk [vmem:[#allocation3 + $0x380] sm:$0xf] %vm40_vm0, %v3795_v18  ;;  %v5675_v13 = vpop.f32.mrf.mxu0  ;;  %v6016_v23 = vpop.f32.mrf.mxu2 }
 0x4b8   :  { %3586 = vrot.lane.b32.xlu1 %v3412_v20, %s8887_s11  ;;  %1695 = vst.msk [vmem:[#allocation2 + $0x184] sm:$0xf] %vm40_vm0, %v1630_v53  ;;  %v6009_v35 = vadd.f32 %v6008_v28, %v5840_v45  ;;  %v12133_v28 = vld [vmem:[#allocation26_spill] sm:$0xff] }
 0x4b9   :  { %6217 = vst [vmem:[#allocation5 + $0x8] sm:$0xf] %v6215_v22  ;;  %v5504_v21 = vpop.f32.mrf.mxu3  ;;  %v2785_v48 = vld [vmem:[#allocation2 + $0x180] sm:$0xf] }
 0x4ba   :  { %v6212_v42 = vmax.f32 %v6004_v25, %v6009_v35  ;;  %v5505_v55 = vadd.f32 %v5504_v21, %v12133_v28  ;;  %2849 = vst.msk [vmem:[#allocation3 + $0x4e0] sm:$0xf] %vm40_vm0, %v2785_v48  ;;  %v3416_v22 = vld [vmem:[#allocation2 + $0x1a0] sm:$0xf] }
 0x4bb   :  { %2583 = vrot.lane.b32.xlu0 %v2397_v19, %s8887_s11 }
 0x4bc   :  { %v6214_v51 = vmax.f32 %v12132_v39, %v6212_v42  ;;  %v5674_v49 = vadd.f32 %v5673_v47, %v5505_v55  ;;  %v5847_v61 = vpop.f32.mrf.mxu1  ;;  %v2902_v42 = vld [vmem:[#allocation2 + $0x158] sm:$0xf] }
 0x4bd   :  { %v2556_v16 = vpop.permute.xlu0 %2555 }
 0x4be   :  { %v6216_v12 = vpack.c.bf16 %v6214_v51, %v6214_v51  ;;  %2703 = vst.msk [vmem:[#allocation3 + $0x374] sm:$0xf] %vm2145_vm3, %v2556_v16  ;;  %v7824_v38 = vld [vmem:[#allocation3 + $0x380] sm:$0xf]  ;;  %v5843_v15 = vadd.f32 %v5842_v32, %v5674_v49 }
 0x4bf   :  { %v3796_v5 = vld [vmem:[#allocation2 + $0x184] sm:$0xf]  ;;  %v5678_v17 = vpop.f32.mrf.mxu0  ;;  %v6018_v53 = vpop.f32.mrf.mxu2 }
 0x4c0   :  { %v3413_v24 = vld [vmem:[#allocation2 + $0x184] sm:$0xf]  ;;  %2565 = vrot.lane.b32.xlu1 %v2388_v62, %s8887_s11  ;;  %3860 = vst.msk [vmem:[#allocation3 + $0x394] sm:$0xf] %vm40_vm0, %v3796_v5  ;;  %v6012_v43 = vadd.f32 %v11410_v3, %v5843_v15  ;;  %v12137_v3 = vmax.f32 %v11168_v56, %v11195_v58 }
 0x4c1   :  { %3588 = vrot.lane.b32.xlu2 %v3413_v24, %s8887_s11  ;;  %6218 = vst [vmem:[#allocation5 + $0x28] sm:$0xf] %v6216_v12  ;;  %v5506_v36 = vpop.f32.mrf.mxu3  ;;  %v2786_v20 = vld [vmem:[#allocation2 + $0x184] sm:$0xf] }
 0x4c2   :  { %v5507_v29 = vadd.f32 %v5506_v36, %v12135_v4  ;;  %2850 = vst.msk [vmem:[#allocation3 + $0x4f4] sm:$0xf] %vm40_vm0, %v2786_v20  ;;  %v2913_v25 = vld [vmem:[#allocation2 + $0x184] sm:$0xf]  ;;  %v2904_v4 = vld [vmem:[#allocation2 + $0x160] sm:$0xf] }
 0x4c3   :  { %3098 = vrot.lane.b32.xlu0 %v2911_v59, %s8887_s11  ;;  %v8678_v12 = vld [vmem:[#allocation3 + $0x360] sm:$0xf0]  ;;  %v2401_v59 = vld [vmem:[#allocation2 + $0x178] sm:$0xf] }
 0x4c4   :  { %v5676_v47 = vadd.f32 %v5675_v13, %v5507_v29  ;;  %v5849_v35 = vpop.f32.mrf.mxu1  ;;  %v12138_v16 = vld [vmem:[#allocation30_spill] sm:$0xff] }
 0x4c5   :  { %v3071_v33 = vpop.permute.xlu0 %3070 }
 0x4c6   :  { %3217 = vst.msk [vmem:[#allocation3 + $0x38c] sm:$0xf] %vm2145_vm3, %v3071_v33  ;;  %v5845_v45 = vadd.f32 %v5844_v50, %v5676_v47 }
 0x4c7   :  { %v8684_v63 = vld [vmem:[#allocation3 + $0x390] sm:$0xf0]  ;;  %v5680_v10 = vpop.f32.mrf.mxu0 }
 0x4c8   :  { %3590 = vrot.lane.b32.xlu1 %v3414_v57, %s8887_s11  ;;  %v7825_v31 = vor.u32 %v8684_v63, %v7824_v38  ;;  %v6014_v51 = vadd.f32 %v11427_v44, %v5845_v45  ;;  %v6021_v57 = vpop.f32.mrf.mxu2  ;;  %v12139_v44 = vmax.f32 %v11183_v41, %v11212_v46  ;;  %v2392_v63 = vld [vmem:[#allocation2 + $0x154] sm:$0xf] }
 0x4c9   :  { %3076 = vrot.lane.b32.xlu2 %v2900_v14, %s8887_s11  ;;  %v5509_v54 = vpop.f32.mrf.mxu3  ;;  %v8777_v14 = vld [vmem:[%s12018_s4 + $0x18] sm:$0xff] }
 0x4ca   :  { %v3577_v11 = vpop.permute.xlu2 %3576  ;;  %8172 = vmatmul.msk.bf16.gmra.mxu2 %vm5159_vm4, %v7825_v31  ;;  %v5510_v1 = vadd.f32 %v5509_v54, %v12134_v7  ;;  %6876 = vmatpush.bf16.msra.mxu3 %v8777_v14 }
 0x4cb   :  { %3727 = vst.msk [vmem:[#allocation3 + $0x340] sm:$0xf] %vm2145_vm3, %v3577_v11  ;;  %2587 = vrot.lane.b32.xlu0 %v2399_v27, %s8887_s11 }
 0x4cc   :  { %v5679_v8 = vadd.f32 %v5678_v17, %v5510_v1  ;;  %v3417_v17 = vld [vmem:[#allocation2 + $0x1a4] sm:$0xf] }
 0x4cd   :  { %v2560_v37 = vpop.permute.xlu0 %2559  ;;  %v8683_v47 = vld [vmem:[#allocation3 + $0x388] sm:$0xf0] }
 0x4ce   :  { %v5848_v30 = vadd.f32 %v5847_v61, %v5679_v8  ;;  %2705 = vst.msk [vmem:[#allocation3 + $0x39c] sm:$0xf] %vm2145_vm3, %v2560_v37  ;;  %v3418_v61 = vld [vmem:[#allocation2 + $0x1a8] sm:$0xf] }
 0x4cf   :  { %v5683_v39 = vpop.f32.mrf.mxu0 }
 0x4d0   :  { %2569 = vrot.lane.b32.xlu1 %v2390_v0, %s8887_s11  ;;  %v6017_v2 = vadd.f32 %v6016_v23, %v5848_v30  ;;  %v11480_v15 = vpop.f32.mrf.mxu2  ;;  %v12140_v30 = vld [vmem:[#allocation32_spill] sm:$0xff] }
 0x4d1   :  { %3592 = vrot.lane.b32.xlu2 %v3415_v52, %s8887_s11  ;;  %v5511_v40 = vpop.f32.mrf.mxu3  ;;  %v8675_v52 = vld [vmem:[#allocation3 + $0x34c] sm:$0xf] }
 0x4d2   :  { %v3065_v6 = vpop.permute.xlu2 %3064  ;;  %v6229_v60 = vmax.f32 %v6012_v43, %v6017_v2  ;;  %v5512_v18 = vadd.f32 %v5511_v40, %v12136_v26  ;;  %v7778_v7 = vld [vmem:[#allocation3 + $0x33c] sm:$0xf0] }
 0x4d3   :  { %3214 = vst.msk [vmem:[#allocation3 + $0x350] sm:$0xf] %vm2145_vm3, %v3065_v6  ;;  %3102 = vrot.lane.b32.xlu0 %v2913_v25, %s8887_s11  ;;  %v2906_v25 = vld [vmem:[#allocation2 + $0x168] sm:$0xf] }
 0x4d4   :  { %v6231_v32 = vmax.f32 %v12137_v3, %v6229_v60  ;;  %v5681_v34 = vadd.f32 %v5680_v10, %v5512_v18  ;;  %v2394_v60 = vld [vmem:[#allocation2 + $0x15c] sm:$0xf]  ;;  %v3420_v3 = vld [vmem:[#allocation2 + $0x1b0] sm:$0xf] }
 0x4d5   :  { %v3075_v62 = vpop.permute.xlu0 %3074  ;;  %v5852_v38 = vpop.f32.mrf.mxu1 }
 0x4d6   :  { %v6233_v9 = vpack.c.bf16 %v6231_v32, %v6231_v32  ;;  %v5850_v21 = vadd.f32 %v5849_v35, %v5681_v34  ;;  %3219 = vst.msk [vmem:[#allocation3 + $0x3b4] sm:$0xf] %vm2145_vm3, %v3075_v62  ;;  %v2258_v32 = vld [vmem:[#allocation2 + $0xec] sm:$0xf]  ;;  %v3421_v62 = vld [vmem:[#allocation2 + $0x1b4] sm:$0xf] }
 0x4d7   :  { %v11477_v48 = vpop.f32.mrf.mxu0  ;;  %2322 = vst.msk [vmem:[#allocation3 + $0x3b0] sm:$0xf] %vm40_vm0, %v2258_v32  ;;  %v3285_v32 = vld [vmem:[#allocation2 + $0x190] sm:$0xf] }
 0x4d8   :  { %3594 = vrot.lane.b32.xlu1 %v3416_v22, %s8887_s11  ;;  %6235 = vst [vmem:[#allocation5 + $0xc] sm:$0xf] %v6233_v9  ;;  %v6019_v19 = vadd.f32 %v6018_v53, %v5850_v21  ;;  %v3419_v53 = vld [vmem:[#allocation2 + $0x1ac] sm:$0xf]  ;;  %v6026_v22 = vpop.f32.mrf.mxu2 }
 0x4d9   :  { %3080 = vrot.lane.b32.xlu2 %v2902_v42, %s8887_s11  ;;  %v3575_v56 = vpop.permute.xlu1 %3574  ;;  %v5514_v58 = vpop.f32.mrf.mxu3  ;;  %3349 = vst.msk [vmem:[#allocation3 + $0x3cc] sm:$0xf] %vm40_vm0, %v3285_v32 }
 0x4da   :  { %v3581_v13 = vpop.permute.xlu2 %3580  ;;  %v7796_v5 = vld [vmem:[#allocation3 + $0x350] sm:$0xf]  ;;  %v6230_v24 = vmax.f32 %v6014_v51, %v6019_v19  ;;  %v5515_v50 = vadd.f32 %v5514_v58, %v12138_v16  ;;  %3726 = vst.msk [vmem:[#allocation3 + $0x32c] sm:$0xf] %vm2145_vm3, %v3575_v56 }
 0x4db   :  { %v7797_v36 = vor.u32 %v8678_v12, %v7796_v5  ;;  %3729 = vst.msk [vmem:[#allocation3 + $0x368] sm:$0xf] %vm2145_vm3, %v3581_v13  ;;  %2591 = vrot.lane.b32.xlu0 %v2401_v59, %s8887_s11 }
 0x4dc   :  { %v6232_v28 = vmax.f32 %v12139_v44, %v6230_v24  ;;  %v5684_v55 = vadd.f32 %v5683_v39, %v5515_v50  ;;  %v2396_v39 = vld [vmem:[#allocation2 + $0x164] sm:$0xf]  ;;  %v3422_v50 = vld [vmem:[#allocation2 + $0x1b8] sm:$0xf] }
 0x4dd   :  { %5707 = vmatmul.bf16.gmra.mxu0 %v7797_v36  ;;  %v2564_v23 = vpop.permute.xlu0 %2563  ;;  %v11483_v29 = vpop.f32.mrf.mxu1  ;;  %v12141_v36 = vld [vmem:[#allocation34_spill] sm:$0xff] }
 0x4de   :  { %v6234_v33 = vpack.c.bf16 %v6232_v28, %v6232_v28  ;;  %v5853_v31 = vadd.f32 %v5852_v38, %v5684_v55  ;;  %2707 = vst.msk [vmem:[#allocation3 + $0x3c4] sm:$0xf] %vm2145_vm3, %v2564_v23  ;;  %v2908_v28 = vld [vmem:[#allocation2 + $0x170] sm:$0xf] }
 0x4df   :  { %v5688_v2 = vpop.f32.mrf.mxu0 }
 0x4e0   :  { %2573 = vrot.lane.b32.xlu1 %v2392_v63, %s8887_s11  ;;  %6236 = vst [vmem:[#allocation5 + $0x2c] sm:$0xf] %v6234_v33  ;;  %v11471_v46 = vadd.f32 %v6021_v57, %v5853_v31  ;;  %v8680_v63 = vld [vmem:[#allocation3 + $0x374] sm:$0xf] }
 0x4e1   :  { %3596 = vrot.lane.b32.xlu2 %v3417_v17, %s8887_s11  ;;  %v2554_v41 = vpop.permute.xlu1 %2553  ;;  %v11474_v49 = vpop.f32.mrf.mxu3  ;;  %v8671_v11 = vld [vmem:[#allocation3 + $0x32c] sm:$0xf]  ;;  %v8688_v17 = vld [vmem:[#allocation3 + $0x3b0] sm:$0xf0] }
 0x4e2   :  { %v3069_v54 = vpop.permute.xlu2 %3068  ;;  %2702 = vst.msk [vmem:[#allocation3 + $0x360] sm:$0xf] %vm2145_vm3, %v2554_v41  ;;  %v7781_v1 = vor.u32 %v8671_v11, %v7778_v7  ;;  %v7798_v5 = vld [vmem:[#allocation3 + $0x364] sm:$0xf0]  ;;  %v3286_v11 = vld [vmem:[#allocation2 + $0x194] sm:$0xf]  ;;  %v11519_v7 = vpop.f32.mrf.mxu2 }
 0x4e3   :  { %3216 = vst.msk [vmem:[#allocation3 + $0x378] sm:$0xf] %vm2145_vm3, %v3069_v54 }
 0x4e4   :  { %5871 = vmatmul.bf16.gmra.mxu1 %v7781_v1  ;;  %v3423_v1 = vld [vmem:[#allocation2 + $0x1bc] sm:$0xf]  ;;  %3350 = vst.msk [vmem:[#allocation3 + $0x3e0] sm:$0xf] %vm40_vm0, %v3286_v11 }
 0x4e5   :  { %v3079_v8 = vpop.permute.xlu0 %3078 }
 0x4e6   :  { %3221 = vst.msk [vmem:[#allocation3 + $0x3dc] sm:$0xf] %vm2145_vm3, %v3079_v8 }
 0x4e7   :  { %v11503_v51 = vpop.f32.mrf.mxu0 }
 0x4e8   :  { %3598 = vrot.lane.b32.xlu1 %v3418_v61, %s8887_s11  ;;  %v2398_v61 = vld [vmem:[#allocation2 + $0x16c] sm:$0xf] }
 0x4e9   :  { %3084 = vrot.lane.b32.xlu2 %v2904_v4, %s8887_s11  ;;  %v5519_v27 = vpop.f32.mrf.mxu3  ;;  %v7790_v0 = vld [vmem:[#allocation3 + $0x35c] sm:$0xf0] }
 0x4ea   :  { %v5520_v37 = vadd.f32 %v5519_v27, %v12140_v30  ;;  %v7793_v10 = vor.u32 %v8675_v52, %v7790_v0  ;;  %v7816_v43 = vld [vmem:[#allocation3 + $0x378] sm:$0xf] }
 0x4eb   :  { %v7817_v40 = vor.u32 %v8683_v47, %v7816_v43  ;;  %v3798_v43 = vld [vmem:[#allocation2 + $0x18c] sm:$0xf]  ;;  %v6031_v47 = vpop.f32.mrf.mxu2 }
 0x4ec   :  { %5538 = vmatmul.bf16.gmra.mxu3 %v7793_v10  ;;  %v5689_v6 = vadd.f32 %v5688_v2, %v5520_v37  ;;  %v3424_v37 = vld [vmem:[#allocation2 + $0x1c0] sm:$0xf]  ;;  %v3797_v10 = vld [vmem:[#allocation2 + $0x188] sm:$0xf]  ;;  %3862 = vst.msk [vmem:[#allocation3 + $0x3bc] sm:$0xf] %vm40_vm0, %v3798_v43 }
 0x4ed   :  { %5712 = vmatmul.bf16.gmra.mxu0 %v7817_v40  ;;  %v2568_v18 = vpop.permute.xlu0 %2567  ;;  %3861 = vst.msk [vmem:[#allocation3 + $0x3a8] sm:$0xf] %vm40_vm0, %v3797_v10  ;;  %v2910_v40 = vld [vmem:[#allocation2 + $0x178] sm:$0xf] }
 0x4ee   :  { %2709 = vst.msk [vmem:[#allocation3 + $0x3ec] sm:$0xf] %vm2145_vm3, %v2568_v18  ;;  %v2915_v18 = vld [vmem:[#allocation2 + $0x18c] sm:$0xf]  ;;  %v2273_v43 = vld [vmem:[#allocation2 + $0x138] sm:$0xf] }
 0x4ef   :  { %v5857_v26 = vpop.f32.mrf.mxu1  ;;  %3106 = vrot.lane.b32.xlu0 %v2915_v18, %s8887_s11  ;;  %2337 = vst.msk [vmem:[#allocation3 + $0x4dc] sm:$0xf] %vm40_vm0, %v2273_v43 }
 0x4f0   :  { %2577 = vrot.lane.b32.xlu1 %v2394_v60, %s8887_s11  ;;  %v5858_v20 = vadd.f32 %v5857_v26, %v5689_v6  ;;  %v8685_v60 = vld [vmem:[#allocation3 + $0x39c] sm:$0xf] }
 0x4f1   :  { %3600 = vrot.lane.b32.xlu2 %v3419_v53, %s8887_s11  ;;  %v11500_v42 = vpop.f32.mrf.mxu3 }
 0x4f2   :  { %v11491_v45 = vadd.f32 %v6026_v22, %v5858_v20 }
 0x4f4   :  { %v6241_v34 = vmax.f32 %v11471_v46, %v11491_v45  ;;  %v8803_v45 = vld [vmem:[%s12018_s4 + $0xe8] sm:$0xff] }
 0x4f5   :  { %v3083_v35 = vpop.permute.xlu0 %3082 }
 0x4f6   :  { %3223 = vst.msk [vmem:[#allocation3 + $0x404] sm:$0xf] %vm2145_vm3, %v3083_v35  ;;  %v7844_v35 = vld [vmem:[#allocation3 + $0x3a8] sm:$0xf] }
 0x4f7   :  { %v11505_v19 = vpop.f32.mrf.mxu1 }
 0x4f8   :  { %3602 = vrot.lane.b32.xlu1 %v3420_v3, %s8887_s11  ;;  %v3288_v3 = vld [vmem:[#allocation2 + $0x19c] sm:$0xf] }
 0x4f9   :  { %3088 = vrot.lane.b32.xlu2 %v2906_v25, %s8887_s11  ;;  %v3425_v25 = vld [vmem:[#allocation2 + $0x1c4] sm:$0xf]  ;;  %3352 = vst.msk [vmem:[#allocation3 + $0x408] sm:$0xf] %vm40_vm0, %v3288_v3 }
 0x4fa   :  { %v3579_v9 = vpop.permute.xlu1 %3578  ;;  %v3585_v21 = vpop.permute.xlu2 %3584 }
 0x4fb   :  { %3728 = vst.msk [vmem:[#allocation3 + $0x354] sm:$0xf] %vm2145_vm3, %v3579_v9  ;;  %v8689_v9 = vld [vmem:[#allocation3 + $0x3b8] sm:$0xf0] }
 0x4fc   :  { %3731 = vst.msk [vmem:[#allocation3 + $0x390] sm:$0xf] %vm2145_vm3, %v3585_v21  ;;  %v5524_v16 = vpop.f32.mrf.mxu3  ;;  %v8776_v21 = vld [vmem:[%s12018_s4 + $0x10] sm:$0xff] }
 0x4fd   :  { %v2572_v56 = vpop.permute.xlu0 %2571  ;;  %v5525_v57 = vadd.f32 %v5524_v16, %v12141_v36  ;;  %6877 = vmatpush.bf16.msra.mxu3 %v8776_v21  ;;  %v11548_v16 = vpop.f32.mrf.mxu2  ;;  %v2914_v21 = vld [vmem:[#allocation2 + $0x188] sm:$0xf] }
 0x4fe   :  { %2711 = vst.msk [vmem:[#allocation3 + $0x414] sm:$0xf] %vm2145_vm3, %v2572_v56  ;;  %v2400_v56 = vld [vmem:[#allocation2 + $0x174] sm:$0xf] }
 0x4ff   :  { %v5862_v14 = vpop.f32.mrf.mxu1 }
 0x500   :  { %2581 = vrot.lane.b32.xlu1 %v2396_v39, %s8887_s11 }
 0x501   :  { %3604 = vrot.lane.b32.xlu2 %v3421_v62, %s8887_s11  ;;  %v12142_v62 = vld [vmem:[#allocation36_spill] sm:$0xff] }
 0x502   :  { %v2558_v58 = vpop.permute.xlu1 %2557  ;;  %v8676_v13 = vld [vmem:[#allocation3 + $0x354] sm:$0xf]  ;;  %v3073_v12 = vpop.permute.xlu2 %3072 }
 0x503   :  { %2704 = vst.msk [vmem:[#allocation3 + $0x388] sm:$0xf] %vm2145_vm3, %v2558_v58  ;;  %v7801_v24 = vor.u32 %v8676_v13, %v7798_v5  ;;  %v7818_v0 = vld [vmem:[#allocation3 + $0x38c] sm:$0xf0]  ;;  %v7845_v58 = vor.u32 %v8689_v9, %v7844_v35  ;;  %v3802_v9 = vld [vmem:[#allocation2 + $0x1ac] sm:$0xf] }
 0x504   :  { %3218 = vst.msk [vmem:[#allocation3 + $0x3a0] sm:$0xf] %vm2145_vm3, %v3073_v12  ;;  %v11523_v4 = vpop.f32.mrf.mxu3  ;;  %v3428_v35 = vld [vmem:[#allocation2 + $0x1d0] sm:$0xf] }
 0x505   :  { %5876 = vmatmul.bf16.gmra.mxu1 %v7801_v24  ;;  %v3087_v55 = vpop.permute.xlu0 %3086  ;;  %8173 = vmatmul.msk.bf16.gmra.mxu2 %vm5159_vm4, %v7845_v58  ;;  %3866 = vst.msk [vmem:[#allocation3 + $0x40c] sm:$0xf] %vm40_vm0, %v3802_v9 }
 0x506   :  { %3225 = vst.msk [vmem:[#allocation3 + $0x42c] sm:$0xf] %vm2145_vm3, %v3087_v55 }
 0x507   :  { %v5693_v44 = vpop.f32.mrf.mxu0  ;;  %v11543_v13 = vpop.f32.mrf.mxu1 }
 0x508   :  { %3606 = vrot.lane.b32.xlu1 %v3422_v50, %s8887_s11  ;;  %v5694_v59 = vadd.f32 %v5693_v44, %v5525_v57  ;;  %v3799_v57 = vld [vmem:[#allocation2 + $0x1a0] sm:$0xf]  ;;  %v3800_v44 = vld [vmem:[#allocation2 + $0x1a4] sm:$0xf] }
 0x509   :  { %3092 = vrot.lane.b32.xlu2 %v2908_v28, %s8887_s11  ;;  %v3426_v28 = vld [vmem:[#allocation2 + $0x1c8] sm:$0xf]  ;;  %3863 = vst.msk [vmem:[#allocation3 + $0x3d0] sm:$0xf] %vm40_vm0, %v3799_v57  ;;  %v8698_v57 = vld [vmem:[#allocation3 + $0x400] sm:$0xf0] }
 0x50a   :  { %v3583_v38 = vpop.permute.xlu1 %3582  ;;  %v7810_v33 = vld [vmem:[#allocation3 + $0x384] sm:$0xf0]  ;;  %v11516_v31 = vadd.f32 %v5862_v14, %v5694_v59  ;;  %3864 = vst.msk [vmem:[#allocation3 + $0x3e4] sm:$0xf] %vm40_vm0, %v3800_v44  ;;  %v2912_v59 = vld [vmem:[#allocation2 + $0x180] sm:$0xf] }
 0x50b   :  { %3730 = vst.msk [vmem:[#allocation3 + $0x37c] sm:$0xf] %vm2145_vm3, %v3583_v38  ;;  %v7813_v23 = vor.u32 %v8680_v63, %v7810_v33  ;;  %v7836_v41 = vld [vmem:[#allocation3 + $0x3a0] sm:$0xf]  ;;  %v6036_v63 = vpop.f32.mrf.mxu2 }
 0x50c   :  { %v7837_v54 = vor.u32 %v8688_v17, %v7836_v41  ;;  %v11562_v41 = vadd.f32 %v6031_v47, %v11516_v31  ;;  %v3427_v31 = vld [vmem:[#allocation2 + $0x1cc] sm:$0xf]  ;;  %v2402_v47 = vld [vmem:[#allocation2 + $0x17c] sm:$0xf] }
 0x50d   :  { %5543 = vmatmul.bf16.gmra.mxu3 %v7813_v23  ;;  %v2576_v8 = vpop.permute.xlu0 %2575  ;;  %v3290_v23 = vld [vmem:[#allocation2 + $0x1a4] sm:$0xf] }
 0x50e   :  { %5717 = vmatmul.bf16.gmra.mxu0 %v7837_v54  ;;  %2713 = vst.msk [vmem:[#allocation3 + $0x43c] sm:$0xf] %vm2145_vm3, %v2576_v8 }
 0x50f   :  { %v11530_v2 = vpop.f32.mrf.mxu0  ;;  %3354 = vst.msk [vmem:[#allocation3 + $0x430] sm:$0xf] %vm40_vm0, %v3290_v23 }
 0x510   :  { %2585 = vrot.lane.b32.xlu1 %v2398_v61, %s8887_s11  ;;  %v8693_v61 = vld [vmem:[#allocation3 + $0x3d8] sm:$0xf0] }
 0x511   :  { %3608 = vrot.lane.b32.xlu2 %v3423_v1, %s8887_s11 }
 0x512   :  { %v2562_v27 = vpop.permute.xlu1 %2561  ;;  %v8681_v52 = vld [vmem:[#allocation3 + $0x37c] sm:$0xf] }
 0x513   :  { %2706 = vst.msk [vmem:[#allocation3 + $0x3b0] sm:$0xf] %vm2145_vm3, %v2562_v27  ;;  %v7821_v30 = vor.u32 %v8681_v52, %v7818_v0  ;;  %v7864_v27 = vld [vmem:[#allocation3 + $0x3d0] sm:$0xf]  ;;  %v3287_v52 = vld [vmem:[#allocation2 + $0x198] sm:$0xf] }
 0x514   :  { %3351 = vst.msk [vmem:[#allocation3 + $0x3f4] sm:$0xf] %vm40_vm0, %v3287_v52  ;;  %v3294_v52 = vld [vmem:[#allocation2 + $0x1b4] sm:$0xf] }
 0x515   :  { %5881 = vmatmul.bf16.gmra.mxu1 %v7821_v30  ;;  %v3091_v53 = vpop.permute.xlu0 %3090  ;;  %3358 = vst.msk [vmem:[#allocation3 + $0x480] sm:$0xf] %vm40_vm0, %v3294_v52 }
 0x516   :  { %v5529_v6 = vpop.f32.mrf.mxu3  ;;  %3227 = vst.msk [vmem:[#allocation3 + $0x454] sm:$0xf] %vm2145_vm3, %v3091_v53 }
 0x517   :  { %v5530_v39 = vadd.f32 %v5529_v6, %v12142_v62  ;;  %v3292_v62 = vld [vmem:[#allocation2 + $0x1ac] sm:$0xf] }
 0x518   :  { %3610 = vrot.lane.b32.xlu1 %v3424_v37, %s8887_s11  ;;  %v8694_v37 = vld [vmem:[#allocation3 + $0x3e0] sm:$0xf0]  ;;  %3356 = vst.msk [vmem:[#allocation3 + $0x458] sm:$0xf] %vm40_vm0, %v3292_v62  ;;  %v3805_v62 = vld [vmem:[#allocation2 + $0x1b8] sm:$0xf] }
 0x519   :  { %3096 = vrot.lane.b32.xlu2 %v2910_v40, %s8887_s11  ;;  %v7865_v10 = vor.u32 %v8694_v37, %v7864_v27  ;;  %v12143_v40 = vld [vmem:[#allocation38_spill] sm:$0xff]  ;;  %v3804_v27 = vld [vmem:[#allocation2 + $0x1b4] sm:$0xf]  ;;  %3869 = vst.msk [vmem:[#allocation3 + $0x448] sm:$0xf] %vm40_vm0, %v3805_v62 }
 0x51a   :  { %v7830_v26 = vld [vmem:[#allocation3 + $0x3ac] sm:$0xf0]  ;;  %3868 = vst.msk [vmem:[#allocation3 + $0x434] sm:$0xf] %vm40_vm0, %v3804_v27  ;;  %v3295_v62 = vld [vmem:[#allocation2 + $0x1b8] sm:$0xf] }
 0x51b   :  { %v3589_v20 = vpop.permute.xlu2 %3588  ;;  %v7833_v22 = vor.u32 %v8685_v60, %v7830_v26  ;;  %8174 = vmatmul.msk.bf16.gmra.mxu2 %vm5159_vm4, %v7865_v10  ;;  %3359 = vst.msk [vmem:[#allocation3 + $0x494] sm:$0xf] %vm40_vm0, %v3295_v62 }
 0x51c   :  { %3733 = vst.msk [vmem:[#allocation3 + $0x3b8] sm:$0xf] %vm2145_vm3, %v3589_v20 }
 0x51d   :  { %5548 = vmatmul.bf16.gmra.mxu3 %v7833_v22  ;;  %v2580_v12 = vpop.permute.xlu0 %2579 }
 0x51e   :  { %2715 = vst.msk [vmem:[#allocation3 + $0x464] sm:$0xf] %vm2145_vm3, %v2580_v12  ;;  %v11551_v50 = vpop.f32.mrf.mxu3 }
 0x51f   :  { %v5698_v5 = vpop.f32.mrf.mxu0 }
 0x520   :  { %2589 = vrot.lane.b32.xlu1 %v2400_v56, %s8887_s11  ;;  %v5699_v24 = vadd.f32 %v5698_v5, %v5530_v39  ;;  %v8690_v39 = vld [vmem:[#allocation3 + $0x3c4] sm:$0xf] }
 0x521   :  { %3612 = vrot.lane.b32.xlu2 %v3425_v25, %s8887_s11  ;;  %v3801_v25 = vld [vmem:[#allocation2 + $0x1a8] sm:$0xf] }
 0x522   :  { %3865 = vst.msk [vmem:[#allocation3 + $0x3f8] sm:$0xf] %vm40_vm0, %v3801_v25 }
 0x523   :  { %v3077_v36 = vpop.permute.xlu2 %3076  ;;  %v7838_v22 = vld [vmem:[#allocation3 + $0x3b4] sm:$0xf0] }
 0x524   :  { %3220 = vst.msk [vmem:[#allocation3 + $0x3c8] sm:$0xf] %vm2145_vm3, %v3077_v36 }
 0x525   :  { %v3095_v14 = vpop.permute.xlu0 %3094 }
 0x526   :  { %3229 = vst.msk [vmem:[#allocation3 + $0x47c] sm:$0xf] %vm2145_vm3, %v3095_v14  ;;  %v5534_v0 = vpop.f32.mrf.mxu3 }
 0x527   :  { %v5867_v55 = vpop.f32.mrf.mxu1  ;;  %v11557_v38 = vpop.f32.mrf.mxu0  ;;  %v5535_v6 = vadd.f32 %v5534_v0, %v12143_v40 }
 0x528   :  { %3614 = vrot.lane.b32.xlu1 %v3426_v28, %s8887_s11  ;;  %v5868_v17 = vadd.f32 %v5867_v55, %v5699_v24  ;;  %v3289_v55 = vld [vmem:[#allocation2 + $0x1a0] sm:$0xf] }
 0x529   :  { %3100 = vrot.lane.b32.xlu2 %v2912_v59, %s8887_s11  ;;  %v7884_v28 = vld [vmem:[#allocation3 + $0x3f8] sm:$0xf]  ;;  %v8699_v59 = vld [vmem:[#allocation3 + $0x408] sm:$0xf0]  ;;  %3353 = vst.msk [vmem:[#allocation3 + $0x41c] sm:$0xf] %vm40_vm0, %v3289_v55 }
 0x52a   :  { %v3587_v33 = vpop.permute.xlu1 %3586  ;;  %v11564_v54 = vadd.f32 %v6036_v63, %v5868_v17  ;;  %v3429_v17 = vld [vmem:[#allocation2 + $0x1d4] sm:$0xf]  ;;  %v7885_v14 = vor.u32 %v8699_v59, %v7884_v28  ;;  %v7924_v59 = vld [vmem:[#allocation3 + $0x448] sm:$0xf] }
 0x52b   :  { %v3593_v11 = vpop.permute.xlu2 %3592  ;;  %3732 = vst.msk [vmem:[#allocation3 + $0x3a4] sm:$0xf] %vm2145_vm3, %v3587_v33  ;;  %v7856_v1 = vld [vmem:[#allocation3 + $0x3c8] sm:$0xf]  ;;  %v8708_v28 = vld [vmem:[#allocation3 + $0x450] sm:$0xf0] }
 0x52c   :  { %3735 = vst.msk [vmem:[#allocation3 + $0x3e0] sm:$0xf] %vm2145_vm3, %v3593_v11  ;;  %v7857_v8 = vor.u32 %v8693_v61, %v7856_v1  ;;  %v6259_v30 = vmax.f32 %v11562_v41, %v11564_v54  ;;  %8175 = vmatmul.msk.bf16.gmra.mxu2 %vm5159_vm4, %v7885_v14  ;;  %v8810_v54 = vld [vmem:[%s12018_s4 + $0x120] sm:$0xff] }
 0x52d   :  { %v2584_v53 = vpop.permute.xlu0 %2583 }
 0x52e   :  { %5722 = vmatmul.bf16.gmra.mxu0 %v7857_v8  ;;  %2717 = vst.msk [vmem:[#allocation3 + $0x48c] sm:$0xf] %vm2145_vm3, %v2584_v53  ;;  %v3803_v8 = vld [vmem:[#allocation2 + $0x1b0] sm:$0xf] }
 0x52f   :  { %v5703_v60 = vpop.f32.mrf.mxu0  ;;  %3867 = vst.msk [vmem:[#allocation3 + $0x420] sm:$0xf] %vm40_vm0, %v3803_v8 }
 0x530   :  { %2593 = vrot.lane.b32.xlu1 %v2402_v47, %s8887_s11  ;;  %v11578_v26 = vadd.f32 %v5703_v60, %v5535_v6  ;;  %v8703_v6 = vld [vmem:[#allocation3 + $0x428] sm:$0xf0] }
 0x531   :  { %3616 = vrot.lane.b32.xlu2 %v3427_v31, %s8887_s11  ;;  %v8695_v31 = vld [vmem:[#allocation3 + $0x3ec] sm:$0xf] }
 0x532   :  { %v2566_v18 = vpop.permute.xlu1 %2565  ;;  %v8686_v20 = vld [vmem:[#allocation3 + $0x3a4] sm:$0xf] }
 0x533   :  { %v3081_v3 = vpop.permute.xlu2 %3080  ;;  %2708 = vst.msk [vmem:[#allocation3 + $0x3d8] sm:$0xf] %vm2145_vm3, %v2566_v18  ;;  %v7841_v32 = vor.u32 %v8686_v20, %v7838_v22  ;;  %v7858_v63 = vld [vmem:[#allocation3 + $0x3dc] sm:$0xf0]  ;;  %v3291_v18 = vld [vmem:[#allocation2 + $0x1a8] sm:$0xf] }
 0x534   :  { %3222 = vst.msk [vmem:[#allocation3 + $0x3f0] sm:$0xf] %vm2145_vm3, %v3081_v3  ;;  %v8704_v20 = vld [vmem:[#allocation3 + $0x430] sm:$0xf0] }
 0x535   :  { %5886 = vmatmul.bf16.gmra.mxu1 %v7841_v32  ;;  %v3099_v56 = vpop.permute.xlu0 %3098  ;;  %3355 = vst.msk [vmem:[#allocation3 + $0x444] sm:$0xf] %vm40_vm0, %v3291_v18 }
 0x536   :  { %3231 = vst.msk [vmem:[#allocation3 + $0x4a4] sm:$0xf] %vm2145_vm3, %v3099_v56  ;;  %v7904_v60 = vld [vmem:[#allocation3 + $0x420] sm:$0xf] }
 0x537   :  { %v7905_v3 = vor.u32 %v8704_v20, %v7904_v60  ;;  %v8705_v60 = vld [vmem:[#allocation3 + $0x43c] sm:$0xf] }
 0x538   :  { %3618 = vrot.lane.b32.xlu1 %v3428_v35, %s8887_s11 }
 0x539   :  { %3104 = vrot.lane.b32.xlu2 %v2914_v21, %s8887_s11 }
 0x53a   :  { %v3591_v58 = vpop.permute.xlu1 %3590  ;;  %v7850_v5 = vld [vmem:[#allocation3 + $0x3d4] sm:$0xf0] }
 0x53b   :  { %v3597_v12 = vpop.permute.xlu2 %3596  ;;  %3734 = vst.msk [vmem:[#allocation3 + $0x3cc] sm:$0xf] %vm2145_vm3, %v3591_v58  ;;  %v7853_v24 = vor.u32 %v8690_v39, %v7850_v5  ;;  %v7876_v36 = vld [vmem:[#allocation3 + $0x3f0] sm:$0xf]  ;;  %v3806_v39 = vld [vmem:[#allocation2 + $0x1bc] sm:$0xf] }
 0x53c   :  { %3737 = vst.msk [vmem:[#allocation3 + $0x408] sm:$0xf] %vm2145_vm3, %v3597_v12  ;;  %v7877_v44 = vor.u32 %v8698_v57, %v7876_v36  ;;  %8176 = vmatmul.msk.bf16.gmra.mxu2 %vm5159_vm4, %v7905_v3  ;;  %v8700_v58 = vld [vmem:[#allocation3 + $0x414] sm:$0xf]  ;;  %v3296_v12 = vld [vmem:[#allocation2 + $0x1bc] sm:$0xf] }
 0x53d   :  { %5553 = vmatmul.bf16.gmra.mxu3 %v7853_v24  ;;  %v2588_v33 = vpop.permute.xlu0 %2587  ;;  %3870 = vst.msk [vmem:[#allocation3 + $0x45c] sm:$0xf] %vm40_vm0, %v3806_v39  ;;  %v11609_v24 = vpop.f32.mrf.mxu1 }
 0x53e   :  { %5727 = vmatmul.bf16.gmra.mxu0 %v7877_v44  ;;  %2719 = vst.msk [vmem:[#allocation3 + $0x4b4] sm:$0xf] %vm2145_vm3, %v2588_v33  ;;  %v8775_v33 = vld [vmem:[%s12018_s4 + $0x8] sm:$0xff] }
 0x53f   :  { %3360 = vst.msk [vmem:[#allocation3 + $0x4a8] sm:$0xf] %vm40_vm0, %v3296_v12  ;;  %6878 = vmatpush.bf16.msra.mxu3 %v8775_v33  ;;  %v3810_v33 = vld [vmem:[#allocation2 + $0x1cc] sm:$0xf] }
 0x540   :  { %3874 = vst.msk [vmem:[#allocation3 + $0x4ac] sm:$0xf] %vm40_vm0, %v3810_v33 }
 0x541   :  { %3620 = vrot.lane.b32.xlu2 %v3429_v17, %s8887_s11  ;;  %v3293_v17 = vld [vmem:[#allocation2 + $0x1b0] sm:$0xf] }
 0x542   :  { %v2570_v23 = vpop.permute.xlu1 %2569  ;;  %v8691_v11 = vld [vmem:[#allocation3 + $0x3cc] sm:$0xf]  ;;  %3357 = vst.msk [vmem:[#allocation3 + $0x46c] sm:$0xf] %vm40_vm0, %v3293_v17 }
 0x543   :  { %v3085_v1 = vpop.permute.xlu2 %3084  ;;  %2710 = vst.msk [vmem:[#allocation3 + $0x400] sm:$0xf] %vm2145_vm3, %v2570_v23  ;;  %v7861_v61 = vor.u32 %v8691_v11, %v7858_v63  ;;  %v7878_v22 = vld [vmem:[#allocation3 + $0x404] sm:$0xf0] }
 0x544   :  { %3224 = vst.msk [vmem:[#allocation3 + $0x418] sm:$0xf] %vm2145_vm3, %v3085_v1  ;;  %v8709_v14 = vld [vmem:[#allocation3 + $0x458] sm:$0xf0] }
 0x545   :  { %5891 = vmatmul.bf16.gmra.mxu1 %v7861_v61  ;;  %v3103_v0 = vpop.permute.xlu0 %3102  ;;  %v7925_v63 = vor.u32 %v8709_v14, %v7924_v59 }
 0x546   :  { %3233 = vst.msk [vmem:[#allocation3 + $0x4cc] sm:$0xf] %vm2145_vm3, %v3103_v0  ;;  %v11624_v0 = vpop.f32.mrf.mxu2 }
 0x54a   :  { %v3595_v37 = vpop.permute.xlu1 %3594  ;;  %v7870_v10 = vld [vmem:[#allocation3 + $0x3fc] sm:$0xf0] }
 0x54b   :  { %v3601_v43 = vpop.permute.xlu2 %3600  ;;  %3736 = vst.msk [vmem:[#allocation3 + $0x3f4] sm:$0xf] %vm2145_vm3, %v3595_v37  ;;  %v7873_v47 = vor.u32 %v8695_v31, %v7870_v10  ;;  %v7896_v40 = vld [vmem:[#allocation3 + $0x418] sm:$0xf]  ;;  %v5536_v37 = vpop.f32.mrf.mxu3  ;;  %v3807_v10 = vld [vmem:[#allocation2 + $0x1c0] sm:$0xf] }
 0x54c   :  { %3739 = vst.msk [vmem:[#allocation3 + $0x430] sm:$0xf] %vm2145_vm3, %v3601_v43  ;;  %v7897_v53 = vor.u32 %v8703_v6, %v7896_v40  ;;  %8177 = vmatmul.msk.bf16.gmra.mxu2 %vm5159_vm4, %v7925_v63  ;;  %v5705_v31 = vpop.f32.mrf.mxu0  ;;  %v3808_v43 = vld [vmem:[#allocation2 + $0x1c4] sm:$0xf]  ;;  %v3809_v63 = vld [vmem:[#allocation2 + $0x1c8] sm:$0xf] }
 0x54d   :  { %5558 = vmatmul.bf16.gmra.mxu3 %v7873_v47  ;;  %v2592_v32 = vpop.permute.xlu0 %2591  ;;  %v12144_v47 = vld [vmem:[#allocation39_spill] sm:$0xff]  ;;  %3871 = vst.msk [vmem:[#allocation3 + $0x470] sm:$0xf] %vm40_vm0, %v3807_v10 }
 0x54e   :  { %5732 = vmatmul.bf16.gmra.mxu0 %v7897_v53  ;;  %2721 = vst.msk [vmem:[#allocation3 + $0x4dc] sm:$0xf] %vm2145_vm3, %v2592_v32  ;;  %v5537_v40 = vadd.f32 %v5536_v37, %v12144_v47  ;;  %v8713_v32 = vld [vmem:[#allocation3 + $0x478] sm:$0xf0] }
 0x54f   :  { %3872 = vst.msk [vmem:[#allocation3 + $0x484] sm:$0xf] %vm40_vm0, %v3808_v43 }
 0x550   :  { %v5706_v6 = vadd.f32 %v5705_v31, %v5537_v40  ;;  %3873 = vst.msk [vmem:[#allocation3 + $0x498] sm:$0xf] %vm40_vm0, %v3809_v63  ;;  %v8718_v31 = vld [vmem:[#allocation3 + $0x4a0] sm:$0xf0] }
 0x552   :  { %v2574_v25 = vpop.permute.xlu1 %2573  ;;  %v8696_v35 = vld [vmem:[#allocation3 + $0x3f4] sm:$0xf] }
 0x553   :  { %v3089_v9 = vpop.permute.xlu2 %3088  ;;  %2712 = vst.msk [vmem:[#allocation3 + $0x428] sm:$0xf] %vm2145_vm3, %v2574_v25  ;;  %v7881_v21 = vor.u32 %v8696_v35, %v7878_v22  ;;  %v7898_v23 = vld [vmem:[#allocation3 + $0x42c] sm:$0xf0] }
 0x554   :  { %3226 = vst.msk [vmem:[#allocation3 + $0x440] sm:$0xf] %vm2145_vm3, %v3089_v9  ;;  %v11633_v9 = vpop.f32.mrf.mxu2 }
 0x555   :  { %5896 = vmatmul.bf16.gmra.mxu1 %v7881_v21  ;;  %v7944_v21 = vld [vmem:[#allocation3 + $0x470] sm:$0xf] }
 0x557   :  { %v7964_v40 = vld [vmem:[#allocation3 + $0x498] sm:$0xf] }
 0x55a   :  { %v3599_v56 = vpop.permute.xlu1 %3598  ;;  %v7890_v5 = vld [vmem:[#allocation3 + $0x424] sm:$0xf0] }
 0x55b   :  { %v3605_v36 = vpop.permute.xlu2 %3604  ;;  %3738 = vst.msk [vmem:[#allocation3 + $0x41c] sm:$0xf] %vm2145_vm3, %v3599_v56  ;;  %v7893_v57 = vor.u32 %v8700_v58, %v7890_v5  ;;  %v7916_v44 = vld [vmem:[#allocation3 + $0x440] sm:$0xf]  ;;  %v8714_v56 = vld [vmem:[#allocation3 + $0x480] sm:$0xf0]  ;;  %v5708_v58 = vpop.f32.mrf.mxu0 }
 0x55c   :  { %3741 = vst.msk [vmem:[#allocation3 + $0x458] sm:$0xf] %vm2145_vm3, %v3605_v36  ;;  %v7917_v55 = vor.u32 %v8708_v28, %v7916_v44  ;;  %v7945_v12 = vor.u32 %v8714_v56, %v7944_v21  ;;  %v12145_v36 = vld [vmem:[#allocation40_spill] sm:$0xff]  ;;  %v11640_v14 = vpop.f32.mrf.mxu2 }
 0x55d   :  { %5563 = vmatmul.bf16.gmra.mxu3 %v7893_v57 }
 0x55e   :  { %5737 = vmatmul.bf16.gmra.mxu0 %v7917_v55  ;;  %8178 = vmatmul.msk.bf16.gmra.mxu2 %vm5159_vm4, %v7945_v12  ;;  %v8788_v12 = vld [vmem:[%s12018_s4 + $0x70] sm:$0xff] }
 0x561   :  { %v5872_v8 = vpop.f32.mrf.mxu1 }
 0x562   :  { %v2578_v11 = vpop.permute.xlu1 %2577  ;;  %v8701_v1 = vld [vmem:[#allocation3 + $0x41c] sm:$0xf]  ;;  %v11622_v52 = vadd.f32 %v5872_v8, %v11578_v26 }
 0x563   :  { %v3093_v61 = vpop.permute.xlu2 %3092  ;;  %2714 = vst.msk [vmem:[#allocation3 + $0x450] sm:$0xf] %vm2145_vm3, %v2578_v11  ;;  %v7901_v27 = vor.u32 %v8701_v1, %v7898_v23  ;;  %v7918_v39 = vld [vmem:[#allocation3 + $0x454] sm:$0xf0]  ;;  %v8710_v11 = vld [vmem:[#allocation3 + $0x464] sm:$0xf] }
 0x564   :  { %3228 = vst.msk [vmem:[#allocation3 + $0x468] sm:$0xf] %vm2145_vm3, %v3093_v61  ;;  %v5710_v61 = vpop.f32.mrf.mxu0  ;;  %v6046_v47 = vpop.f32.mrf.mxu2 }
 0x565   :  { %5901 = vmatmul.bf16.gmra.mxu1 %v7901_v27 }
 0x569   :  { %v5874_v26 = vpop.f32.mrf.mxu1 }
 0x56a   :  { %v3603_v53 = vpop.permute.xlu1 %3602  ;;  %v7910_v18 = vld [vmem:[#allocation3 + $0x44c] sm:$0xf0]  ;;  %v11631_v25 = vadd.f32 %v5874_v26, %v5706_v6  ;;  %v3297_v6 = vld [vmem:[#allocation2 + $0x1c0] sm:$0xf] }
 0x56b   :  { %v3609_v20 = vpop.permute.xlu2 %3608  ;;  %3740 = vst.msk [vmem:[#allocation3 + $0x444] sm:$0xf] %vm2145_vm3, %v3603_v53  ;;  %v7913_v22 = vor.u32 %v8705_v60, %v7910_v18  ;;  %v7936_v3 = vld [vmem:[#allocation3 + $0x468] sm:$0xf]  ;;  %v3298_v53 = vld [vmem:[#allocation2 + $0x1c4] sm:$0xf] }
 0x56c   :  { %3743 = vst.msk [vmem:[#allocation3 + $0x480] sm:$0xf] %vm2145_vm3, %v3609_v20  ;;  %v7937_v35 = vor.u32 %v8713_v32, %v7936_v3  ;;  %v8719_v60 = vld [vmem:[#allocation3 + $0x4a8] sm:$0xf0]  ;;  %v8774_v18 = vld [vmem:[%s12018_s4] sm:$0xff] }
 0x56d   :  { %5568 = vmatmul.bf16.gmra.mxu3 %v7913_v22  ;;  %3361 = vst.msk [vmem:[#allocation3 + $0x4bc] sm:$0xf] %vm40_vm0, %v3297_v6  ;;  %v7965_v26 = vor.u32 %v8719_v60, %v7964_v40  ;;  %v8789_v22 = vld [vmem:[%s12018_s4 + $0x78] sm:$0xff]  ;;  %v11682_v40 = vadd.f32 %v11640_v14, %v11631_v25  ;;  %v3107_v60 = vpop.permute.xlu0 %3106 }
 0x56e   :  { %5742 = vmatmul.bf16.gmra.mxu0 %v7937_v35  ;;  %3362 = vst.msk [vmem:[#allocation3 + $0x4d0] sm:$0xf] %vm40_vm0, %v3298_v53  ;;  %v2274_v3 = vld [vmem:[#allocation2 + $0x13c] sm:$0xf]  ;;  %6879 = vmatpush.bf16.msra.mxu3 %v8774_v18  ;;  %v3300_v18 = vld [vmem:[#allocation2 + $0x1cc] sm:$0xf] }
 0x56f   :  { %v5539_v5 = vpop.f32.mrf.mxu3  ;;  %2338 = vst.msk [vmem:[#allocation3 + $0x4f0] sm:$0xf] %vm40_vm0, %v2274_v3  ;;  %8179 = vmatmul.msk.bf16.gmra.mxu2 %vm5159_vm4, %v7965_v26  ;;  %v8785_v25 = vld [vmem:[%s12018_s4 + $0x58] sm:$0xff] }
 0x570   :  { %v5540_v57 = vadd.f32 %v5539_v5, %v12145_v36  ;;  %v3812_v5 = vld [vmem:[#allocation2 + $0x1d4] sm:$0xf]  ;;  %v11663_v36 = vadd.f32 %v11633_v9, %v11622_v52  ;;  %v8787_v52 = vld [vmem:[%s12018_s4 + $0x68] sm:$0xff]  ;;  %3235 = vst.msk [vmem:[#allocation3 + $0x4f4] sm:$0xf] %vm2145_vm3, %v3107_v60 }
 0x571   :  { %3876 = vst.msk [vmem:[#allocation3 + $0x4d4] sm:$0xf] %vm40_vm0, %v3812_v5 }
 0x572   :  { %v2582_v44 = vpop.permute.xlu1 %2581  ;;  %v8706_v28 = vld [vmem:[#allocation3 + $0x444] sm:$0xf]  ;;  %v5709_v17 = vadd.f32 %v5708_v58, %v5540_v57  ;;  %6886 = vmatpush.bf16.msrb.mxu3 %v8789_v22  ;;  %v3811_v58 = vld [vmem:[#allocation2 + $0x1d0] sm:$0xf]  ;;  %v5713_v57 = vpop.f32.mrf.mxu0  ;;  %3364 = vst.msk [vmem:[#allocation3 + $0x4f8] sm:$0xf] %vm40_vm0, %v3300_v18 }
 0x573   :  { %v3097_v55 = vpop.permute.xlu2 %3096  ;;  %2716 = vst.msk [vmem:[#allocation3 + $0x478] sm:$0xf] %vm2145_vm3, %v2582_v44  ;;  %v7921_v59 = vor.u32 %v8706_v28, %v7918_v39  ;;  %v7938_v43 = vld [vmem:[#allocation3 + $0x47c] sm:$0xf0]  ;;  %v12146_v44 = vld [vmem:[#allocation41_spill] sm:$0xff] }
 0x574   :  { %3230 = vst.msk [vmem:[#allocation3 + $0x490] sm:$0xf] %vm2145_vm3, %v3097_v55 }
 0x575   :  { %5906 = vmatmul.bf16.gmra.mxu1 %v7921_v59  ;;  %3875 = vst.msk [vmem:[#allocation3 + $0x4c0] sm:$0xf] %vm40_vm0, %v3811_v58 }
 0x576   :  { %6887 = vmatpush.bf16.msrb.mxu3 %v8788_v12 }
 0x577   :  { %v5541_v20 = vpop.f32.mrf.mxu3 }
 0x578   :  { %v5542_v28 = vadd.f32 %v5541_v20, %v12146_v44  ;;  %v8724_v53 = vld [vmem:[#allocation3 + $0x4d0] sm:$0xf0]  ;;  %v3813_v44 = vld [vmem:[#allocation2 + $0x1d8] sm:$0xf] }
 0x579   :  { %3877 = vst.msk [vmem:[#allocation3 + $0x4e8] sm:$0xf] %vm40_vm0, %v3813_v44 }
 0x57a   :  { %v3607_v23 = vpop.permute.xlu1 %3606  ;;  %v7930_v1 = vld [vmem:[#allocation3 + $0x474] sm:$0xf0]  ;;  %v5711_v63 = vadd.f32 %v5710_v61, %v5542_v28  ;;  %6888 = vmatpush.bf16.msrb.mxu3 %v8787_v52  ;;  %v8786_v61 = vld [vmem:[%s12018_s4 + $0x60] sm:$0xff]  ;;  %v5715_v20 = vpop.f32.mrf.mxu0  ;;  %v3814_v28 = vld [vmem:[#allocation2 + $0x1dc] sm:$0xf] }
 0x57b   :  { %v3613_v8 = vpop.permute.xlu2 %3612  ;;  %3742 = vst.msk [vmem:[#allocation3 + $0x46c] sm:$0xf] %vm2145_vm3, %v3607_v23  ;;  %v7933_v27 = vor.u32 %v8710_v11, %v7930_v1  ;;  %v7956_v37 = vld [vmem:[#allocation3 + $0x490] sm:$0xf]  ;;  %v8715_v23 = vld [vmem:[#allocation3 + $0x48c] sm:$0xf] }
 0x57c   :  { %3745 = vst.msk [vmem:[#allocation3 + $0x4a8] sm:$0xf] %vm2145_vm3, %v3613_v8  ;;  %v7957_v10 = vor.u32 %v8718_v31, %v7956_v37  ;;  %v8723_v1 = vld [vmem:[#allocation3 + $0x4c8] sm:$0xf0] }
 0x57d   :  { %5573 = vmatmul.bf16.gmra.mxu3 %v7933_v27  ;;  %3878 = vst.msk [vmem:[#allocation3 + $0x4fc] sm:$0xf] %vm40_vm0, %v3814_v28 }
 0x57e   :  { %5747 = vmatmul.bf16.gmra.mxu0 %v7957_v10  ;;  %6889 = vmatpush.bf16.msrb.mxu3 %v8786_v61 }
 0x582   :  { %v5877_v32 = vpop.f32.mrf.mxu1  ;;  %v2586_v35 = vpop.permute.xlu1 %2585  ;;  %v8711_v21 = vld [vmem:[#allocation3 + $0x46c] sm:$0xf]  ;;  %6890 = vmatpush.bf16.msrb.mxu3 %v8785_v25 }
 0x583   :  { %v5878_v62 = vadd.f32 %v5877_v32, %v5709_v17  ;;  %2718 = vst.msk [vmem:[#allocation3 + $0x4a0] sm:$0xf] %vm2145_vm3, %v2586_v35  ;;  %v3101_v39 = vpop.permute.xlu2 %3100  ;;  %v7941_v56 = vor.u32 %v8711_v21, %v7938_v43  ;;  %v6048_v17 = vpop.f32.mrf.mxu2  ;;  %v7984_v43 = vld [vmem:[#allocation3 + $0x4c0] sm:$0xf]  ;;  %v7958_v3 = vld [vmem:[#allocation3 + $0x4a4] sm:$0xf0] }
 0x584   :  { %3232 = vst.msk [vmem:[#allocation3 + $0x4b8] sm:$0xf] %vm2145_vm3, %v3101_v39  ;;  %v7985_v22 = vor.u32 %v8724_v53, %v7984_v43  ;;  %v12147_v35 = vld [vmem:[#allocation42_spill] sm:$0xff]  ;;  %v8004_v53 = vld [vmem:[#allocation3 + $0x4e8] sm:$0xf] }
 0x585   :  { %v11666_v55 = vadd.f32 %v6046_v47, %v5878_v62  ;;  %5911 = vmatmul.bf16.gmra.mxu1 %v7941_v56  ;;  %v3299_v47 = vld [vmem:[#allocation2 + $0x1c8] sm:$0xf] }
 0x586   :  { %3363 = vst.msk [vmem:[#allocation3 + $0x4e4] sm:$0xf] %vm40_vm0, %v3299_v47  ;;  %8180 = vmatmul.msk.bf16.gmra.mxu2 %vm5159_vm4, %v7985_v22  ;;  %v8729_v22 = vld [vmem:[#allocation3 + $0x4f8] sm:$0xf0] }
 0x587   :  { %v6277_v59 = vmax.f32 %v11663_v36, %v11666_v55  ;;  %v8817_v36 = vld [vmem:[%s12018_s4 + $0x158] sm:$0xff] }
 0x58a   :  { %v5879_v9 = vpop.f32.mrf.mxu1  ;;  %v3611_v33 = vpop.permute.xlu1 %3610  ;;  %v7950_v11 = vld [vmem:[#allocation3 + $0x49c] sm:$0xf0] }
 0x58b   :  { %v5880_v8 = vadd.f32 %v5879_v9, %v5711_v63  ;;  %3744 = vst.msk [vmem:[#allocation3 + $0x494] sm:$0xf] %vm2145_vm3, %v3611_v33  ;;  %v7953_v27 = vor.u32 %v8715_v23, %v7950_v11  ;;  %v7976_v37 = vld [vmem:[#allocation3 + $0x4b8] sm:$0xf]  ;;  %v3617_v31 = vpop.permute.xlu2 %3616  ;;  %v11694_v32 = vpop.f32.mrf.mxu2  ;;  %v12148_v9 = vld [vmem:[#allocation43_spill] sm:$0xff] }
 0x58c   :  { %v7977_v10 = vor.u32 %v8723_v1, %v7976_v37  ;;  %3747 = vst.msk [vmem:[#allocation3 + $0x4d0] sm:$0xf] %vm2145_vm3, %v3617_v31  ;;  %v5718_v63 = vpop.f32.mrf.mxu0  ;;  %v8728_v23 = vld [vmem:[#allocation3 + $0x4f0] sm:$0xf0] }
 0x58d   :  { %v11684_v6 = vadd.f32 %v6048_v17, %v5880_v8  ;;  %5578 = vmatmul.bf16.gmra.mxu3 %v7953_v27  ;;  %v8720_v1 = vld [vmem:[#allocation3 + $0x4b4] sm:$0xf]  ;;  %v8783_v27 = vld [vmem:[%s12018_s4 + $0x48] sm:$0xff] }
 0x58e   :  { %5752 = vmatmul.bf16.gmra.mxu0 %v7977_v10 }
 0x58f   :  { %v6278_v26 = vmax.f32 %v11682_v40, %v11684_v6  ;;  %v8814_v40 = vld [vmem:[%s12018_s4 + $0x140] sm:$0xff]  ;;  %v8829_v6 = vld [vmem:[%s12018_s4 + $0x1b8] sm:$0xff] }
 0x590   :  { %v5544_v14 = vpop.f32.mrf.mxu3 }
 0x591   :  { %v5545_v21 = vadd.f32 %v5544_v14, %v12147_v35  ;;  %v8005_v14 = vor.u32 %v8729_v22, %v8004_v53 }
 0x592   :  { %v5882_v62 = vpop.f32.mrf.mxu1  ;;  %v2590_v39 = vpop.permute.xlu1 %2589  ;;  %v8716_v56 = vld [vmem:[#allocation3 + $0x494] sm:$0xf] }
 0x593   :  { %v5714_v58 = vadd.f32 %v5713_v57, %v5545_v21  ;;  %2720 = vst.msk [vmem:[#allocation3 + $0x4c8] sm:$0xf] %vm2145_vm3, %v2590_v39  ;;  %v7961_v5 = vor.u32 %v8716_v56, %v7958_v3  ;;  %v3105_v12 = vpop.permute.xlu2 %3104  ;;  %v8784_v57 = vld [vmem:[%s12018_s4 + $0x50] sm:$0xff]  ;;  %v6053_v43 = vpop.f32.mrf.mxu2 }
 0x594   :  { %3234 = vst.msk [vmem:[#allocation3 + $0x4e0] sm:$0xf] %vm2145_vm3, %v3105_v12  ;;  %6891 = vmatpush.bf16.msrb.mxu3 %v8784_v57  ;;  %v7978_v35 = vld [vmem:[#allocation3 + $0x4cc] sm:$0xf0]  ;;  %v5720_v39 = vpop.f32.mrf.mxu0  ;;  %v8725_v57 = vld [vmem:[#allocation3 + $0x4dc] sm:$0xf] }
 0x595   :  { %v5883_v17 = vadd.f32 %v5882_v62, %v5714_v58  ;;  %5916 = vmatmul.bf16.gmra.mxu1 %v7961_v5  ;;  %v12149_v21 = vld [vmem:[#allocation44_spill] sm:$0xff] }
 0x596   :  { %8181 = vmatmul.msk.bf16.gmra.mxu2 %vm5159_vm4, %v8005_v14 }
 0x598   :  { %v5546_v52 = vpop.f32.mrf.mxu3  ;;  %6892 = vmatpush.bf16.msrb.mxu3 %v8783_v27 }
 0x599   :  { %v5547_v33 = vadd.f32 %v5546_v52, %v12148_v9 }
 0x59a   :  { %v3615_v11 = vpop.permute.xlu1 %3614  ;;  %v7970_v8 = vld [vmem:[#allocation3 + $0x4c4] sm:$0xf0]  ;;  %v5884_v47 = vpop.f32.mrf.mxu1 }
 0x59b   :  { %v5716_v37 = vadd.f32 %v5715_v20, %v5547_v33  ;;  %3746 = vst.msk [vmem:[#allocation3 + $0x4bc] sm:$0xf] %vm2145_vm3, %v3615_v11  ;;  %v7973_v31 = vor.u32 %v8720_v1, %v7970_v8  ;;  %v3621_v61 = vpop.permute.xlu2 %3620  ;;  %v7996_v10 = vld [vmem:[#allocation3 + $0x4e0] sm:$0xf]  ;;  %v6056_v44 = vpop.f32.mrf.mxu2 }
 0x59c   :  { %3749 = vst.msk [vmem:[#allocation3 + $0x4f8] sm:$0xf] %vm2145_vm3, %v3621_v61  ;;  %v7997_v60 = vor.u32 %v8728_v23, %v7996_v10  ;;  %v8782_v20 = vld [vmem:[%s12018_s4 + $0x40] sm:$0xff]  ;;  %v11723_v10 = vadd.f32 %v11694_v32, %v5883_v17 }
 0x59d   :  { %v5885_v18 = vadd.f32 %v5884_v47, %v5716_v37  ;;  %5583 = vmatmul.bf16.gmra.mxu3 %v7973_v31 }
 0x59e   :  { %5757 = vmatmul.bf16.gmra.mxu0 %v7997_v60  ;;  %6893 = vmatpush.bf16.msrb.mxu3 %v8782_v20  ;;  %v8184_v20 = vld [vmem:[#allocation5] sm:$0xf] }
 0x59f   :  { %v11711_v25 = vadd.f32 %v6053_v43, %v5885_v18  ;;  %v12150_v43 = vld [vmem:[#allocation45_spill] sm:$0xff]  ;;  %v8770_v18 = vld [vmem:[#allocation5 + $0x1c] sm:$0xf0] }
 0x5a0   :  { %v5549_v3 = vpop.f32.mrf.mxu3  ;;  %v8185_v32 = vor.u32 %v8770_v18, %v8184_v20 }
 0x5a1   :  { %v5550_v62 = vadd.f32 %v5549_v3, %v12149_v21  ;;  %v8797_v3 = vld [vmem:[%s12018_s4 + $0xb8] sm:$0xff] }
 0x5a2   :  { %v2594_v56 = vpop.permute.xlu1 %2593  ;;  %v8721_v58 = vld [vmem:[#allocation3 + $0x4bc] sm:$0xf] }
 0x5a3   :  { %2722 = vst.msk [vmem:[#allocation3 + $0x4f0] sm:$0xf] %vm2145_vm3, %v2594_v56  ;;  %v7981_v5 = vor.u32 %v8721_v58, %v7978_v35  ;;  %v5719_v12 = vadd.f32 %v5718_v63, %v5550_v62  ;;  %v6058_v23 = vpop.f32.mrf.mxu2  ;;  %v7998_v11 = vld [vmem:[#allocation3 + $0x4f4] sm:$0xf0]  ;;  %v8796_v56 = vld [vmem:[%s12018_s4 + $0xb0] sm:$0xff] }
 0x5a5   :  { %5921 = vmatmul.bf16.gmra.mxu1 %v7981_v5 }
 0x5a8   :  { %v5551_v1 = vpop.f32.mrf.mxu3 }
 0x5a9   :  { %v5552_v47 = vadd.f32 %v5551_v1, %v12150_v43  ;;  %v8793_v1 = vld [vmem:[%s12018_s4 + $0x98] sm:$0xff] }
 0x5aa   :  { %v3619_v28 = vpop.permute.xlu1 %3618  ;;  %v7990_v52 = vld [vmem:[#allocation3 + $0x4ec] sm:$0xf0] }
 0x5ab   :  { %v5723_v9 = vpop.f32.mrf.mxu0  ;;  %3748 = vst.msk [vmem:[#allocation3 + $0x4e4] sm:$0xf] %vm2145_vm3, %v3619_v28  ;;  %v7993_v33 = vor.u32 %v8725_v57, %v7990_v52  ;;  %v6061_v61 = vpop.f32.mrf.mxu2  ;;  %v5721_v22 = vadd.f32 %v5720_v39, %v5552_v47  ;;  %v8794_v57 = vld [vmem:[%s12018_s4 + $0xa0] sm:$0xff]  ;;  %v8792_v47 = vld [vmem:[%s12018_s4 + $0x90] sm:$0xff] }
 0x5ad   :  { %5588 = vmatmul.bf16.gmra.mxu3 %v7993_v33  ;;  %v8186_v33 = vld [vmem:[#allocation5 + $0x20] sm:$0xf0] }
 0x5b2   :  { %v5887_v8 = vpop.f32.mrf.mxu1  ;;  %v8726_v27 = vld [vmem:[#allocation3 + $0x4e4] sm:$0xf] }
 0x5b3   :  { %v11720_v37 = vpop.f32.mrf.mxu0  ;;  %v5888_v63 = vadd.f32 %v5887_v8, %v5719_v12  ;;  %v8001_v31 = vor.u32 %v8726_v27, %v7998_v11  ;;  %v11733_v17 = vpop.f32.mrf.mxu2  ;;  %v8795_v12 = vld [vmem:[%s12018_s4 + $0xa8] sm:$0xff]  ;;  %v8766_v11 = vld [vmem:[#allocation5 + $0x4] sm:$0xf] }
 0x5b4   :  { %v12151_v8 = vld [vmem:[#allocation46_spill] sm:$0xff] }
 0x5b5   :  { %v11726_v53 = vadd.f32 %v6056_v44, %v5888_v63  ;;  %5926 = vmatmul.bf16.gmra.mxu1 %v8001_v31  ;;  %v8189_v63 = vor.u32 %v8766_v11, %v8186_v33  ;;  %v12155_v33 = vld [vmem:[#allocation47_spill] sm:$0xff] }
 0x5b7   :  { %v6295_v60 = vmax.f32 %v11723_v10, %v11726_v53  ;;  %v8824_v10 = vld [vmem:[%s12018_s4 + $0x190] sm:$0xff] }
 0x5ba   :  { %v5889_v14 = vpop.f32.mrf.mxu1 }
 0x5bb   :  { %v5728_v35 = vpop.f32.mrf.mxu0  ;;  %v5890_v21 = vadd.f32 %v5889_v14, %v5721_v22  ;;  %v6066_v28 = vpop.f32.mrf.mxu2  ;;  %v12152_v14 = vld [vmem:[#allocation33_spill] sm:$0xff] }
 0x5bc   :  { %v5522_v20 = vadd.f32 %v11500_v42, %v12152_v14 }
 0x5bd   :  { %v11735_v62 = vadd.f32 %v6058_v23, %v5890_v21  ;;  %6880 = vmatmul.bf16.vlgmr.msra.gmra.mxu3 %v8185_v32 }
 0x5be   :  { %6900 = vmatpush.bf16.msra.mxu3 %v8797_v3  ;;  %v12153_v3 = vld [vmem:[#allocation49_spill] sm:$0xff] }
 0x5bf   :  { %v6296_v39 = vmax.f32 %v11711_v25, %v11735_v62  ;;  %v8837_v25 = vld [vmem:[%s12018_s4 + $0x1f8] sm:$0xff] }
 0x5c0   :  { %v5554_v58 = vpop.f32.mrf.mxu3 }
 0x5c1   :  { %v5555_v27 = vadd.f32 %v5554_v58, %v12151_v8  ;;  %v12154_v58 = vld [vmem:[#allocation31_spill] sm:$0xff] }
 0x5c2   :  { %6901 = vmatpush.bf16.msra.mxu3 %v8796_v56  ;;  %v5892_v5 = vpop.f32.mrf.mxu1  ;;  %v8791_v56 = vld [vmem:[%s12018_s4 + $0x88] sm:$0xff] }
 0x5c3   :  { %v5730_v44 = vpop.f32.mrf.mxu0  ;;  %v6068_v43 = vpop.f32.mrf.mxu2  ;;  %v5724_v18 = vadd.f32 %v5723_v9, %v5555_v27  ;;  %v5691_v9 = vadd.f32 %v11503_v51, %v5522_v20  ;;  %v8805_v51 = vld [vmem:[%s12018_s4 + $0xf8] sm:$0xff]  ;;  %v12156_v20 = vld [vmem:[#allocation51_spill] sm:$0xff] }
 0x5c6   :  { %6902 = vmatpush.bf16.msra.mxu3 %v8795_v12  ;;  %v5517_v12 = vadd.f32 %v11474_v49, %v12154_v58 }
 0x5c8   :  { %v5556_v52 = vpop.f32.mrf.mxu3 }
 0x5c9   :  { %v5557_v11 = vadd.f32 %v5556_v52, %v12155_v33 }
 0x5ca   :  { %6903 = vmatpush.bf16.msra.mxu3 %v8794_v57  ;;  %v5894_v23 = vpop.f32.mrf.mxu1  ;;  %v5893_v57 = vadd.f32 %v5892_v5, %v5724_v18  ;;  %v5860_v18 = vadd.f32 %v11505_v19, %v5691_v9  ;;  %v8804_v19 = vld [vmem:[%s12018_s4 + $0xf0] sm:$0xff] }
 0x5cb   :  { %v11752_v31 = vpop.f32.mrf.mxu0  ;;  %v11767_v27 = vpop.f32.mrf.mxu2  ;;  %v5726_v49 = vadd.f32 %v11720_v37, %v5557_v11 }
 0x5cc   :  { %v6029_v58 = vadd.f32 %v11519_v7, %v5860_v18  ;;  %v8799_v18 = vld [vmem:[%s12018_s4 + $0xc8] sm:$0xff] }
 0x5cd   :  { %6894 = vmatmul.bf16.vlgmr.msrb.gmra.mxu3 %v8189_v63  ;;  %v8790_v63 = vld [vmem:[%s12018_s4 + $0x80] sm:$0xff] }
 0x5ce   :  { %6904 = vmatpush.bf16.msra.mxu3 %v8793_v1 }
 0x5d0   :  { %v5559_v22 = vpop.f32.mrf.mxu3 }
 0x5d1   :  { %v5560_v21 = vadd.f32 %v5559_v22, %v12153_v3  ;;  %v6062_v22 = vadd.f32 %v6061_v61, %v5893_v57  ;;  %v5895_v61 = vadd.f32 %v5894_v23, %v5726_v49  ;;  %v12157_v49 = vld [vmem:[#allocation53_spill] sm:$0xff] }
 0x5d2   :  { %6905 = vmatpush.bf16.msra.mxu3 %v8792_v47  ;;  %v5897_v32 = vpop.f32.mrf.mxu1  ;;  %v5686_v47 = vadd.f32 %v11477_v48, %v5517_v12 }
 0x5d3   :  { %v5729_v1 = vadd.f32 %v5728_v35, %v5560_v21  ;;  %v11769_v42 = vpop.f32.mrf.mxu0  ;;  %v8771_v35 = vld [vmem:[#allocation5 + $0x24] sm:$0xf0]  ;;  %v11789_v33 = vpop.f32.mrf.mxu2  ;;  %v6064_v23 = vadd.f32 %v11733_v17, %v5895_v61 }
 0x5d4   :  { %v8192_v21 = vld [vmem:[#allocation5 + $0x8] sm:$0xf]  ;;  %v5855_v48 = vadd.f32 %v11483_v29, %v5686_v47 }
 0x5d5   :  { %v5898_v8 = vadd.f32 %v5897_v32, %v5729_v1 }
 0x5d6   :  { %6906 = vmatpush.bf16.msra.mxu3 %v8791_v56  ;;  %v8193_v56 = vor.u32 %v8771_v35, %v8192_v21  ;;  %v6024_v29 = vadd.f32 %v11480_v15, %v5855_v48  ;;  %v8802_v15 = vld [vmem:[%s12018_s4 + $0xe0] sm:$0xff] }
 0x5d7   :  { %v6067_v5 = vadd.f32 %v6066_v28, %v5898_v8 }
 0x5d8   :  { %v5561_v52 = vpop.f32.mrf.mxu3  ;;  %v6242_v11 = vmax.f32 %v6024_v29, %v6029_v58  ;;  %v8813_v58 = vld [vmem:[%s12018_s4 + $0x138] sm:$0xff] }
 0x5d9   :  { %v6247_v14 = vmax.f32 %v6062_v22, %v6067_v5  ;;  %v5562_v3 = vadd.f32 %v5561_v52, %v12156_v20  ;;  %v12158_v20 = vld [vmem:[#allocation58_spill] sm:$0xff] }
 0x5da   :  { %6907 = vmatpush.bf16.msra.mxu3 %v8790_v63  ;;  %v5899_v32 = vpop.f32.mrf.mxu1 }
 0x5db   :  { %v6249_v37 = vmax.f32 %v6241_v34, %v6247_v14  ;;  %v5731_v28 = vadd.f32 %v5730_v44, %v5562_v3  ;;  %v5738_v34 = vpop.f32.mrf.mxu0  ;;  %v6076_v17 = vpop.f32.mrf.mxu2 }
 0x5dd   :  { %v6251_v12 = vpack.c.bf16 %v6249_v37, %v6249_v37  ;;  %v5900_v57 = vadd.f32 %v5899_v32, %v5731_v28  ;;  %6908 = vmatmul.bf16.vlgmr.msra.gmra.mxu3 %v8193_v56  ;;  %v12159_v56 = vld [vmem:[#allocation56_spill] sm:$0xff]  ;;  %v8798_v37 = vld [vmem:[%s12018_s4 + $0xc0] sm:$0xff]  ;;  %v12160_v28 = vld [vmem:[#allocation35_spill] sm:$0xff] }
 0x5de   :  { %6914 = vmatpush.bf16.msrb.mxu3 %v8805_v51  ;;  %v8800_v51 = vld [vmem:[%s12018_s4 + $0xd0] sm:$0xff] }
 0x5df   :  { %6253 = vst [vmem:[#allocation5 + $0x10] sm:$0xf] %v6251_v12  ;;  %v6069_v46 = vadd.f32 %v6068_v43, %v5900_v57  ;;  %v8801_v43 = vld [vmem:[%s12018_s4 + $0xd8] sm:$0xff] }
 0x5e0   :  { %v5564_v44 = vpop.f32.mrf.mxu3  ;;  %v12161_v12 = vld [vmem:[#allocation37_spill] sm:$0xff] }
 0x5e1   :  { %v6248_v7 = vmax.f32 %v6064_v23, %v6069_v46  ;;  %v5565_v5 = vadd.f32 %v5564_v44, %v12157_v49  ;;  %v5532_v57 = vadd.f32 %v11551_v50, %v12161_v12  ;;  %v8194_v23 = vld [vmem:[#allocation5 + $0x28] sm:$0xf0]  ;;  %v8812_v50 = vld [vmem:[%s12018_s4 + $0x130] sm:$0xff]  ;;  %v12164_v12 = vld [vmem:[#allocation66_spill] sm:$0xff] }
 0x5e2   :  { %6915 = vmatpush.bf16.msrb.mxu3 %v8804_v19  ;;  %v5902_v1 = vpop.f32.mrf.mxu1  ;;  %v8811_v49 = vld [vmem:[%s12018_s4 + $0x128] sm:$0xff] }
 0x5e3   :  { %v6250_v9 = vmax.f32 %v6242_v11, %v6248_v7  ;;  %v5740_v47 = vpop.f32.mrf.mxu0  ;;  %v6078_v35 = vpop.f32.mrf.mxu2  ;;  %v5734_v52 = vadd.f32 %v11752_v31, %v5565_v5  ;;  %v5527_v31 = vadd.f32 %v11523_v4, %v12160_v28  ;;  %v8767_v7 = vld [vmem:[#allocation5 + $0xc] sm:$0xf] }
 0x5e5   :  { %v6252_v8 = vpack.c.bf16 %v6250_v9, %v6250_v9  ;;  %v5903_v32 = vadd.f32 %v5902_v1, %v5734_v52  ;;  %v5696_v46 = vadd.f32 %v11530_v2, %v5527_v31  ;;  %v8197_v9 = vor.u32 %v8767_v7, %v8194_v23 }
 0x5e6   :  { %6916 = vmatpush.bf16.msrb.mxu3 %v8803_v45 }
 0x5e7   :  { %6254 = vst [vmem:[#allocation5 + $0x30] sm:$0xf] %v6252_v8  ;;  %v6072_v44 = vadd.f32 %v11767_v27, %v5903_v32  ;;  %v12162_v8 = vld [vmem:[#allocation61_spill] sm:$0xff]  ;;  %v5865_v27 = vadd.f32 %v11543_v13, %v5696_v46 }
 0x5e8   :  { %v5566_v63 = vpop.f32.mrf.mxu3 }
 0x5e9   :  { %v5567_v48 = vadd.f32 %v5566_v63, %v12159_v56 }
 0x5ea   :  { %6917 = vmatpush.bf16.msrb.mxu3 %v8802_v15  ;;  %v5904_v22 = vpop.f32.mrf.mxu1 }
 0x5eb   :  { %v5743_v19 = vpop.f32.mrf.mxu0  ;;  %v11823_v45 = vpop.f32.mrf.mxu2  ;;  %v5736_v4 = vadd.f32 %v11769_v42, %v5567_v48  ;;  %v12163_v48 = vld [vmem:[#allocation63_spill] sm:$0xff] }
 0x5ed   :  { %v5905_v42 = vadd.f32 %v5904_v22, %v5736_v4  ;;  %v12165_v4 = vld [vmem:[#allocation64_spill] sm:$0xff] }
 0x5ee   :  { %6918 = vmatpush.bf16.msrb.mxu3 %v8801_v43 }
 0x5ef   :  { %v6074_v13 = vadd.f32 %v11789_v33, %v5905_v42  ;;  %v12166_v42 = vld [vmem:[#allocation67_spill] sm:$0xff] }
 0x5f0   :  { %v5569_v14 = vpop.f32.mrf.mxu3 }
 0x5f1   :  { %v5570_v3 = vadd.f32 %v5569_v14, %v12158_v20 }
 0x5f2   :  { %6919 = vmatpush.bf16.msrb.mxu3 %v8800_v51  ;;  %v5907_v21 = vpop.f32.mrf.mxu1 }
 0x5f3   :  { %v5739_v61 = vadd.f32 %v5738_v34, %v5570_v3  ;;  %v5701_v34 = vadd.f32 %v11557_v38, %v5532_v57  ;;  %v5745_v52 = vpop.f32.mrf.mxu0 }
 0x5f5   :  { %v5908_v29 = vadd.f32 %v5907_v21, %v5739_v61  ;;  %v5870_v2 = vadd.f32 %v11609_v24, %v5701_v34  ;;  %v8808_v21 = vld [vmem:[%s12018_s4 + $0x110] sm:$0xff] }
 0x5f6   :  { %6920 = vmatpush.bf16.msrb.mxu3 %v8799_v18  ;;  %v6034_v18 = vadd.f32 %v11548_v16, %v5865_v27  ;;  %v8809_v16 = vld [vmem:[%s12018_s4 + $0x118] sm:$0xff]  ;;  %v8772_v34 = vld [vmem:[#allocation5 + $0x2c] sm:$0xf0] }
 0x5f7   :  { %v6077_v11 = vadd.f32 %v6076_v17, %v5908_v29  ;;  %v6039_v24 = vadd.f32 %v11624_v0, %v5870_v2  ;;  %v8821_v29 = vld [vmem:[%s12018_s4 + $0x178] sm:$0xff]  ;;  %v8820_v2 = vld [vmem:[%s12018_s4 + $0x170] sm:$0xff] }
 0x5f8   :  { %v5571_v1 = vpop.f32.mrf.mxu3 }
 0x5f9   :  { %v6265_v15 = vmax.f32 %v6072_v44, %v6077_v11  ;;  %v5572_v43 = vadd.f32 %v5571_v1, %v12162_v8 }
 0x5fa   :  { %6921 = vmatpush.bf16.msrb.mxu3 %v8798_v37  ;;  %v5909_v38 = vpop.f32.mrf.mxu1  ;;  %v8807_v37 = vld [vmem:[%s12018_s4 + $0x108] sm:$0xff] }
 0x5fb   :  { %v6267_v17 = vmax.f32 %v6259_v30, %v6265_v15  ;;  %v5741_v63 = vadd.f32 %v5740_v47, %v5572_v43  ;;  %v6083_v30 = vpop.f32.mrf.mxu2  ;;  %v6260_v47 = vmax.f32 %v6034_v18, %v6039_v24  ;;  %v5748_v33 = vpop.f32.mrf.mxu0 }
 0x5fd   :  { %6922 = vmatmul.bf16.vlgmr.msrb.gmra.mxu3 %v8197_v9  ;;  %v6269_v5 = vpack.c.bf16 %v6267_v17, %v6267_v17  ;;  %v5910_v51 = vadd.f32 %v5909_v38, %v5741_v63  ;;  %v8819_v63 = vld [vmem:[%s12018_s4 + $0x168] sm:$0xff] }
 0x5fe   :  { %6928 = vmatpush.bf16.msra.mxu3 %v8813_v58  ;;  %v8806_v58 = vld [vmem:[%s12018_s4 + $0x100] sm:$0xff] }
 0x5ff   :  { %6271 = vst [vmem:[#allocation5 + $0x14] sm:$0xf] %v6269_v5  ;;  %v6079_v22 = vadd.f32 %v6078_v35, %v5910_v51 }
 0x600   :  { %v5574_v41 = vpop.f32.mrf.mxu3 }
 0x601   :  { %v6266_v14 = vmax.f32 %v6074_v13, %v6079_v22  ;;  %v5575_v61 = vadd.f32 %v5574_v41, %v12163_v48  ;;  %v8818_v13 = vld [vmem:[%s12018_s4 + $0x160] sm:$0xff] }
 0x602   :  { %6929 = vmatpush.bf16.msra.mxu3 %v8812_v50  ;;  %v5912_v20 = vpop.f32.mrf.mxu1 }
 0x603   :  { %v6268_v0 = vmax.f32 %v6260_v47, %v6266_v14  ;;  %v6086_v56 = vpop.f32.mrf.mxu2  ;;  %v5744_v28 = vadd.f32 %v5743_v19, %v5575_v61  ;;  %v5750_v23 = vpop.f32.mrf.mxu0  ;;  %v8200_v19 = vld [vmem:[#allocation5 + $0x10] sm:$0xf] }
 0x604   :  { %v8201_v50 = vor.u32 %v8772_v34, %v8200_v19 }
 0x605   :  { %v6270_v3 = vpack.c.bf16 %v6268_v0, %v6268_v0  ;;  %v5913_v44 = vadd.f32 %v5912_v20, %v5744_v28 }
 0x606   :  { %6930 = vmatpush.bf16.msra.mxu3 %v8811_v49 }
 0x607   :  { %6272 = vst [vmem:[#allocation5 + $0x34] sm:$0xf] %v6270_v3  ;;  %v6082_v15 = vadd.f32 %v11823_v45, %v5913_v44 }
 0x608   :  { %v5576_v35 = vpop.f32.mrf.mxu3 }
 0x609   :  { %v5577_v11 = vadd.f32 %v5576_v35, %v12165_v4 }
 0x60a   :  { %6931 = vmatpush.bf16.msra.mxu3 %v8810_v54  ;;  %v5914_v32 = vpop.f32.mrf.mxu1 }
 0x60b   :  { %v6088_v1 = vpop.f32.mrf.mxu2  ;;  %v5746_v8 = vadd.f32 %v5745_v52, %v5577_v11  ;;  %v5753_v45 = vpop.f32.mrf.mxu0  ;;  %v8827_v11 = vld [vmem:[%s12018_s4 + $0x1a8] sm:$0xff] }
 0x60d   :  { %v5915_v24 = vadd.f32 %v5914_v32, %v5746_v8 }
 0x60e   :  { %6932 = vmatpush.bf16.msra.mxu3 %v8809_v16  ;;  %v8202_v48 = vld [vmem:[#allocation5 + $0x30] sm:$0xf0] }
 0x60f   :  { %v6084_v41 = vadd.f32 %v6083_v30, %v5915_v24  ;;  %v8816_v30 = vld [vmem:[%s12018_s4 + $0x150] sm:$0xff] }
 0x610   :  { %v5579_v31 = vpop.f32.mrf.mxu3 }
 0x611   :  { %v5580_v57 = vadd.f32 %v5579_v31, %v12164_v12  ;;  %v8768_v31 = vld [vmem:[#allocation5 + $0x14] sm:$0xf] }
 0x612   :  { %6933 = vmatpush.bf16.msra.mxu3 %v8808_v21  ;;  %v5917_v46 = vpop.f32.mrf.mxu1  ;;  %v12167_v21 = vld [vmem:[#allocation68_spill] sm:$0xff] }
 0x613   :  { %v5749_v7 = vadd.f32 %v5748_v33, %v5580_v57  ;;  %v6091_v22 = vpop.f32.mrf.mxu2  ;;  %v5755_v0 = vpop.f32.mrf.mxu0  ;;  %v8815_v33 = vld [vmem:[%s12018_s4 + $0x148] sm:$0xff]  ;;  %v8828_v57 = vld [vmem:[%s12018_s4 + $0x1b0] sm:$0xff] }
 0x615   :  { %v5918_v9 = vadd.f32 %v5917_v46, %v5749_v7  ;;  %v12169_v46 = vld [vmem:[#allocation69_spill] sm:$0xff] }
 0x616   :  { %6934 = vmatpush.bf16.msra.mxu3 %v8807_v37  ;;  %v12168_v37 = vld [vmem:[#allocation70_spill] sm:$0xff] }
 0x617   :  { %v6087_v43 = vadd.f32 %v6086_v56, %v5918_v9 }
 0x618   :  { %v5581_v38 = vpop.f32.mrf.mxu3 }
 0x619   :  { %v6283_v27 = vmax.f32 %v6082_v15, %v6087_v43  ;;  %v5582_v17 = vadd.f32 %v5581_v38, %v12166_v42  ;;  %v12170_v15 = vld [vmem:[#allocation71_spill] sm:$0xff]  ;;  %v8826_v38 = vld [vmem:[%s12018_s4 + $0x1a0] sm:$0xff] }
 0x61a   :  { %6935 = vmatpush.bf16.msra.mxu3 %v8806_v58  ;;  %v5919_v49 = vpop.f32.mrf.mxu1  ;;  %v8205_v58 = vor.u32 %v8768_v31, %v8202_v48 }
 0x61b   :  { %v6285_v5 = vmax.f32 %v6277_v59, %v6283_v27  ;;  %v5751_v51 = vadd.f32 %v5750_v23, %v5582_v17  ;;  %v6093_v3 = vpop.f32.mrf.mxu2 }
 0x61d   :  { %6936 = vmatmul.bf16.vlgmr.msra.gmra.mxu3 %v8201_v50  ;;  %v6287_v52 = vpack.c.bf16 %v6285_v5, %v6285_v5  ;;  %v5920_v18 = vadd.f32 %v5919_v49, %v5751_v51  ;;  %v8825_v5 = vld [vmem:[%s12018_s4 + $0x198] sm:$0xff] }
 0x61e   :  { %6942 = vmatpush.bf16.msrb.mxu3 %v8821_v29 }
 0x61f   :  { %6289 = vst [vmem:[#allocation5 + $0x18] sm:$0xf] %v6287_v52  ;;  %v6089_v54 = vadd.f32 %v6088_v1, %v5920_v18 }
 0x620   :  { %v5584_v47 = vpop.f32.mrf.mxu3 }
 0x621   :  { %v6284_v14 = vmax.f32 %v6084_v41, %v6089_v54  ;;  %v5585_v32 = vadd.f32 %v5584_v47, %v12167_v21  ;;  %v8822_v41 = vld [vmem:[%s12018_s4 + $0x180] sm:$0xff] }
 0x622   :  { %6943 = vmatpush.bf16.msrb.mxu3 %v8820_v2  ;;  %v5922_v55 = vpop.f32.mrf.mxu1  ;;  %v8871_v54 = vld [vmem:[%s12019_s5] ss:$0 sm:$0xff] }
 0x623   :  { %v6286_v59 = vmax.f32 %v6278_v26, %v6284_v14  ;;  %v5758_v26 = vpop.f32.mrf.mxu0  ;;  %v5754_v56 = vadd.f32 %v5753_v45, %v5585_v32  ;;  %v6096_v29 = vpop.f32.mrf.mxu2 }
 0x625   :  { %v6288_v20 = vpack.c.bf16 %v6286_v59, %v6286_v59  ;;  %v5923_v23 = vadd.f32 %v5922_v55, %v5754_v56 }
 0x626   :  { %6944 = vmatpush.bf16.msrb.mxu3 %v8819_v63 }
 0x627   :  { %6290 = vst [vmem:[#allocation5 + $0x38] sm:$0xf] %v6288_v20  ;;  %v6092_v7 = vadd.f32 %v6091_v22, %v5923_v23  ;;  %v8835_v20 = vld [vmem:[%s12018_s4 + $0x1e8] sm:$0xff] }
 0x628   :  { %v5586_v16 = vpop.f32.mrf.mxu3  ;;  %v8843_v23 = vld [vmem:[%s12021_s6 + $0x28] sm:$0xff] }
 0x629   :  { %v5587_v34 = vadd.f32 %v5586_v16, %v12169_v46 }
 0x62a   :  { %6945 = vmatpush.bf16.msrb.mxu3 %v8818_v13  ;;  %v5924_v35 = vpop.f32.mrf.mxu1  ;;  %v8823_v13 = vld [vmem:[%s12018_s4 + $0x188] sm:$0xff] }
 0x62b   :  { %v5756_v19 = vadd.f32 %v5755_v0, %v5587_v34  ;;  %v5760_v50 = vpop.f32.mrf.mxu0  ;;  %v6098_v63 = vpop.f32.mrf.mxu2  ;;  %v8834_v0 = vld [vmem:[%s12018_s4 + $0x1e0] sm:$0xff] }
 0x62c   :  { %v8842_v34 = vld [vmem:[%s12021_s6 + $0x20] sm:$0xff] }
 0x62d   :  { %v5925_v27 = vadd.f32 %v5924_v35, %v5756_v19  ;;  %v8832_v35 = vld [vmem:[%s12018_s4 + $0x1d0] sm:$0xff]  ;;  %v8839_v19 = vld [vmem:[%s12021_s6 + $0x8] sm:$0xff] }
 0x62e   :  { %6946 = vmatpush.bf16.msrb.mxu3 %v8817_v36  ;;  %v8773_v62 = vld [vmem:[#allocation5 + $0x34] sm:$0xf0]  ;;  %v8836_v36 = vld [vmem:[%s12018_s4 + $0x1f0] sm:$0xff] }
 0x62f   :  { %v6094_v51 = vadd.f32 %v6093_v3, %v5925_v27 }
 0x630   :  { %v5589_v61 = vpop.f32.mrf.mxu3 }
 0x631   :  { %v5590_v28 = vadd.f32 %v5589_v61, %v12168_v37 }
 0x632   :  { %6947 = vmatpush.bf16.msrb.mxu3 %v8816_v30  ;;  %v5927_v12 = vpop.f32.mrf.mxu1 }
 0x633   :  { %v5759_v44 = vadd.f32 %v5758_v26, %v5590_v28 }
 0x635   :  { %v5928_v4 = vadd.f32 %v5927_v12, %v5759_v44 }
 0x636   :  { %6948 = vmatpush.bf16.msrb.mxu3 %v8815_v33  ;;  %v8833_v33 = vld [vmem:[%s12018_s4 + $0x1d8] sm:$0xff] }
 0x637   :  { %v6097_v1 = vadd.f32 %v6096_v29, %v5928_v4  ;;  %v8844_v29 = vld [vmem:[%s12021_s6 + $0x30] sm:$0xff]  ;;  %v8841_v4 = vld [vmem:[%s12021_s6 + $0x18] sm:$0xff] }
 0x638   :  { %v5591_v9 = vpop.f32.mrf.mxu3 }
 0x639   :  { %v6301_v2 = vmax.f32 %v6092_v7, %v6097_v1  ;;  %v5592_v8 = vadd.f32 %v5591_v9, %v12170_v15  ;;  %v8838_v9 = vld [vmem:[%s12021_s6] sm:$0xff] }
 0x63a   :  { %6949 = vmatpush.bf16.msrb.mxu3 %v8814_v40  ;;  %v5929_v43 = vpop.f32.mrf.mxu1  ;;  %v8831_v40 = vld [vmem:[%s12018_s4 + $0x1c8] sm:$0xff] }
 0x63b   :  { %v6303_v42 = vmax.f32 %v6295_v60, %v6301_v2  ;;  %v5761_v17 = vadd.f32 %v5760_v50, %v5592_v8  ;;  %v8853_v50 = vld [vmem:[%s12022_s8 + $0x38] sm:$0xff]  ;;  %v8852_v2 = vld [vmem:[%s12022_s8 + $0x30] sm:$0xff]  ;;  %v8851_v8 = vld [vmem:[%s12022_s8 + $0x28] sm:$0xff] }
 0x63d   :  { %6950 = vmatmul.bf16.vlgmr.msrb.gmra.mxu3 %v8205_v58  ;;  %v6305_v49 = vpack.c.bf16 %v6303_v42, %v6303_v42  ;;  %v5930_v24 = vadd.f32 %v5929_v43, %v5761_v17  ;;  %v8850_v43 = vld [vmem:[%s12022_s8 + $0x20] sm:$0xff] }
 0x63e   :  { %6956 = vmatpush.bf16.msra.mxu3 %v8829_v6  ;;  %v8830_v6 = vld [vmem:[%s12018_s4 + $0x1c0] sm:$0xff] }
 0x63f   :  { %6307 = vst [vmem:[#allocation5 + $0x1c] sm:$0xf] %v6305_v49  ;;  %v6099_v45 = vadd.f32 %v6098_v63, %v5930_v24 }
 0x640   :  { %v6881_v52 = vpop.f32.mrf.mxu3 }
 0x641   :  { %v6302_v18 = vmax.f32 %v6094_v51, %v6099_v45  ;;  %v6882_v47 = vadd.f32 %v8871_v54, %v6881_v52 }
 0x642   :  { %6957 = vmatpush.bf16.msra.mxu3 %v8828_v57  ;;  %v8845_v57 = vld [vmem:[%s12021_s6 + $0x38] sm:$0xff] }
 0x643   :  { %v6304_v53 = vmax.f32 %v6296_v39, %v6302_v18  ;;  %v8208_v39 = vld [vmem:[#allocation5 + $0x18] sm:$0xf] }
 0x644   :  { %v8209_v14 = vor.u32 %v8773_v62, %v8208_v39 }
 0x645   :  { %v6306_v60 = vpack.c.bf16 %v6304_v53, %v6304_v53 }
 0x646   :  { %6958 = vmatpush.bf16.msra.mxu3 %v8827_v11  ;;  %v8769_v61 = vld [vmem:[#allocation5 + $0x1c] sm:$0xf]  ;;  %v8840_v11 = vld [vmem:[%s12021_s6 + $0x10] sm:$0xff] }
 0x647   :  { %6308 = vst [vmem:[#allocation5 + $0x3c] sm:$0xf] %v6306_v60  ;;  %v8849_v60 = vld [vmem:[%s12022_s8 + $0x18] sm:$0xff] }
 0x648   :  { %v6883_v22 = vpop.f32.mrf.mxu3 }
 0x649   :  { %v6884_v30 = vadd.f32 %v8871_v54, %v6883_v22  ;;  %v8847_v22 = vld [vmem:[%s12022_s8 + $0x8] sm:$0xff] }
 0x64a   :  { %6959 = vmatpush.bf16.msra.mxu3 %v8826_v38 }
 0x64e   :  { %6960 = vmatpush.bf16.msra.mxu3 %v8825_v5  ;;  %v8210_v48 = vld [vmem:[#allocation5 + $0x38] sm:$0xf0] }
 0x64f   :  { %v8213_v37 = vor.u32 %v8769_v61, %v8210_v48 }
 0x650   :  { %v6895_v55 = vpop.f32.mrf.mxu3 }
 0x651   :  { %v6896_v59 = vadd.f32 %v6895_v55, %v6882_v47 }
 0x652   :  { %6961 = vmatpush.bf16.msra.mxu3 %v8824_v10 }
 0x656   :  { %6962 = vmatpush.bf16.msra.mxu3 %v8823_v13  ;;  %v8848_v13 = vld [vmem:[%s12022_s8 + $0x10] sm:$0xff] }
 0x658   :  { %v6897_v16 = vpop.f32.mrf.mxu3 }
 0x659   :  { %v6898_v3 = vadd.f32 %v6897_v16, %v6884_v30 }
 0x65a   :  { %6963 = vmatpush.bf16.msra.mxu3 %v8822_v41  ;;  %v8846_v41 = vld [vmem:[%s12022_s8] sm:$0xff] }
 0x65d   :  { %6964 = vmatmul.bf16.vlgmr.msra.gmra.mxu3 %v8209_v14 }
 0x65e   :  { %6970 = vmatpush.bf16.msrb.mxu3 %v8837_v25  ;;  %v8872_v25 = vld [vmem:[%s12020_s7] ss:$0 sm:$0xff] }
 0x660   :  { %v6909_v21 = vpop.f32.mrf.mxu3 }
 0x661   :  { %v6910_v32 = vadd.f32 %v6909_v21, %v6896_v59  ;;  %v8873_v59 = vld [vmem:[%s12023_s9] ss:$0 sm:$0xff] }
 0x662   :  { %6971 = vmatpush.bf16.msrb.mxu3 %v8836_v36 }
 0x666   :  { %6972 = vmatpush.bf16.msrb.mxu3 %v8835_v20 }
 0x668   :  { %v6911_v26 = vpop.f32.mrf.mxu3 }
 0x669   :  { %v6912_v56 = vadd.f32 %v6911_v26, %v6898_v3 }
 0x66a   :  { %6973 = vmatpush.bf16.msrb.mxu3 %v8834_v0 }
 0x66e   :  { %6974 = vmatpush.bf16.msrb.mxu3 %v8833_v33 }
 0x672   :  { %6975 = vmatpush.bf16.msrb.mxu3 %v8832_v35 }
 0x676   :  { %6976 = vmatpush.bf16.msrb.mxu3 %v8831_v40 }
 0x67a   :  { %6977 = vmatpush.bf16.msrb.mxu3 %v8830_v6 }
 0x67d   :  { %6978 = vmatmul.bf16.vlgmr.msrb.gmra.mxu3 %v8213_v37 }
 0x67e   :  { %7054 = vmatpush.bf16.msra.mxu3 %v8845_v57 }
 0x680   :  { %v6923_v28 = vpop.f32.mrf.mxu3 }
 0x681   :  { %v6924_v31 = vadd.f32 %v6923_v28, %v6910_v32 }
 0x682   :  { %7055 = vmatpush.bf16.msra.mxu3 %v8844_v29 }
 0x686   :  { %7056 = vmatpush.bf16.msra.mxu3 %v8843_v23 }
 0x688   :  { %v6925_v58 = vpop.f32.mrf.mxu3 }
 0x689   :  { %v6926_v27 = vadd.f32 %v6925_v58, %v6912_v56 }
 0x68a   :  { %7057 = vmatpush.bf16.msra.mxu3 %v8842_v34 }
 0x68e   :  { %7058 = vmatpush.bf16.msra.mxu3 %v8841_v4 }
 0x692   :  { %7059 = vmatpush.bf16.msra.mxu3 %v8840_v11 }
 0x696   :  { %7060 = vmatpush.bf16.msra.mxu3 %v8839_v19 }
 0x69a   :  { %7061 = vmatpush.bf16.msra.mxu3 %v8838_v9 }
 0x69e   :  { %7138 = vmatpush.bf16.msrb.mxu3 %v8853_v50 }
 0x6a0   :  { %v6937_v12 = vpop.f32.mrf.mxu3 }
 0x6a1   :  { %v6938_v42 = vadd.f32 %v6937_v12, %v6924_v31 }
 0x6a2   :  { %7139 = vmatpush.bf16.msrb.mxu3 %v8852_v2 }
 0x6a6   :  { %7140 = vmatpush.bf16.msrb.mxu3 %v8851_v8 }
 0x6a8   :  { %v6939_v46 = vpop.f32.mrf.mxu3 }
 0x6a9   :  { %v6940_v17 = vadd.f32 %v6939_v46, %v6926_v27 }
 0x6aa   :  { %7141 = vmatpush.bf16.msrb.mxu3 %v8850_v43 }
 0x6ae   :  { %7142 = vmatpush.bf16.msrb.mxu3 %v8849_v60 }
 0x6b2   :  { %7143 = vmatpush.bf16.msrb.mxu3 %v8848_v13 }
 0x6b6   :  { %7144 = vmatpush.bf16.msrb.mxu3 %v8847_v22 }
 0x6ba   :  { %7145 = vmatpush.bf16.msrb.mxu3 %v8846_v41 }
 0x6c0   :  { %v6951_v44 = vpop.f32.mrf.mxu3 }
 0x6c1   :  { %v6952_v63 = vadd.f32 %v6951_v44, %v6938_v42 }
 0x6c8   :  { %v6953_v7 = vpop.f32.mrf.mxu3 }
 0x6c9   :  { %v6954_v49 = vadd.f32 %v6953_v7, %v6940_v17 }
 0x6e0   :  { %v6965_v1 = vpop.f32.mrf.mxu3 }
 0x6e1   :  { %v6966_v24 = vadd.f32 %v6965_v1, %v6952_v63 }
 0x6e8   :  { %v6967_v15 = vpop.f32.mrf.mxu3 }
 0x6e9   :  { %v6968_v5 = vadd.f32 %v6967_v15, %v6954_v49 }
 0x700   :  { %v6979_v38 = vpop.f32.mrf.mxu3 }
 0x701   :  { %v6980_v51 = vadd.f32 %v6979_v38, %v6966_v24 }
 0x703   :  { %v6984_v18 = vmax.f32 %v6980_v51, 0.0 }
 0x708   :  { %v6981_v45 = vpop.f32.mrf.mxu3 }
 0x709   :  { %v6982_v52 = vadd.f32 %v6981_v45, %v6968_v5 }
 0x70b   :  { %v6985_v10 = vmax.f32 %v6982_v52, 0.0 }
 0x70d   :  { %v6986_v53 = vpack.c.bf16 %v6985_v10, %v6984_v18 }
 0x70f   :  { %7062 = vmatmul.bf16.vlgmr.msra.gmra.mxu3 %v6986_v53 }
 0x792   :  { %v7063_v54 = vpop.f32.mrf.mxu3 }
 0x793   :  { %v7064_v62 = vadd.f32 %v8872_v25, %v7063_v54 }
 0x795   :  { %v7068_v14 = vmax.f32 %v7064_v62, 0.0 }
 0x79a   :  { %v7065_v39 = vpop.f32.mrf.mxu3 }
 0x79b   :  { %v7066_v47 = vadd.f32 %v8872_v25, %v7065_v39 }
 0x79d   :  { %v7069_v36 = vmax.f32 %v7066_v47, 0.0 }
 0x79f   :  { %v7070_v55 = vpack.c.bf16 %v7069_v36, %v7068_v14 }
 0x7a1   :  { %7146 = vmatmul.bf16.vlgmr.msrb.gmra.mxu3 %v7070_v55 }
 0x824   :  { %v7147_v20 = vpop.f32.mrf.mxu3 }
 0x825   :  { %v7148_v30 = vadd.f32 %v8873_v59, %v7147_v20 }
 0x827   :  { %7152 = vst [vmem:[%s12024_s10] sm:$0xff] %v7148_v30 }
 0x82c   :  { %v7149_v0 = vpop.f32.mrf.mxu3 }
 0x82d   :  { %v7150_v16 = vadd.f32 %v8873_v59, %v7149_v0 }
 0x82f   :  { %7153 = vst [vmem:[%s12024_s10 + $0x8] sm:$0xff] %v7150_v16 }

</bundles_post_ra>
